<compile_context>
chip_gen: v7x
topology: tpu7x:2x2x1
jax: 0.10.0
libtpu: 0.0.40
codegen_flags: <defaults>
</compile_context>

<pallas_src>
from functools import partial

import numpy as np
import jax
import jax.numpy as jnp
from jax.experimental import pallas as pl
from jax.experimental.pallas import tpu as pltpu


# 3x3 tap order used everywhere: weight column t9 = (dy+1)*3 + (dx+1); the
# centre tap is t9 == 4.  _NC_TAPS fixes the mask-row order of the 8 others.
_NC_TAPS = [(dy, dx) for dy in (-1, 0, 1) for dx in (-1, 0, 1) if (dy, dx) != (0, 0)]


# ---------------------------------------------------------------------------
# Fused DenseBlock3 kernel: one grid step = one image, all three mobile_units
# plus the channel concatenations.
# ---------------------------------------------------------------------------
def _dense_block3_kernel(x_ref, masks_ref, wdw_ref, bdw_ref, wpw_ref, bpw_ref,
                         out_ref, *, C, H, W):
    # x_ref     : (1, C, H*W)   image n, channel-major, pixels on lanes
    # masks_ref : (8, H*W)      per-pixel validity of the 8 non-centre taps
    # wdw_ref   : (6, C, 9)     BN-folded depthwise weights, one (C, 9) block
    #                           per (stage, source-tensor) pair
    # bdw_ref   : (6, C, 1)     BN-folded depthwise bias blocks
    # wpw_ref   : (6, C, C)     BN-folded 1x1 weight blocks (bf16), W_k split
    #                           per source tensor of the dense concat
    # bpw_ref   : (3, C, 1)     BN-folded 1x1 bias per stage
    # out_ref   : (1, 4C, H*W)  comb3 = [x, out1, out2, out3]; also the in-VMEM
    #                           storage that replaces the HBM concats
    HW = H * W
    f32 = jnp.float32

    # comb0 = x  -> channel rows [0, C) of the output block.
    out_ref[0, 0:C, :] = x_ref[0]

    masks = masks_ref[...]                         # (8, HW), loaded once

    blk = 0                                        # packed (stage, source) block
    for k in range(3):                             # stage k: C_in = (k+1)*C
        y = None
        for s in range(k + 1):                     # source tensors of the concat
            src = out_ref[0, s * C:(s + 1) * C, :].astype(f32)    # (C, HW)
            w_dw = wdw_ref[blk].astype(f32)        # (C, 9)
            b_dw = bdw_ref[blk]                    # (C, 1)

            # Depthwise 3x3, stride 1, zero padding.  Neighbour (h+dy, w+dx) of
            # flat pixel p is an XLU lane roll by dy*W+dx; pixels whose
            # neighbour falls outside the image are zeroed with the
            # precomputed mask row (no iota / select in-kernel).
            terms = [src * w_dw[:, 4:5] + b_dw]    # centre tap + folded BN bias
            for j, (dy, dx) in enumerate(_NC_TAPS):
                t9 = (dy + 1) * 3 + (dx + 1)
                off = dy * W + dx
                v = pltpu.roll(src, (-off) % HW, axis=1)
                terms.append(v * masks[j:j + 1, :] * w_dw[:, t9:t9 + 1])
            # pairwise tree-sum: shorter VALU dependency chain than a serial
            # 9-deep accumulate (v6e has no f32 FMA).
            while len(terms) > 1:
                nxt = [terms[i] + terms[i + 1] for i in range(0, len(terms) - 1, 2)]
                if len(terms) % 2:
                    nxt.append(terms[-1])
                terms = nxt
            half = jnp.maximum(terms[0], 0.0)      # fused BN + ReLU, (C, HW)

            # Pointwise 1x1 contribution of this source: per-pixel channel
            # matmul on the MXU, bf16 operands / f32 accumulation.
            part = jnp.dot(wpw_ref[blk], half.astype(jnp.bfloat16),
                           preferred_element_type=f32)             # (C, HW)
            y = part if y is None else y + part
            blk += 1

        y = jnp.maximum(y + bpw_ref[k], 0.0)
        if k == 0:                                 # residual iff C_in == C_out
            y = y + out_ref[0, 0:C, :].astype(f32)
        out_ref[0, (k + 1) * C:(k + 2) * C, :] = y.astype(out_ref.dtype)


# ---------------------------------------------------------------------------
# One-time parameter repack (call once, outside the per-forward jit).
# ---------------------------------------------------------------------------
def prepare_dense_block3_params(params, H, W):
    """params: 3 BN-folded mobile_unit tuples in torch layout
       (w_dw (Cin,3,3), b_dw (Cin,), w_pw (Cout,Cin), b_pw (Cout,)) with
       Cin = C, 2C, 3C and Cout = C."""
    C = params[0][0].shape[0]
    wdw_blocks, bdw_blocks, wpw_blocks, bpw_rows = [], [], [], []
    for k, (w_dw, b_dw, w_pw, b_pw) in enumerate(params):
        cin = (k + 1) * C
        assert w_dw.shape == (cin, 3, 3) and b_dw.shape == (cin,)
        assert w_pw.shape == (C, cin) and b_pw.shape == (C,)
        for s in range(k + 1):                        # split per concat source
            sl = slice(s * C, (s + 1) * C)
            wdw_blocks.append(w_dw[sl].reshape(C, 9).astype(jnp.float32))
            bdw_blocks.append(b_dw[sl].reshape(C, 1).astype(jnp.float32))
            wpw_blocks.append(w_pw[:, sl].astype(jnp.bfloat16))
        bpw_rows.append(b_pw.reshape(C, 1).astype(jnp.float32))
    wdw_all = jnp.stack(wdw_blocks)                   # (6, C, 9)
    bdw_all = jnp.stack(bdw_blocks)                   # (6, C, 1)
    wpw_all = jnp.stack(wpw_blocks)                   # (6, C, C) bf16
    bpw_all = jnp.stack(bpw_rows)                     # (3, C, 1)

    # Per-pixel validity masks (zero padding) for the 8 non-centre taps.
    hh, ww = np.meshgrid(np.arange(H), np.arange(W), indexing="ij")
    hh, ww = hh.reshape(-1), ww.reshape(-1)
    masks = np.stack([((hh + dy >= 0) & (hh + dy < H) &
                       (ww + dx >= 0) & (ww + dx < W)).astype(np.float32)
                      for (dy, dx) in _NC_TAPS])      # (8, H*W)
    return jnp.asarray(masks), wdw_all, bdw_all, wpw_all, bpw_all


# ---------------------------------------------------------------------------
# DenseBlock3 forward
# ---------------------------------------------------------------------------
def dense_block3_pallas(x, prepared):
    """x: (N, C, H, W) NCHW, like the PyTorch module.  Returns (N, 4C, H, W)."""
    masks, wdw_all, bdw_all, wpw_all, bpw_all = prepared
    N, C, H, W = x.shape
    HW = H * W
    x_flat = x.reshape(N, C, HW)                      # free (metadata) reshape

    kernel = partial(_dense_block3_kernel, C=C, H=H, W=W)
    const3 = lambda n: (0, 0, 0)

    out = pl.pallas_call(
        kernel,
        out_shape=jax.ShapeDtypeStruct((N, 4 * C, HW), x.dtype),
        grid_spec=pltpu.PrefetchScalarGridSpec(
            num_scalar_prefetch=0,
            grid=(N,),                                # one image per grid step
            in_specs=[
                pl.BlockSpec((1, C, HW), lambda n: (n, 0, 0)),
                pl.BlockSpec((8, HW), lambda n: (0, 0)),
                pl.BlockSpec(wdw_all.shape, const3),
                pl.BlockSpec(bdw_all.shape, const3),
                pl.BlockSpec(wpw_all.shape, const3),
                pl.BlockSpec(bpw_all.shape, const3),
            ],
            out_specs=pl.BlockSpec((1, 4 * C, HW), lambda n: (n, 0, 0)),
        ),
        compiler_params=pltpu.CompilerParams(
            dimension_semantics=("parallel",)),       # batch across TCs (v7x)
    )(x_flat, masks, wdw_all, bdw_all, wpw_all, bpw_all)
    return out.reshape(N, 4 * C, H, W)


# ---------------------------------------------------------------------------
# Synthetic parameters (eval-mode BatchNorm folded into conv weight + bias),
# torch layouts.
# ---------------------------------------------------------------------------
def init_params(key, C_in, C_out, eps=1e-5):
    ks = jax.random.split(key, 10)
    w_dw_raw = 0.1 * jax.random.normal(ks[0], (C_in, 3, 3), jnp.float32)    # (Cin,1,3,3) squeezed
    w_pw_raw = 0.1 * jax.random.normal(ks[1], (C_out, C_in), jnp.float32)   # (Cout,Cin,1,1) squeezed

    g1 = 1.0 + 0.1 * jax.random.normal(ks[2], (C_in,), jnp.float32)
    b1 = 0.1 * jax.random.normal(ks[3], (C_in,), jnp.float32)
    m1 = 0.1 * jax.random.normal(ks[4], (C_in,), jnp.float32)
    v1 = 1.0 + 0.1 * jnp.abs(jax.random.normal(ks[5], (C_in,), jnp.float32))

    g2 = 1.0 + 0.1 * jax.random.normal(ks[6], (C_out,), jnp.float32)
    b2 = 0.1 * jax.random.normal(ks[7], (C_out,), jnp.float32)
    m2 = 0.1 * jax.random.normal(ks[8], (C_out,), jnp.float32)
    v2 = 1.0 + 0.1 * jnp.abs(jax.random.normal(ks[9], (C_out,), jnp.float32))

    s1 = g1 / jnp.sqrt(v1 + eps)
    w_dw = w_dw_raw * s1[:, None, None]               # (C_in, 3, 3)
    b_dw = b1 - m1 * s1                               # (C_in,)
    s2 = g2 / jnp.sqrt(v2 + eps)
    w_pw = w_pw_raw * s2[:, None]                     # (C_out, C_in)
    b_pw = b2 - m2 * s2                               # (C_out,)
    return w_dw, b_dw, w_pw, b_pw


# ---------------------------------------------------------------------------
# Pure-JAX NCHW reference (1x1 operands quantised to bf16 like the MXU path,
# so tolerances can stay tight).
# ---------------------------------------------------------------------------
def mobile_unit_ref(x, w_dw, b_dw, w_pw, b_pw):
    N, C_in, H, W = x.shape
    C_out = w_pw.shape[0]
    xp = jnp.pad(x.astype(jnp.float32), ((0, 0), (0, 0), (1, 1), (1, 1)))
    acc = jnp.broadcast_to(b_dw[None, :, None, None], (N, C_in, H, W))
    for dy in range(3):
        for dx in range(3):
            acc = acc + xp[:, :, dy:dy + H, dx:dx + W] * w_dw[:, dy, dx][None, :, None, None]
    half = jax.nn.relu(acc)
    half_q = half.astype(jnp.bfloat16).astype(jnp.float32)
    wq = w_pw.astype(jnp.bfloat16).astype(jnp.float32)
    y = jnp.einsum('oc,nchw->nohw', wq, half_q,
                   precision=jax.lax.Precision.HIGHEST) + b_pw[None, :, None, None]
    y = jax.nn.relu(y)
    if C_in == C_out:
        y = y + x.astype(jnp.float32)
    return y.astype(x.dtype)


def dense_block3_ref(x, params):
    feat = x
    for p in params:
        feat = jnp.concatenate([feat, mobile_unit_ref(feat, *p)], axis=1)
    return feat


if __name__ == "__main__":
    N, C, H, W = 2, 32, 16, 16        # units see C, 2C, 3C input channels

    key = jax.random.PRNGKey(0)
    kx, k1, k2, k3 = jax.random.split(key, 4)
    x = jax.random.normal(kx, (N, C, H, W), jnp.float32)
    params = [init_params(k1, C, C),
              init_params(k2, 2 * C, C),
              init_params(k3, 3 * C, C)]

    # One-time parameter repack, hoisted out of the per-forward path.
    prepared = prepare_dense_block3_params(params, H, W)

    fwd = jax.jit(dense_block3_pallas)
    out = fwd(x, prepared)
    jax.block_until_ready(out)
    assert out.shape == (N, 4 * C, H, W)

    ref = dense_block3_ref(x, params)
    np.testing.assert_allclose(np.asarray(out), np.asarray(ref),
                               rtol=2e-3, atol=2e-3)

    print("KERNEL_OK")
</pallas_src>

<mosaic_0001>
module attributes {stable_mosaic.version = 11 : i64} {
  func.func @_dense_block3_kernel(%arg0: i32, %arg1: memref<1x32x256xf32, #tpu.memory_space<vmem>>, %arg2: memref<8x256xf32, #tpu.memory_space<vmem>>, %arg3: memref<6x32x9xf32, #tpu.memory_space<vmem>>, %arg4: memref<6x32x1xf32, #tpu.memory_space<vmem>>, %arg5: memref<6x32x32xbf16, #tpu.memory_space<vmem>>, %arg6: memref<3x32x1xf32, #tpu.memory_space<vmem>>, %arg7: memref<1x128x256xf32, #tpu.memory_space<vmem>>) attributes {dimension_semantics = [#tpu.dimension_semantics<parallel>], iteration_bounds = array<i64: 2>, scalar_prefetch = 0 : i64, scratch_operands = 0 : i64, tpu.core_type = #tpu.core_type<tc>, window_params = [{transform_indices = @transform_0, window_bounds = array<i64: 1, 32, 256>}, {pipeline_mode = #tpu.pipeline_mode<synchronous>, transform_indices = @transform_1, window_bounds = array<i64: 8, 256>}, {pipeline_mode = #tpu.pipeline_mode<synchronous>, transform_indices = @transform_2, window_bounds = array<i64: 6, 32, 9>}, {pipeline_mode = #tpu.pipeline_mode<synchronous>, transform_indices = @transform_3, window_bounds = array<i64: 6, 32, 1>}, {pipeline_mode = #tpu.pipeline_mode<synchronous>, transform_indices = @transform_4, window_bounds = array<i64: 6, 32, 32>}, {pipeline_mode = #tpu.pipeline_mode<synchronous>, transform_indices = @transform_5, window_bounds = array<i64: 3, 32, 1>}, {transform_indices = @transform_6, window_bounds = array<i64: 1, 128, 256>}]} {
    %c0 = arith.constant 0 : index
    %c0_0 = arith.constant 0 : index
    %c0_1 = arith.constant 0 : index
    %0 = vector.load %arg1[%c0, %c0_0, %c0_1] : memref<1x32x256xf32, #tpu.memory_space<vmem>>, vector<1x32x256xf32>
    %1 = vector.shape_cast %0 : vector<1x32x256xf32> to vector<32x256xf32>
    %c0_2 = arith.constant 0 : index
    %c0_3 = arith.constant 0 : index
    %c0_4 = arith.constant 0 : index
    %2 = vector.load %arg7[%c0_2, %c0_3, %c0_4] : memref<1x128x256xf32, #tpu.memory_space<vmem>>, vector<1x32x256xf32>
    %3 = vector.shape_cast %2 : vector<1x32x256xf32> to vector<32x256xf32>
    %4 = vector.shape_cast %1 : vector<32x256xf32> to vector<1x32x256xf32>
    tpu.vector_store %arg7[%c0_2, %c0_3, %c0_4], %4 {strides = array<i32>} : memref<1x128x256xf32, #tpu.memory_space<vmem>>, vector<1x32x256xf32>,
    %c0_5 = arith.constant 0 : index
    %c0_6 = arith.constant 0 : index
    %5 = vector.load %arg2[%c0_5, %c0_6] : memref<8x256xf32, #tpu.memory_space<vmem>>, vector<8x256xf32>
    %c0_7 = arith.constant 0 : index
    %c0_8 = arith.constant 0 : index
    %c0_9 = arith.constant 0 : index
    %6 = vector.load %arg7[%c0_7, %c0_8, %c0_9] : memref<1x128x256xf32, #tpu.memory_space<vmem>>, vector<1x32x256xf32>
    %7 = vector.shape_cast %6 : vector<1x32x256xf32> to vector<32x256xf32>
    %c0_10 = arith.constant 0 : index
    %c0_11 = arith.constant 0 : index
    %c0_12 = arith.constant 0 : index
    %8 = vector.load %arg3[%c0_10, %c0_11, %c0_12] : memref<6x32x9xf32, #tpu.memory_space<vmem>>, vector<1x32x9xf32>
    %9 = vector.shape_cast %8 : vector<1x32x9xf32> to vector<32x9xf32>
    %c0_13 = arith.constant 0 : index
    %c0_14 = arith.constant 0 : index
    %c0_15 = arith.constant 0 : index
    %10 = vector.load %arg4[%c0_13, %c0_14, %c0_15] : memref<6x32x1xf32, #tpu.memory_space<vmem>>, vector<1x32x1xf32>
    %11 = vector.shape_cast %10 : vector<1x32x1xf32> to vector<32x1xf32>
    %12 = vector.extract_strided_slice %9 {offsets = [0, 4], sizes = [32, 1], strides = [1, 1]} : vector<32x9xf32> to vector<32x1xf32>
    %13 = vector.broadcast %12 : vector<32x1xf32> to vector<32x256xf32>
    %14 = arith.mulf %7, %13 : vector<32x256xf32>
    %15 = vector.broadcast %11 : vector<32x1xf32> to vector<32x256xf32>
    %16 = arith.addf %14, %15 : vector<32x256xf32>
    %c17_i32 = arith.constant 17 : i32
    %17 = tpu.dynamic_rotate %7 by %c17_i32 dim 1 : vector<32x256xf32>, i32 -> vector<32x256xf32>
    %18 = vector.extract_strided_slice %5 {offsets = [0, 0], sizes = [1, 256], strides = [1, 1]} : vector<8x256xf32> to vector<1x256xf32>
    %19 = vector.broadcast %18 : vector<1x256xf32> to vector<32x256xf32>
    %20 = arith.mulf %17, %19 : vector<32x256xf32>
    %21 = vector.extract_strided_slice %9 {offsets = [0, 0], sizes = [32, 1], strides = [1, 1]} : vector<32x9xf32> to vector<32x1xf32>
    %22 = vector.broadcast %21 : vector<32x1xf32> to vector<32x256xf32>
    %23 = arith.mulf %20, %22 : vector<32x256xf32>
    %c16_i32 = arith.constant 16 : i32
    %24 = tpu.dynamic_rotate %7 by %c16_i32 dim 1 : vector<32x256xf32>, i32 -> vector<32x256xf32>
    %25 = vector.extract_strided_slice %5 {offsets = [1, 0], sizes = [1, 256], strides = [1, 1]} : vector<8x256xf32> to vector<1x256xf32>
    %26 = vector.broadcast %25 : vector<1x256xf32> to vector<32x256xf32>
    %27 = arith.mulf %24, %26 : vector<32x256xf32>
    %28 = vector.extract_strided_slice %9 {offsets = [0, 1], sizes = [32, 1], strides = [1, 1]} : vector<32x9xf32> to vector<32x1xf32>
    %29 = vector.broadcast %28 : vector<32x1xf32> to vector<32x256xf32>
    %30 = arith.mulf %27, %29 : vector<32x256xf32>
    %c15_i32 = arith.constant 15 : i32
    %31 = tpu.dynamic_rotate %7 by %c15_i32 dim 1 : vector<32x256xf32>, i32 -> vector<32x256xf32>
    %32 = vector.extract_strided_slice %5 {offsets = [2, 0], sizes = [1, 256], strides = [1, 1]} : vector<8x256xf32> to vector<1x256xf32>
    %33 = vector.broadcast %32 : vector<1x256xf32> to vector<32x256xf32>
    %34 = arith.mulf %31, %33 : vector<32x256xf32>
    %35 = vector.extract_strided_slice %9 {offsets = [0, 2], sizes = [32, 1], strides = [1, 1]} : vector<32x9xf32> to vector<32x1xf32>
    %36 = vector.broadcast %35 : vector<32x1xf32> to vector<32x256xf32>
    %37 = arith.mulf %34, %36 : vector<32x256xf32>
    %c1_i32 = arith.constant 1 : i32
    %38 = tpu.dynamic_rotate %7 by %c1_i32 dim 1 : vector<32x256xf32>, i32 -> vector<32x256xf32>
    %39 = vector.extract_strided_slice %5 {offsets = [3, 0], sizes = [1, 256], strides = [1, 1]} : vector<8x256xf32> to vector<1x256xf32>
    %40 = vector.broadcast %39 : vector<1x256xf32> to vector<32x256xf32>
    %41 = arith.mulf %38, %40 : vector<32x256xf32>
    %42 = vector.extract_strided_slice %9 {offsets = [0, 3], sizes = [32, 1], strides = [1, 1]} : vector<32x9xf32> to vector<32x1xf32>
    %43 = vector.broadcast %42 : vector<32x1xf32> to vector<32x256xf32>
    %44 = arith.mulf %41, %43 : vector<32x256xf32>
    %c255_i32 = arith.constant 255 : i32
    %45 = tpu.dynamic_rotate %7 by %c255_i32 dim 1 : vector<32x256xf32>, i32 -> vector<32x256xf32>
    %46 = vector.extract_strided_slice %5 {offsets = [4, 0], sizes = [1, 256], strides = [1, 1]} : vector<8x256xf32> to vector<1x256xf32>
    %47 = vector.broadcast %46 : vector<1x256xf32> to vector<32x256xf32>
    %48 = arith.mulf %45, %47 : vector<32x256xf32>
    %49 = vector.extract_strided_slice %9 {offsets = [0, 5], sizes = [32, 1], strides = [1, 1]} : vector<32x9xf32> to vector<32x1xf32>
    %50 = vector.broadcast %49 : vector<32x1xf32> to vector<32x256xf32>
    %51 = arith.mulf %48, %50 : vector<32x256xf32>
    %c241_i32 = arith.constant 241 : i32
    %52 = tpu.dynamic_rotate %7 by %c241_i32 dim 1 : vector<32x256xf32>, i32 -> vector<32x256xf32>
    %53 = vector.extract_strided_slice %5 {offsets = [5, 0], sizes = [1, 256], strides = [1, 1]} : vector<8x256xf32> to vector<1x256xf32>
    %54 = vector.broadcast %53 : vector<1x256xf32> to vector<32x256xf32>
    %55 = arith.mulf %52, %54 : vector<32x256xf32>
    %56 = vector.extract_strided_slice %9 {offsets = [0, 6], sizes = [32, 1], strides = [1, 1]} : vector<32x9xf32> to vector<32x1xf32>
    %57 = vector.broadcast %56 : vector<32x1xf32> to vector<32x256xf32>
    %58 = arith.mulf %55, %57 : vector<32x256xf32>
    %c240_i32 = arith.constant 240 : i32
    %59 = tpu.dynamic_rotate %7 by %c240_i32 dim 1 : vector<32x256xf32>, i32 -> vector<32x256xf32>
    %60 = vector.extract_strided_slice %5 {offsets = [6, 0], sizes = [1, 256], strides = [1, 1]} : vector<8x256xf32> to vector<1x256xf32>
    %61 = vector.broadcast %60 : vector<1x256xf32> to vector<32x256xf32>
    %62 = arith.mulf %59, %61 : vector<32x256xf32>
    %63 = vector.extract_strided_slice %9 {offsets = [0, 7], sizes = [32, 1], strides = [1, 1]} : vector<32x9xf32> to vector<32x1xf32>
    %64 = vector.broadcast %63 : vector<32x1xf32> to vector<32x256xf32>
    %65 = arith.mulf %62, %64 : vector<32x256xf32>
    %c239_i32 = arith.constant 239 : i32
    %66 = tpu.dynamic_rotate %7 by %c239_i32 dim 1 : vector<32x256xf32>, i32 -> vector<32x256xf32>
    %67 = vector.extract_strided_slice %5 {offsets = [7, 0], sizes = [1, 256], strides = [1, 1]} : vector<8x256xf32> to vector<1x256xf32>
    %68 = vector.broadcast %67 : vector<1x256xf32> to vector<32x256xf32>
    %69 = arith.mulf %66, %68 : vector<32x256xf32>
    %70 = vector.extract_strided_slice %9 {offsets = [0, 8], sizes = [32, 1], strides = [1, 1]} : vector<32x9xf32> to vector<32x1xf32>
    %71 = vector.broadcast %70 : vector<32x1xf32> to vector<32x256xf32>
    %72 = arith.mulf %69, %71 : vector<32x256xf32>
    %73 = arith.addf %16, %23 : vector<32x256xf32>
    %74 = arith.addf %30, %37 : vector<32x256xf32>
    %75 = arith.addf %44, %51 : vector<32x256xf32>
    %76 = arith.addf %58, %65 : vector<32x256xf32>
    %77 = arith.addf %73, %74 : vector<32x256xf32>
    %78 = arith.addf %75, %76 : vector<32x256xf32>
    %79 = arith.addf %77, %78 : vector<32x256xf32>
    %80 = arith.addf %79, %72 : vector<32x256xf32>
    %cst = arith.constant 0.000000e+00 : f32
    %81 = vector.broadcast %cst : f32 to vector<32x256xf32>
    %82 = arith.maximumf %80, %81 : vector<32x256xf32>
    %c0_16 = arith.constant 0 : index
    %c0_17 = arith.constant 0 : index
    %c0_18 = arith.constant 0 : index
    %83 = vector.load %arg5[%c0_16, %c0_17, %c0_18] : memref<6x32x32xbf16, #tpu.memory_space<vmem>>, vector<1x32x32xbf16>
    %84 = vector.shape_cast %83 : vector<1x32x32xbf16> to vector<32x32xbf16>
    %85 = arith.truncf %82 : vector<32x256xf32> to vector<32x256xbf16>
    %cst_19 = arith.constant dense<0.000000e+00> : vector<32x256xf32>
    %86 = tpu.matmul %84, %85, %cst_19 {dimension_numbers = #tpu.dot_dimension_numbers<[1], [0], [0], [1], [0, 0, 1, 1], [], []>} : vector<32x32xbf16>, vector<32x256xbf16>, vector<32x256xf32> -> vector<32x256xf32>
    %c0_20 = arith.constant 0 : index
    %c0_21 = arith.constant 0 : index
    %c0_22 = arith.constant 0 : index
    %87 = vector.load %arg6[%c0_20, %c0_21, %c0_22] : memref<3x32x1xf32, #tpu.memory_space<vmem>>, vector<1x32x1xf32>
    %88 = vector.shape_cast %87 : vector<1x32x1xf32> to vector<32x1xf32>
    %89 = vector.broadcast %88 : vector<32x1xf32> to vector<32x256xf32>
    %90 = arith.addf %86, %89 : vector<32x256xf32>
    %cst_23 = arith.constant 0.000000e+00 : f32
    %91 = vector.broadcast %cst_23 : f32 to vector<32x256xf32>
    %92 = arith.maximumf %90, %91 : vector<32x256xf32>
    %c0_24 = arith.constant 0 : index
    %c0_25 = arith.constant 0 : index
    %c0_26 = arith.constant 0 : index
    %93 = vector.load %arg7[%c0_24, %c0_25, %c0_26] : memref<1x128x256xf32, #tpu.memory_space<vmem>>, vector<1x32x256xf32>
    %94 = vector.shape_cast %93 : vector<1x32x256xf32> to vector<32x256xf32>
    %95 = arith.addf %92, %94 : vector<32x256xf32>
    %c0_27 = arith.constant 0 : index
    %c32 = arith.constant 32 : index
    %c0_28 = arith.constant 0 : index
    %96 = vector.load %arg7[%c0_27, %c32, %c0_28] : memref<1x128x256xf32, #tpu.memory_space<vmem>>, vector<1x32x256xf32>
    %97 = vector.shape_cast %96 : vector<1x32x256xf32> to vector<32x256xf32>
    %98 = vector.shape_cast %95 : vector<32x256xf32> to vector<1x32x256xf32>
    tpu.vector_store %arg7[%c0_27, %c32, %c0_28], %98 {strides = array<i32>} : memref<1x128x256xf32, #tpu.memory_space<vmem>>, vector<1x32x256xf32>,
    %c0_29 = arith.constant 0 : index
    %c0_30 = arith.constant 0 : index
    %c0_31 = arith.constant 0 : index
    %99 = vector.load %arg7[%c0_29, %c0_30, %c0_31] : memref<1x128x256xf32, #tpu.memory_space<vmem>>, vector<1x32x256xf32>
    %100 = vector.shape_cast %99 : vector<1x32x256xf32> to vector<32x256xf32>
    %c1 = arith.constant 1 : index
    %c0_32 = arith.constant 0 : index
    %c0_33 = arith.constant 0 : index
    %101 = vector.load %arg3[%c1, %c0_32, %c0_33] : memref<6x32x9xf32, #tpu.memory_space<vmem>>, vector<1x32x9xf32>
    %102 = vector.shape_cast %101 : vector<1x32x9xf32> to vector<32x9xf32>
    %c1_34 = arith.constant 1 : index
    %c0_35 = arith.constant 0 : index
    %c0_36 = arith.constant 0 : index
    %103 = vector.load %arg4[%c1_34, %c0_35, %c0_36] : memref<6x32x1xf32, #tpu.memory_space<vmem>>, vector<1x32x1xf32>
    %104 = vector.shape_cast %103 : vector<1x32x1xf32> to vector<32x1xf32>
    %105 = vector.extract_strided_slice %102 {offsets = [0, 4], sizes = [32, 1], strides = [1, 1]} : vector<32x9xf32> to vector<32x1xf32>
    %106 = vector.broadcast %105 : vector<32x1xf32> to vector<32x256xf32>
    %107 = arith.mulf %100, %106 : vector<32x256xf32>
    %108 = vector.broadcast %104 : vector<32x1xf32> to vector<32x256xf32>
    %109 = arith.addf %107, %108 : vector<32x256xf32>
    %c17_i32_37 = arith.constant 17 : i32
    %110 = tpu.dynamic_rotate %100 by %c17_i32_37 dim 1 : vector<32x256xf32>, i32 -> vector<32x256xf32>
    %111 = vector.extract_strided_slice %5 {offsets = [0, 0], sizes = [1, 256], strides = [1, 1]} : vector<8x256xf32> to vector<1x256xf32>
    %112 = vector.broadcast %111 : vector<1x256xf32> to vector<32x256xf32>
    %113 = arith.mulf %110, %112 : vector<32x256xf32>
    %114 = vector.extract_strided_slice %102 {offsets = [0, 0], sizes = [32, 1], strides = [1, 1]} : vector<32x9xf32> to vector<32x1xf32>
    %115 = vector.broadcast %114 : vector<32x1xf32> to vector<32x256xf32>
    %116 = arith.mulf %113, %115 : vector<32x256xf32>
    %c16_i32_38 = arith.constant 16 : i32
    %117 = tpu.dynamic_rotate %100 by %c16_i32_38 dim 1 : vector<32x256xf32>, i32 -> vector<32x256xf32>
    %118 = vector.extract_strided_slice %5 {offsets = [1, 0], sizes = [1, 256], strides = [1, 1]} : vector<8x256xf32> to vector<1x256xf32>
    %119 = vector.broadcast %118 : vector<1x256xf32> to vector<32x256xf32>
    %120 = arith.mulf %117, %119 : vector<32x256xf32>
    %121 = vector.extract_strided_slice %102 {offsets = [0, 1], sizes = [32, 1], strides = [1, 1]} : vector<32x9xf32> to vector<32x1xf32>
    %122 = vector.broadcast %121 : vector<32x1xf32> to vector<32x256xf32>
    %123 = arith.mulf %120, %122 : vector<32x256xf32>
    %c15_i32_39 = arith.constant 15 : i32
    %124 = tpu.dynamic_rotate %100 by %c15_i32_39 dim 1 : vector<32x256xf32>, i32 -> vector<32x256xf32>
    %125 = vector.extract_strided_slice %5 {offsets = [2, 0], sizes = [1, 256], strides = [1, 1]} : vector<8x256xf32> to vector<1x256xf32>
    %126 = vector.broadcast %125 : vector<1x256xf32> to vector<32x256xf32>
    %127 = arith.mulf %124, %126 : vector<32x256xf32>
    %128 = vector.extract_strided_slice %102 {offsets = [0, 2], sizes = [32, 1], strides = [1, 1]} : vector<32x9xf32> to vector<32x1xf32>
    %129 = vector.broadcast %128 : vector<32x1xf32> to vector<32x256xf32>
    %130 = arith.mulf %127, %129 : vector<32x256xf32>
    %c1_i32_40 = arith.constant 1 : i32
    %131 = tpu.dynamic_rotate %100 by %c1_i32_40 dim 1 : vector<32x256xf32>, i32 -> vector<32x256xf32>
    %132 = vector.extract_strided_slice %5 {offsets = [3, 0], sizes = [1, 256], strides = [1, 1]} : vector<8x256xf32> to vector<1x256xf32>
    %133 = vector.broadcast %132 : vector<1x256xf32> to vector<32x256xf32>
    %134 = arith.mulf %131, %133 : vector<32x256xf32>
    %135 = vector.extract_strided_slice %102 {offsets = [0, 3], sizes = [32, 1], strides = [1, 1]} : vector<32x9xf32> to vector<32x1xf32>
    %136 = vector.broadcast %135 : vector<32x1xf32> to vector<32x256xf32>
    %137 = arith.mulf %134, %136 : vector<32x256xf32>
    %c255_i32_41 = arith.constant 255 : i32
    %138 = tpu.dynamic_rotate %100 by %c255_i32_41 dim 1 : vector<32x256xf32>, i32 -> vector<32x256xf32>
    %139 = vector.extract_strided_slice %5 {offsets = [4, 0], sizes = [1, 256], strides = [1, 1]} : vector<8x256xf32> to vector<1x256xf32>
    %140 = vector.broadcast %139 : vector<1x256xf32> to vector<32x256xf32>
    %141 = arith.mulf %138, %140 : vector<32x256xf32>
    %142 = vector.extract_strided_slice %102 {offsets = [0, 5], sizes = [32, 1], strides = [1, 1]} : vector<32x9xf32> to vector<32x1xf32>
    %143 = vector.broadcast %142 : vector<32x1xf32> to vector<32x256xf32>
    %144 = arith.mulf %141, %143 : vector<32x256xf32>
    %c241_i32_42 = arith.constant 241 : i32
    %145 = tpu.dynamic_rotate %100 by %c241_i32_42 dim 1 : vector<32x256xf32>, i32 -> vector<32x256xf32>
    %146 = vector.extract_strided_slice %5 {offsets = [5, 0], sizes = [1, 256], strides = [1, 1]} : vector<8x256xf32> to vector<1x256xf32>
    %147 = vector.broadcast %146 : vector<1x256xf32> to vector<32x256xf32>
    %148 = arith.mulf %145, %147 : vector<32x256xf32>
    %149 = vector.extract_strided_slice %102 {offsets = [0, 6], sizes = [32, 1], strides = [1, 1]} : vector<32x9xf32> to vector<32x1xf32>
    %150 = vector.broadcast %149 : vector<32x1xf32> to vector<32x256xf32>
    %151 = arith.mulf %148, %150 : vector<32x256xf32>
    %c240_i32_43 = arith.constant 240 : i32
    %152 = tpu.dynamic_rotate %100 by %c240_i32_43 dim 1 : vector<32x256xf32>, i32 -> vector<32x256xf32>
    %153 = vector.extract_strided_slice %5 {offsets = [6, 0], sizes = [1, 256], strides = [1, 1]} : vector<8x256xf32> to vector<1x256xf32>
    %154 = vector.broadcast %153 : vector<1x256xf32> to vector<32x256xf32>
    %155 = arith.mulf %152, %154 : vector<32x256xf32>
    %156 = vector.extract_strided_slice %102 {offsets = [0, 7], sizes = [32, 1], strides = [1, 1]} : vector<32x9xf32> to vector<32x1xf32>
    %157 = vector.broadcast %156 : vector<32x1xf32> to vector<32x256xf32>
    %158 = arith.mulf %155, %157 : vector<32x256xf32>
    %c239_i32_44 = arith.constant 239 : i32
    %159 = tpu.dynamic_rotate %100 by %c239_i32_44 dim 1 : vector<32x256xf32>, i32 -> vector<32x256xf32>
    %160 = vector.extract_strided_slice %5 {offsets = [7, 0], sizes = [1, 256], strides = [1, 1]} : vector<8x256xf32> to vector<1x256xf32>
    %161 = vector.broadcast %160 : vector<1x256xf32> to vector<32x256xf32>
    %162 = arith.mulf %159, %161 : vector<32x256xf32>
    %163 = vector.extract_strided_slice %102 {offsets = [0, 8], sizes = [32, 1], strides = [1, 1]} : vector<32x9xf32> to vector<32x1xf32>
    %164 = vector.broadcast %163 : vector<32x1xf32> to vector<32x256xf32>
    %165 = arith.mulf %162, %164 : vector<32x256xf32>
    %166 = arith.addf %109, %116 : vector<32x256xf32>
    %167 = arith.addf %123, %130 : vector<32x256xf32>
    %168 = arith.addf %137, %144 : vector<32x256xf32>
    %169 = arith.addf %151, %158 : vector<32x256xf32>
    %170 = arith.addf %166, %167 : vector<32x256xf32>
    %171 = arith.addf %168, %169 : vector<32x256xf32>
    %172 = arith.addf %170, %171 : vector<32x256xf32>
    %173 = arith.addf %172, %165 : vector<32x256xf32>
    %cst_45 = arith.constant 0.000000e+00 : f32
    %174 = vector.broadcast %cst_45 : f32 to vector<32x256xf32>
    %175 = arith.maximumf %173, %174 : vector<32x256xf32>
    %c1_46 = arith.constant 1 : index
    %c0_47 = arith.constant 0 : index
    %c0_48 = arith.constant 0 : index
    %176 = vector.load %arg5[%c1_46, %c0_47, %c0_48] : memref<6x32x32xbf16, #tpu.memory_space<vmem>>, vector<1x32x32xbf16>
    %177 = vector.shape_cast %176 : vector<1x32x32xbf16> to vector<32x32xbf16>
    %178 = arith.truncf %175 : vector<32x256xf32> to vector<32x256xbf16>
    %cst_49 = arith.constant dense<0.000000e+00> : vector<32x256xf32>
    %179 = tpu.matmul %177, %178, %cst_49 {dimension_numbers = #tpu.dot_dimension_numbers<[1], [0], [0], [1], [0, 0, 1, 1], [], []>} : vector<32x32xbf16>, vector<32x256xbf16>, vector<32x256xf32> -> vector<32x256xf32>
    %c0_50 = arith.constant 0 : index
    %c32_51 = arith.constant 32 : index
    %c0_52 = arith.constant 0 : index
    %180 = vector.load %arg7[%c0_50, %c32_51, %c0_52] : memref<1x128x256xf32, #tpu.memory_space<vmem>>, vector<1x32x256xf32>
    %181 = vector.shape_cast %180 : vector<1x32x256xf32> to vector<32x256xf32>
    %c2 = arith.constant 2 : index
    %c0_53 = arith.constant 0 : index
    %c0_54 = arith.constant 0 : index
    %182 = vector.load %arg3[%c2, %c0_53, %c0_54] : memref<6x32x9xf32, #tpu.memory_space<vmem>>, vector<1x32x9xf32>
    %183 = vector.shape_cast %182 : vector<1x32x9xf32> to vector<32x9xf32>
    %c2_55 = arith.constant 2 : index
    %c0_56 = arith.constant 0 : index
    %c0_57 = arith.constant 0 : index
    %184 = vector.load %arg4[%c2_55, %c0_56, %c0_57] : memref<6x32x1xf32, #tpu.memory_space<vmem>>, vector<1x32x1xf32>
    %185 = vector.shape_cast %184 : vector<1x32x1xf32> to vector<32x1xf32>
    %186 = vector.extract_strided_slice %183 {offsets = [0, 4], sizes = [32, 1], strides = [1, 1]} : vector<32x9xf32> to vector<32x1xf32>
    %187 = vector.broadcast %186 : vector<32x1xf32> to vector<32x256xf32>
    %188 = arith.mulf %181, %187 : vector<32x256xf32>
    %189 = vector.broadcast %185 : vector<32x1xf32> to vector<32x256xf32>
    %190 = arith.addf %188, %189 : vector<32x256xf32>
    %c17_i32_58 = arith.constant 17 : i32
    %191 = tpu.dynamic_rotate %181 by %c17_i32_58 dim 1 : vector<32x256xf32>, i32 -> vector<32x256xf32>
    %192 = vector.extract_strided_slice %5 {offsets = [0, 0], sizes = [1, 256], strides = [1, 1]} : vector<8x256xf32> to vector<1x256xf32>
    %193 = vector.broadcast %192 : vector<1x256xf32> to vector<32x256xf32>
    %194 = arith.mulf %191, %193 : vector<32x256xf32>
    %195 = vector.extract_strided_slice %183 {offsets = [0, 0], sizes = [32, 1], strides = [1, 1]} : vector<32x9xf32> to vector<32x1xf32>
    %196 = vector.broadcast %195 : vector<32x1xf32> to vector<32x256xf32>
    %197 = arith.mulf %194, %196 : vector<32x256xf32>
    %c16_i32_59 = arith.constant 16 : i32
    %198 = tpu.dynamic_rotate %181 by %c16_i32_59 dim 1 : vector<32x256xf32>, i32 -> vector<32x256xf32>
    %199 = vector.extract_strided_slice %5 {offsets = [1, 0], sizes = [1, 256], strides = [1, 1]} : vector<8x256xf32> to vector<1x256xf32>
    %200 = vector.broadcast %199 : vector<1x256xf32> to vector<32x256xf32>
    %201 = arith.mulf %198, %200 : vector<32x256xf32>
    %202 = vector.extract_strided_slice %183 {offsets = [0, 1], sizes = [32, 1], strides = [1, 1]} : vector<32x9xf32> to vector<32x1xf32>
    %203 = vector.broadcast %202 : vector<32x1xf32> to vector<32x256xf32>
    %204 = arith.mulf %201, %203 : vector<32x256xf32>
    %c15_i32_60 = arith.constant 15 : i32
    %205 = tpu.dynamic_rotate %181 by %c15_i32_60 dim 1 : vector<32x256xf32>, i32 -> vector<32x256xf32>
    %206 = vector.extract_strided_slice %5 {offsets = [2, 0], sizes = [1, 256], strides = [1, 1]} : vector<8x256xf32> to vector<1x256xf32>
    %207 = vector.broadcast %206 : vector<1x256xf32> to vector<32x256xf32>
    %208 = arith.mulf %205, %207 : vector<32x256xf32>
    %209 = vector.extract_strided_slice %183 {offsets = [0, 2], sizes = [32, 1], strides = [1, 1]} : vector<32x9xf32> to vector<32x1xf32>
    %210 = vector.broadcast %209 : vector<32x1xf32> to vector<32x256xf32>
    %211 = arith.mulf %208, %210 : vector<32x256xf32>
    %c1_i32_61 = arith.constant 1 : i32
    %212 = tpu.dynamic_rotate %181 by %c1_i32_61 dim 1 : vector<32x256xf32>, i32 -> vector<32x256xf32>
    %213 = vector.extract_strided_slice %5 {offsets = [3, 0], sizes = [1, 256], strides = [1, 1]} : vector<8x256xf32> to vector<1x256xf32>
    %214 = vector.broadcast %213 : vector<1x256xf32> to vector<32x256xf32>
    %215 = arith.mulf %212, %214 : vector<32x256xf32>
    %216 = vector.extract_strided_slice %183 {offsets = [0, 3], sizes = [32, 1], strides = [1, 1]} : vector<32x9xf32> to vector<32x1xf32>
    %217 = vector.broadcast %216 : vector<32x1xf32> to vector<32x256xf32>
    %218 = arith.mulf %215, %217 : vector<32x256xf32>
    %c255_i32_62 = arith.constant 255 : i32
    %219 = tpu.dynamic_rotate %181 by %c255_i32_62 dim 1 : vector<32x256xf32>, i32 -> vector<32x256xf32>
    %220 = vector.extract_strided_slice %5 {offsets = [4, 0], sizes = [1, 256], strides = [1, 1]} : vector<8x256xf32> to vector<1x256xf32>
    %221 = vector.broadcast %220 : vector<1x256xf32> to vector<32x256xf32>
    %222 = arith.mulf %219, %221 : vector<32x256xf32>
    %223 = vector.extract_strided_slice %183 {offsets = [0, 5], sizes = [32, 1], strides = [1, 1]} : vector<32x9xf32> to vector<32x1xf32>
    %224 = vector.broadcast %223 : vector<32x1xf32> to vector<32x256xf32>
    %225 = arith.mulf %222, %224 : vector<32x256xf32>
    %c241_i32_63 = arith.constant 241 : i32
    %226 = tpu.dynamic_rotate %181 by %c241_i32_63 dim 1 : vector<32x256xf32>, i32 -> vector<32x256xf32>
    %227 = vector.extract_strided_slice %5 {offsets = [5, 0], sizes = [1, 256], strides = [1, 1]} : vector<8x256xf32> to vector<1x256xf32>
    %228 = vector.broadcast %227 : vector<1x256xf32> to vector<32x256xf32>
    %229 = arith.mulf %226, %228 : vector<32x256xf32>
    %230 = vector.extract_strided_slice %183 {offsets = [0, 6], sizes = [32, 1], strides = [1, 1]} : vector<32x9xf32> to vector<32x1xf32>
    %231 = vector.broadcast %230 : vector<32x1xf32> to vector<32x256xf32>
    %232 = arith.mulf %229, %231 : vector<32x256xf32>
    %c240_i32_64 = arith.constant 240 : i32
    %233 = tpu.dynamic_rotate %181 by %c240_i32_64 dim 1 : vector<32x256xf32>, i32 -> vector<32x256xf32>
    %234 = vector.extract_strided_slice %5 {offsets = [6, 0], sizes = [1, 256], strides = [1, 1]} : vector<8x256xf32> to vector<1x256xf32>
    %235 = vector.broadcast %234 : vector<1x256xf32> to vector<32x256xf32>
    %236 = arith.mulf %233, %235 : vector<32x256xf32>
    %237 = vector.extract_strided_slice %183 {offsets = [0, 7], sizes = [32, 1], strides = [1, 1]} : vector<32x9xf32> to vector<32x1xf32>
    %238 = vector.broadcast %237 : vector<32x1xf32> to vector<32x256xf32>
    %239 = arith.mulf %236, %238 : vector<32x256xf32>
    %c239_i32_65 = arith.constant 239 : i32
    %240 = tpu.dynamic_rotate %181 by %c239_i32_65 dim 1 : vector<32x256xf32>, i32 -> vector<32x256xf32>
    %241 = vector.extract_strided_slice %5 {offsets = [7, 0], sizes = [1, 256], strides = [1, 1]} : vector<8x256xf32> to vector<1x256xf32>
    %242 = vector.broadcast %241 : vector<1x256xf32> to vector<32x256xf32>
    %243 = arith.mulf %240, %242 : vector<32x256xf32>
    %244 = vector.extract_strided_slice %183 {offsets = [0, 8], sizes = [32, 1], strides = [1, 1]} : vector<32x9xf32> to vector<32x1xf32>
    %245 = vector.broadcast %244 : vector<32x1xf32> to vector<32x256xf32>
    %246 = arith.mulf %243, %245 : vector<32x256xf32>
    %247 = arith.addf %190, %197 : vector<32x256xf32>
    %248 = arith.addf %204, %211 : vector<32x256xf32>
    %249 = arith.addf %218, %225 : vector<32x256xf32>
    %250 = arith.addf %232, %239 : vector<32x256xf32>
    %251 = arith.addf %247, %248 : vector<32x256xf32>
    %252 = arith.addf %249, %250 : vector<32x256xf32>
    %253 = arith.addf %251, %252 : vector<32x256xf32>
    %254 = arith.addf %253, %246 : vector<32x256xf32>
    %cst_66 = arith.constant 0.000000e+00 : f32
    %255 = vector.broadcast %cst_66 : f32 to vector<32x256xf32>
    %256 = arith.maximumf %254, %255 : vector<32x256xf32>
    %c2_67 = arith.constant 2 : index
    %c0_68 = arith.constant 0 : index
    %c0_69 = arith.constant 0 : index
    %257 = vector.load %arg5[%c2_67, %c0_68, %c0_69] : memref<6x32x32xbf16, #tpu.memory_space<vmem>>, vector<1x32x32xbf16>
    %258 = vector.shape_cast %257 : vector<1x32x32xbf16> to vector<32x32xbf16>
    %259 = arith.truncf %256 : vector<32x256xf32> to vector<32x256xbf16>
    %cst_70 = arith.constant dense<0.000000e+00> : vector<32x256xf32>
    %260 = tpu.matmul %258, %259, %cst_70 {dimension_numbers = #tpu.dot_dimension_numbers<[1], [0], [0], [1], [0, 0, 1, 1], [], []>} : vector<32x32xbf16>, vector<32x256xbf16>, vector<32x256xf32> -> vector<32x256xf32>
    %261 = arith.addf %179, %260 : vector<32x256xf32>
    %c1_71 = arith.constant 1 : index
    %c0_72 = arith.constant 0 : index
    %c0_73 = arith.constant 0 : index
    %262 = vector.load %arg6[%c1_71, %c0_72, %c0_73] : memref<3x32x1xf32, #tpu.memory_space<vmem>>, vector<1x32x1xf32>
    %263 = vector.shape_cast %262 : vector<1x32x1xf32> to vector<32x1xf32>
    %264 = vector.broadcast %263 : vector<32x1xf32> to vector<32x256xf32>
    %265 = arith.addf %261, %264 : vector<32x256xf32>
    %cst_74 = arith.constant 0.000000e+00 : f32
    %266 = vector.broadcast %cst_74 : f32 to vector<32x256xf32>
    %267 = arith.maximumf %265, %266 : vector<32x256xf32>
    %c0_75 = arith.constant 0 : index
    %c64 = arith.constant 64 : index
    %c0_76 = arith.constant 0 : index
    %268 = vector.load %arg7[%c0_75, %c64, %c0_76] : memref<1x128x256xf32, #tpu.memory_space<vmem>>, vector<1x32x256xf32>
    %269 = vector.shape_cast %268 : vector<1x32x256xf32> to vector<32x256xf32>
    %270 = vector.shape_cast %267 : vector<32x256xf32> to vector<1x32x256xf32>
    tpu.vector_store %arg7[%c0_75, %c64, %c0_76], %270 {strides = array<i32>} : memref<1x128x256xf32, #tpu.memory_space<vmem>>, vector<1x32x256xf32>,
    %c0_77 = arith.constant 0 : index
    %c0_78 = arith.constant 0 : index
    %c0_79 = arith.constant 0 : index
    %271 = vector.load %arg7[%c0_77, %c0_78, %c0_79] : memref<1x128x256xf32, #tpu.memory_space<vmem>>, vector<1x32x256xf32>
    %272 = vector.shape_cast %271 : vector<1x32x256xf32> to vector<32x256xf32>
    %c3 = arith.constant 3 : index
    %c0_80 = arith.constant 0 : index
    %c0_81 = arith.constant 0 : index
    %273 = vector.load %arg3[%c3, %c0_80, %c0_81] : memref<6x32x9xf32, #tpu.memory_space<vmem>>, vector<1x32x9xf32>
    %274 = vector.shape_cast %273 : vector<1x32x9xf32> to vector<32x9xf32>
    %c3_82 = arith.constant 3 : index
    %c0_83 = arith.constant 0 : index
    %c0_84 = arith.constant 0 : index
    %275 = vector.load %arg4[%c3_82, %c0_83, %c0_84] : memref<6x32x1xf32, #tpu.memory_space<vmem>>, vector<1x32x1xf32>
    %276 = vector.shape_cast %275 : vector<1x32x1xf32> to vector<32x1xf32>
    %277 = vector.extract_strided_slice %274 {offsets = [0, 4], sizes = [32, 1], strides = [1, 1]} : vector<32x9xf32> to vector<32x1xf32>
    %278 = vector.broadcast %277 : vector<32x1xf32> to vector<32x256xf32>
    %279 = arith.mulf %272, %278 : vector<32x256xf32>
    %280 = vector.broadcast %276 : vector<32x1xf32> to vector<32x256xf32>
    %281 = arith.addf %279, %280 : vector<32x256xf32>
    %c17_i32_85 = arith.constant 17 : i32
    %282 = tpu.dynamic_rotate %272 by %c17_i32_85 dim 1 : vector<32x256xf32>, i32 -> vector<32x256xf32>
    %283 = vector.extract_strided_slice %5 {offsets = [0, 0], sizes = [1, 256], strides = [1, 1]} : vector<8x256xf32> to vector<1x256xf32>
    %284 = vector.broadcast %283 : vector<1x256xf32> to vector<32x256xf32>
    %285 = arith.mulf %282, %284 : vector<32x256xf32>
    %286 = vector.extract_strided_slice %274 {offsets = [0, 0], sizes = [32, 1], strides = [1, 1]} : vector<32x9xf32> to vector<32x1xf32>
    %287 = vector.broadcast %286 : vector<32x1xf32> to vector<32x256xf32>
    %288 = arith.mulf %285, %287 : vector<32x256xf32>
    %c16_i32_86 = arith.constant 16 : i32
    %289 = tpu.dynamic_rotate %272 by %c16_i32_86 dim 1 : vector<32x256xf32>, i32 -> vector<32x256xf32>
    %290 = vector.extract_strided_slice %5 {offsets = [1, 0], sizes = [1, 256], strides = [1, 1]} : vector<8x256xf32> to vector<1x256xf32>
    %291 = vector.broadcast %290 : vector<1x256xf32> to vector<32x256xf32>
    %292 = arith.mulf %289, %291 : vector<32x256xf32>
    %293 = vector.extract_strided_slice %274 {offsets = [0, 1], sizes = [32, 1], strides = [1, 1]} : vector<32x9xf32> to vector<32x1xf32>
    %294 = vector.broadcast %293 : vector<32x1xf32> to vector<32x256xf32>
    %295 = arith.mulf %292, %294 : vector<32x256xf32>
    %c15_i32_87 = arith.constant 15 : i32
    %296 = tpu.dynamic_rotate %272 by %c15_i32_87 dim 1 : vector<32x256xf32>, i32 -> vector<32x256xf32>
    %297 = vector.extract_strided_slice %5 {offsets = [2, 0], sizes = [1, 256], strides = [1, 1]} : vector<8x256xf32> to vector<1x256xf32>
    %298 = vector.broadcast %297 : vector<1x256xf32> to vector<32x256xf32>
    %299 = arith.mulf %296, %298 : vector<32x256xf32>
    %300 = vector.extract_strided_slice %274 {offsets = [0, 2], sizes = [32, 1], strides = [1, 1]} : vector<32x9xf32> to vector<32x1xf32>
    %301 = vector.broadcast %300 : vector<32x1xf32> to vector<32x256xf32>
    %302 = arith.mulf %299, %301 : vector<32x256xf32>
    %c1_i32_88 = arith.constant 1 : i32
    %303 = tpu.dynamic_rotate %272 by %c1_i32_88 dim 1 : vector<32x256xf32>, i32 -> vector<32x256xf32>
    %304 = vector.extract_strided_slice %5 {offsets = [3, 0], sizes = [1, 256], strides = [1, 1]} : vector<8x256xf32> to vector<1x256xf32>
    %305 = vector.broadcast %304 : vector<1x256xf32> to vector<32x256xf32>
    %306 = arith.mulf %303, %305 : vector<32x256xf32>
    %307 = vector.extract_strided_slice %274 {offsets = [0, 3], sizes = [32, 1], strides = [1, 1]} : vector<32x9xf32> to vector<32x1xf32>
    %308 = vector.broadcast %307 : vector<32x1xf32> to vector<32x256xf32>
    %309 = arith.mulf %306, %308 : vector<32x256xf32>
    %c255_i32_89 = arith.constant 255 : i32
    %310 = tpu.dynamic_rotate %272 by %c255_i32_89 dim 1 : vector<32x256xf32>, i32 -> vector<32x256xf32>
    %311 = vector.extract_strided_slice %5 {offsets = [4, 0], sizes = [1, 256], strides = [1, 1]} : vector<8x256xf32> to vector<1x256xf32>
    %312 = vector.broadcast %311 : vector<1x256xf32> to vector<32x256xf32>
    %313 = arith.mulf %310, %312 : vector<32x256xf32>
    %314 = vector.extract_strided_slice %274 {offsets = [0, 5], sizes = [32, 1], strides = [1, 1]} : vector<32x9xf32> to vector<32x1xf32>
    %315 = vector.broadcast %314 : vector<32x1xf32> to vector<32x256xf32>
    %316 = arith.mulf %313, %315 : vector<32x256xf32>
    %c241_i32_90 = arith.constant 241 : i32
    %317 = tpu.dynamic_rotate %272 by %c241_i32_90 dim 1 : vector<32x256xf32>, i32 -> vector<32x256xf32>
    %318 = vector.extract_strided_slice %5 {offsets = [5, 0], sizes = [1, 256], strides = [1, 1]} : vector<8x256xf32> to vector<1x256xf32>
    %319 = vector.broadcast %318 : vector<1x256xf32> to vector<32x256xf32>
    %320 = arith.mulf %317, %319 : vector<32x256xf32>
    %321 = vector.extract_strided_slice %274 {offsets = [0, 6], sizes = [32, 1], strides = [1, 1]} : vector<32x9xf32> to vector<32x1xf32>
    %322 = vector.broadcast %321 : vector<32x1xf32> to vector<32x256xf32>
    %323 = arith.mulf %320, %322 : vector<32x256xf32>
    %c240_i32_91 = arith.constant 240 : i32
    %324 = tpu.dynamic_rotate %272 by %c240_i32_91 dim 1 : vector<32x256xf32>, i32 -> vector<32x256xf32>
    %325 = vector.extract_strided_slice %5 {offsets = [6, 0], sizes = [1, 256], strides = [1, 1]} : vector<8x256xf32> to vector<1x256xf32>
    %326 = vector.broadcast %325 : vector<1x256xf32> to vector<32x256xf32>
    %327 = arith.mulf %324, %326 : vector<32x256xf32>
    %328 = vector.extract_strided_slice %274 {offsets = [0, 7], sizes = [32, 1], strides = [1, 1]} : vector<32x9xf32> to vector<32x1xf32>
    %329 = vector.broadcast %328 : vector<32x1xf32> to vector<32x256xf32>
    %330 = arith.mulf %327, %329 : vector<32x256xf32>
    %c239_i32_92 = arith.constant 239 : i32
    %331 = tpu.dynamic_rotate %272 by %c239_i32_92 dim 1 : vector<32x256xf32>, i32 -> vector<32x256xf32>
    %332 = vector.extract_strided_slice %5 {offsets = [7, 0], sizes = [1, 256], strides = [1, 1]} : vector<8x256xf32> to vector<1x256xf32>
    %333 = vector.broadcast %332 : vector<1x256xf32> to vector<32x256xf32>
    %334 = arith.mulf %331, %333 : vector<32x256xf32>
    %335 = vector.extract_strided_slice %274 {offsets = [0, 8], sizes = [32, 1], strides = [1, 1]} : vector<32x9xf32> to vector<32x1xf32>
    %336 = vector.broadcast %335 : vector<32x1xf32> to vector<32x256xf32>
    %337 = arith.mulf %334, %336 : vector<32x256xf32>
    %338 = arith.addf %281, %288 : vector<32x256xf32>
    %339 = arith.addf %295, %302 : vector<32x256xf32>
    %340 = arith.addf %309, %316 : vector<32x256xf32>
    %341 = arith.addf %323, %330 : vector<32x256xf32>
    %342 = arith.addf %338, %339 : vector<32x256xf32>
    %343 = arith.addf %340, %341 : vector<32x256xf32>
    %344 = arith.addf %342, %343 : vector<32x256xf32>
    %345 = arith.addf %344, %337 : vector<32x256xf32>
    %cst_93 = arith.constant 0.000000e+00 : f32
    %346 = vector.broadcast %cst_93 : f32 to vector<32x256xf32>
    %347 = arith.maximumf %345, %346 : vector<32x256xf32>
    %c3_94 = arith.constant 3 : index
    %c0_95 = arith.constant 0 : index
    %c0_96 = arith.constant 0 : index
    %348 = vector.load %arg5[%c3_94, %c0_95, %c0_96] : memref<6x32x32xbf16, #tpu.memory_space<vmem>>, vector<1x32x32xbf16>
    %349 = vector.shape_cast %348 : vector<1x32x32xbf16> to vector<32x32xbf16>
    %350 = arith.truncf %347 : vector<32x256xf32> to vector<32x256xbf16>
    %cst_97 = arith.constant dense<0.000000e+00> : vector<32x256xf32>
    %351 = tpu.matmul %349, %350, %cst_97 {dimension_numbers = #tpu.dot_dimension_numbers<[1], [0], [0], [1], [0, 0, 1, 1], [], []>} : vector<32x32xbf16>, vector<32x256xbf16>, vector<32x256xf32> -> vector<32x256xf32>
    %c0_98 = arith.constant 0 : index
    %c32_99 = arith.constant 32 : index
    %c0_100 = arith.constant 0 : index
    %352 = vector.load %arg7[%c0_98, %c32_99, %c0_100] : memref<1x128x256xf32, #tpu.memory_space<vmem>>, vector<1x32x256xf32>
    %353 = vector.shape_cast %352 : vector<1x32x256xf32> to vector<32x256xf32>
    %c4 = arith.constant 4 : index
    %c0_101 = arith.constant 0 : index
    %c0_102 = arith.constant 0 : index
    %354 = vector.load %arg3[%c4, %c0_101, %c0_102] : memref<6x32x9xf32, #tpu.memory_space<vmem>>, vector<1x32x9xf32>
    %355 = vector.shape_cast %354 : vector<1x32x9xf32> to vector<32x9xf32>
    %c4_103 = arith.constant 4 : index
    %c0_104 = arith.constant 0 : index
    %c0_105 = arith.constant 0 : index
    %356 = vector.load %arg4[%c4_103, %c0_104, %c0_105] : memref<6x32x1xf32, #tpu.memory_space<vmem>>, vector<1x32x1xf32>
    %357 = vector.shape_cast %356 : vector<1x32x1xf32> to vector<32x1xf32>
    %358 = vector.extract_strided_slice %355 {offsets = [0, 4], sizes = [32, 1], strides = [1, 1]} : vector<32x9xf32> to vector<32x1xf32>
    %359 = vector.broadcast %358 : vector<32x1xf32> to vector<32x256xf32>
    %360 = arith.mulf %353, %359 : vector<32x256xf32>
    %361 = vector.broadcast %357 : vector<32x1xf32> to vector<32x256xf32>
    %362 = arith.addf %360, %361 : vector<32x256xf32>
    %c17_i32_106 = arith.constant 17 : i32
    %363 = tpu.dynamic_rotate %353 by %c17_i32_106 dim 1 : vector<32x256xf32>, i32 -> vector<32x256xf32>
    %364 = vector.extract_strided_slice %5 {offsets = [0, 0], sizes = [1, 256], strides = [1, 1]} : vector<8x256xf32> to vector<1x256xf32>
    %365 = vector.broadcast %364 : vector<1x256xf32> to vector<32x256xf32>
    %366 = arith.mulf %363, %365 : vector<32x256xf32>
    %367 = vector.extract_strided_slice %355 {offsets = [0, 0], sizes = [32, 1], strides = [1, 1]} : vector<32x9xf32> to vector<32x1xf32>
    %368 = vector.broadcast %367 : vector<32x1xf32> to vector<32x256xf32>
    %369 = arith.mulf %366, %368 : vector<32x256xf32>
    %c16_i32_107 = arith.constant 16 : i32
    %370 = tpu.dynamic_rotate %353 by %c16_i32_107 dim 1 : vector<32x256xf32>, i32 -> vector<32x256xf32>
    %371 = vector.extract_strided_slice %5 {offsets = [1, 0], sizes = [1, 256], strides = [1, 1]} : vector<8x256xf32> to vector<1x256xf32>
    %372 = vector.broadcast %371 : vector<1x256xf32> to vector<32x256xf32>
    %373 = arith.mulf %370, %372 : vector<32x256xf32>
    %374 = vector.extract_strided_slice %355 {offsets = [0, 1], sizes = [32, 1], strides = [1, 1]} : vector<32x9xf32> to vector<32x1xf32>
    %375 = vector.broadcast %374 : vector<32x1xf32> to vector<32x256xf32>
    %376 = arith.mulf %373, %375 : vector<32x256xf32>
    %c15_i32_108 = arith.constant 15 : i32
    %377 = tpu.dynamic_rotate %353 by %c15_i32_108 dim 1 : vector<32x256xf32>, i32 -> vector<32x256xf32>
    %378 = vector.extract_strided_slice %5 {offsets = [2, 0], sizes = [1, 256], strides = [1, 1]} : vector<8x256xf32> to vector<1x256xf32>
    %379 = vector.broadcast %378 : vector<1x256xf32> to vector<32x256xf32>
    %380 = arith.mulf %377, %379 : vector<32x256xf32>
    %381 = vector.extract_strided_slice %355 {offsets = [0, 2], sizes = [32, 1], strides = [1, 1]} : vector<32x9xf32> to vector<32x1xf32>
    %382 = vector.broadcast %381 : vector<32x1xf32> to vector<32x256xf32>
    %383 = arith.mulf %380, %382 : vector<32x256xf32>
    %c1_i32_109 = arith.constant 1 : i32
    %384 = tpu.dynamic_rotate %353 by %c1_i32_109 dim 1 : vector<32x256xf32>, i32 -> vector<32x256xf32>
    %385 = vector.extract_strided_slice %5 {offsets = [3, 0], sizes = [1, 256], strides = [1, 1]} : vector<8x256xf32> to vector<1x256xf32>
    %386 = vector.broadcast %385 : vector<1x256xf32> to vector<32x256xf32>
    %387 = arith.mulf %384, %386 : vector<32x256xf32>
    %388 = vector.extract_strided_slice %355 {offsets = [0, 3], sizes = [32, 1], strides = [1, 1]} : vector<32x9xf32> to vector<32x1xf32>
    %389 = vector.broadcast %388 : vector<32x1xf32> to vector<32x256xf32>
    %390 = arith.mulf %387, %389 : vector<32x256xf32>
    %c255_i32_110 = arith.constant 255 : i32
    %391 = tpu.dynamic_rotate %353 by %c255_i32_110 dim 1 : vector<32x256xf32>, i32 -> vector<32x256xf32>
    %392 = vector.extract_strided_slice %5 {offsets = [4, 0], sizes = [1, 256], strides = [1, 1]} : vector<8x256xf32> to vector<1x256xf32>
    %393 = vector.broadcast %392 : vector<1x256xf32> to vector<32x256xf32>
    %394 = arith.mulf %391, %393 : vector<32x256xf32>
    %395 = vector.extract_strided_slice %355 {offsets = [0, 5], sizes = [32, 1], strides = [1, 1]} : vector<32x9xf32> to vector<32x1xf32>
    %396 = vector.broadcast %395 : vector<32x1xf32> to vector<32x256xf32>
    %397 = arith.mulf %394, %396 : vector<32x256xf32>
    %c241_i32_111 = arith.constant 241 : i32
    %398 = tpu.dynamic_rotate %353 by %c241_i32_111 dim 1 : vector<32x256xf32>, i32 -> vector<32x256xf32>
    %399 = vector.extract_strided_slice %5 {offsets = [5, 0], sizes = [1, 256], strides = [1, 1]} : vector<8x256xf32> to vector<1x256xf32>
    %400 = vector.broadcast %399 : vector<1x256xf32> to vector<32x256xf32>
    %401 = arith.mulf %398, %400 : vector<32x256xf32>
    %402 = vector.extract_strided_slice %355 {offsets = [0, 6], sizes = [32, 1], strides = [1, 1]} : vector<32x9xf32> to vector<32x1xf32>
    %403 = vector.broadcast %402 : vector<32x1xf32> to vector<32x256xf32>
    %404 = arith.mulf %401, %403 : vector<32x256xf32>
    %c240_i32_112 = arith.constant 240 : i32
    %405 = tpu.dynamic_rotate %353 by %c240_i32_112 dim 1 : vector<32x256xf32>, i32 -> vector<32x256xf32>
    %406 = vector.extract_strided_slice %5 {offsets = [6, 0], sizes = [1, 256], strides = [1, 1]} : vector<8x256xf32> to vector<1x256xf32>
    %407 = vector.broadcast %406 : vector<1x256xf32> to vector<32x256xf32>
    %408 = arith.mulf %405, %407 : vector<32x256xf32>
    %409 = vector.extract_strided_slice %355 {offsets = [0, 7], sizes = [32, 1], strides = [1, 1]} : vector<32x9xf32> to vector<32x1xf32>
    %410 = vector.broadcast %409 : vector<32x1xf32> to vector<32x256xf32>
    %411 = arith.mulf %408, %410 : vector<32x256xf32>
    %c239_i32_113 = arith.constant 239 : i32
    %412 = tpu.dynamic_rotate %353 by %c239_i32_113 dim 1 : vector<32x256xf32>, i32 -> vector<32x256xf32>
    %413 = vector.extract_strided_slice %5 {offsets = [7, 0], sizes = [1, 256], strides = [1, 1]} : vector<8x256xf32> to vector<1x256xf32>
    %414 = vector.broadcast %413 : vector<1x256xf32> to vector<32x256xf32>
    %415 = arith.mulf %412, %414 : vector<32x256xf32>
    %416 = vector.extract_strided_slice %355 {offsets = [0, 8], sizes = [32, 1], strides = [1, 1]} : vector<32x9xf32> to vector<32x1xf32>
    %417 = vector.broadcast %416 : vector<32x1xf32> to vector<32x256xf32>
    %418 = arith.mulf %415, %417 : vector<32x256xf32>
    %419 = arith.addf %362, %369 : vector<32x256xf32>
    %420 = arith.addf %376, %383 : vector<32x256xf32>
    %421 = arith.addf %390, %397 : vector<32x256xf32>
    %422 = arith.addf %404, %411 : vector<32x256xf32>
    %423 = arith.addf %419, %420 : vector<32x256xf32>
    %424 = arith.addf %421, %422 : vector<32x256xf32>
    %425 = arith.addf %423, %424 : vector<32x256xf32>
    %426 = arith.addf %425, %418 : vector<32x256xf32>
    %cst_114 = arith.constant 0.000000e+00 : f32
    %427 = vector.broadcast %cst_114 : f32 to vector<32x256xf32>
    %428 = arith.maximumf %426, %427 : vector<32x256xf32>
    %c4_115 = arith.constant 4 : index
    %c0_116 = arith.constant 0 : index
    %c0_117 = arith.constant 0 : index
    %429 = vector.load %arg5[%c4_115, %c0_116, %c0_117] : memref<6x32x32xbf16, #tpu.memory_space<vmem>>, vector<1x32x32xbf16>
    %430 = vector.shape_cast %429 : vector<1x32x32xbf16> to vector<32x32xbf16>
    %431 = arith.truncf %428 : vector<32x256xf32> to vector<32x256xbf16>
    %cst_118 = arith.constant dense<0.000000e+00> : vector<32x256xf32>
    %432 = tpu.matmul %430, %431, %cst_118 {dimension_numbers = #tpu.dot_dimension_numbers<[1], [0], [0], [1], [0, 0, 1, 1], [], []>} : vector<32x32xbf16>, vector<32x256xbf16>, vector<32x256xf32> -> vector<32x256xf32>
    %433 = arith.addf %351, %432 : vector<32x256xf32>
    %c0_119 = arith.constant 0 : index
    %c64_120 = arith.constant 64 : index
    %c0_121 = arith.constant 0 : index
    %434 = vector.load %arg7[%c0_119, %c64_120, %c0_121] : memref<1x128x256xf32, #tpu.memory_space<vmem>>, vector<1x32x256xf32>
    %435 = vector.shape_cast %434 : vector<1x32x256xf32> to vector<32x256xf32>
    %c5 = arith.constant 5 : index
    %c0_122 = arith.constant 0 : index
    %c0_123 = arith.constant 0 : index
    %436 = vector.load %arg3[%c5, %c0_122, %c0_123] : memref<6x32x9xf32, #tpu.memory_space<vmem>>, vector<1x32x9xf32>
    %437 = vector.shape_cast %436 : vector<1x32x9xf32> to vector<32x9xf32>
    %c5_124 = arith.constant 5 : index
    %c0_125 = arith.constant 0 : index
    %c0_126 = arith.constant 0 : index
    %438 = vector.load %arg4[%c5_124, %c0_125, %c0_126] : memref<6x32x1xf32, #tpu.memory_space<vmem>>, vector<1x32x1xf32>
    %439 = vector.shape_cast %438 : vector<1x32x1xf32> to vector<32x1xf32>
    %440 = vector.extract_strided_slice %437 {offsets = [0, 4], sizes = [32, 1], strides = [1, 1]} : vector<32x9xf32> to vector<32x1xf32>
    %441 = vector.broadcast %440 : vector<32x1xf32> to vector<32x256xf32>
    %442 = arith.mulf %435, %441 : vector<32x256xf32>
    %443 = vector.broadcast %439 : vector<32x1xf32> to vector<32x256xf32>
    %444 = arith.addf %442, %443 : vector<32x256xf32>
    %c17_i32_127 = arith.constant 17 : i32
    %445 = tpu.dynamic_rotate %435 by %c17_i32_127 dim 1 : vector<32x256xf32>, i32 -> vector<32x256xf32>
    %446 = vector.extract_strided_slice %5 {offsets = [0, 0], sizes = [1, 256], strides = [1, 1]} : vector<8x256xf32> to vector<1x256xf32>
    %447 = vector.broadcast %446 : vector<1x256xf32> to vector<32x256xf32>
    %448 = arith.mulf %445, %447 : vector<32x256xf32>
    %449 = vector.extract_strided_slice %437 {offsets = [0, 0], sizes = [32, 1], strides = [1, 1]} : vector<32x9xf32> to vector<32x1xf32>
    %450 = vector.broadcast %449 : vector<32x1xf32> to vector<32x256xf32>
    %451 = arith.mulf %448, %450 : vector<32x256xf32>
    %c16_i32_128 = arith.constant 16 : i32
    %452 = tpu.dynamic_rotate %435 by %c16_i32_128 dim 1 : vector<32x256xf32>, i32 -> vector<32x256xf32>
    %453 = vector.extract_strided_slice %5 {offsets = [1, 0], sizes = [1, 256], strides = [1, 1]} : vector<8x256xf32> to vector<1x256xf32>
    %454 = vector.broadcast %453 : vector<1x256xf32> to vector<32x256xf32>
    %455 = arith.mulf %452, %454 : vector<32x256xf32>
    %456 = vector.extract_strided_slice %437 {offsets = [0, 1], sizes = [32, 1], strides = [1, 1]} : vector<32x9xf32> to vector<32x1xf32>
    %457 = vector.broadcast %456 : vector<32x1xf32> to vector<32x256xf32>
    %458 = arith.mulf %455, %457 : vector<32x256xf32>
    %c15_i32_129 = arith.constant 15 : i32
    %459 = tpu.dynamic_rotate %435 by %c15_i32_129 dim 1 : vector<32x256xf32>, i32 -> vector<32x256xf32>
    %460 = vector.extract_strided_slice %5 {offsets = [2, 0], sizes = [1, 256], strides = [1, 1]} : vector<8x256xf32> to vector<1x256xf32>
    %461 = vector.broadcast %460 : vector<1x256xf32> to vector<32x256xf32>
    %462 = arith.mulf %459, %461 : vector<32x256xf32>
    %463 = vector.extract_strided_slice %437 {offsets = [0, 2], sizes = [32, 1], strides = [1, 1]} : vector<32x9xf32> to vector<32x1xf32>
    %464 = vector.broadcast %463 : vector<32x1xf32> to vector<32x256xf32>
    %465 = arith.mulf %462, %464 : vector<32x256xf32>
    %c1_i32_130 = arith.constant 1 : i32
    %466 = tpu.dynamic_rotate %435 by %c1_i32_130 dim 1 : vector<32x256xf32>, i32 -> vector<32x256xf32>
    %467 = vector.extract_strided_slice %5 {offsets = [3, 0], sizes = [1, 256], strides = [1, 1]} : vector<8x256xf32> to vector<1x256xf32>
    %468 = vector.broadcast %467 : vector<1x256xf32> to vector<32x256xf32>
    %469 = arith.mulf %466, %468 : vector<32x256xf32>
    %470 = vector.extract_strided_slice %437 {offsets = [0, 3], sizes = [32, 1], strides = [1, 1]} : vector<32x9xf32> to vector<32x1xf32>
    %471 = vector.broadcast %470 : vector<32x1xf32> to vector<32x256xf32>
    %472 = arith.mulf %469, %471 : vector<32x256xf32>
    %c255_i32_131 = arith.constant 255 : i32
    %473 = tpu.dynamic_rotate %435 by %c255_i32_131 dim 1 : vector<32x256xf32>, i32 -> vector<32x256xf32>
    %474 = vector.extract_strided_slice %5 {offsets = [4, 0], sizes = [1, 256], strides = [1, 1]} : vector<8x256xf32> to vector<1x256xf32>
    %475 = vector.broadcast %474 : vector<1x256xf32> to vector<32x256xf32>
    %476 = arith.mulf %473, %475 : vector<32x256xf32>
    %477 = vector.extract_strided_slice %437 {offsets = [0, 5], sizes = [32, 1], strides = [1, 1]} : vector<32x9xf32> to vector<32x1xf32>
    %478 = vector.broadcast %477 : vector<32x1xf32> to vector<32x256xf32>
    %479 = arith.mulf %476, %478 : vector<32x256xf32>
    %c241_i32_132 = arith.constant 241 : i32
    %480 = tpu.dynamic_rotate %435 by %c241_i32_132 dim 1 : vector<32x256xf32>, i32 -> vector<32x256xf32>
    %481 = vector.extract_strided_slice %5 {offsets = [5, 0], sizes = [1, 256], strides = [1, 1]} : vector<8x256xf32> to vector<1x256xf32>
    %482 = vector.broadcast %481 : vector<1x256xf32> to vector<32x256xf32>
    %483 = arith.mulf %480, %482 : vector<32x256xf32>
    %484 = vector.extract_strided_slice %437 {offsets = [0, 6], sizes = [32, 1], strides = [1, 1]} : vector<32x9xf32> to vector<32x1xf32>
    %485 = vector.broadcast %484 : vector<32x1xf32> to vector<32x256xf32>
    %486 = arith.mulf %483, %485 : vector<32x256xf32>
    %c240_i32_133 = arith.constant 240 : i32
    %487 = tpu.dynamic_rotate %435 by %c240_i32_133 dim 1 : vector<32x256xf32>, i32 -> vector<32x256xf32>
    %488 = vector.extract_strided_slice %5 {offsets = [6, 0], sizes = [1, 256], strides = [1, 1]} : vector<8x256xf32> to vector<1x256xf32>
    %489 = vector.broadcast %488 : vector<1x256xf32> to vector<32x256xf32>
    %490 = arith.mulf %487, %489 : vector<32x256xf32>
    %491 = vector.extract_strided_slice %437 {offsets = [0, 7], sizes = [32, 1], strides = [1, 1]} : vector<32x9xf32> to vector<32x1xf32>
    %492 = vector.broadcast %491 : vector<32x1xf32> to vector<32x256xf32>
    %493 = arith.mulf %490, %492 : vector<32x256xf32>
    %c239_i32_134 = arith.constant 239 : i32
    %494 = tpu.dynamic_rotate %435 by %c239_i32_134 dim 1 : vector<32x256xf32>, i32 -> vector<32x256xf32>
    %495 = vector.extract_strided_slice %5 {offsets = [7, 0], sizes = [1, 256], strides = [1, 1]} : vector<8x256xf32> to vector<1x256xf32>
    %496 = vector.broadcast %495 : vector<1x256xf32> to vector<32x256xf32>
    %497 = arith.mulf %494, %496 : vector<32x256xf32>
    %498 = vector.extract_strided_slice %437 {offsets = [0, 8], sizes = [32, 1], strides = [1, 1]} : vector<32x9xf32> to vector<32x1xf32>
    %499 = vector.broadcast %498 : vector<32x1xf32> to vector<32x256xf32>
    %500 = arith.mulf %497, %499 : vector<32x256xf32>
    %501 = arith.addf %444, %451 : vector<32x256xf32>
    %502 = arith.addf %458, %465 : vector<32x256xf32>
    %503 = arith.addf %472, %479 : vector<32x256xf32>
    %504 = arith.addf %486, %493 : vector<32x256xf32>
    %505 = arith.addf %501, %502 : vector<32x256xf32>
    %506 = arith.addf %503, %504 : vector<32x256xf32>
    %507 = arith.addf %505, %506 : vector<32x256xf32>
    %508 = arith.addf %507, %500 : vector<32x256xf32>
    %cst_135 = arith.constant 0.000000e+00 : f32
    %509 = vector.broadcast %cst_135 : f32 to vector<32x256xf32>
    %510 = arith.maximumf %508, %509 : vector<32x256xf32>
    %c5_136 = arith.constant 5 : index
    %c0_137 = arith.constant 0 : index
    %c0_138 = arith.constant 0 : index
    %511 = vector.load %arg5[%c5_136, %c0_137, %c0_138] : memref<6x32x32xbf16, #tpu.memory_space<vmem>>, vector<1x32x32xbf16>
    %512 = vector.shape_cast %511 : vector<1x32x32xbf16> to vector<32x32xbf16>
    %513 = arith.truncf %510 : vector<32x256xf32> to vector<32x256xbf16>
    %cst_139 = arith.constant dense<0.000000e+00> : vector<32x256xf32>
    %514 = tpu.matmul %512, %513, %cst_139 {dimension_numbers = #tpu.dot_dimension_numbers<[1], [0], [0], [1], [0, 0, 1, 1], [], []>} : vector<32x32xbf16>, vector<32x256xbf16>, vector<32x256xf32> -> vector<32x256xf32>
    %515 = arith.addf %433, %514 : vector<32x256xf32>
    %c2_140 = arith.constant 2 : index
    %c0_141 = arith.constant 0 : index
    %c0_142 = arith.constant 0 : index
    %516 = vector.load %arg6[%c2_140, %c0_141, %c0_142] : memref<3x32x1xf32, #tpu.memory_space<vmem>>, vector<1x32x1xf32>
    %517 = vector.shape_cast %516 : vector<1x32x1xf32> to vector<32x1xf32>
    %518 = vector.broadcast %517 : vector<32x1xf32> to vector<32x256xf32>
    %519 = arith.addf %515, %518 : vector<32x256xf32>
    %cst_143 = arith.constant 0.000000e+00 : f32
    %520 = vector.broadcast %cst_143 : f32 to vector<32x256xf32>
    %521 = arith.maximumf %519, %520 : vector<32x256xf32>
    %c0_144 = arith.constant 0 : index
    %c96 = arith.constant 96 : index
    %c0_145 = arith.constant 0 : index
    %522 = vector.load %arg7[%c0_144, %c96, %c0_145] : memref<1x128x256xf32, #tpu.memory_space<vmem>>, vector<1x32x256xf32>
    %523 = vector.shape_cast %522 : vector<1x32x256xf32> to vector<32x256xf32>
    %524 = vector.shape_cast %521 : vector<32x256xf32> to vector<1x32x256xf32>
    tpu.vector_store %arg7[%c0_144, %c96, %c0_145], %524 {strides = array<i32>} : memref<1x128x256xf32, #tpu.memory_space<vmem>>, vector<1x32x256xf32>,
    return
  }
  func.func @transform_0(%arg0: i32) -> (i32, i32, i32) {
    %c0_i32 = arith.constant 0 : i32
    %c0_i32_0 = arith.constant 0 : i32
    %c0_i32_1 = arith.constant 0 : i32
    return %arg0, %c0_i32, %c0_i32_0 : i32, i32, i32
  }
  func.func @transform_1(%arg0: i32) -> (i32, i32) {
    %c0_i32 = arith.constant 0 : i32
    %c0_i32_0 = arith.constant 0 : i32
    %c0_i32_1 = arith.constant 0 : i32
    return %c0_i32, %c0_i32_0 : i32, i32
  }
  func.func @transform_2(%arg0: i32) -> (i32, i32, i32) {
    %c0_i32 = arith.constant 0 : i32
    %c0_i32_0 = arith.constant 0 : i32
    %c0_i32_1 = arith.constant 0 : i32
    %c0_i32_2 = arith.constant 0 : i32
    return %c0_i32, %c0_i32_0, %c0_i32_1 : i32, i32, i32
  }
  func.func @transform_3(%arg0: i32) -> (i32, i32, i32) {
    %c0_i32 = arith.constant 0 : i32
    %c0_i32_0 = arith.constant 0 : i32
    %c0_i32_1 = arith.constant 0 : i32
    %c0_i32_2 = arith.constant 0 : i32
    return %c0_i32, %c0_i32_0, %c0_i32_1 : i32, i32, i32
  }
  func.func @transform_4(%arg0: i32) -> (i32, i32, i32) {
    %c0_i32 = arith.constant 0 : i32
    %c0_i32_0 = arith.constant 0 : i32
    %c0_i32_1 = arith.constant 0 : i32
    %c0_i32_2 = arith.constant 0 : i32
    return %c0_i32, %c0_i32_0, %c0_i32_1 : i32, i32, i32
  }
  func.func @transform_5(%arg0: i32) -> (i32, i32, i32) {
    %c0_i32 = arith.constant 0 : i32
    %c0_i32_0 = arith.constant 0 : i32
    %c0_i32_1 = arith.constant 0 : i32
    %c0_i32_2 = arith.constant 0 : i32
    return %c0_i32, %c0_i32_0, %c0_i32_1 : i32, i32, i32
  }
  func.func @transform_6(%arg0: i32) -> (i32, i32, i32) {
    %c0_i32 = arith.constant 0 : i32
    %c0_i32_0 = arith.constant 0 : i32
    %c0_i32_1 = arith.constant 0 : i32
    return %arg0, %c0_i32, %c0_i32_0 : i32, i32, i32
  }
}

</mosaic_0001>

<bundles_post_ra>
// kernel: dense_block3_pallas.1
= control target key start
LH: loop header
LB: loop body
LE: loop exit
PB: predicated region body
PF: predicated region fallthrough
CT: control target
= control target key end

     0   :  { %s4968_s21 = smov 0   ;;  %s11223_s0 = inlined_call_operand.vmem [shape: f32[2,32,256], index: 0, kind: input, shape index: {}]   ;;  %s11224_s1 = inlined_call_operand.vmem [shape: f32[8,256], index: 1, kind: input, shape index: {}]   ;;  %s11225_s2 = inlined_call_operand.vmem [shape: f32[6,32,9], index: 2, kind: input, shape index: {}]   ;;  %s11226_s3 = inlined_call_operand.vmem [shape: f32[6,32,1], index: 3, kind: input, shape index: {}]   ;;  %s11227_s4 = inlined_call_operand.vmem [shape: bf16[6,32,32], index: 4, kind: input, shape index: {}]   ;;  %s11228_s5 = inlined_call_operand.vmem [shape: f32[3,32,1], index: 5, kind: input, shape index: {}]   ;;  %s11229_s6 = inlined_call_operand.vmem [shape: f32[2,128,256], index: 6, kind: output, shape index: {}]  }
   0x1 LB: > { %s4584_s22 = sadd.s32 4294967295, %s4914_s21   ;;  %p4588_p0 = scmp.ge.s32.totalorder %s4914_s21, 1  ;;  %s4914_s21 = sphi %s4968_s21, %s16_s21  }
   0x2   : > { %p212_p1 = scmp.lt.s32.totalorder %s4914_s21, 3 }
   0x4   : > { %p213_p2 = pnand %p4588_p0, %p212_p1 }
   0x6   : > { %216 = sbr.rel (%p213_p2) target bundleno = 1909 (0x775), region = 44 }
   0xd   : > { %v4979_v0 = vld [vmem:[%s11225_s2 + $0x10] sm:$0xff]  ;;  %v4984_v1 = vld [vmem:[%s11225_s2] sm:$0xff]  ;;  %p242_p3 = scmp.lt.s32.totalorder %s4584_s22, 1  ;;  %v11244_v2 = vmov 4   ;;  %v4993_v3 = vld [vmem:[%s11225_s2 + $0x18] sm:$0xff]  ;;  %v11247_v5 = vmov 0  }
   0xe   : > { %4739 = vset.pattern.permute.xlu1 %v11244_v2  ;;  %4738 = vset.pattern.permute.xlu0 %v11244_v2  ;;  %v4998_v4 = vld [vmem:[%s11225_s2 + $0x8] sm:$0xff]  ;;  %v285_v15 = vld [vmem:[%s11226_s3 + $0x10] sm:$0xff]  ;;  %s4918_s19 = smov 17   ;;  %v11242_v16 = vmov 1   ;;  %s4920_s20 = smov 16   ;;  %v11240_v17 = vmov 2  }
   0xf   : > { %299 = vperm.xlu1 %4739, %v4979_v0   ;;  %289 = vperm.xlu0 %4738, %v4984_v1   ;;  %s13069_s22 = smov (!%p242_p3, %s4584_s22), 1  ;;  %v284_v6 = vld [vmem:[%s11226_s3 + $0x8] sm:$0xff]  ;;  %s4923_s23 = smov 1   ;;  %v11238_v18 = vmov 3   ;;  %v11236_v19 = vmov 5   ;;  %v11234_v20 = vmov 6  }
  0x10   : > { %1018 = vmatprep.mubr.bf16.mxu1 %v11247_v5  ;;  %3710 = vmatprep.mubr.bf16.mxu0 %v11247_v5  ;;  %s4687_s7 = sshll.u32 %s13069_s22, 6  ;;  %s4688_s8 = sshll.u32 %s13069_s22, 8  ;;  %v11232_v25 = vmov 7   ;;  %v11230_v38 = vmov 8   ;;  %v283_v47 = vld [vmem:[%s11226_s3] sm:$0xff]  ;;  %v286_v51 = vld [vmem:[%s11226_s3 + $0x18] sm:$0xff] }
  0x11   : > { %s246_s11 = scalar_lea.vmem %s11223_s0, %s4687_s7  ;;  %s5013_s16 = scalar_lea.vmem %s11229_s6, %s4688_s8  ;;  %v945_v58 = vld [vmem:[%s11228_s5] sm:$0xff]  ;;  %v948_v61 = vld [vmem:[%s11228_s5 + $0x18] sm:$0xff]  ;;  %vm979_vm8 = vcmask 261120  }
  0x12   : > { %v5015_v7 = vld [vmem:[%s246_s11 + $0x10] sm:$0xff]  ;;  %v5019_v9 = vld [vmem:[%s246_s11] sm:$0xff]  ;;  %v5027_v10 = vld [vmem:[%s246_s11 + $0x18] sm:$0xff]  ;;  %s4921_s22 = smov 15   ;;  %s4925_s24 = smov 127  }
  0x13   : > { %304 = vperm.xlu1 %4739, %v4993_v3   ;;  %294 = vperm.xlu0 %4738, %v4998_v4   ;;  %v5017_v8 = vld [vmem:[%s246_s11 + $0x30] sm:$0xff]  ;;  %263 = vst [vmem:[%s5013_s16 + $0x10] sm:$0xff] %v5015_v7  ;;  %261 = vst [vmem:[%s5013_s16] sm:$0xff] %v5019_v9  ;;  %v5029_v11 = vld [vmem:[%s246_s11 + $0x20] sm:$0xff]  ;;  %s4927_s25 = smov 113   ;;  %s4929_s26 = smov 112  }
  0x14   : > { %267 = vst [vmem:[%s5013_s16 + $0x30] sm:$0xff] %v5017_v8  ;;  %11758 = vst [vmem:[#allocation2_spill] sm:$0xff] %v5027_v10  ;;  %v5031_v12 = vld [vmem:[%s246_s11 + $0x38] sm:$0xff]  ;;  %v5039_v13 = vld [vmem:[%s246_s11 + $0x8] sm:$0xff]  ;;  %s4931_s27 = smov 111  }
  0x15   : > { %264 = vst [vmem:[%s5013_s16 + $0x18] sm:$0xff] %v5027_v10  ;;  %265 = vst [vmem:[%s5013_s16 + $0x20] sm:$0xff] %v5029_v11  ;;  %v5041_v14 = vld [vmem:[%s246_s11 + $0x28] sm:$0xff]  ;;  %v5370_v2 = vld [vmem:[%s11225_s2 + $0x38] sm:$0xff] }
  0x16   : > { %268 = vst [vmem:[%s5013_s16 + $0x38] sm:$0xff] %v5031_v12  ;;  %262 = vst [vmem:[%s5013_s16 + $0x8] sm:$0xff] %v5039_v13 }
  0x17   : > { %266 = vst [vmem:[%s5013_s16 + $0x28] sm:$0xff] %v5041_v14  ;;  %4740 = vset.pattern.permute.xlu1 %v11247_v5  ;;  %345 = vrot.lane.b32.xlu0 %v5015_v7, %s4918_s19  ;;  %11776 = vst [vmem:[#allocation20_spill] sm:$0xff] %v5370_v2 }
  0x18   : > { %322 = vperm.xlu1 %4740, %v284_v6   ;;  %4742 = vset.pattern.permute.xlu0 %v11242_v16 }
  0x1b   : > { %349 = vrot.lane.b32.xlu0 %v5017_v8, %s4918_s19 }
  0x1c   : > { %327 = vperm.xlu1 %4740, %v285_v15  }
  0x1f   : > { %353 = vrot.lane.b32.xlu0 %v5027_v10, %s4918_s19 }
  0x20   : > { %343 = vrot.lane.b32.xlu1 %v5019_v9, %s4918_s19 }
  0x23   : > { %357 = vrot.lane.b32.xlu0 %v5031_v12, %s4918_s19 }
  0x24   : > { %347 = vrot.lane.b32.xlu1 %v5029_v11, %s4918_s19 }
  0x27   : > { %412 = vrot.lane.b32.xlu0 %v5015_v7, %s4920_s20 }
  0x28   : > { %351 = vrot.lane.b32.xlu1 %v5039_v13, %s4918_s19 }
  0x2b   : > { %416 = vrot.lane.b32.xlu0 %v5017_v8, %s4920_s20 }
  0x2c   : > { %355 = vrot.lane.b32.xlu1 %v5041_v14, %s4918_s19 }
  0x2f   : > { %420 = vrot.lane.b32.xlu0 %v5027_v10, %s4920_s20 }
  0x30   : > { %387 = vperm.xlu1 %4740, %v4984_v1  }
  0x33   : > { %424 = vrot.lane.b32.xlu0 %v5031_v12, %s4920_s20 }
  0x34   : > { %395 = vperm.xlu1 %4740, %v4979_v0  }
  0x37   : > { %456 = vperm.xlu0 %4742, %v4998_v4  }
  0x38   : > { %410 = vrot.lane.b32.xlu1 %v5019_v9, %s4920_s20 }
  0x39   : > { %4741 = vset.pattern.permute.xlu1 %v11242_v16 }
  0x3b   : > { %475 = vrot.lane.b32.xlu0 %v5019_v9, %s4921_s22 }
  0x3c   : > { %414 = vrot.lane.b32.xlu1 %v5029_v11, %s4920_s20  ;;  %4743 = vset.pattern.permute.xlu0 %v11240_v17 }
  0x3f   : > { %479 = vrot.lane.b32.xlu0 %v5029_v11, %s4921_s22 }
  0x40   : > { %418 = vrot.lane.b32.xlu1 %v5039_v13, %s4920_s20 }
  0x43   : > { %483 = vrot.lane.b32.xlu0 %v5039_v13, %s4921_s22 }
  0x44   : > { %422 = vrot.lane.b32.xlu1 %v5041_v14, %s4920_s20 }
  0x47   : > { %487 = vrot.lane.b32.xlu0 %v5041_v14, %s4921_s22 }
  0x48   : > { %452 = vperm.xlu1 %4741, %v4984_v1  }
  0x4b   : > { %517 = vperm.xlu0 %4743, %v4984_v1  }
  0x4c   : > { %460 = vperm.xlu1 %4741, %v4979_v0  }
  0x4f   : > { %529 = vperm.xlu0 %4743, %v4993_v3  }
  0x50   : > { %464 = vperm.xlu1 %4741, %v4993_v3  }
  0x53   : > { %542 = vrot.lane.b32.xlu0 %v5015_v7, %s4923_s23 }
  0x54   : > { %477 = vrot.lane.b32.xlu1 %v5015_v7, %s4921_s22  ;;  %4746 = vset.pattern.permute.xlu0 %v11238_v18 }
  0x55   : > { %4744 = vset.pattern.permute.xlu1 %v11240_v17 }
  0x57   : > { %546 = vrot.lane.b32.xlu0 %v5017_v8, %s4923_s23 }
  0x58   : > { %481 = vrot.lane.b32.xlu1 %v5017_v8, %s4921_s22 }
  0x5b   : > { %550 = vrot.lane.b32.xlu0 %v5027_v10, %s4923_s23 }
  0x5c   : > { %485 = vrot.lane.b32.xlu1 %v5027_v10, %s4921_s22 }
  0x5f   : > { %554 = vrot.lane.b32.xlu0 %v5031_v12, %s4923_s23 }
  0x60   : > { %489 = vrot.lane.b32.xlu1 %v5031_v12, %s4921_s22 }
  0x63   : > { %586 = vperm.xlu0 %4746, %v4998_v4  }
  0x64   : > { %521 = vperm.xlu1 %4744, %v4998_v4  }
  0x67   : > { %605 = vrot.lane.b32.xlu0 %v5019_v9, %s4925_s24 }
  0x68   : > { %525 = vperm.xlu1 %4744, %v4979_v0   ;;  %4747 = vset.pattern.permute.xlu0 %v11236_v19 }
  0x6b   : > { %609 = vrot.lane.b32.xlu0 %v5029_v11, %s4925_s24 }
  0x6c   : > { %540 = vrot.lane.b32.xlu1 %v5019_v9, %s4923_s23 }
  0x6d   : > { %4745 = vset.pattern.permute.xlu1 %v11238_v18 }
  0x6f   : > { %613 = vrot.lane.b32.xlu0 %v5039_v13, %s4925_s24 }
  0x70   : > { %544 = vrot.lane.b32.xlu1 %v5029_v11, %s4923_s23 }
  0x73   : > { %617 = vrot.lane.b32.xlu0 %v5041_v14, %s4925_s24 }
  0x74   : > { %548 = vrot.lane.b32.xlu1 %v5039_v13, %s4923_s23 }
  0x77   : > { %647 = vperm.xlu0 %4747, %v4984_v1  }
  0x78   : > { %552 = vrot.lane.b32.xlu1 %v5041_v14, %s4923_s23 }
  0x7b   : > { %659 = vperm.xlu0 %4747, %v4993_v3  }
  0x7c   : > { %582 = vperm.xlu1 %4745, %v4984_v1  }
  0x7f   : > { %672 = vrot.lane.b32.xlu0 %v5015_v7, %s4927_s25 }
  0x80   : > { %590 = vperm.xlu1 %4745, %v4979_v0   ;;  %4750 = vset.pattern.permute.xlu0 %v11234_v20 }
  0x83   : > { %676 = vrot.lane.b32.xlu0 %v5017_v8, %s4927_s25 }
  0x84   : > { %594 = vperm.xlu1 %4745, %v4993_v3  }
  0x87   : > { %680 = vrot.lane.b32.xlu0 %v5027_v10, %s4927_s25 }
  0x88   : > { %607 = vrot.lane.b32.xlu1 %v5015_v7, %s4925_s24 }
  0x89   : > { %4748 = vset.pattern.permute.xlu1 %v11236_v19 }
  0x8b   : > { %684 = vrot.lane.b32.xlu0 %v5031_v12, %s4927_s25 }
  0x8c   : > { %611 = vrot.lane.b32.xlu1 %v5017_v8, %s4925_s24 }
  0x8e   : > { %v5160_v21 = vpop.permute.xlu1 %299  ;;  %v5162_v22 = vpop.permute.xlu0 %289 }
  0x8f   : > { %716 = vperm.xlu0 %4750, %v4998_v4  }
  0x90   : > { %615 = vrot.lane.b32.xlu1 %v5027_v10, %s4925_s24 }
  0x92   : > { %v5167_v23 = vpop.permute.xlu1 %304  ;;  %v5169_v24 = vpop.permute.xlu0 %294 }
  0x93   : > { %735 = vrot.lane.b32.xlu0 %v5019_v9, %s4929_s26 }
  0x94   : > { %619 = vrot.lane.b32.xlu1 %v5031_v12, %s4925_s24  ;;  %4751 = vset.pattern.permute.xlu0 %v11232_v25 }
  0x96   : > { %v5176_v26 = vpop.permute.xlu0 %345 }
  0x97   : > { %v5178_v27 = vpop.permute.xlu1 %322  ;;  %739 = vrot.lane.b32.xlu0 %v5029_v11, %s4929_s26 }
  0x98   : > { %651 = vperm.xlu1 %4748, %v4998_v4  }
  0x9a   : > { %v5183_v28 = vpop.permute.xlu0 %349 }
  0x9b   : > { %v5185_v29 = vpop.permute.xlu1 %327  ;;  %743 = vrot.lane.b32.xlu0 %v5039_v13, %s4929_s26 }
  0x9c   : > { %655 = vperm.xlu1 %4748, %v4979_v0  }
  0x9e   : > { %v5190_v30 = vpop.permute.xlu0 %353 }
  0x9f   : > { %v5192_v31 = vpop.permute.xlu1 %343  ;;  %747 = vrot.lane.b32.xlu0 %v5041_v14, %s4929_s26 }
  0xa0   : > { %670 = vrot.lane.b32.xlu1 %v5019_v9, %s4927_s25 }
  0xa1   : > { %4749 = vset.pattern.permute.xlu1 %v11234_v20 }
  0xa2   : > { %v5199_v32 = vpop.permute.xlu0 %357 }
  0xa3   : > { %v5201_v33 = vpop.permute.xlu1 %347  ;;  %777 = vperm.xlu0 %4751, %v4984_v1  }
  0xa4   : > { %674 = vrot.lane.b32.xlu1 %v5029_v11, %s4927_s25 }
  0xa6   : > { %v5206_v34 = vpop.permute.xlu0 %412 }
  0xa7   : > { %v5208_v35 = vpop.permute.xlu1 %351  ;;  %789 = vperm.xlu0 %4751, %v4993_v3  }
  0xa8   : > { %678 = vrot.lane.b32.xlu1 %v5039_v13, %s4927_s25 }
  0xaa   : > { %v5213_v36 = vpop.permute.xlu0 %416 }
  0xab   : > { %v5215_v37 = vpop.permute.xlu1 %355  ;;  %802 = vrot.lane.b32.xlu0 %v5015_v7, %s4931_s27 }
  0xac   : > { %682 = vrot.lane.b32.xlu1 %v5041_v14, %s4927_s25  ;;  %4754 = vset.pattern.permute.xlu0 %v11230_v38 }
  0xae   : > { %v5222_v39 = vpop.permute.xlu0 %420 }
  0xaf   : > { %v5224_v40 = vpop.permute.xlu1 %387  ;;  %806 = vrot.lane.b32.xlu0 %v5017_v8, %s4931_s27 }
  0xb0   : > { %712 = vperm.xlu1 %4749, %v4984_v1  }
  0xb2   : > { %v5229_v41 = vpop.permute.xlu0 %424 }
  0xb3   : > { %v5231_v42 = vpop.permute.xlu1 %395  ;;  %810 = vrot.lane.b32.xlu0 %v5027_v10, %s4931_s27 }
  0xb4   : > { %720 = vperm.xlu1 %4749, %v4979_v0  }
  0xb6   : > { %v5236_v43 = vpop.permute.xlu0 %456 }
  0xb7   : > { %v5238_v44 = vpop.permute.xlu1 %410  ;;  %814 = vrot.lane.b32.xlu0 %v5031_v12, %s4931_s27 }
  0xb8   : > { %724 = vperm.xlu1 %4749, %v4993_v3  }
  0xba   : > { %v5243_v45 = vpop.permute.xlu0 %475 }
  0xbb   : > { %v5245_v46 = vpop.permute.xlu1 %414  ;;  %846 = vperm.xlu0 %4754, %v4998_v4  }
  0xbc   : > { %737 = vrot.lane.b32.xlu1 %v5015_v7, %s4929_s26 }
  0xbd   : > { %4752 = vset.pattern.permute.xlu1 %v11232_v25 }
  0xbe   : > { %v5254_v48 = vpop.permute.xlu0 %479 }
  0xbf   : > { %v5256_v49 = vpop.permute.xlu1 %418  ;;  %4755 = vset.pattern.permute.xlu0 %v11247_v5 }
  0xc0   : > { %741 = vrot.lane.b32.xlu1 %v5017_v8, %s4929_s26  ;;  %317 = vperm.xlu0 %4755, %v283_v47   ;;  %v4604_v47 = vld [vmem:[%s11226_s3 + $0x38] sm:$0xff] }
  0xc2   : > { %v5261_v50 = vpop.permute.xlu0 %483 }
  0xc3   : > { %v5266_v52 = vpop.permute.xlu1 %422 }
  0xc4   : > { %745 = vrot.lane.b32.xlu1 %v5027_v10, %s4929_s26  ;;  %332 = vperm.xlu0 %4755, %v286_v51  }
  0xc6   : > { %v5270_v53 = vpop.permute.xlu0 %487 }
  0xc7   : > { %v5272_v54 = vpop.permute.xlu1 %452 }
  0xc8   : > { %749 = vrot.lane.b32.xlu1 %v5031_v12, %s4929_s26  ;;  %391 = vperm.xlu0 %4755, %v4998_v4  }
  0xca   : > { %v5277_v55 = vpop.permute.xlu0 %517 }
  0xcb   : > { %v5279_v56 = vpop.permute.xlu1 %460 }
  0xcc   : > { %11759 = vst [vmem:[#allocation3_spill] sm:$0xff] %v5279_v56  ;;  %781 = vperm.xlu1 %4752, %v4998_v4   ;;  %399 = vperm.xlu0 %4755, %v4993_v3   ;;  %v4601_v4 = vld [vmem:[%s11226_s3 + $0x20] sm:$0xff] }
  0xce   : > { %v5283_v57 = vpop.permute.xlu0 %529 }
  0xcf   : > { %11760 = vst [vmem:[#allocation4_spill] sm:$0xff] %v5283_v57  ;;  %v5288_v59 = vpop.permute.xlu1 %464 }
  0xd0   : > { %11761 = vst [vmem:[#allocation5_spill] sm:$0xff] %v5288_v59  ;;  %785 = vperm.xlu1 %4752, %v4979_v0   ;;  %951 = vperm.xlu0 %4755, %v945_v58  }
  0xd2   : > { %v5291_v60 = vpop.permute.xlu0 %542 }
  0xd3   : > { %v5296_v62 = vpop.permute.xlu1 %477 }
  0xd4   : > { %11762 = vst [vmem:[#allocation6_spill] sm:$0xff] %v5296_v62  ;;  %800 = vrot.lane.b32.xlu1 %v5019_v9, %s4931_s27  ;;  %966 = vperm.xlu0 %4755, %v948_v61  }
  0xd5   : > { %4753 = vset.pattern.permute.xlu1 %v11230_v38 }
  0xd6   : > { %v5301_v63 = vpop.permute.xlu0 %546 }
  0xd7   : > { %11763 = vst [vmem:[#allocation7_spill] sm:$0xff] %v5301_v63  ;;  %v5306_v6 = vpop.permute.xlu1 %481 }
  0xd8   : > { %804 = vrot.lane.b32.xlu1 %v5029_v11, %s4931_s27  ;;  %1111 = vperm.xlu0 %4755, %v4601_v4  }
  0xda   : > { %v5310_v15 = vpop.permute.xlu0 %550 }
  0xdb   : > { %v5315_v51 = vpop.permute.xlu1 %485 }
  0xdc   : > { %11764 = vst [vmem:[#allocation8_spill] sm:$0xff] %v5315_v51  ;;  %808 = vrot.lane.b32.xlu1 %v5039_v13, %s4931_s27  ;;  %1126 = vperm.xlu0 %4755, %v4604_v47  }
  0xde   : > { %v5319_v58 = vpop.permute.xlu0 %554 }
  0xdf   : > { %11765 = vst [vmem:[#allocation9_spill] sm:$0xff] %v5319_v58  ;;  %v5321_v61 = vpop.permute.xlu1 %489 }
  0xe0   : > { %812 = vrot.lane.b32.xlu1 %v5041_v14, %s4931_s27  ;;  %1139 = vrot.lane.b32.xlu0 %v5015_v7, %s4918_s19 }
  0xe2   : > { %v5327_v4 = vpop.permute.xlu0 %586 }
  0xe3   : > { %11766 = vst [vmem:[#allocation10_spill] sm:$0xff] %v5327_v4  ;;  %v5329_v38 = vpop.permute.xlu1 %521  ;;  %v4602_v4 = vld [vmem:[%s11226_s3 + $0x28] sm:$0xff] }
  0xe4   : > { %11767 = vst [vmem:[#allocation11_spill] sm:$0xff] %v5329_v38  ;;  %842 = vperm.xlu1 %4753, %v4984_v1   ;;  %1143 = vrot.lane.b32.xlu0 %v5017_v8, %s4918_s19  ;;  %v946_v1 = vld [vmem:[%s11228_s5 + $0x8] sm:$0xff]  ;;  %v11789_v38 = vmov 0  }
  0xe6   : > { %v5334_v47 = vpop.permute.xlu0 %605 }
  0xe7   : > { %11768 = vst [vmem:[#allocation12_spill] sm:$0xff] %v5334_v47  ;;  %v5336_v25 = vpop.permute.xlu1 %525 }
  0xe8   : > { %11769 = vst [vmem:[#allocation13_spill] sm:$0xff] %v5336_v25  ;;  %850 = vperm.xlu1 %4753, %v4979_v0   ;;  %1147 = vrot.lane.b32.xlu0 %v5027_v10, %s4918_s19  ;;  %v5356_v0 = vld [vmem:[%s11225_s2 + $0x28] sm:$0xff] }
  0xe9   : > { %11773 = vst [vmem:[#allocation17_spill] sm:$0xff] %v5356_v0 }
  0xea   : > { %v5341_v20 = vpop.permute.xlu0 %609 }
  0xeb   : > { %11770 = vst [vmem:[#allocation14_spill] sm:$0xff] %v5341_v20  ;;  %v5343_v19 = vpop.permute.xlu1 %540 }
  0xec   : > { %11771 = vst [vmem:[#allocation15_spill] sm:$0xff] %v5343_v19  ;;  %854 = vperm.xlu1 %4753, %v4993_v3   ;;  %1151 = vrot.lane.b32.xlu0 %v5031_v12, %s4918_s19  ;;  %v947_v3 = vld [vmem:[%s11228_s5 + $0x10] sm:$0xff]  ;;  %v5474_v19 = vld [vmem:[%s11224_s1] sm:$0xff] }
  0xee   : > { %v5351_v18 = vpop.permute.xlu0 %613 }
  0xef   : > { %11772 = vst [vmem:[#allocation16_spill] sm:$0xff] %v5351_v18  ;;  %v5358_v17 = vpop.permute.xlu1 %544 }
  0xf0   : > { %11774 = vst [vmem:[#allocation18_spill] sm:$0xff] %v5358_v17  ;;  %4756 = vset.pattern.permute.xlu1 %v11247_v5  ;;  %1174 = vperm.xlu0 %4755, %v5356_v0   ;;  %v5382_v0 = vld [vmem:[%s11225_s2 + $0x20] sm:$0xff]  ;;  %v11781_v17 = vmov 4  }
  0xf1   : > { %956 = vperm.xlu1 %4756, %v946_v1   ;;  %11780 = vst [vmem:[#allocation24_spill] sm:$0xff] %v5382_v0 }
  0xf2   : > { %v5365_v16 = vpop.permute.xlu0 %617 }
  0xf3   : > { %11775 = vst [vmem:[#allocation19_spill] sm:$0xff] %v5365_v16  ;;  %v5372_v20 = vpop.permute.xlu1 %548 }
  0xf4   : > { %11777 = vst [vmem:[#allocation21_spill] sm:$0xff] %v5372_v20  ;;  %1182 = vperm.xlu0 %4755, %v5370_v2  }
  0xf5   : > { %961 = vperm.xlu1 %4756, %v947_v3  }
  0xf6   : > { %v5375_v5 = vpop.permute.xlu0 %647 }
  0xf7   : > { %11778 = vst [vmem:[#allocation22_spill] sm:$0xff] %v5375_v5  ;;  %v5377_v1 = vpop.permute.xlu1 %552  ;;  %v5395_v5 = vld [vmem:[%s11225_s2 + $0x30] sm:$0xff] }
  0xf8   : > { %11779 = vst [vmem:[#allocation23_spill] sm:$0xff] %v5377_v1  ;;  %1195 = vrot.lane.b32.xlu0 %v5015_v7, %s4920_s20  ;;  %11784 = vst [vmem:[#allocation27_spill] sm:$0xff] %v5395_v5 }
  0xf9   : > { %4757 = vset.pattern.permute.xlu1 %v11781_v17 }
  0xfa   : > { %1083 = vperm.xlu1 %4757, %v5382_v0   ;;  %v5388_v16 = vpop.permute.xlu0 %659 }
  0xfb   : > { %11782 = vst [vmem:[#allocation25_spill] sm:$0xff] %v5388_v16  ;;  %v5390_v3 = vpop.permute.xlu1 %582 }
  0xfc   : > { %11783 = vst [vmem:[#allocation26_spill] sm:$0xff] %v5390_v3  ;;  %1199 = vrot.lane.b32.xlu0 %v5017_v8, %s4920_s20 }
  0xfe   : > { %1093 = vperm.xlu1 %4757, %v5395_v5   ;;  %v5400_v17 = vpop.permute.xlu0 %672 }
  0xff   : > { %11785 = vst [vmem:[#allocation28_spill] sm:$0xff] %v5400_v17  ;;  %v5402_v1 = vpop.permute.xlu1 %590 }
 0x100   : > { %11786 = vst [vmem:[#allocation29_spill] sm:$0xff] %v5402_v1  ;;  %1203 = vrot.lane.b32.xlu0 %v5027_v10, %s4920_s20 }
 0x102   : > { %1098 = vperm.xlu1 %4757, %v5370_v2   ;;  %v5407_v16 = vpop.permute.xlu0 %676 }
 0x103   : > { %11787 = vst [vmem:[#allocation30_spill] sm:$0xff] %v5407_v16  ;;  %v5409_v3 = vpop.permute.xlu1 %594  ;;  %v4603_v16 = vld [vmem:[%s11226_s3 + $0x30] sm:$0xff] }
 0x104   : > { %11788 = vst [vmem:[#allocation31_spill] sm:$0xff] %v5409_v3  ;;  %1207 = vrot.lane.b32.xlu0 %v5031_v12, %s4920_s20 }
 0x106   : > { %4758 = vset.pattern.permute.xlu1 %v11789_v38  ;;  %v5417_v17 = vpop.permute.xlu0 %680 }
 0x107   : > { %11790 = vst [vmem:[#allocation32_spill] sm:$0xff] %v5417_v17  ;;  %1116 = vperm.xlu1 %4758, %v4602_v4   ;;  %v5419_v1 = vpop.permute.xlu1 %607 }
 0x108   : > { %11791 = vst [vmem:[#allocation33_spill] sm:$0xff] %v5419_v1  ;;  %1249 = vrot.lane.b32.xlu0 %v5019_v9, %s4921_s22 }
 0x10a   : > { %v5426_v3 = vpop.permute.xlu0 %684 }
 0x10b   : > { %11792 = vst [vmem:[#allocation34_spill] sm:$0xff] %v5426_v3  ;;  %1121 = vperm.xlu1 %4758, %v4603_v16   ;;  %v5428_v2 = vpop.permute.xlu1 %611  ;;  %v359_v3 = vlaneseq }
 0x10c   : > { %11793 = vst [vmem:[#allocation35_spill] sm:$0xff] %v5428_v2  ;;  %1253 = vrot.lane.b32.xlu0 %v5029_v11, %s4921_s22 }
 0x10e   : > { %v5432_v38 = vpop.permute.xlu0 %716 }
 0x10f   : > { %11794 = vst [vmem:[#allocation36_spill] sm:$0xff] %v5432_v38  ;;  %1137 = vrot.lane.b32.xlu1 %v5019_v9, %s4918_s19  ;;  %v5436_v4 = vpop.permute.xlu1 %615 }
 0x110   : > { %11795 = vst [vmem:[#allocation37_spill] sm:$0xff] %v5436_v4  ;;  %1257 = vrot.lane.b32.xlu0 %v5039_v13, %s4921_s22 }
 0x112   : > { %v5440_v1 = vpop.permute.xlu0 %735 }
 0x113   : > { %11796 = vst [vmem:[#allocation38_spill] sm:$0xff] %v5440_v1  ;;  %1141 = vrot.lane.b32.xlu1 %v5029_v11, %s4918_s19  ;;  %v5444_v16 = vpop.permute.xlu1 %619  ;;  %v5456_v1 = vshrl.u32 %v359_v3, 7 }
 0x114   : > { %11797 = vst [vmem:[#allocation39_spill] sm:$0xff] %v5444_v16  ;;  %1261 = vrot.lane.b32.xlu0 %v5041_v14, %s4921_s22 }
 0x115   : > { %v372_v16 = vsub.s32 0, %v5456_v1  ;;  %v502_v20 = vsub.s32 2, %v5456_v1  ;;  %v632_v47 = vsub.s32 4, %v5456_v1  ;;  %v697_v25 = vsub.s32 5, %v5456_v1 }
 0x116   : > { %v5448_v38 = vpop.permute.xlu0 %739 }
 0x117   : > { %11798 = vst [vmem:[#allocation40_spill] sm:$0xff] %v5448_v38  ;;  %1145 = vrot.lane.b32.xlu1 %v5039_v13, %s4918_s19  ;;  %v5452_v4 = vpop.permute.xlu1 %651  ;;  %v5466_v38 = vand.u32 127, %v359_v3  ;;  %v5492_v18 = vrot.slane %v5474_v19, %v372_v16  ;;  %v5514_v62 = vrot.slane %v5474_v19, %v502_v20 }
 0x118   : > { %11799 = vst [vmem:[#allocation41_spill] sm:$0xff] %v5452_v4  ;;  %1307 = vrot.lane.b32.xlu0 %v5015_v7, %s4923_s23 }
 0x119   : > { %vm361_vm0 = vcmp.lt.s32.totalorder %v5466_v38, 17  ;;  %11804 = vst [vmem:[#allocation46_spill] sm:$0xff] %v5492_v18  ;;  %vm426_vm1 = vcmp.lt.s32.totalorder %v5466_v38, 16  ;;  %vm491_vm2 = vcmp.lt.s32.totalorder %v5466_v38, 15  ;;  %11810 = vst [vmem:[#allocation52_spill] sm:$0xff] %v5514_v62  ;;  %vm556_vm3 = vcmp.lt.s32.totalorder %v5466_v38, 1 }
 0x11a   : > { %v5458_v17 = vpop.permute.xlu0 %743  ;;  %vm621_vm4 = vcmp.lt.s32.totalorder %v5466_v38, 127  ;;  %vm686_vm5 = vcmp.lt.s32.totalorder %v5466_v38, 113  ;;  %vm751_vm6 = vcmp.lt.s32.totalorder %v5466_v38, 112  ;;  %vm816_vm7 = vcmp.lt.s32.totalorder %v5466_v38, 111 }
 0x11b   : > { %11800 = vst [vmem:[#allocation42_spill] sm:$0xff] %v5458_v17  ;;  %1149 = vrot.lane.b32.xlu1 %v5041_v14, %s4918_s19  ;;  %v5462_v2 = vpop.permute.xlu1 %655  ;;  %v5479_v17 = vld [vmem:[%s11224_s1 + $0x8] sm:$0xff] }
 0x11c   : > { %11801 = vst [vmem:[#allocation43_spill] sm:$0xff] %v5462_v2  ;;  %1311 = vrot.lane.b32.xlu0 %v5017_v8, %s4923_s23  ;;  %v437_v2 = vsub.s32 1, %v5456_v1  ;;  %v5495_v57 = vrot.slane %v5479_v17, %v372_v16  ;;  %v309_v16 = vmul.f32 %v5169_v24, %v5015_v7 }
 0x11e   : > { %v5469_v4 = vpop.permute.xlu0 %747  ;;  %11805 = vst [vmem:[#allocation47_spill] sm:$0xff] %v5495_v57  ;;  %v5502_v63 = vrot.slane %v5474_v19, %v437_v2  ;;  %v5505_v58 = vrot.slane %v5479_v17, %v437_v2  ;;  %v310_v2 = vmul.f32 %v5169_v24, %v5027_v10  ;;  %v5540_v24 = vrot.slane %v5474_v19, %v697_v25 }
 0x11f   : > { %11802 = vst [vmem:[#allocation44_spill] sm:$0xff] %v5469_v4  ;;  %1170 = vperm.xlu1 %4758, %v5382_v0   ;;  %v5483_v3 = vpop.permute.xlu1 %670  ;;  %v567_v4 = vsub.s32 3, %v5456_v1 }
 0x120   : > { %11803 = vst [vmem:[#allocation45_spill] sm:$0xff] %v5483_v3  ;;  %1315 = vrot.lane.b32.xlu0 %v5027_v10, %s4923_s23  ;;  %11807 = vst [vmem:[#allocation49_spill] sm:$0xff] %v5502_v63 }
 0x121   : > { %11808 = vst [vmem:[#allocation50_spill] sm:$0xff] %v5505_v58  ;;  %v5520_v51 = vrot.slane %v5474_v19, %v567_v4  ;;  %v5525_v56 = vrot.slane %v5479_v17, %v567_v4  ;;  %11816 = vst [vmem:[#allocation58_spill] sm:$0xff] %v5540_v24  ;;  %v5543_v4 = vrot.slane %v5479_v17, %v697_v25  ;;  %v762_v24 = vsub.s32 6, %v5456_v1 }
 0x122   : > { %v5498_v3 = vpop.permute.xlu0 %777 }
 0x123   : > { %11806 = vst [vmem:[#allocation48_spill] sm:$0xff] %v5498_v3  ;;  %1178 = vperm.xlu1 %4758, %v5395_v5   ;;  %v5509_v59 = vpop.permute.xlu1 %674  ;;  %v5517_v3 = vrot.slane %v5479_v17, %v502_v20  ;;  %11812 = vst [vmem:[#allocation54_spill] sm:$0xff] %v5520_v51  ;;  %v5531_v5 = vrot.slane %v5479_v17, %v632_v47  ;;  %v311_v20 = vmul.f32 %v5160_v21, %v5029_v11 }
 0x124   : > { %11809 = vst [vmem:[#allocation51_spill] sm:$0xff] %v5509_v59  ;;  %11813 = vst [vmem:[#allocation55_spill] sm:$0xff] %v5525_v56  ;;  %v5528_v59 = vrot.slane %v5474_v19, %v632_v47  ;;  %1319 = vrot.lane.b32.xlu0 %v5031_v12, %s4923_s23  ;;  %v312_v51 = vmul.f32 %v5160_v21, %v5041_v14  ;;  %v5549_v47 = vmul.f32 %v5162_v22, %v5019_v9 }
 0x125   : > { %11811 = vst [vmem:[#allocation53_spill] sm:$0xff] %v5517_v3  ;;  %11815 = vst [vmem:[#allocation57_spill] sm:$0xff] %v5531_v5  ;;  %v5553_v5 = vmul.f32 %v5162_v22, %v5039_v13  ;;  %v367_v21 = vsel %vm361_vm0, %v5190_v30, %v5176_v26  ;;  %v5570_v22 = vmul.f32 %v5167_v23, %v5031_v12 }
 0x126   : > { %11814 = vst [vmem:[#allocation56_spill] sm:$0xff] %v5528_v59  ;;  %11817 = vst [vmem:[#allocation59_spill] sm:$0xff] %v5543_v4  ;;  %v5545_v10 = vpop.permute.xlu0 %789  ;;  %v11824_v4 = vmov 1   ;;  %v339_v59 = vadd.f32 %v5185_v29, %v311_v20 }
 0x127   : > { %11818 = vst [vmem:[#allocation60_spill] sm:$0xff] %v5545_v10  ;;  %11819 = vst [vmem:[#allocation61_spill] sm:$0xff] %v5549_v47  ;;  %1193 = vrot.lane.b32.xlu1 %v5019_v9, %s4920_s20  ;;  %v5562_v25 = vpop.permute.xlu1 %678  ;;  %v5566_v10 = vmul.f32 %v5167_v23, %v5017_v8  ;;  %v363_v47 = vsel %vm361_vm0, %v5176_v26, %v5190_v30  ;;  %v364_v23 = vsel %vm361_vm0, %v5201_v33, %v5215_v37 }
 0x128   : > { %11820 = vst [vmem:[#allocation62_spill] sm:$0xff] %v5553_v5  ;;  %11821 = vst [vmem:[#allocation63_spill] sm:$0xff] %v5562_v25  ;;  %v5573_v5 = vadd.f32 %v5178_v27, %v309_v16  ;;  %4759 = vset.pattern.permute.xlu1 %v11824_v4  ;;  %v5581_v25 = vadd.f32 %v5178_v27, %v310_v2  ;;  %v368_v16 = vsel %vm361_vm0, %v5215_v37, %v5201_v33 }
 0x129   : > { %11822 = vst [vmem:[#allocation64_spill] sm:$0xff] %v5566_v10  ;;  %11823 = vst [vmem:[#allocation65_spill] sm:$0xff] %v5570_v22  ;;  %1361 = vrot.lane.b32.xlu0 %v5019_v9, %s4925_s24  ;;  %v340_v26 = vadd.f32 %v5185_v29, %v312_v51  ;;  %v5596_v27 = vmul.f32 %v5492_v18, %v367_v21  ;;  %v362_v30 = vsel %vm361_vm0, %v5192_v31, %v5208_v35 }
 0x12a   : > { %v366_v2 = vsel %vm361_vm0, %v5208_v35, %v5192_v31  ;;  %v5606_v20 = vpop.permute.xlu0 %802  ;;  %v5609_v33 = vmul.f32 %v5495_v57, %v363_v47  ;;  %v369_v29 = vsel %vm361_vm0, %v5199_v32, %v5183_v28  ;;  %v5616_v37 = vrot.slane %v5474_v19, %v762_v24 }
 0x12b   : > { %v5619_v51 = vrot.slane %v5479_v17, %v762_v24  ;;  %1197 = vrot.lane.b32.xlu1 %v5029_v11, %s4920_s20  ;;  %v5623_v31 = vpop.permute.xlu1 %682  ;;  %v382_v35 = vmul.f32 %v5492_v18, %v368_v16  ;;  %v383_v47 = vmul.f32 %v5495_v57, %v364_v23  ;;  %v428_v21 = vsel %vm426_vm1, %v5206_v34, %v5222_v39 }
 0x12c   : > { %11825 = vst [vmem:[#allocation66_spill] sm:$0xff] %v5616_v37  ;;  %v432_v24 = vsel %vm426_vm1, %v5222_v39, %v5206_v34  ;;  %v365_v4 = vsel %vm361_vm0, %v5183_v28, %v5199_v32  ;;  %v378_v16 = vmul.f32 %v5492_v18, %v366_v2  ;;  %v379_v23 = vmul.f32 %v5495_v57, %v362_v30 }
 0x12d   : > { %11826 = vst [vmem:[#allocation67_spill] sm:$0xff] %v5619_v51  ;;  %v430_v22 = vsel %vm426_vm1, %v5213_v36, %v5229_v41  ;;  %1365 = vrot.lane.b32.xlu0 %v5029_v11, %s4925_s24  ;;  %v406_v34 = vmul.f32 %v5231_v42, %v382_v35  ;;  %v407_v39 = vmul.f32 %v5231_v42, %v383_v47 }
 0x12e   : > { %v434_v28 = vsel %vm426_vm1, %v5229_v41, %v5213_v36  ;;  %v496_v32 = vsel %vm491_vm2, %v5261_v50, %v5243_v45  ;;  %v5659_v30 = vmul.f32 %v5492_v18, %v369_v29  ;;  %v445_v2 = vmul.f32 %v5502_v63, %v432_v24  ;;  %v5671_v41 = vpop.permute.xlu0 %806  ;;  %v11844_v18 = vld [vmem:[#allocation16_spill] sm:$0xff] }
 0x12f   : > { %v446_v11 = vmul.f32 %v5505_v58, %v428_v21  ;;  %v492_v42 = vsel %vm491_vm2, %v5243_v45, %v5261_v50  ;;  %1201 = vrot.lane.b32.xlu1 %v5039_v13, %s4920_s20  ;;  %v5669_v36 = vpop.permute.xlu1 %712  ;;  %v5674_v35 = vmul.f32 %v5495_v57, %v365_v4  ;;  %v5677_v29 = vmul.f32 %v5224_v40, %v378_v16 }
 0x130   : > { %11827 = vst [vmem:[#allocation68_spill] sm:$0xff] %v5659_v30  ;;  %v5680_v47 = vmul.f32 %v5224_v40, %v379_v23  ;;  %v827_v21 = vsub.s32 7, %v5456_v1  ;;  %v449_v45 = vmul.f32 %v5502_v63, %v434_v28  ;;  %v5685_v50 = vmul.f32 %v5505_v58, %v430_v22 }
 0x131   : > { %11828 = vst [vmem:[#allocation69_spill] sm:$0xff] %v5674_v35  ;;  %v431_v24 = vsel %vm426_vm1, %v5256_v49, %v5238_v44  ;;  %v508_v4 = vmul.f32 %v5514_v62, %v496_v32  ;;  %1369 = vrot.lane.b32.xlu0 %v5039_v13, %s4925_s24  ;;  %v5694_v16 = vadd.f32 %v406_v34, %v339_v59 }
 0x132   : > { %11829 = vst [vmem:[#allocation70_spill] sm:$0xff] %v5680_v47  ;;  %v5696_v40 = vadd.f32 %v407_v39, %v340_v26  ;;  %v427_v1 = vsel %vm426_vm1, %v5238_v44, %v5256_v49  ;;  %v509_v22 = vmul.f32 %v5517_v3, %v492_v42  ;;  %v5705_v23 = vmul.f32 %v5236_v43, %v445_v2  ;;  %v5743_v2 = vpop.permute.xlu0 %810 }
 0x133   : > { %v5708_v28 = vmul.f32 %v5236_v43, %v446_v11  ;;  %v429_v13 = vsel %vm426_vm1, %v5245_v46, %v5266_v52  ;;  %v433_v44 = vsel %vm426_vm1, %v5266_v52, %v5245_v46  ;;  %1205 = vrot.lane.b32.xlu1 %v5041_v14, %s4920_s20  ;;  %v5720_v49 = vpop.permute.xlu1 %720  ;;  %v443_v59 = vmul.f32 %v5502_v63, %v431_v24 }
 0x134   : > { %v498_v43 = vsel %vm491_vm2, %v5270_v53, %v5254_v48  ;;  %v5728_v26 = vrot.slane %v5474_v19, %v827_v21  ;;  %v5731_v34 = vrot.slane %v5479_v17, %v827_v21  ;;  %v444_v46 = vmul.f32 %v5505_v58, %v427_v1 }
 0x135   : > { %v494_v52 = vsel %vm491_vm2, %v5254_v48, %v5270_v53  ;;  %v532_v39 = vmul.f32 %v5277_v55, %v508_v4  ;;  %v499_v32 = vsel %vm491_vm2, %v5321_v61, %v5306_v6  ;;  %1373 = vrot.lane.b32.xlu0 %v5041_v14, %s4925_s24  ;;  %v447_v17 = vmul.f32 %v5502_v63, %v433_v44  ;;  %v11832_v4 = vld [vmem:[#allocation3_spill] sm:$0xff] }
 0x136   : > { %11830 = vst [vmem:[#allocation71_spill] sm:$0xff] %v5728_v26  ;;  %11831 = vst [vmem:[#allocation72_spill] sm:$0xff] %v5731_v34  ;;  %v448_v19 = vmul.f32 %v5505_v58, %v429_v13  ;;  %v467_v11 = vmul.f32 %v5272_v54, %v443_v59  ;;  %v533_v48 = vmul.f32 %v5277_v55, %v509_v22  ;;  %v11843_v58 = vld [vmem:[#allocation4_spill] sm:$0xff] }
 0x137   : > { %v468_v53 = vmul.f32 %v5272_v54, %v444_v46  ;;  %v512_v42 = vmul.f32 %v5514_v62, %v498_v43  ;;  %v562_v21 = vsel %vm556_vm3, %v5310_v15, %v5291_v60  ;;  %v495_v14 = vsel %vm491_vm2, %v5306_v6, %v5321_v61  ;;  %1226 = vperm.xlu1 %4759, %v5382_v0   ;;  %v5762_v24 = vpop.permute.xlu1 %724  ;;  %v11834_v6 = vld [vmem:[#allocation8_spill] sm:$0xff]  ;;  %v11835_v61 = vld [vmem:[#allocation6_spill] sm:$0xff]  ;;  %v11846_v0 = vld [vmem:[#allocation21_spill] sm:$0xff] }
 0x138   : > { %v513_v55 = vmul.f32 %v5517_v3, %v494_v52  ;;  %v471_v54 = vmul.f32 %v11832_v4, %v447_v17  ;;  %v558_v1 = vsel %vm556_vm3, %v5291_v60, %v5310_v15  ;;  %v514_v22 = vmul.f32 %v5514_v62, %v499_v32  ;;  %v11837_v15 = vld [vmem:[#allocation5_spill] sm:$0xff]  ;;  %v11838_v52 = vld [vmem:[#allocation54_spill] sm:$0xff] }
 0x139   : > { %v472_v13 = vmul.f32 %v11832_v4, %v448_v19  ;;  %v5772_v44 = vadd.f32 %v532_v39, %v467_v11  ;;  %v493_v59 = vsel %vm491_vm2, %v11835_v61, %v11834_v6  ;;  %v497_v43 = vsel %vm491_vm2, %v11834_v6, %v11835_v61  ;;  %1419 = vrot.lane.b32.xlu0 %v5015_v7, %s4927_s25  ;;  %v11839_v19 = vld [vmem:[#allocation9_spill] sm:$0xff]  ;;  %v11840_v11 = vld [vmem:[#allocation7_spill] sm:$0xff]  ;;  %v5799_v61 = vpop.permute.xlu0 %814 }
 0x13a   : > { %v5784_v60 = vadd.f32 %v533_v48, %v468_v53  ;;  %v473_v46 = vmul.f32 %v11837_v15, %v449_v45  ;;  %v575_v39 = vmul.f32 %v11838_v52, %v562_v21  ;;  %v515_v32 = vmul.f32 %v5517_v3, %v495_v14  ;;  %v11841_v48 = vld [vmem:[#allocation13_spill] sm:$0xff]  ;;  %v11842_v45 = vld [vmem:[#allocation27_spill] sm:$0xff] }
 0x13b   : > { %11833 = vst [vmem:[#allocation3_spill] sm:$0xff] %v5772_v44  ;;  %v576_v17 = vmul.f32 %v5525_v56, %v558_v1  ;;  %v560_v4 = vsel %vm556_vm3, %v11840_v11, %v11839_v19  ;;  %v564_v6 = vsel %vm556_vm3, %v11839_v19, %v11840_v11  ;;  %v536_v53 = vmul.f32 %v11841_v48, %v512_v42  ;;  %v5802_v21 = vpop.permute.xlu1 %737  ;;  %v11845_v19 = vld [vmem:[#allocation12_spill] sm:$0xff] }
 0x13c   : > { %11836 = vst [vmem:[#allocation8_spill] sm:$0xff] %v5784_v60  ;;  %1234 = vperm.xlu1 %4759, %v11842_v45   ;;  %v510_v14 = vmul.f32 %v5514_v62, %v497_v43  ;;  %v511_v1 = vmul.f32 %v5517_v3, %v493_v59  ;;  %v538_v63 = vmul.f32 %v11843_v58, %v514_v22  ;;  %v11847_v43 = vld [vmem:[#allocation15_spill] sm:$0xff]  ;;  %v11850_v44 = vld [vmem:[#allocation20_spill] sm:$0xff] }
 0x13d   : > { %v537_v57 = vmul.f32 %v11841_v48, %v513_v55  ;;  %v622_v42 = vsel %vm621_vm4, %v11845_v19, %v11844_v18  ;;  %v626_v11 = vsel %vm621_vm4, %v11844_v18, %v11845_v19  ;;  %v557_v59 = vsel %vm556_vm3, %v11847_v43, %v11846_v0  ;;  %1423 = vrot.lane.b32.xlu0 %v5017_v8, %s4927_s25  ;;  %v11848_v3 = vld [vmem:[#allocation11_spill] sm:$0xff] }
 0x13e   : > { %v561_v55 = vsel %vm556_vm3, %v11846_v0, %v11847_v43  ;;  %v474_v22 = vmul.f32 %v11837_v15, %v5685_v50  ;;  %v539_v48 = vmul.f32 %v11843_v58, %v515_v32  ;;  %v579_v18 = vmul.f32 %v11838_v52, %v564_v6  ;;  %v11849_v0 = vld [vmem:[#allocation10_spill] sm:$0xff]  ;;  %v11851_v58 = vld [vmem:[#allocation56_spill] sm:$0xff]  ;;  %v11852_v32 = vld [vmem:[#allocation57_spill] sm:$0xff] }
 0x13f   : > { %v5832_v19 = vmul.f32 %v5525_v56, %v560_v4  ;;  %v534_v62 = vmul.f32 %v11848_v3, %v510_v14  ;;  %v535_v60 = vmul.f32 %v11848_v3, %v511_v1  ;;  %v5838_v43 = vmul.f32 %v11849_v0, %v575_v39  ;;  %v5841_v50 = vpop.permute.xlu1 %741  ;;  %v11854_v14 = vld [vmem:[#allocation19_spill] sm:$0xff]  ;;  %v5856_v1 = vpop.permute.xlu0 %846 }
 0x140   : > { %v877_v10 = vadd.f32 %v536_v53, %v471_v54  ;;  %1238 = vperm.xlu1 %4759, %v11850_v44   ;;  %v638_v15 = vmul.f32 %v11851_v58, %v622_v42  ;;  %v639_v6 = vmul.f32 %v11852_v32, %v626_v11  ;;  %v573_v4 = vmul.f32 %v11838_v52, %v561_v55  ;;  %v11855_v54 = vld [vmem:[#allocation14_spill] sm:$0xff]  ;;  %v11858_v11 = vld [vmem:[#allocation23_spill] sm:$0xff] }
 0x141   : > { %v574_v35 = vmul.f32 %v5525_v56, %v557_v59  ;;  %v5847_v30 = vadd.f32 %v538_v63, %v473_v46  ;;  %v5850_v3 = vmul.f32 %v11849_v0, %v576_v17  ;;  %v878_v39 = vadd.f32 %v537_v57, %v472_v13  ;;  %v11856_v42 = vld [vmem:[#allocation2_spill] sm:$0xff] }
 0x142   : > { %v624_v53 = vsel %vm621_vm4, %v11855_v54, %v11854_v14  ;;  %1427 = vrot.lane.b32.xlu0 %v11856_v42, %s4927_s25  ;;  %v628_v63 = vsel %vm621_vm4, %v11854_v14, %v11855_v54  ;;  %v11857_v46 = vld [vmem:[#allocation18_spill] sm:$0xff]  ;;  %v5870_v55 = vadd.f32 %v539_v48, %v474_v22  ;;  %v5873_v0 = vadd.f32 %v534_v62, %v5705_v23  ;;  %v11865_v23 = vld [vmem:[#allocation39_spill] sm:$0xff] }
 0x143   : > { %11853 = vst [vmem:[#allocation6_spill] sm:$0xff] %v5847_v30  ;;  %v563_v57 = vsel %vm556_vm3, %v11858_v11, %v11857_v46  ;;  %v11859_v13 = vld [vmem:[#allocation26_spill] sm:$0xff]  ;;  %v5876_v44 = vadd.f32 %v535_v60, %v5708_v28  ;;  %v559_v14 = vsel %vm556_vm3, %v11857_v46, %v11858_v11  ;;  %v5884_v54 = vpop.permute.xlu1 %745  ;;  %v11866_v28 = vld [vmem:[#allocation35_spill] sm:$0xff]  ;;  %v5897_v46 = vadd.f32 %v878_v39, %v5696_v40  ;;  %v11869_v39 = vld [vmem:[#allocation32_spill] sm:$0xff] }
 0x144   : > { %v597_v17 = vmul.f32 %v11859_v13, %v573_v4  ;;  %v598_v59 = vmul.f32 %v11859_v13, %v574_v35  ;;  %11860 = vst [vmem:[#allocation5_spill] sm:$0xff] %v5870_v55  ;;  %11861 = vst [vmem:[#allocation9_spill] sm:$0xff] %v5873_v0  ;;  %1251 = vrot.lane.b32.xlu1 %v5015_v7, %s4921_s22  ;;  %v5887_v35 = vadd.f32 %v877_v10, %v5694_v16  ;;  %v11864_v22 = vld [vmem:[#allocation22_spill] sm:$0xff]  ;;  %v11867_v4 = vmov 2   ;;  %v11872_v13 = vld [vmem:[#allocation33_spill] sm:$0xff] }
 0x145   : > { %11862 = vst [vmem:[#allocation7_spill] sm:$0xff] %v5876_v44  ;;  %v662_v48 = vmul.f32 %v11864_v22, %v638_v15  ;;  %v663_v62 = vmul.f32 %v11864_v22, %v639_v6  ;;  %v625_v60 = vsel %vm621_vm4, %v11866_v28, %v11865_v23  ;;  %4760 = vset.pattern.permute.xlu1 %v11867_v4  ;;  %11868 = vst [vmem:[#allocation27_spill] sm:$0xff] %v5897_v46  ;;  %v11877_v4 = vld [vmem:[#allocation42_spill] sm:$0xff]  ;;  %v11883_v0 = vld [vmem:[#allocation25_spill] sm:$0xff] }
 0x146   : > { %11863 = vst [vmem:[#allocation13_spill] sm:$0xff] %v5887_v35  ;;  %v642_v7 = vmul.f32 %v11851_v58, %v624_v53  ;;  %v643_v11 = vmul.f32 %v11852_v32, %v628_v63  ;;  %v577_v10 = vmul.f32 %v11838_v52, %v563_v57  ;;  %1431 = vrot.lane.b32.xlu0 %v5031_v12, %s4927_s25  ;;  %v11870_v53 = vld [vmem:[#allocation28_spill] sm:$0xff]  ;;  %v11871_v57 = vld [vmem:[#allocation37_spill] sm:$0xff]  ;;  %v11878_v46 = vld [vmem:[#allocation38_spill] sm:$0xff] }
 0x147   : > { %v578_v16 = vmul.f32 %v5525_v56, %v559_v14  ;;  %v5905_v15 = vadd.f32 %v662_v48, %v597_v17  ;;  %v5907_v6 = vadd.f32 %v663_v62, %v598_v59  ;;  %v629_v40 = vsel %vm621_vm4, %v11865_v23, %v11866_v28  ;;  %v5926_v14 = vpop.permute.xlu0 %317  ;;  %v5930_v22 = vpop.permute.xlu1 %749  ;;  %v11873_v48 = vld [vmem:[#allocation29_spill] sm:$0xff]  ;;  %v11874_v28 = vld [vmem:[#allocation31_spill] sm:$0xff]  ;;  %v11875_v56 = vld [vmem:[#allocation34_spill] sm:$0xff] }
 0x148   : > { %v688_v63 = vsel %vm686_vm5, %v11870_v53, %v11869_v39  ;;  %v692_v12 = vsel %vm686_vm5, %v11869_v39, %v11870_v53  ;;  %v623_v17 = vsel %vm621_vm4, %v11872_v13, %v11871_v57  ;;  %v644_v59 = vmul.f32 %v11851_v58, %v625_v60  ;;  %1255 = vrot.lane.b32.xlu1 %v5017_v8, %s4921_s22  ;;  %v11876_v60 = vld [vmem:[#allocation30_spill] sm:$0xff]  ;;  %v11882_v35 = vld [vmem:[#allocation59_spill] sm:$0xff] }
 0x149   : > { %v601_v62 = vmul.f32 %v11873_v48, %v577_v10  ;;  %v602_v23 = vmul.f32 %v11873_v48, %v578_v16  ;;  %v603_v39 = vmul.f32 %v11874_v28, %v579_v18  ;;  %v627_v53 = vsel %vm621_vm4, %v11871_v57, %v11872_v13  ;;  %v11879_v16 = vld [vmem:[#allocation63_spill] sm:$0xff]  ;;  %v11880_v48 = vld [vmem:[#allocation45_spill] sm:$0xff]  ;;  %v11881_v57 = vld [vmem:[#allocation58_spill] sm:$0xff] }
 0x14a   : > { %v690_v52 = vsel %vm686_vm5, %v11876_v60, %v11875_v56  ;;  %v645_v8 = vmul.f32 %v11852_v32, %v629_v40  ;;  %v752_v10 = vsel %vm751_vm6, %v11878_v46, %v11877_v4  ;;  %v687_v18 = vsel %vm686_vm5, %v11880_v48, %v11879_v16  ;;  %1473 = vrot.lane.b32.xlu0 %v5019_v9, %s4929_s26 }
 0x14b   : > { %v705_v13 = vmul.f32 %v11881_v57, %v688_v63  ;;  %v706_v55 = vmul.f32 %v11882_v35, %v692_v12  ;;  %v694_v40 = vsel %vm686_vm5, %v11875_v56, %v11876_v60  ;;  %v640_v30 = vmul.f32 %v11851_v58, %v623_v17  ;;  %v782_v56 = vpop.permute.xlu1 %781  ;;  %v11884_v60 = vld [vmem:[#allocation41_spill] sm:$0xff] }
 0x14c   : > { %v641_v44 = vmul.f32 %v11852_v32, %v627_v53  ;;  %v668_v47 = vmul.f32 %v11883_v0, %v644_v59  ;;  %v756_v9 = vsel %vm751_vm6, %v11877_v4, %v11878_v46  ;;  %v691_v63 = vsel %vm686_vm5, %v11879_v16, %v11880_v48  ;;  %1259 = vrot.lane.b32.xlu1 %v11856_v42, %s4921_s22  ;;  %v5987_v48 = vpop.permute.xlu0 %332  ;;  %v6004_v32 = vld [vmem:[%s5013_s16 + $0x38] sm:$0xff] }
 0x14d   : > { %v604_v12 = vmul.f32 %v11874_v28, %v5832_v19  ;;  %v5977_v17 = vmul.f32 %v11881_v57, %v690_v52  ;;  %v768_v59 = vmul.f32 %v5616_v37, %v752_v10  ;;  %v703_v53 = vmul.f32 %v11881_v57, %v687_v18  ;;  %v5990_v19 = vld [vmem:[%s5013_s16 + $0x20] sm:$0xff]  ;;  %v11885_v52 = vld [vmem:[#allocation43_spill] sm:$0xff] }
 0x14e   : > { %v5982_v4 = vmul.f32 %v11882_v35, %v694_v40  ;;  %v669_v46 = vmul.f32 %v11883_v0, %v645_v8  ;;  %v664_v16 = vmul.f32 %v11884_v60, %v640_v30  ;;  %v665_v42 = vmul.f32 %v11884_v60, %v641_v44  ;;  %1477 = vrot.lane.b32.xlu0 %v5990_v19, %s4929_s26  ;;  %v11886_v0 = vld [vmem:[#allocation36_spill] sm:$0xff] }
 0x14f   : > { %v666_v28 = vmul.f32 %v11885_v52, %v642_v7  ;;  %v769_v10 = vmul.f32 %v5619_v51, %v756_v9  ;;  %v704_v18 = vmul.f32 %v11882_v35, %v691_v63  ;;  %v727_v40 = vmul.f32 %v5669_v36, %v703_v53  ;;  %v6008_v7 = vpop.permute.xlu1 %785  ;;  %v11887_v9 = vld [vmem:[#allocation48_spill] sm:$0xff] }
 0x150   : > { %v729_v30 = vmul.f32 %v11886_v0, %v705_v13  ;;  %v730_v44 = vmul.f32 %v11886_v0, %v706_v55  ;;  %v6000_v8 = vadd.f32 %v668_v47, %v603_v39  ;;  %v667_v60 = vmul.f32 %v11885_v52, %v643_v11  ;;  %1263 = vrot.lane.b32.xlu1 %v6004_v32, %s4921_s22  ;;  %v11888_v13 = vld [vmem:[#allocation44_spill] sm:$0xff]  ;;  %v6034_v0 = vld [vmem:[%s5013_s16 + $0x8] sm:$0xff] }
 0x151   : > { %v792_v63 = vmul.f32 %v11887_v9, %v768_v59  ;;  %v728_v53 = vmul.f32 %v5669_v36, %v704_v18  ;;  %v753_v55 = vsel %vm751_vm6, %v5802_v21, %v5884_v54  ;;  %v757_v47 = vsel %vm751_vm6, %v5884_v54, %v5802_v21  ;;  %v11889_v52 = vld [vmem:[#allocation40_spill] sm:$0xff]  ;;  %v11890_v59 = vld [vmem:[#allocation51_spill] sm:$0xff] }
 0x152   : > { %v6020_v11 = vadd.f32 %v669_v46, %v604_v12  ;;  %v6023_v39 = vadd.f32 %v664_v16, %v5838_v43  ;;  %v754_v36 = vsel %vm751_vm6, %v11889_v52, %v11888_v13  ;;  %v689_v18 = vsel %vm686_vm5, %v11890_v59, %v5623_v31  ;;  %1481 = vrot.lane.b32.xlu0 %v6034_v0, %s4929_s26 }
 0x153   : > { %v6039_v21 = vadd.f32 %v665_v42, %v5850_v3  ;;  %v6041_v43 = vadd.f32 %v666_v28, %v601_v62  ;;  %v793_v54 = vmul.f32 %v11887_v9, %v769_v10  ;;  %v889_v12 = vadd.f32 %v792_v63, %v727_v40  ;;  %v392_v62 = vpop.permute.xlu0 %391  ;;  %v11891_v42 = vld [vmem:[#allocation17_spill] sm:$0xff]  ;;  %v801_v28 = vpop.permute.xlu1 %800 }
 0x154   : > { %v758_v46 = vsel %vm751_vm6, %v11888_v13, %v11889_v52  ;;  %v693_v16 = vsel %vm686_vm5, %v5623_v31, %v11890_v59  ;;  %v770_v58 = vmul.f32 %v5616_v37, %v753_v55  ;;  %v771_v3 = vmul.f32 %v5619_v51, %v757_v47  ;;  %1286 = vperm.xlu1 %4760, %v11891_v42   ;;  %v6068_v52 = vld [vmem:[%s5013_s16 + $0x28] sm:$0xff] }
 0x155   : > { %v6055_v10 = vadd.f32 %v667_v60, %v602_v23  ;;  %v772_v40 = vmul.f32 %v5616_v37, %v754_v36  ;;  %v707_v9 = vmul.f32 %v11881_v57, %v689_v18  ;;  %v890_v63 = vadd.f32 %v793_v54, %v728_v53  ;;  %v11892_v18 = vld [vmem:[#allocation61_spill] sm:$0xff] }
 0x156   : > { %v818_v31 = vsel %vm816_vm7, %v5606_v20, %v5743_v2  ;;  %v822_v55 = vsel %vm816_vm7, %v5743_v2, %v5606_v20  ;;  %v794_v47 = vmul.f32 %v782_v56, %v770_v58  ;;  %v795_v13 = vmul.f32 %v782_v56, %v771_v3  ;;  %1485 = vrot.lane.b32.xlu0 %v6068_v52, %s4929_s26 }
 0x157   : > { %v773_v23 = vmul.f32 %v5619_v51, %v758_v46  ;;  %v708_v60 = vmul.f32 %v11882_v35, %v693_v16  ;;  %v6075_v53 = vadd.f32 %v889_v12, %v5905_v15  ;;  %v404_v36 = vmul.f32 %v392_v62, %v5596_v27  ;;  %v805_v15 = vpop.permute.xlu1 %804  ;;  %v11893_v12 = vld [vmem:[#allocation62_spill] sm:$0xff] }
 0x158   : > { %v731_v59 = vmul.f32 %v5720_v49, %v707_v9  ;;  %v755_v20 = vsel %vm751_vm6, %v5841_v50, %v5930_v22  ;;  %v759_v2 = vsel %vm751_vm6, %v5930_v22, %v5841_v50  ;;  %v405_v58 = vmul.f32 %v392_v62, %v5609_v33  ;;  %1290 = vperm.xlu1 %4760, %v11842_v45   ;;  %v6097_v22 = vld [vmem:[%s5013_s16 + $0x10] sm:$0xff] }
 0x159   : > { %v835_v56 = vmul.f32 %v5728_v26, %v818_v31  ;;  %v836_v27 = vmul.f32 %v5731_v34, %v822_v55  ;;  %v335_v54 = vadd.f32 %v5926_v14, %v11892_v18  ;;  %v336_v46 = vadd.f32 %v5926_v14, %v11893_v12  ;;  %v400_v31 = vpop.permute.xlu0 %399  ;;  %v6123_v55 = vld [vmem:[%s5013_s16] sm:$0xff]  ;;  %v11899_v18 = vld [vmem:[#allocation69_spill] sm:$0xff] }
 0x15a   : > { %v732_v16 = vmul.f32 %v5720_v49, %v708_v60  ;;  %v891_v3 = vadd.f32 %v794_v47, %v729_v30  ;;  %v892_v50 = vadd.f32 %v795_v13, %v730_v44  ;;  %1531 = vrot.lane.b32.xlu0 %v6097_v22, %s4931_s27  ;;  %v906_v33 = vadd.f32 %v890_v63, %v5907_v6 }
 0x15b   : > { %v6106_v62 = vsel %vm816_vm7, %v5671_v41, %v5799_v61  ;;  %v774_v14 = vmul.f32 %v5616_v37, %v755_v20  ;;  %v775_v9 = vmul.f32 %v5619_v51, %v759_v2  ;;  %v867_v49 = vadd.f32 %v404_v36, %v5573_v5  ;;  %v809_v5 = vpop.permute.xlu1 %808  ;;  %v6136_v36 = vld [vmem:[%s5013_s16 + $0x30] sm:$0xff] }
 0x15c   : > { %v733_v30 = vmul.f32 %v5762_v24, %v5977_v17  ;;  %v734_v44 = vmul.f32 %v5762_v24, %v5982_v4  ;;  %v6119_v6 = vsel %vm816_vm7, %v5799_v61, %v5671_v41  ;;  %v868_v63 = vadd.f32 %v405_v58, %v5581_v25  ;;  %1305 = vrot.lane.b32.xlu1 %v6123_v55, %s4923_s23  ;;  %v11894_v4 = vld [vmem:[#allocation70_spill] sm:$0xff]  ;;  %v11897_v58 = vld [vmem:[#allocation9_spill] sm:$0xff] }
 0x15d   : > { %v859_v17 = vmul.f32 %v5856_v1, %v835_v56  ;;  %v860_v47 = vmul.f32 %v5856_v1, %v836_v27  ;;  %v865_v24 = vadd.f32 %v5677_v29, %v335_v54  ;;  %v866_v13 = vadd.f32 %v11894_v4, %v336_v46  ;;  %v11896_v1 = vld [vmem:[#allocation60_spill] sm:$0xff]  ;;  %v11900_v54 = vld [vmem:[#allocation7_spill] sm:$0xff] }
 0x15e   : > { %v11895_v60 = vmov 3   ;;  %v907_v41 = vadd.f32 %v891_v3, %v6023_v39  ;;  %v796_v25 = vmul.f32 %v6008_v7, %v772_v40  ;;  %v797_v61 = vmul.f32 %v6008_v7, %v773_v23  ;;  %1535 = vrot.lane.b32.xlu0 %v6136_v36, %s4931_s27  ;;  %v11898_v27 = vld [vmem:[#allocation68_spill] sm:$0xff]  ;;  %v11901_v46 = vld [vmem:[#allocation3_spill] sm:$0xff] }
 0x15f   : > { %4761 = vset.pattern.permute.xlu1 %v11895_v60  ;;  %v908_v20 = vadd.f32 %v892_v50, %v6039_v21  ;;  %v798_v2 = vmul.f32 %v11896_v1, %v774_v14  ;;  %v799_v29 = vmul.f32 %v11896_v1, %v775_v9  ;;  %v899_v56 = vadd.f32 %v11897_v58, %v867_v49  ;;  %v813_v21 = vpop.permute.xlu1 %812  ;;  %v11902_v50 = vld [vmem:[#allocation64_spill] sm:$0xff]  ;;  %v11903_v9 = vld [vmem:[#allocation65_spill] sm:$0xff] }
 0x160   : > { %v408_v39 = vmul.f32 %v400_v31, %v11898_v27  ;;  %v409_v40 = vmul.f32 %v400_v31, %v11899_v18  ;;  %v817_v7 = vsel %vm816_vm7, %v801_v28, %v809_v5  ;;  %v821_v23 = vsel %vm816_vm7, %v809_v5, %v801_v28  ;;  %1309 = vrot.lane.b32.xlu1 %v5990_v19, %s4923_s23  ;;  %v11904_v31 = vld [vmem:[#allocation8_spill] sm:$0xff]  ;;  %v6160_v27 = vld [vmem:[%s5013_s16 + $0x18] sm:$0xff] }
 0x161   : > { %v900_v12 = vadd.f32 %v11900_v54, %v868_v63  ;;  %v897_v3 = vadd.f32 %v11901_v46, %v865_v24  ;;  %v341_v14 = vadd.f32 %v5987_v48, %v11902_v50  ;;  %v342_v49 = vadd.f32 %v5987_v48, %v11903_v9 }
 0x162   : > { %v898_v4 = vadd.f32 %v11904_v31, %v866_v13  ;;  %v893_v1 = vadd.f32 %v796_v25, %v731_v59  ;;  %v894_v58 = vadd.f32 %v797_v61, %v732_v16  ;;  %1539 = vrot.lane.b32.xlu0 %v6160_v27, %s4931_s27  ;;  %v915_v5 = vadd.f32 %v907_v41, %v899_v56 }
 0x163   : > { %v916_v28 = vadd.f32 %v908_v20, %v900_v12  ;;  %v895_v63 = vadd.f32 %v798_v2, %v733_v30  ;;  %v896_v18 = vadd.f32 %v799_v29, %v734_v44  ;;  %v833_v24 = vmul.f32 %v5728_v26, %v817_v7  ;;  %v843_v16 = vpop.permute.xlu1 %842 }
 0x164   : > { %v834_v54 = vmul.f32 %v5731_v34, %v821_v23  ;;  %v871_v46 = vadd.f32 %v408_v39, %v341_v14  ;;  %v872_v50 = vadd.f32 %v409_v40, %v342_v49  ;;  %v819_v48 = vsel %vm816_vm7, %v805_v15, %v813_v21  ;;  %1313 = vrot.lane.b32.xlu1 %v6034_v0, %s4923_s23 }
 0x165   : > { %v823_v59 = vsel %vm816_vm7, %v813_v21, %v805_v15  ;;  %v857_v13 = vmul.f32 %v843_v16, %v833_v24  ;;  %v914_v30 = vadd.f32 %v906_v33, %v898_v4  ;;  %v913_v44 = vadd.f32 %v6075_v53, %v897_v3  ;;  %v4614_v33 = vld [vmem:[%s11226_s3 + $0x48] sm:$0xff]  ;;  %v11905_v53 = vld [vmem:[#allocation6_spill] sm:$0xff]  ;;  %v11907_v4 = vld [vmem:[#allocation13_spill] sm:$0xff] }
 0x166   : > { %v858_v41 = vmul.f32 %v843_v16, %v834_v54  ;;  %v909_v25 = vadd.f32 %v893_v1, %v6041_v43  ;;  %v910_v61 = vadd.f32 %v894_v58, %v6055_v10  ;;  %1543 = vrot.lane.b32.xlu0 %v6004_v32, %s4931_s27  ;;  %v924_v20 = vadd.f32 %v916_v28, %v860_v47  ;;  %v11906_v43 = vld [vmem:[#allocation5_spill] sm:$0xff]  ;;  %v11908_v58 = vld [vmem:[#allocation27_spill] sm:$0xff] }
 0x167   : > { %v923_v2 = vadd.f32 %v915_v5, %v859_v17  ;;  %v837_v15 = vmul.f32 %v5728_v26, %v819_v48  ;;  %v838_v29 = vmul.f32 %v5731_v34, %v823_v59  ;;  %v921_v39 = vadd.f32 %v913_v44, %v857_v13  ;;  %v851_v10 = vpop.permute.xlu1 %850 }
 0x168   : > { %v922_v56 = vadd.f32 %v914_v30, %v858_v41  ;;  %v903_v40 = vadd.f32 %v11905_v53, %v871_v46  ;;  %v904_v7 = vadd.f32 %v11906_v43, %v872_v50  ;;  %1317 = vrot.lane.b32.xlu1 %v6068_v52, %s4923_s23  ;;  %v911_v17 = vadd.f32 %v895_v63, %v6000_v8  ;;  %v11909_v8 = vld [vmem:[#allocation24_spill] sm:$0xff] }
 0x169   : > { %v912_v47 = vadd.f32 %v896_v18, %v6020_v11  ;;  %v861_v23 = vmul.f32 %v851_v10, %v837_v15  ;;  %v862_v21 = vmul.f32 %v851_v10, %v838_v29  ;;  %v929_v3 = vmax.f32 %v921_v39, 0.0 }
 0x16a   : > { %v930_v12 = vmax.f32 %v922_v56, 0.0  ;;  %v932_v14 = vmax.f32 %v924_v20, 0.0  ;;  %1719 = vperm.xlu0 %4755, %v4614_v33   ;;  %v931_v9 = vmax.f32 %v923_v2, 0.0  ;;  %v839_v49 = vmul.f32 %v5728_v26, %v6106_v62  ;;  %v4829_v2 = vld [vmem:[%s11227_s4] sm:$0xff]   ;;  %v4830_v33 = vld [vmem:[%s11227_s4 + $0x8] sm:$0xff]  }
 0x16b   : > { %v840_v31 = vmul.f32 %v5731_v34, %v6119_v6  ;;  %v917_v1 = vadd.f32 %v909_v25, %v11907_v4  ;;  %v918_v28 = vadd.f32 %v910_v61, %v11908_v58  ;;  %v919_v11 = vadd.f32 %v911_v17, %v903_v40  ;;  %v855_v63 = vpop.permute.xlu1 %854  ;;  %v11910_v61 = vld [vmem:[#allocation20_spill] sm:$0xff] }
 0x16c   : > { %1338 = vperm.xlu1 %4761, %v11909_v8   ;;  %v920_v5 = vadd.f32 %v912_v47, %v904_v7  ;;  %v942_v18 = vpack.c.bf16 %v932_v14, %v930_v12  ;;  %v941_v24 = vpack.c.bf16 %v931_v9, %v929_v3  ;;  %v863_v50 = vmul.f32 %v855_v63, %v839_v49 }
 0x16d   : > { %v925_v54 = vadd.f32 %v917_v1, %v861_v23  ;;  %v926_v46 = vadd.f32 %v918_v28, %v862_v21  ;;  %v864_v48 = vmul.f32 %v855_v63, %v840_v31  ;;  %v11911_v15 = vmov 5   ;;  %v6302_v63 = vld [vmem:[%s11225_s2 + $0x48] sm:$0xff] }
 0x16e   : > { %986 = vmatprep.subr.bf16.mxu1 %v942_v18  ;;  %v927_v62 = vadd.f32 %v919_v11, %v863_v50  ;;  %v11912_v56 = vmov 0   ;;  %v11914_v10 = vmov 6   ;;  %v11916_v9 = vmov 7   ;;  %v4615_v50 = vld [vmem:[%s11226_s3 + $0x50] sm:$0xff] }
 0x16f   : > { %v928_v59 = vadd.f32 %v920_v5, %v864_v48  ;;  %987 = vmatpush1.bf16.msra.mxu1 %v941_v24  ;;  %v934_v16 = vmax.f32 %v926_v46, 0.0  ;;  %v933_v41 = vmax.f32 %v925_v54, 0.0  ;;  %v11919_v58 = vmov 8   ;;  %v4613_v54 = vld [vmem:[%s11226_s3 + $0x40] sm:$0xff]  ;;  %v952_v46 = vpop.permute.xlu0 %951 }
 0x170   : > { %1346 = vperm.xlu1 %4761, %v11842_v45   ;;  %v6196_v6 = vpop.permute.xlu1 %956  ;;  %v935_v30 = vmax.f32 %v927_v62, 0.0  ;;  %v11925_v24 = vmov 4   ;;  %v4616_v62 = vld [vmem:[%s11226_s3 + $0x58] sm:$0xff] }
 0x171   : > { %v936_v13 = vmax.f32 %v928_v59, 0.0 }
 0x172   : > { %v943_v25 = vpack.c.bf16 %v935_v30, %v933_v41 }
 0x173   : > { %v944_v44 = vpack.c.bf16 %v936_v13, %v934_v16  ;;  %v6328_v59 = vpop.permute.xlu0 %966 }
 0x174   : > { %1350 = vperm.xlu1 %4761, %v11910_v61   ;;  %v6199_v20 = vpop.permute.xlu1 %961 }
 0x175   : > { %988 = vmatprep.subr.bf16.mxu1 %v944_v44 }
 0x176   : > { %989 = vmatpush1.bf16.msra.mxu1 %v943_v25 }
 0x177   : > { %v6332_v13 = vpop.permute.xlu0 %1111 }
 0x178   : > { %1363 = vrot.lane.b32.xlu1 %v6097_v22, %s4925_s24 }
 0x179   : > { %4595 = vmatmul.mubr.msk.bf16.vlgmr.msra.gmra.mrb[0].mxu1 %vm979_vm8, %v4829_v2  ;;  %4762 = vset.pattern.permute.xlu1 %v11911_v15  ;;  %v6208_v29 = vpop.permute.xlu1 %1083 }
 0x17a   : > { %1028 = vmatprep.mubr.bf16.mxu1 %v11912_v56 }
 0x17b   : > { %v6336_v30 = vpop.permute.xlu0 %1126 }
 0x17c   : > { %1367 = vrot.lane.b32.xlu1 %v6136_v36, %s4925_s24 }
 0x17d   : > { %v6216_v39 = vpop.permute.xlu1 %1093 }
 0x17f   : > { %v6340_v25 = vpop.permute.xlu0 %1139 }
 0x180   : > { %1371 = vrot.lane.b32.xlu1 %v6160_v27, %s4925_s24 }
 0x181   : > { %4596 = vmatmul.mubr.msk.bf16.gmra.mrb[4].mxu1 %vm979_vm8, %v4830_v33  ;;  %v6221_v53 = vpop.permute.xlu1 %1098 }
 0x182   : > { %2317 = vmatprep.mubr.bf16.mxu1 %v11912_v56 }
 0x183   : > { %v6344_v2 = vpop.permute.xlu0 %1143 }
 0x184   : > { %1375 = vrot.lane.b32.xlu1 %v6004_v32, %s4925_s24 }
 0x186   : > { %v6226_v40 = vpop.permute.xlu1 %1116 }
 0x187   : > { %11913 = vst [vmem:[#allocation4_spill] sm:$0xff] %v6226_v40 }
 0x188   : > { %1398 = vperm.xlu1 %4762, %v11891_v42  }
 0x18a   : > { %v6229_v43 = vpop.permute.xlu1 %1121 }
 0x18c   : > { %1402 = vperm.xlu1 %4762, %v11842_v45  }
 0x18e   : > { %v6232_v7 = vpop.permute.xlu1 %1137 }
 0x190   : > { %1417 = vrot.lane.b32.xlu1 %v6123_v55, %s4927_s25 }
 0x191   : > { %4763 = vset.pattern.permute.xlu1 %v11914_v10 }
 0x192   : > { %v6237_v17 = vpop.permute.xlu1 %1141 }
 0x194   : > { %1421 = vrot.lane.b32.xlu1 %v5990_v19, %s4927_s25 }
 0x196   : > { %v6241_v47 = vpop.permute.xlu1 %1145 }
 0x198   : > { %1425 = vrot.lane.b32.xlu1 %v6034_v0, %s4927_s25 }
 0x19a   : > { %v6245_v23 = vpop.permute.xlu1 %1149 }
 0x19c   : > { %1429 = vrot.lane.b32.xlu1 %v6068_v52, %s4927_s25 }
 0x19e   : > { %v6249_v21 = vpop.permute.xlu1 %1170 }
 0x1a0   : > { %1450 = vperm.xlu1 %4763, %v11909_v8  }
 0x1a2   : > { %v6252_v12 = vpop.permute.xlu1 %1178 }
 0x1a3   : > { %11915 = vst [vmem:[#allocation16_spill] sm:$0xff] %v6252_v12 }
 0x1a4   : > { %1458 = vperm.xlu1 %4763, %v11842_v45  }
 0x1a6   : > { %v6255_v3 = vpop.permute.xlu1 %1193 }
 0x1a8   : > { %1462 = vperm.xlu1 %4763, %v11910_v61  }
 0x1aa   : > { %v6258_v14 = vpop.permute.xlu1 %1197 }
 0x1ac   : > { %1475 = vrot.lane.b32.xlu1 %v6097_v22, %s4929_s26 }
 0x1ad   : > { %4764 = vset.pattern.permute.xlu1 %v11916_v9 }
 0x1ae   : > { %v6263_v49 = vpop.permute.xlu1 %1201 }
 0x1b0   : > { %1479 = vrot.lane.b32.xlu1 %v6136_v36, %s4929_s26 }
 0x1b2   : > { %v6269_v31 = vpop.permute.xlu1 %1205 }
 0x1b4   : > { %1483 = vrot.lane.b32.xlu1 %v6160_v27, %s4929_s26 }
 0x1b6   : > { %v6273_v4 = vpop.permute.xlu1 %1226 }
 0x1b7   : > { %11917 = vst [vmem:[#allocation12_spill] sm:$0xff] %v6273_v4 }
 0x1b8   : > { %1487 = vrot.lane.b32.xlu1 %v6004_v32, %s4929_s26 }
 0x1bb   : > { %v6277_v1 = vpop.permute.xlu1 %1234 }
 0x1bc   : > { %1510 = vperm.xlu1 %4764, %v11891_v42   ;;  %11918 = vst [vmem:[#allocation21_spill] sm:$0xff] %v6277_v1 }
 0x1bf   : > { %v6282_v28 = vpop.permute.xlu1 %1238 }
 0x1c0   : > { %1514 = vperm.xlu1 %4764, %v11842_v45   ;;  %11920 = vst [vmem:[#allocation15_spill] sm:$0xff] %v6282_v28 }
 0x1c3   : > { %v6288_v11 = vpop.permute.xlu1 %1251 }
 0x1c4   : > { %1529 = vrot.lane.b32.xlu1 %v6123_v55, %s4931_s27  ;;  %11921 = vst [vmem:[#allocation11_spill] sm:$0xff] %v6288_v11 }
 0x1c5   : > { %4765 = vset.pattern.permute.xlu1 %v11919_v58 }
 0x1c7   : > { %v6292_v42 = vpop.permute.xlu1 %1255 }
 0x1c8   : > { %1533 = vrot.lane.b32.xlu1 %v5990_v19, %s4931_s27  ;;  %11922 = vst [vmem:[#allocation10_spill] sm:$0xff] %v6292_v42 }
 0x1cb   : > { %v6296_v5 = vpop.permute.xlu1 %1259 }
 0x1cc   : > { %1537 = vrot.lane.b32.xlu1 %v6034_v0, %s4931_s27  ;;  %11923 = vst [vmem:[#allocation19_spill] sm:$0xff] %v6296_v5 }
 0x1cf   : > { %v6304_v18 = vpop.permute.xlu1 %1263 }
 0x1d0   : > { %1541 = vrot.lane.b32.xlu1 %v6068_v52, %s4931_s27  ;;  %11924 = vst [vmem:[#allocation14_spill] sm:$0xff] %v6304_v18 }
 0x1d4   : > { %1562 = vperm.xlu1 %4765, %v11909_v8   ;;  %v6311_v8 = vld [vmem:[%s11225_s2 + $0x50] sm:$0xff] }
 0x1d8   : > { %1570 = vperm.xlu1 %4765, %v11842_v45   ;;  %v6314_v45 = vpop.permute.xlu1 %1286 }
 0x1d9   : > { %11926 = vst [vmem:[#allocation2_spill] sm:$0xff] %v6314_v45 }
 0x1dc   : > { %1574 = vperm.xlu1 %4765, %v11910_v61   ;;  %v6323_v48 = vpop.permute.xlu1 %1290 }
 0x1dd   : > { %11927 = vst [vmem:[#allocation18_spill] sm:$0xff] %v6323_v48 }
 0x1e0   : > { %4766 = vset.pattern.permute.xlu1 %v11925_v24  ;;  %v6330_v16 = vpop.permute.xlu1 %1305 }
 0x1e1   : > { %1691 = vperm.xlu1 %4766, %v6302_v63   ;;  %11928 = vst [vmem:[#allocation23_spill] sm:$0xff] %v6330_v16 }
 0x1e4   : > { %v6334_v41 = vpop.permute.xlu1 %1309 }
 0x1e5   : > { %1696 = vperm.xlu1 %4766, %v6311_v8   ;;  %11929 = vst [vmem:[#allocation26_spill] sm:$0xff] %v6334_v41 }
 0x1e8   : > { %v6338_v44 = vpop.permute.xlu1 %1313 }
 0x1e9   : > { %4767 = vset.pattern.permute.xlu1 %v11912_v56  ;;  %11930 = vst [vmem:[#allocation22_spill] sm:$0xff] %v6338_v44 }
 0x1ea   : > { %1714 = vperm.xlu1 %4767, %v4613_v54   ;;  %v6348_v54 = vpop.permute.xlu0 %1147 }
 0x1ec   : > { %v6342_v61 = vpop.permute.xlu1 %1317 }
 0x1ed   : > { %11931 = vst [vmem:[#allocation39_spill] sm:$0xff] %v6342_v61 }
 0x1ee   : > { %1724 = vperm.xlu1 %4767, %v4615_v50  }
 0x1f0   : > { %v6346_v33 = vpop.permute.xlu1 %1338 }
 0x1f1   : > { %11932 = vst [vmem:[#allocation35_spill] sm:$0xff] %v6346_v33 }
 0x1f2   : > { %1729 = vperm.xlu1 %4767, %v4616_v62   ;;  %v6352_v62 = vpop.permute.xlu0 %1151 }
 0x1f4   : > { %v6350_v50 = vpop.permute.xlu1 %1346 }
 0x1f5   : > { %11933 = vst [vmem:[#allocation32_spill] sm:$0xff] %v6350_v50 }
 0x1f6   : > { %v6356_v34 = vpop.permute.xlu0 %1174 }
 0x1f8   : > { %v6354_v40 = vpop.permute.xlu1 %1350 }
 0x1f9   : > { %11934 = vst [vmem:[#allocation28_spill] sm:$0xff] %v6354_v40 }
 0x1fa   : > { %v6360_v41 = vpop.permute.xlu0 %1182 }
 0x1fc   : > { %v6358_v26 = vpop.permute.xlu1 %1363 }
 0x1fd   : > { %11935 = vst [vmem:[#allocation37_spill] sm:$0xff] %v6358_v26 }
 0x1fe   : > { %v6364_v61 = vpop.permute.xlu0 %1195 }
 0x200   : > { %v6362_v44 = vpop.permute.xlu1 %1367 }
 0x201   : > { %11936 = vst [vmem:[#allocation33_spill] sm:$0xff] %v6362_v44 }
 0x202   : > { %v6368_v33 = vpop.permute.xlu0 %1199 }
 0x204   : > { %v6366_v16 = vpop.permute.xlu1 %1371 }
 0x205   : > { %11937 = vst [vmem:[#allocation29_spill] sm:$0xff] %v6366_v16 }
 0x206   : > { %v6372_v50 = vpop.permute.xlu0 %1203 }
 0x208   : > { %v6370_v45 = vpop.permute.xlu1 %1375 }
 0x209   : > { %11938 = vst [vmem:[#allocation31_spill] sm:$0xff] %v6370_v45 }
 0x20a   : > { %v6376_v40 = vpop.permute.xlu0 %1207 }
 0x20c   : > { %v6374_v51 = vpop.permute.xlu1 %1398 }
 0x20d   : > { %11939 = vst [vmem:[#allocation34_spill] sm:$0xff] %v6374_v51 }
 0x20e   : > { %v6380_v26 = vpop.permute.xlu0 %1249 }
 0x210   : > { %v6378_v37 = vpop.permute.xlu1 %1402 }
 0x211   : > { %11940 = vst [vmem:[#allocation30_spill] sm:$0xff] %v6378_v37 }
 0x212   : > { %v6384_v44 = vpop.permute.xlu0 %1253 }
 0x214   : > { %v6382_v35 = vpop.permute.xlu1 %1417 }
 0x215   : > { %11941 = vst [vmem:[#allocation42_spill] sm:$0xff] %v6382_v35 }
 0x216   : > { %v6388_v16 = vpop.permute.xlu0 %1257 }
 0x218   : > { %v6386_v57 = vpop.permute.xlu1 %1421 }
 0x219   : > { %11942 = vst [vmem:[#allocation38_spill] sm:$0xff] %v6386_v57 }
 0x21a   : > { %v6393_v11 = vpop.permute.xlu0 %1261 }
 0x21c   : > { %v6390_v48 = vpop.permute.xlu1 %1425 }
 0x21d   : > { %11943 = vst [vmem:[#allocation63_spill] sm:$0xff] %v6390_v48 }
 0x24c   : > { %v1020_v45 = vpop.f32.mrb[0].mxu1 }
 0x24d   : > { %v1021_v42 = vadd.f32 %v1020_v45, %v952_v46  ;;  %v1022_v51 = vpop.f32.mrb[1].mxu1  ;;  %v6399_v45 = vpop.permute.xlu1 %1429 }
 0x24e   : > { %v1023_v18 = vadd.f32 %v1022_v51, %v952_v46  ;;  %v1024_v28 = vpop.f32.mrb[2].mxu1  ;;  %11944 = vst [vmem:[#allocation45_spill] sm:$0xff] %v6399_v45 }
 0x24f   : > { %v1039_v37 = vmax.f32 %v1021_v42, 0.0  ;;  %v1025_v5 = vadd.f32 %v1024_v28, %v6196_v6  ;;  %v1026_v35 = vpop.f32.mrb[3].mxu1 }
 0x250   : > { %v1040_v1 = vmax.f32 %v1023_v18, 0.0  ;;  %v1027_v57 = vadd.f32 %v1026_v35, %v6196_v6 }
 0x251   : > { %v6397_v4 = vadd.f32 %v6123_v55, %v1039_v37  ;;  %v1041_v48 = vmax.f32 %v1025_v5, 0.0  ;;  %v6427_v46 = vpop.permute.xlu1 %1450 }
 0x252   : > { %v6402_v51 = vadd.f32 %v6034_v0, %v1040_v1  ;;  %v1042_v42 = vmax.f32 %v1027_v57, 0.0  ;;  %v6421_v57 = vpop.permute.xlu0 %1307  ;;  %11945 = vst [vmem:[#allocation25_spill] sm:$0xff] %v6427_v46 }
 0x253   : > { %1055 = vst [vmem:[%s5013_s16 + $0x40] sm:$0xff] %v6397_v4  ;;  %v6407_v28 = vadd.f32 %v6097_v22, %v1041_v48  ;;  %1740 = vrot.lane.b32.xlu0 %v6397_v4, %s4918_s19 }
 0x254   : > { %1056 = vst [vmem:[%s5013_s16 + $0x48] sm:$0xff] %v6402_v51  ;;  %v6414_v37 = vadd.f32 %v6160_v27, %v1042_v42  ;;  %v1030_v35 = vpop.f32.mrb[4].mxu1 }
 0x255   : > { %1057 = vst [vmem:[%s5013_s16 + $0x50] sm:$0xff] %v6407_v28  ;;  %v1031_v0 = vadd.f32 %v1030_v35, %v6199_v20  ;;  %v1032_v6 = vpop.f32.mrb[5].mxu1  ;;  %1742 = vrot.lane.b32.xlu1 %v6407_v28, %s4918_s19 }
 0x256   : > { %1058 = vst [vmem:[%s5013_s16 + $0x58] sm:$0xff] %v6414_v37  ;;  %v1033_v22 = vadd.f32 %v1032_v6, %v6199_v20  ;;  %v1034_v1 = vpop.f32.mrb[6].mxu1  ;;  %v6443_v6 = vpop.permute.xlu0 %1311 }
 0x257   : > { %v1043_v27 = vmax.f32 %v1031_v0, 0.0  ;;  %v1035_v5 = vadd.f32 %v1034_v1, %v6328_v59  ;;  %v1036_v18 = vpop.f32.mrb[7].mxu1 }
 0x258   : > { %v1044_v48 = vmax.f32 %v1033_v22, 0.0  ;;  %v1037_v42 = vadd.f32 %v1036_v18, %v6328_v59  ;;  %v11949_v18 = vmov 1  }
 0x259   : > { %v6431_v35 = vadd.f32 %v5990_v19, %v1043_v27  ;;  %v1045_v45 = vmax.f32 %v1035_v5, 0.0  ;;  %v6484_v27 = vld [vmem:[%s11225_s2 + $0x58] sm:$0xff] }
 0x25a   : > { %v6434_v12 = vadd.f32 %v6068_v52, %v1044_v48  ;;  %v1046_v20 = vmax.f32 %v1037_v42, 0.0  ;;  %v6454_v52 = vpop.permute.xlu1 %1458  ;;  %v6462_v59 = vpop.permute.xlu0 %1315  ;;  %v6496_v42 = vld [vmem:[%s11225_s2 + $0x28] sm:$0xff] }
 0x25b   : > { %1059 = vst [vmem:[%s5013_s16 + $0x60] sm:$0xff] %v6431_v35  ;;  %v6439_v0 = vadd.f32 %v6136_v36, %v1045_v45  ;;  %1744 = vrot.lane.b32.xlu0 %v6431_v35, %s4918_s19  ;;  %11946 = vst [vmem:[#allocation41_spill] sm:$0xff] %v6454_v52  ;;  %v6471_v45 = vld [vmem:[%s11225_s2 + $0x40] sm:$0xff] }
 0x25c   : > { %1060 = vst [vmem:[%s5013_s16 + $0x68] sm:$0xff] %v6434_v12  ;;  %v6448_v19 = vadd.f32 %v6004_v32, %v1046_v20 }
 0x25d   : > { %1061 = vst [vmem:[%s5013_s16 + $0x70] sm:$0xff] %v6439_v0  ;;  %1746 = vrot.lane.b32.xlu1 %v6439_v0, %s4918_s19 }
 0x25e   : > { %1062 = vst [vmem:[%s5013_s16 + $0x78] sm:$0xff] %v6448_v19  ;;  %v6466_v32 = vpop.permute.xlu1 %1462  ;;  %v6476_v22 = vpop.permute.xlu0 %1319 }
 0x25f   : > { %1748 = vrot.lane.b32.xlu0 %v6402_v51, %s4918_s19  ;;  %11947 = vst [vmem:[#allocation43_spill] sm:$0xff] %v6466_v32 }
 0x261   : > { %1750 = vrot.lane.b32.xlu1 %v6414_v37, %s4918_s19 }
 0x262   : > { %v6479_v1 = vpop.permute.xlu1 %1475  ;;  %v6488_v5 = vpop.permute.xlu0 %1361 }
 0x263   : > { %1752 = vrot.lane.b32.xlu0 %v6434_v12, %s4918_s19  ;;  %11948 = vst [vmem:[#allocation36_spill] sm:$0xff] %v6479_v1 }
 0x265   : > { %1754 = vrot.lane.b32.xlu1 %v6448_v19, %s4918_s19 }
 0x266   : > { %v6491_v48 = vpop.permute.xlu1 %1479  ;;  %v6502_v20 = vpop.permute.xlu0 %1365 }
 0x267   : > { %1773 = vperm.xlu0 %4755, %v6471_v45   ;;  %11950 = vst [vmem:[#allocation48_spill] sm:$0xff] %v6491_v48  ;;  %11951 = vst [vmem:[#allocation44_spill] sm:$0xff] %v6502_v20 }
 0x269   : > { %1777 = vperm.xlu1 %4767, %v6302_v63  }
 0x26a   : > { %v6508_v32 = vpop.permute.xlu1 %1483  ;;  %v6514_v46 = vpop.permute.xlu0 %1369 }
 0x26b   : > { %1781 = vperm.xlu0 %4755, %v6311_v8   ;;  %11952 = vst [vmem:[#allocation40_spill] sm:$0xff] %v6508_v32 }
 0x26d   : > { %1785 = vperm.xlu1 %4767, %v6484_v27  }
 0x26e   : > { %v6516_v48 = vpop.permute.xlu1 %1487  ;;  %v6522_v1 = vpop.permute.xlu0 %1373 }
 0x26f   : > { %4768 = vset.pattern.permute.xlu0 %v11949_v18  ;;  %11953 = vst [vmem:[#allocation51_spill] sm:$0xff] %v6516_v48  ;;  %11954 = vst [vmem:[#allocation17_spill] sm:$0xff] %v6522_v1 }
 0x270   : > { %1230 = vperm.xlu0 %4768, %v6496_v42  }
 0x271   : > { %1798 = vrot.lane.b32.xlu1 %v6407_v28, %s4920_s20 }
 0x272   : > { %4769 = vset.pattern.permute.xlu1 %v11949_v18  ;;  %v6527_v32 = vpop.permute.xlu1 %1510  ;;  %v6531_v48 = vpop.permute.xlu0 %1419  ;;  %v11958_v18 = vmov 2  }
 0x273   : > { %11955 = vst [vmem:[#allocation61_spill] sm:$0xff] %v6527_v32  ;;  %11956 = vst [vmem:[#allocation62_spill] sm:$0xff] %v6531_v48  ;;  %v6547_v32 = vld [vmem:[%s11225_s2 + $0x20] sm:$0xff] }
 0x274   : > { %1796 = vrot.lane.b32.xlu0 %v6397_v4, %s4920_s20 }
 0x275   : > { %1802 = vrot.lane.b32.xlu1 %v6439_v0, %s4920_s20 }
 0x276   : > { %v6533_v52 = vpop.permute.xlu1 %1514  ;;  %v6539_v20 = vpop.permute.xlu0 %1423 }
 0x277   : > { %11957 = vst [vmem:[#allocation70_spill] sm:$0xff] %v6533_v52  ;;  %11959 = vst [vmem:[#allocation60_spill] sm:$0xff] %v6539_v20  ;;  %v6557_v20 = vld [vmem:[%s11225_s2 + $0x38] sm:$0xff] }
 0x278   : > { %1800 = vrot.lane.b32.xlu0 %v6431_v35, %s4920_s20 }
 0x279   : > { %1806 = vrot.lane.b32.xlu1 %v6414_v37, %s4920_s20 }
 0x27a   : > { %v6550_v52 = vpop.permute.xlu1 %1529 }
 0x27b   : > { %11960 = vst [vmem:[#allocation9_spill] sm:$0xff] %v6550_v52 }
 0x27c   : > { %1804 = vrot.lane.b32.xlu0 %v6402_v51, %s4920_s20 }
 0x27d   : > { %1810 = vrot.lane.b32.xlu1 %v6448_v19, %s4920_s20 }
 0x27e   : > { %v6562_v48 = vpop.permute.xlu1 %1533 }
 0x27f   : > { %11962 = vst [vmem:[#allocation69_spill] sm:$0xff] %v6562_v48 }
 0x280   : > { %1808 = vrot.lane.b32.xlu0 %v6434_v12, %s4920_s20 }
 0x281   : > { %1833 = vperm.xlu1 %4769, %v6302_v63  }
 0x282   : > { %v6573_v1 = vpop.permute.xlu1 %1537 }
 0x283   : > { %11964 = vst [vmem:[#allocation3_spill] sm:$0xff] %v6573_v1 }
 0x284   : > { %1829 = vperm.xlu0 %4768, %v6471_v45  }
 0x285   : > { %1837 = vperm.xlu1 %4769, %v6311_v8  }
 0x288   : > { %1841 = vperm.xlu0 %4768, %v6484_v27  }
 0x289   : > { %1852 = vrot.lane.b32.xlu1 %v6397_v4, %s4921_s22 }
 0x28a   : > { %4771 = vset.pattern.permute.xlu1 %v11958_v18 }
 0x28c   : > { %4770 = vset.pattern.permute.xlu0 %v11958_v18  ;;  %v6560_v18 = vpop.permute.xlu0 %1427 }
 0x28d   : > { %1856 = vrot.lane.b32.xlu1 %v6431_v35, %s4921_s22  ;;  %1282 = vperm.xlu0 %4770, %v6547_v32   ;;  %11961 = vst [vmem:[#allocation68_spill] sm:$0xff] %v6560_v18  ;;  %v6580_v18 = vpop.permute.xlu1 %1541 }
 0x28e   : > { %11966 = vst [vmem:[#allocation65_spill] sm:$0xff] %v6580_v18 }
 0x290   : > { %v6568_v52 = vpop.permute.xlu0 %1431 }
 0x291   : > { %1860 = vrot.lane.b32.xlu1 %v6402_v51, %s4921_s22  ;;  %1294 = vperm.xlu0 %4770, %v6557_v20   ;;  %11963 = vst [vmem:[#allocation7_spill] sm:$0xff] %v6568_v52  ;;  %v6590_v1 = vpop.permute.xlu1 %1562 }
 0x292   : > { %11968 = vst [vmem:[#allocation6_spill] sm:$0xff] %v6590_v1 }
 0x294   : > { %v6578_v48 = vpop.permute.xlu0 %1473 }
 0x295   : > { %1864 = vrot.lane.b32.xlu1 %v6434_v12, %s4921_s22  ;;  %1854 = vrot.lane.b32.xlu0 %v6407_v28, %s4921_s22  ;;  %11965 = vst [vmem:[#allocation64_spill] sm:$0xff] %v6578_v48  ;;  %v6599_v48 = vpop.permute.xlu1 %1570 }
 0x296   : > { %11969 = vst [vmem:[#allocation5_spill] sm:$0xff] %v6599_v48 }
 0x298   : > { %v6585_v52 = vpop.permute.xlu0 %1477 }
 0x299   : > { %1885 = vperm.xlu1 %4771, %v6471_v45   ;;  %1858 = vrot.lane.b32.xlu0 %v6439_v0, %s4921_s22  ;;  %11967 = vst [vmem:[#allocation8_spill] sm:$0xff] %v6585_v52  ;;  %v6609_v52 = vpop.permute.xlu1 %1574 }
 0x29a   : > { %11971 = vst [vmem:[#allocation27_spill] sm:$0xff] %v6609_v52 }
 0x29c   : > { %v6596_v18 = vpop.permute.xlu0 %1481 }
 0x29d   : > { %1893 = vperm.xlu1 %4771, %v6311_v8   ;;  %1862 = vrot.lane.b32.xlu0 %v6414_v37, %s4921_s22  ;;  %v6618_v48 = vpop.permute.xlu1 %1691 }
 0x29e   : > { %11973 = vst [vmem:[#allocation20_spill] sm:$0xff] %v6618_v48 }
 0x2a0   : > { %v6605_v1 = vpop.permute.xlu0 %1485 }
 0x2a1   : > { %1897 = vperm.xlu1 %4771, %v6484_v27   ;;  %1866 = vrot.lane.b32.xlu0 %v6448_v19, %s4921_s22  ;;  %11970 = vst [vmem:[#allocation13_spill] sm:$0xff] %v6605_v1  ;;  %v6627_v52 = vpop.permute.xlu1 %1696 }
 0x2a2   : > { %11975 = vst [vmem:[#allocation74_spill] sm:$0xff] %v6627_v52 }
 0x2a5   : > { %1910 = vrot.lane.b32.xlu1 %v6407_v28, %s4923_s23  ;;  %1889 = vperm.xlu0 %4770, %v6302_v63  }
 0x2a6   : > { %4773 = vset.pattern.permute.xlu1 %v11895_v60 }
 0x2a9   : > { %1914 = vrot.lane.b32.xlu1 %v6439_v0, %s4923_s23  ;;  %4772 = vset.pattern.permute.xlu0 %v11895_v60  ;;  %v6614_v60 = vpop.permute.xlu0 %1531 }
 0x2aa   : > { %1342 = vperm.xlu0 %4772, %v6496_v42   ;;  %11972 = vst [vmem:[#allocation24_spill] sm:$0xff] %v6614_v60  ;;  %v6636_v60 = vpop.permute.xlu1 %1714 }
 0x2ab   : > { %11977 = vst [vmem:[#allocation76_spill] sm:$0xff] %v6636_v60 }
 0x2ad   : > { %1918 = vrot.lane.b32.xlu1 %v6414_v37, %s4923_s23  ;;  %v6623_v1 = vpop.permute.xlu0 %1535 }
 0x2ae   : > { %1908 = vrot.lane.b32.xlu0 %v6397_v4, %s4923_s23  ;;  %11974 = vst [vmem:[#allocation73_spill] sm:$0xff] %v6623_v1  ;;  %v6646_v1 = vpop.permute.xlu1 %1724 }
 0x2af   : > { %11979 = vst [vmem:[#allocation78_spill] sm:$0xff] %v6646_v1 }
 0x2b1   : > { %1922 = vrot.lane.b32.xlu1 %v6448_v19, %s4923_s23  ;;  %v6633_v48 = vpop.permute.xlu0 %1539 }
 0x2b2   : > { %1912 = vrot.lane.b32.xlu0 %v6431_v35, %s4923_s23  ;;  %11976 = vst [vmem:[#allocation75_spill] sm:$0xff] %v6633_v48  ;;  %v6652_v60 = vpop.permute.xlu1 %1729 }
 0x2b3   : > { %11981 = vst [vmem:[#allocation80_spill] sm:$0xff] %v6652_v60 }
 0x2b5   : > { %1945 = vperm.xlu1 %4773, %v6302_v63   ;;  %v6642_v52 = vpop.permute.xlu0 %1543 }
 0x2b6   : > { %1916 = vrot.lane.b32.xlu0 %v6402_v51, %s4923_s23  ;;  %11978 = vst [vmem:[#allocation77_spill] sm:$0xff] %v6642_v52 }
 0x2b9   : > { %1949 = vperm.xlu1 %4773, %v6311_v8   ;;  %v6650_v48 = vpop.permute.xlu0 %1719 }
 0x2ba   : > { %1920 = vrot.lane.b32.xlu0 %v6434_v12, %s4923_s23  ;;  %11980 = vst [vmem:[#allocation79_spill] sm:$0xff] %v6650_v48 }
 0x2bd   : > { %1964 = vrot.lane.b32.xlu1 %v6397_v4, %s4925_s24 }
 0x2be   : > { %1941 = vperm.xlu0 %4772, %v6471_v45   ;;  %4775 = vset.pattern.permute.xlu1 %v11911_v15 }
 0x2c1   : > { %1968 = vrot.lane.b32.xlu1 %v6431_v35, %s4925_s24 }
 0x2c2   : > { %1953 = vperm.xlu0 %4772, %v6484_v27  }
 0x2c5   : > { %1972 = vrot.lane.b32.xlu1 %v6402_v51, %s4925_s24 }
 0x2c6   : > { %4774 = vset.pattern.permute.xlu0 %v11911_v15  ;;  %v6657_v15 = vpop.permute.xlu0 %1740 }
 0x2c7   : > { %1394 = vperm.xlu0 %4774, %v6547_v32   ;;  %11982 = vst [vmem:[#allocation81_spill] sm:$0xff] %v6657_v15  ;;  %v6661_v52 = vpop.permute.xlu1 %1742 }
 0x2c8   : > { %11983 = vst [vmem:[#allocation82_spill] sm:$0xff] %v6661_v52 }
 0x2c9   : > { %1976 = vrot.lane.b32.xlu1 %v6434_v12, %s4925_s24 }
 0x2cb   : > { %1406 = vperm.xlu0 %4774, %v6557_v20  }
 0x2cd   : > { %1997 = vperm.xlu1 %4775, %v6471_v45   ;;  %v6664_v1 = vpop.permute.xlu0 %1744 }
 0x2ce   : > { %11984 = vst [vmem:[#allocation83_spill] sm:$0xff] %v6664_v1 }
 0x2cf   : > { %1966 = vrot.lane.b32.xlu0 %v6407_v28, %s4925_s24  ;;  %v6668_v60 = vpop.permute.xlu1 %1746 }
 0x2d0   : > { %11985 = vst [vmem:[#allocation84_spill] sm:$0xff] %v6668_v60 }
 0x2d1   : > { %2005 = vperm.xlu1 %4775, %v6311_v8   ;;  %v6675_v15 = vpop.permute.xlu0 %1748 }
 0x2d2   : > { %11986 = vst [vmem:[#allocation85_spill] sm:$0xff] %v6675_v15 }
 0x2d3   : > { %1970 = vrot.lane.b32.xlu0 %v6439_v0, %s4925_s24  ;;  %v6679_v48 = vpop.permute.xlu1 %1750 }
 0x2d4   : > { %11987 = vst [vmem:[#allocation86_spill] sm:$0xff] %v6679_v48 }
 0x2d5   : > { %2009 = vperm.xlu1 %4775, %v6484_v27   ;;  %v6684_v60 = vpop.permute.xlu0 %1752 }
 0x2d6   : > { %11988 = vst [vmem:[#allocation87_spill] sm:$0xff] %v6684_v60 }
 0x2d7   : > { %1974 = vrot.lane.b32.xlu0 %v6414_v37, %s4925_s24  ;;  %v6687_v1 = vpop.permute.xlu1 %1754 }
 0x2d8   : > { %11989 = vst [vmem:[#allocation88_spill] sm:$0xff] %v6687_v1 }
 0x2d9   : > { %2022 = vrot.lane.b32.xlu1 %v6407_v28, %s4927_s25 }
 0x2da   : > { %4777 = vset.pattern.permute.xlu1 %v11914_v10 }
 0x2db   : > { %1978 = vrot.lane.b32.xlu0 %v6448_v19, %s4925_s24 }
 0x2dd   : > { %2026 = vrot.lane.b32.xlu1 %v6439_v0, %s4927_s25 }
 0x2df   : > { %2001 = vperm.xlu0 %4774, %v6302_v63  }
 0x2e1   : > { %2030 = vrot.lane.b32.xlu1 %v6414_v37, %s4927_s25 }
 0x2e3   : > { %4776 = vset.pattern.permute.xlu0 %v11914_v10 }
 0x2e4   : > { %1454 = vperm.xlu0 %4776, %v6496_v42  }
 0x2e5   : > { %2034 = vrot.lane.b32.xlu1 %v6448_v19, %s4927_s25 }
 0x2e6   : > { %v6692_v15 = vpop.permute.xlu0 %1773 }
 0x2e7   : > { %11990 = vst [vmem:[#allocation89_spill] sm:$0xff] %v6692_v15 }
 0x2e8   : > { %v6694_v52 = vpop.permute.xlu1 %1777  ;;  %2020 = vrot.lane.b32.xlu0 %v6397_v4, %s4927_s25 }
 0x2e9   : > { %11991 = vst [vmem:[#allocation90_spill] sm:$0xff] %v6694_v52  ;;  %2057 = vperm.xlu1 %4777, %v6302_v63  }
 0x2ea   : > { %v6699_v48 = vpop.permute.xlu0 %1781 }
 0x2eb   : > { %11992 = vst [vmem:[#allocation91_spill] sm:$0xff] %v6699_v48 }
 0x2ec   : > { %v6701_v60 = vpop.permute.xlu1 %1785  ;;  %2024 = vrot.lane.b32.xlu0 %v6431_v35, %s4927_s25 }
 0x2ed   : > { %11993 = vst [vmem:[#allocation92_spill] sm:$0xff] %v6701_v60  ;;  %2061 = vperm.xlu1 %4777, %v6311_v8  }
 0x2ef   : > { %v6706_v10 = vpop.permute.xlu0 %1230 }
 0x2f0   : > { %11994 = vst [vmem:[#allocation93_spill] sm:$0xff] %v6706_v10  ;;  %v6708_v1 = vpop.permute.xlu1 %1798  ;;  %2028 = vrot.lane.b32.xlu0 %v6402_v51, %s4927_s25 }
 0x2f1   : > { %11995 = vst [vmem:[#allocation94_spill] sm:$0xff] %v6708_v1  ;;  %2076 = vrot.lane.b32.xlu1 %v6397_v4, %s4929_s26 }
 0x2f2   : > { %4779 = vset.pattern.permute.xlu1 %v11916_v9 }
 0x2f3   : > { %v6715_v15 = vpop.permute.xlu0 %1796 }
 0x2f4   : > { %11996 = vst [vmem:[#allocation95_spill] sm:$0xff] %v6715_v15  ;;  %v6717_v60 = vpop.permute.xlu1 %1802  ;;  %2032 = vrot.lane.b32.xlu0 %v6434_v12, %s4927_s25 }
 0x2f5   : > { %11997 = vst [vmem:[#allocation96_spill] sm:$0xff] %v6717_v60  ;;  %2080 = vrot.lane.b32.xlu1 %v6431_v35, %s4929_s26 }
 0x2f7   : > { %v6723_v10 = vpop.permute.xlu0 %1800 }
 0x2f8   : > { %11998 = vst [vmem:[#allocation97_spill] sm:$0xff] %v6723_v10  ;;  %v6725_v1 = vpop.permute.xlu1 %1806  ;;  %2053 = vperm.xlu0 %4776, %v6471_v45  }
 0x2f9   : > { %11999 = vst [vmem:[#allocation98_spill] sm:$0xff] %v6725_v1  ;;  %2084 = vrot.lane.b32.xlu1 %v6402_v51, %s4929_s26 }
 0x2fb   : > { %v6730_v48 = vpop.permute.xlu0 %1804 }
 0x2fc   : > { %12000 = vst [vmem:[#allocation99_spill] sm:$0xff] %v6730_v48  ;;  %v6732_v15 = vpop.permute.xlu1 %1810  ;;  %2065 = vperm.xlu0 %4776, %v6484_v27  }
 0x2fd   : > { %12001 = vst [vmem:[#allocation100_spill] sm:$0xff] %v6732_v15  ;;  %2088 = vrot.lane.b32.xlu1 %v6434_v12, %s4929_s26 }
 0x2ff   : > { %v6737_v60 = vpop.permute.xlu0 %1808 }
 0x300   : > { %v6739_v52 = vpop.permute.xlu1 %1833  ;;  %4778 = vset.pattern.permute.xlu0 %v11916_v9 }
 0x301   : > { %2109 = vperm.xlu1 %4779, %v6471_v45   ;;  %1506 = vperm.xlu0 %4778, %v6547_v32  }
 0x303   : > { %v6744_v10 = vpop.permute.xlu0 %1829 }
 0x304   : > { %12002 = vst [vmem:[#allocation101_spill] sm:$0xff] %v6744_v10  ;;  %v6746_v48 = vpop.permute.xlu1 %1837  ;;  %v12118_v10 = vld [vmem:[#allocation71_spill] sm:$0xff] }
 0x305   : > { %12003 = vst [vmem:[#allocation102_spill] sm:$0xff] %v6746_v48  ;;  %2117 = vperm.xlu1 %4779, %v6311_v8   ;;  %1518 = vperm.xlu0 %4778, %v6557_v20  }
 0x307   : > { %v6750_v15 = vpop.permute.xlu0 %1841 }
 0x308   : > { %12004 = vst [vmem:[#allocation103_spill] sm:$0xff] %v6750_v15  ;;  %v6752_v1 = vpop.permute.xlu1 %1852 }
 0x309   : > { %12005 = vst [vmem:[#allocation104_spill] sm:$0xff] %v6752_v1  ;;  %2121 = vperm.xlu1 %4779, %v6484_v27   ;;  %2078 = vrot.lane.b32.xlu0 %v6407_v28, %s4929_s26 }
 0x30c   : > { %v6757_v9 = vpop.permute.xlu1 %1856  ;;  %v6759_v32 = vpop.permute.xlu0 %1282 }
 0x30d   : > { %12006 = vst [vmem:[#allocation105_spill] sm:$0xff] %v6757_v9  ;;  %12007 = vst [vmem:[#allocation106_spill] sm:$0xff] %v6759_v32  ;;  %2134 = vrot.lane.b32.xlu1 %v6407_v28, %s4931_s27  ;;  %2082 = vrot.lane.b32.xlu0 %v6439_v0, %s4929_s26 }
 0x30e   : > { %4781 = vset.pattern.permute.xlu1 %v11919_v58 }
 0x310   : > { %v6766_v20 = vpop.permute.xlu1 %1860  ;;  %v6768_v15 = vpop.permute.xlu0 %1294 }
 0x311   : > { %12008 = vst [vmem:[#allocation107_spill] sm:$0xff] %v6766_v20  ;;  %12009 = vst [vmem:[#allocation108_spill] sm:$0xff] %v6768_v15  ;;  %2138 = vrot.lane.b32.xlu1 %v6439_v0, %s4931_s27  ;;  %2086 = vrot.lane.b32.xlu0 %v6414_v37, %s4929_s26 }
 0x314   : > { %v6774_v1 = vpop.permute.xlu1 %1864  ;;  %v6776_v32 = vpop.permute.xlu0 %1854 }
 0x315   : > { %12010 = vst [vmem:[#allocation109_spill] sm:$0xff] %v6776_v32  ;;  %2142 = vrot.lane.b32.xlu1 %v6414_v37, %s4931_s27  ;;  %2090 = vrot.lane.b32.xlu0 %v6448_v19, %s4929_s26  ;;  %v12106_v32 = vld [vmem:[#allocation39_spill] sm:$0xff] }
 0x318   : > { %v6782_v48 = vpop.permute.xlu1 %1885  ;;  %v6784_v20 = vpop.permute.xlu0 %1858 }
 0x319   : > { %12011 = vst [vmem:[#allocation110_spill] sm:$0xff] %v6782_v48  ;;  %12012 = vst [vmem:[#allocation111_spill] sm:$0xff] %v6784_v20  ;;  %2146 = vrot.lane.b32.xlu1 %v6448_v19, %s4931_s27  ;;  %2113 = vperm.xlu0 %4778, %v6302_v63   ;;  %v4629_v19 = vld [vmem:[%s11228_s5 + $0x20] sm:$0xff] }
 0x31c   : > { %v6789_v0 = vpop.permute.xlu1 %1893  ;;  %v6791_v15 = vpop.permute.xlu0 %1862 }
 0x31d   : > { %12013 = vst [vmem:[#allocation112_spill] sm:$0xff] %v6789_v0  ;;  %12014 = vst [vmem:[#allocation113_spill] sm:$0xff] %v6791_v15  ;;  %2169 = vperm.xlu1 %4781, %v6302_v63   ;;  %4780 = vset.pattern.permute.xlu0 %v11919_v58 }
 0x31e   : > { %1566 = vperm.xlu0 %4780, %v6496_v42  }
 0x320   : > { %v6796_v37 = vpop.permute.xlu1 %1897  ;;  %v6798_v48 = vpop.permute.xlu0 %1866 }
 0x321   : > { %12015 = vst [vmem:[#allocation114_spill] sm:$0xff] %v6796_v37  ;;  %12016 = vst [vmem:[#allocation115_spill] sm:$0xff] %v6798_v48  ;;  %2173 = vperm.xlu1 %4781, %v6311_v8   ;;  %v4631_v8 = vld [vmem:[%s11228_s5 + $0x30] sm:$0xff]  ;;  %v12089_v48 = vld [vmem:[#allocation58_spill] sm:$0xff] }
 0x322   : > { %2132 = vrot.lane.b32.xlu0 %v6397_v4, %s4931_s27 }
 0x324   : > { %v6806_v0 = vpop.permute.xlu1 %1910  ;;  %v6808_v63 = vpop.permute.xlu0 %1889 }
 0x325   : > { %12017 = vst [vmem:[#allocation116_spill] sm:$0xff] %v6806_v0  ;;  %12018 = vst [vmem:[#allocation117_spill] sm:$0xff] %v6808_v63  ;;  %4783 = vset.pattern.permute.xlu1 %v11912_v56  ;;  %v4632_v0 = vld [vmem:[%s11228_s5 + $0x38] sm:$0xff] }
 0x326   : > { %2414 = vperm.xlu1 %4783, %v4629_v19   ;;  %2136 = vrot.lane.b32.xlu0 %v6431_v35, %s4931_s27  ;;  %v4640_v63 = vld [vmem:[%s11226_s3 + $0x78] sm:$0xff] }
 0x328   : > { %v6816_v58 = vpop.permute.xlu1 %1914 }
 0x329   : > { %12019 = vst [vmem:[#allocation118_spill] sm:$0xff] %v6816_v58  ;;  %v6818_v4 = vpop.permute.xlu0 %1342 }
 0x32a   : > { %12020 = vst [vmem:[#allocation119_spill] sm:$0xff] %v6818_v4  ;;  %2424 = vperm.xlu1 %4783, %v4631_v8   ;;  %2140 = vrot.lane.b32.xlu0 %v6402_v51, %s4931_s27  ;;  %v6836_v8 = vld [vmem:[%s11225_s2 + $0x68] sm:$0xff]  ;;  %v1154_v4 = vsel %vm361_vm0, %v6340_v25, %v6348_v54 }
 0x32c   : > { %v6825_v19 = vpop.permute.xlu1 %1918 }
 0x32d   : > { %12021 = vst [vmem:[#allocation120_spill] sm:$0xff] %v6825_v19  ;;  %v6827_v37 = vpop.permute.xlu0 %1908  ;;  %v4637_v19 = vld [vmem:[%s11226_s3 + $0x60] sm:$0xff] }
 0x32e   : > { %12022 = vst [vmem:[#allocation121_spill] sm:$0xff] %v6827_v37  ;;  %2429 = vperm.xlu1 %4783, %v4632_v0   ;;  %2144 = vrot.lane.b32.xlu0 %v6434_v12, %s4931_s27  ;;  %v6848_v12 = vld [vmem:[%s11225_s2 + $0x70] sm:$0xff] }
 0x330   : > { %v6831_v35 = vpop.permute.xlu1 %1922 }
 0x331   : > { %12023 = vst [vmem:[#allocation122_spill] sm:$0xff] %v6831_v35  ;;  %v6838_v51 = vpop.permute.xlu0 %1912 }
 0x332   : > { %12024 = vst [vmem:[#allocation123_spill] sm:$0xff] %v6838_v51  ;;  %4784 = vset.pattern.permute.xlu1 %v11925_v24  ;;  %2165 = vperm.xlu0 %4780, %v6471_v45  }
 0x333   : > { %2481 = vperm.xlu1 %4784, %v6836_v8  }
 0x334   : > { %v6843_v37 = vpop.permute.xlu1 %1945 }
 0x335   : > { %12025 = vst [vmem:[#allocation124_spill] sm:$0xff] %v6843_v37  ;;  %v6850_v0 = vpop.permute.xlu0 %1916 }
 0x336   : > { %12026 = vst [vmem:[#allocation125_spill] sm:$0xff] %v6850_v0  ;;  %2177 = vperm.xlu0 %4780, %v6484_v27  }
 0x337   : > { %2486 = vperm.xlu1 %4784, %v6848_v12  }
 0x338   : > { %v6854_v58 = vpop.permute.xlu1 %1949 }
 0x339   : > { %12027 = vst [vmem:[#allocation126_spill] sm:$0xff] %v6854_v58  ;;  %v6856_v35 = vpop.permute.xlu0 %1920  ;;  %v4639_v58 = vld [vmem:[%s11226_s3 + $0x70] sm:$0xff] }
 0x33a   : > { %12028 = vst [vmem:[#allocation127_spill] sm:$0xff] %v6856_v35  ;;  %4782 = vset.pattern.permute.xlu0 %v11925_v24  ;;  %v1160_v24 = vsel %vm361_vm0, %v6352_v62, %v6344_v2  ;;  %v12033_v35 = vld [vmem:[#allocation47_spill] sm:$0xff] }
 0x33b   : > { %4785 = vset.pattern.permute.xlu1 %v11912_v56  ;;  %1088 = vperm.xlu0 %4782, %v6496_v42   ;;  %v1158_v42 = vsel %vm361_vm0, %v6348_v54, %v6340_v25  ;;  %v1164_v25 = vmul.f32 %v1154_v4, %v12033_v35  ;;  %v1107_v54 = vmul.f32 %v6136_v36, %v6221_v53 }
 0x33c   : > { %2504 = vperm.xlu1 %4785, %v4637_v19   ;;  %v6864_v37 = vpop.permute.xlu1 %1964  ;;  %v1156_v19 = vsel %vm361_vm0, %v6344_v2, %v6352_v62 }
 0x33d   : > { %12029 = vst [vmem:[#allocation128_spill] sm:$0xff] %v6864_v37  ;;  %v6866_v0 = vpop.permute.xlu0 %1941  ;;  %v1168_v62 = vmul.f32 %v1156_v19, %v12033_v35  ;;  %v1135_v19 = vadd.f32 %v6336_v30, %v1107_v54 }
 0x33e   : > { %12030 = vst [vmem:[#allocation129_spill] sm:$0xff] %v6866_v0  ;;  %v12032_v0 = vld [vmem:[#allocation46_spill] sm:$0xff] }
 0x33f   : > { %1686 = vperm.xlu0 %4782, %v6471_v45   ;;  %v1163_v37 = vmul.f32 %v1158_v42, %v12032_v0  ;;  %v1167_v2 = vmul.f32 %v1160_v24, %v12032_v0  ;;  %v4852_v45 = vld [vmem:[%s5013_s16 + $0x8] sm:$0xff]  ;;  %v4853_v42 = vld [vmem:[%s5013_s16 + $0x38] sm:$0xff]  ;;  %v1157_v24 = vsel %vm361_vm0, %v6241_v47, %v6232_v7 }
 0x340   : > { %2514 = vperm.xlu1 %4785, %v4639_v58   ;;  %v6888_v56 = vpop.permute.xlu1 %1968  ;;  %v1101_v58 = vmul.f32 %v6123_v55, %v6208_v29  ;;  %v1102_v4 = vmul.f32 %v4852_v45, %v6208_v29  ;;  %v1108_v36 = vmul.f32 %v4853_v42, %v6221_v53  ;;  %v6922_v53 = vmul.f32 %v6356_v34, %v1164_v25  ;;  %v4854_v42 = vld [vmem:[%s5013_s16 + $0x20] sm:$0xff] }
 0x341   : > { %12031 = vst [vmem:[#allocation130_spill] sm:$0xff] %v6888_v56  ;;  %v6894_v51 = vpop.permute.xlu0 %1953  ;;  %v1153_v56 = vsel %vm361_vm0, %v6232_v7, %v6241_v47  ;;  %v6919_v29 = vmul.f32 %v6356_v34, %v1163_v37  ;;  %v1214_v7 = vsel %vm426_vm1, %v6372_v50, %v6364_v61  ;;  %v6932_v47 = vld [vmem:[%s11225_s2 + $0x60] sm:$0xff]  ;;  %v1191_v37 = vmul.f32 %v6360_v41, %v1167_v2 }
 0x342   : > { %12034 = vst [vmem:[#allocation131_spill] sm:$0xff] %v6894_v51  ;;  %12037 = vst [vmem:[#allocation134_spill] sm:$0xff] %v6922_v53  ;;  %v1129_v34 = vadd.f32 %v6332_v13, %v1101_v58  ;;  %v1210_v25 = vsel %vm426_vm1, %v6364_v61, %v6372_v50  ;;  %v1130_v45 = vadd.f32 %v6332_v13, %v1102_v4  ;;  %v12040_v51 = vld [vmem:[#allocation49_spill] sm:$0xff]  ;;  %v12043_v50 = vld [vmem:[#allocation50_spill] sm:$0xff] }
 0x343   : > { %1701 = vperm.xlu0 %4782, %v6484_v27   ;;  %12036 = vst [vmem:[#allocation133_spill] sm:$0xff] %v6919_v29  ;;  %12038 = vst [vmem:[#allocation135_spill] sm:$0xff] %v6932_v47  ;;  %v6935_v27 = vld [vmem:[%s5013_s16 + $0x10] sm:$0xff]  ;;  %v1105_v29 = vmul.f32 %v4854_v42, %v6216_v39  ;;  %v1161_v53 = vmul.f32 %v1157_v24, %v12032_v0  ;;  %v1162_v2 = vmul.f32 %v1153_v56, %v12033_v35 }
 0x344   : > { %2519 = vperm.xlu1 %4785, %v4640_v63   ;;  %v6916_v55 = vpop.permute.xlu1 %1972  ;;  %v1192_v63 = vmul.f32 %v6360_v41, %v1168_v62  ;;  %v4855_v41 = vld [vmem:[%s5013_s16 + $0x28] sm:$0xff]  ;;  %v1136_v58 = vadd.f32 %v6336_v30, %v1108_v36  ;;  %v6962_v61 = vadd.f32 %v1191_v37, %v1135_v19  ;;  %v6965_v4 = vmul.f32 %v1210_v25, %v12043_v50  ;;  %v6978_v30 = vld [vmem:[%s11225_s2 + $0x78] sm:$0xff]  ;;  %v6981_v36 = vld [vmem:[%s5013_s16 + $0x30] sm:$0xff] }
 0x345   : > { %12035 = vst [vmem:[#allocation132_spill] sm:$0xff] %v6916_v55  ;;  %v1106_v62 = vmul.f32 %v4855_v41, %v6216_v39  ;;  %v6955_v55 = vmul.f32 %v1214_v7, %v12040_v51  ;;  %v1212_v56 = vsel %vm426_vm1, %v6368_v33, %v6376_v40  ;;  %v1216_v39 = vsel %vm426_vm1, %v6376_v40, %v6368_v33 }
 0x346   : > { %v6944_v54 = vpop.permute.xlu0 %1394  ;;  %12042 = vst [vmem:[#allocation138_spill] sm:$0xff] %v6962_v61  ;;  %12044 = vst [vmem:[#allocation139_spill] sm:$0xff] %v6978_v30  ;;  %v1265_v24 = vsel %vm491_vm2, %v6380_v26, %v6388_v16  ;;  %v1269_v19 = vsel %vm491_vm2, %v6388_v16, %v6380_v26  ;;  %v1155_v40 = vsel %vm361_vm0, %v6237_v17, %v6245_v23 }
 0x347   : > { %12039 = vst [vmem:[#allocation136_spill] sm:$0xff] %v6944_v54  ;;  %2476 = vperm.xlu0 %4782, %v6932_v47   ;;  %v1159_v33 = vsel %vm361_vm0, %v6245_v23, %v6237_v17  ;;  %v1267_v37 = vsel %vm491_vm2, %v6384_v44, %v6393_v11  ;;  %v1271_v26 = vsel %vm491_vm2, %v6393_v11, %v6384_v44 }
 0x348   : > { %2532 = vrot.lane.b32.xlu1 %v6935_v27, %s4918_s19  ;;  %v6960_v13 = vpop.permute.xlu1 %1976  ;;  %v1185_v16 = vmul.f32 %v6249_v21, %v1161_v53  ;;  %v1186_v25 = vmul.f32 %v6249_v21, %v1162_v2  ;;  %v7011_v42 = vadd.f32 %v1192_v63, %v1136_v58  ;;  %v1223_v17 = vmul.f32 %v1216_v39, %v12040_v51  ;;  %v7025_v53 = vld [vmem:[%s5013_s16] sm:$0xff]  ;;  %v7028_v63 = vld [vmem:[%s5013_s16 + $0x18] sm:$0xff]  ;;  %v12048_v2 = vld [vmem:[#allocation52_spill] sm:$0xff] }
 0x349   : > { %12041 = vst [vmem:[#allocation137_spill] sm:$0xff] %v6960_v13  ;;  %v1224_v23 = vmul.f32 %v1212_v56, %v12043_v50  ;;  %v1134_v11 = vadd.f32 %v6229_v43, %v1106_v62  ;;  %v1165_v44 = vmul.f32 %v1159_v33, %v12032_v0  ;;  %v1166_v21 = vmul.f32 %v1155_v40, %v12033_v35  ;;  %v12050_v56 = vld [vmem:[#allocation53_spill] sm:$0xff] }
 0x34a   : > { %v6999_v7 = vpop.permute.xlu0 %1406  ;;  %12046 = vst [vmem:[#allocation141_spill] sm:$0xff] %v7011_v42  ;;  %v7031_v58 = vmul.f32 %v1269_v19, %v12048_v2  ;;  %v7034_v39 = vmul.f32 %v1265_v24, %v12050_v56  ;;  %v7044_v62 = vadd.f32 %v1185_v16, %v1129_v34  ;;  %v7046_v40 = vadd.f32 %v1186_v25, %v1130_v45  ;;  %v7085_v16 = vld [vmem:[%s5013_s16 + $0x20] sm:$0xff]  ;;  %v7088_v25 = vld [vmem:[%s5013_s16 + $0x38] sm:$0xff] }
 0x34b   : > { %12045 = vst [vmem:[#allocation140_spill] sm:$0xff] %v6999_v7  ;;  %2491 = vperm.xlu0 %4782, %v6978_v30   ;;  %v1133_v7 = vadd.f32 %v6229_v43, %v1105_v29  ;;  %v7040_v29 = vmul.f32 %v1267_v37, %v12050_v56  ;;  %v1209_v24 = vsel %vm426_vm1, %v6255_v3, %v6263_v49 }
 0x34c   : > { %2536 = vrot.lane.b32.xlu1 %v6981_v36, %s4918_s19  ;;  %v7018_v41 = vpop.permute.xlu1 %1997  ;;  %12049 = vst [vmem:[#allocation143_spill] sm:$0xff] %v7031_v58  ;;  %12051 = vst [vmem:[#allocation144_spill] sm:$0xff] %v7034_v39  ;;  %v1213_v19 = vsel %vm426_vm1, %v6263_v49, %v6255_v3  ;;  %v1322_v33 = vsel %vm556_vm3, %v6421_v57, %v6462_v59  ;;  %v1326_v34 = vsel %vm556_vm3, %v6462_v59, %v6421_v57  ;;  %v12056_v49 = vld [vmem:[#allocation16_spill] sm:$0xff] }
 0x34d   : > { %12047 = vst [vmem:[#allocation142_spill] sm:$0xff] %v7018_v41  ;;  %v7037_v41 = vmul.f32 %v1271_v26, %v12048_v2  ;;  %12053 = vst [vmem:[#allocation146_spill] sm:$0xff] %v7044_v62  ;;  %v1215_v45 = vsel %vm426_vm1, %v6269_v31, %v6258_v14  ;;  %v1189_v37 = vmul.f32 %v12056_v49, %v1165_v44 }
 0x34e   : > { %v7042_v43 = vpop.permute.xlu0 %1966  ;;  %12054 = vst [vmem:[#allocation147_spill] sm:$0xff] %v7046_v40  ;;  %v1190_v26 = vmul.f32 %v12056_v49, %v1166_v21  ;;  %v1324_v57 = vsel %vm556_vm3, %v6443_v6, %v6476_v22  ;;  %v1211_v59 = vsel %vm426_vm1, %v6258_v14, %v6269_v31  ;;  %v1328_v44 = vsel %vm556_vm3, %v6476_v22, %v6443_v6  ;;  %v12058_v6 = vld [vmem:[#allocation17_spill] sm:$0xff]  ;;  %v12059_v22 = vld [vmem:[#allocation44_spill] sm:$0xff] }
 0x34f   : > { %12052 = vst [vmem:[#allocation145_spill] sm:$0xff] %v7042_v43  ;;  %2530 = vrot.lane.b32.xlu0 %v7025_v53, %s4918_s19  ;;  %v1217_v21 = vmul.f32 %v1213_v19, %v12040_v51  ;;  %v1218_v49 = vmul.f32 %v1209_v24, %v12043_v50  ;;  %v1221_v31 = vmul.f32 %v1215_v45, %v12040_v51  ;;  %v12060_v43 = vld [vmem:[#allocation54_spill] sm:$0xff] }
 0x350   : > { %2540 = vrot.lane.b32.xlu1 %v7028_v63, %s4918_s19  ;;  %v7072_v3 = vpop.permute.xlu1 %2005  ;;  %v1381_v54 = vsel %vm621_vm4, %v6514_v46, %v6488_v5  ;;  %v1379_v24 = vsel %vm621_vm4, %v12059_v22, %v12058_v6  ;;  %v1383_v19 = vsel %vm621_vm4, %v12058_v6, %v12059_v22  ;;  %v7116_v13 = vmul.f32 %v1326_v34, %v12060_v43  ;;  %v7139_v6 = vld [vmem:[%s5013_s16 + $0x8] sm:$0xff] }
 0x351   : > { %12055 = vst [vmem:[#allocation148_spill] sm:$0xff] %v7072_v3  ;;  %v1377_v3 = vsel %vm621_vm4, %v6488_v5, %v6514_v46  ;;  %v1222_v42 = vmul.f32 %v1211_v59, %v12043_v50  ;;  %v7128_v5 = vadd.f32 %v1189_v37, %v1133_v7  ;;  %v7130_v61 = vadd.f32 %v1190_v26, %v1134_v11  ;;  %v12065_v59 = vld [vmem:[#allocation56_spill] sm:$0xff] }
 0x352   : > { %v7100_v14 = vpop.permute.xlu0 %1970  ;;  %12061 = vst [vmem:[#allocation17_spill] sm:$0xff] %v7116_v13  ;;  %v7133_v34 = vmul.f32 %v1328_v44, %v12060_v43  ;;  %v7142_v22 = vmul.f32 %v1377_v3, %v12065_v59  ;;  %v12070_v37 = vld [vmem:[#allocation12_spill] sm:$0xff]  ;;  %v12073_v3 = vld [vmem:[#allocation21_spill] sm:$0xff] }
 0x353   : > { %12057 = vst [vmem:[#allocation16_spill] sm:$0xff] %v7100_v14  ;;  %v12062_v14 = vld [vmem:[#allocation55_spill] sm:$0xff]  ;;  %2534 = vrot.lane.b32.xlu0 %v7085_v16, %s4918_s19  ;;  %v7156_v26 = vmul.f32 %v12070_v37, %v1217_v21  ;;  %v1245_v44 = vmul.f32 %v12073_v3, %v1221_v31  ;;  %v12081_v31 = vld [vmem:[#allocation62_spill] sm:$0xff] }
 0x354   : > { %v7119_v45 = vmul.f32 %v1322_v33, %v12062_v14  ;;  %2544 = vrot.lane.b32.xlu1 %v7088_v25, %s4918_s19  ;;  %v7126_v46 = vpop.permute.xlu1 %2009  ;;  %v7136_v33 = vmul.f32 %v1324_v57, %v12062_v14  ;;  %12066 = vst [vmem:[#allocation150_spill] sm:$0xff] %v7142_v22  ;;  %v7159_v57 = vmul.f32 %v12070_v37, %v1218_v49  ;;  %v12074_v22 = vld [vmem:[#allocation11_spill] sm:$0xff]  ;;  %v12080_v49 = vld [vmem:[#allocation68_spill] sm:$0xff] }
 0x355   : > { %12064 = vst [vmem:[#allocation149_spill] sm:$0xff] %v7126_v46  ;;  %v7148_v46 = vmul.f32 %v1379_v24, %v12065_v59  ;;  %12071 = vst [vmem:[#allocation12_spill] sm:$0xff] %v7156_v26  ;;  %v1434_v37 = vsel %vm686_vm5, %v12081_v31, %v12080_v49 }
 0x356   : > { %12063 = vst [vmem:[#allocation44_spill] sm:$0xff] %v7119_v45  ;;  %v12067_v45 = vld [vmem:[#allocation57_spill] sm:$0xff]  ;;  %v7153_v11 = vpop.permute.xlu0 %1974  ;;  %12072 = vst [vmem:[#allocation153_spill] sm:$0xff] %v7159_v57 }
 0x357   : > { %v7145_v13 = vmul.f32 %v1381_v54, %v12067_v45  ;;  %v7151_v7 = vmul.f32 %v1383_v19, %v12067_v45  ;;  %12069 = vst [vmem:[#allocation152_spill] sm:$0xff] %v7153_v11  ;;  %v12075_v54 = vld [vmem:[#allocation19_spill] sm:$0xff]  ;;  %2538 = vrot.lane.b32.xlu0 %v7139_v6, %s4918_s19 }
 0x358   : > { %v1270_v24 = vsel %vm491_vm2, %v12075_v54, %v12074_v22  ;;  %v12076_v19 = vld [vmem:[#allocation15_spill] sm:$0xff]  ;;  %2567 = vperm.xlu1 %4785, %v6836_v8   ;;  %v7176_v21 = vpop.permute.xlu1 %2022  ;;  %v1266_v62 = vsel %vm491_vm2, %v12074_v22, %v12075_v54  ;;  %v12088_v54 = vld [vmem:[#allocation18_spill] sm:$0xff] }
 0x359   : > { %12068 = vst [vmem:[#allocation151_spill] sm:$0xff] %v7145_v13  ;;  %v1246_v13 = vmul.f32 %v12073_v3, %v1222_v42  ;;  %v7168_v40 = vmul.f32 %v12076_v19, %v1223_v17  ;;  %v7171_v11 = vmul.f32 %v12076_v19, %v1224_v23  ;;  %12079 = vst [vmem:[#allocation19_spill] sm:$0xff] %v7176_v21  ;;  %v12082_v17 = vld [vmem:[#allocation7_spill] sm:$0xff]  ;;  %v12083_v23 = vld [vmem:[#allocation60_spill] sm:$0xff] }
 0x35a   : > { %v1438_v42 = vsel %vm686_vm5, %v12080_v49, %v12081_v31  ;;  %v1436_v3 = vsel %vm686_vm5, %v12083_v23, %v12082_v17  ;;  %v1440_v19 = vsel %vm686_vm5, %v12082_v17, %v12083_v23  ;;  %v7195_v21 = vld [vmem:[%s5013_s16 + $0x28] sm:$0xff]  ;;  %v12084_v49 = vld [vmem:[#allocation14_spill] sm:$0xff]  ;;  %v7210_v17 = vpop.permute.xlu0 %1978  ;;  %v12087_v23 = vld [vmem:[#allocation64_spill] sm:$0xff]  ;;  %v1302_v20 = vmul.f32 %v12088_v54, %v7040_v29 }
 0x35b   : > { %12077 = vst [vmem:[#allocation21_spill] sm:$0xff] %v7168_v40  ;;  %12078 = vst [vmem:[#allocation11_spill] sm:$0xff] %v7171_v11  ;;  %v1275_v11 = vmul.f32 %v1270_v24, %v12048_v2  ;;  %v12085_v31 = vld [vmem:[#allocation10_spill] sm:$0xff]  ;;  %v1489_v26 = vsel %vm751_vm6, %v12087_v23, %v6596_v18  ;;  %v1493_v22 = vsel %vm751_vm6, %v6596_v18, %v12087_v23  ;;  %2542 = vrot.lane.b32.xlu0 %v7195_v21, %s4918_s19 }
 0x35c   : > { %v1268_v40 = vsel %vm491_vm2, %v12085_v31, %v12084_v49  ;;  %v1272_v57 = vsel %vm491_vm2, %v12084_v49, %v12085_v31  ;;  %12086 = vst [vmem:[#allocation15_spill] sm:$0xff] %v7210_v17  ;;  %v1301_v24 = vmul.f32 %v12088_v54, %v7037_v41  ;;  %v7225_v49 = vmul.f32 %v1434_v37, %v12089_v48  ;;  %v12091_v31 = vld [vmem:[#allocation59_spill] sm:$0xff]  ;;  %v7236_v18 = vpop.permute.xlu1 %2026 }
 0x35d   : > { %v7228_v17 = vmul.f32 %v1438_v42, %v12091_v31  ;;  %v7231_v47 = vmul.f32 %v1436_v3, %v12089_v48  ;;  %2575 = vperm.xlu1 %4785, %v6978_v30   ;;  %12093 = vst [vmem:[#allocation7_spill] sm:$0xff] %v7236_v18  ;;  %v7239_v41 = vmul.f32 %v1440_v19, %v12091_v31  ;;  %v12096_v3 = vld [vmem:[#allocation66_spill] sm:$0xff]  ;;  %v12098_v54 = vld [vmem:[#allocation67_spill] sm:$0xff]  ;;  %v12101_v30 = vld [vmem:[#allocation8_spill] sm:$0xff] }
 0x35e   : > { %12090 = vst [vmem:[#allocation68_spill] sm:$0xff] %v7225_v49  ;;  %v1276_v29 = vmul.f32 %v1266_v62, %v12050_v56  ;;  %v7243_v37 = vmul.f32 %v1272_v57, %v12048_v2  ;;  %v7246_v42 = vmul.f32 %v1268_v40, %v12050_v56  ;;  %v7249_v23 = vmul.f32 %v1489_v26, %v12096_v3  ;;  %v12100_v49 = vld [vmem:[#allocation13_spill] sm:$0xff]  ;;  %v7262_v57 = vpop.permute.xlu0 %2001  ;;  %v12103_v40 = vld [vmem:[#allocation2_spill] sm:$0xff] }
 0x35f   : > { %12092 = vst [vmem:[#allocation62_spill] sm:$0xff] %v7228_v17  ;;  %v7252_v17 = vmul.f32 %v1493_v22, %v12098_v54  ;;  %v1491_v19 = vsel %vm751_vm6, %v12101_v30, %v12100_v49  ;;  %v1495_v62 = vsel %vm751_vm6, %v12100_v49, %v12101_v30  ;;  %12102 = vst [vmem:[#allocation18_spill] sm:$0xff] %v7262_v57  ;;  %v12105_v22 = vld [vmem:[#allocation22_spill] sm:$0xff]  ;;  %2586 = vrot.lane.b32.xlu0 %v7025_v53, %s4920_s20  ;;  %v12109_v49 = vld [vmem:[#allocation75_spill] sm:$0xff] }
 0x360   : > { %12094 = vst [vmem:[#allocation60_spill] sm:$0xff] %v7243_v37  ;;  %12095 = vst [vmem:[#allocation14_spill] sm:$0xff] %v7246_v42  ;;  %v7265_v18 = vmul.f32 %v12103_v40, %v1275_v11  ;;  %v1597_v26 = vadd.f32 %v1301_v24, %v1245_v44  ;;  %v12104_v42 = vld [vmem:[#allocation23_spill] sm:$0xff]  ;;  %v12107_v56 = vld [vmem:[#allocation26_spill] sm:$0xff]  ;;  %v7290_v11 = vmul.f32 %v12103_v40, %v1276_v29 }
 0x361   : > { %12097 = vst [vmem:[#allocation10_spill] sm:$0xff] %v7249_v23  ;;  %12099 = vst [vmem:[#allocation64_spill] sm:$0xff] %v7252_v17  ;;  %v1598_v23 = vadd.f32 %v1302_v20, %v1246_v13  ;;  %v1325_v17 = vsel %vm556_vm3, %v12105_v22, %v12104_v42  ;;  %v1321_v15 = vsel %vm556_vm3, %v12104_v42, %v12105_v22  ;;  %2588 = vrot.lane.b32.xlu1 %v6935_v27, %s4920_s20  ;;  %v7287_v13 = vpop.permute.xlu1 %2030  ;;  %v12110_v42 = vld [vmem:[#allocation24_spill] sm:$0xff]  ;;  %v12112_v29 = vld [vmem:[#allocation77_spill] sm:$0xff] }
 0x362   : > { %v1323_v30 = vsel %vm556_vm3, %v12107_v56, %v12106_v32  ;;  %v1327_v20 = vsel %vm556_vm3, %v12106_v32, %v12107_v56  ;;  %12108 = vst [vmem:[#allocation13_spill] sm:$0xff] %v7287_v13  ;;  %v1501_v44 = vmul.f32 %v1491_v19, %v12096_v3  ;;  %v1502_v24 = vmul.f32 %v1495_v62, %v12098_v54  ;;  %v12113_v40 = vld [vmem:[#allocation73_spill] sm:$0xff]  ;;  %v12114_v62 = vld [vmem:[#allocation38_spill] sm:$0xff] }
 0x363   : > { %v1546_v32 = vsel %vm816_vm7, %v12110_v42, %v12109_v49  ;;  %v12111_v56 = vmov 1   ;;  %v1329_v22 = vmul.f32 %v1325_v17, %v12060_v43  ;;  %v1550_v13 = vsel %vm816_vm7, %v12109_v49, %v12110_v42  ;;  %v12115_v57 = vld [vmem:[#allocation45_spill] sm:$0xff]  ;;  %v7319_v42 = vpop.permute.xlu0 %1454  ;;  %2590 = vrot.lane.b32.xlu0 %v7085_v16, %s4920_s20 }
 0x364   : > { %4786 = vset.pattern.permute.xlu1 %v12111_v56  ;;  %v1548_v19 = vsel %vm816_vm7, %v12113_v40, %v12112_v29  ;;  %v1439_v2 = vsel %vm686_vm5, %v12115_v57, %v12114_v62  ;;  %v1330_v37 = vmul.f32 %v1321_v15, %v12062_v14  ;;  %v1333_v56 = vmul.f32 %v1327_v20, %v12060_v43 }
 0x365   : > { %v1334_v17 = vmul.f32 %v1323_v30, %v12062_v14  ;;  %v1552_v49 = vsel %vm816_vm7, %v12112_v29, %v12113_v40  ;;  %12116 = vst [vmem:[#allocation8_spill] sm:$0xff] %v7319_v42  ;;  %v7322_v39 = vadd.f32 %v1597_v26, %v7128_v5  ;;  %v7325_v58 = vadd.f32 %v1598_v23, %v7130_v61  ;;  %v7334_v15 = vpop.permute.xlu1 %2034  ;;  %v12121_v30 = vld [vmem:[#allocation72_spill] sm:$0xff]  ;;  %v12127_v40 = vld [vmem:[#allocation29_spill] sm:$0xff]  ;;  %v12140_v42 = vld [vmem:[#allocation63_spill] sm:$0xff] }
 0x366   : > { %v7328_v9 = vmul.f32 %v1546_v32, %v12118_v10  ;;  %2592 = vrot.lane.b32.xlu1 %v6981_v36, %s4920_s20  ;;  %12120 = vst [vmem:[#allocation22_spill] sm:$0xff] %v7334_v15  ;;  %v7337_v20 = vmul.f32 %v1550_v13, %v12121_v30  ;;  %v7340_v5 = vmul.f32 %v1548_v19, %v12118_v10  ;;  %v12125_v32 = vld [vmem:[#allocation35_spill] sm:$0xff] }
 0x367   : > { %12117 = vst [vmem:[#allocation2_spill] sm:$0xff] %v7322_v39  ;;  %v1435_v61 = vsel %vm686_vm5, %v12114_v62, %v12115_v57  ;;  %v1446_v23 = vmul.f32 %v1439_v2, %v12091_v31  ;;  %v7348_v26 = vmul.f32 %v1552_v49, %v12121_v30  ;;  %v7351_v29 = vmul.f32 %v12125_v32, %v1329_v22  ;;  %v12128_v39 = vld [vmem:[#allocation37_spill] sm:$0xff]  ;;  %v12130_v2 = vld [vmem:[#allocation32_spill] sm:$0xff] }
 0x368   : > { %12119 = vst [vmem:[#allocation23_spill] sm:$0xff] %v7328_v9  ;;  %12122 = vst [vmem:[#allocation39_spill] sm:$0xff] %v7337_v20  ;;  %v1378_v13 = vsel %vm621_vm4, %v12128_v39, %v12127_v40  ;;  %v1382_v19 = vsel %vm621_vm4, %v12127_v40, %v12128_v39  ;;  %v7362_v57 = vmul.f32 %v12125_v32, %v1330_v37  ;;  %v12131_v22 = vld [vmem:[#allocation28_spill] sm:$0xff]  ;;  %v12134_v9 = vld [vmem:[#allocation31_spill] sm:$0xff]  ;;  %2594 = vrot.lane.b32.xlu0 %v7139_v6, %s4920_s20 }
 0x369   : > { %12123 = vst [vmem:[#allocation26_spill] sm:$0xff] %v7340_v5  ;;  %12124 = vst [vmem:[#allocation75_spill] sm:$0xff] %v7348_v26  ;;  %v1357_v62 = vmul.f32 %v12130_v2, %v1333_v56  ;;  %v1358_v49 = vmul.f32 %v12130_v2, %v1334_v17  ;;  %v7368_v5 = vmul.f32 %v12131_v22, %v7133_v34  ;;  %v7370_v26 = vpop.permute.xlu0 %2020  ;;  %v12135_v20 = vld [vmem:[#allocation33_spill] sm:$0xff]  ;;  %v7385_v34 = vpop.permute.xlu1 %2057  ;;  %v12138_v2 = vld [vmem:[#allocation70_spill] sm:$0xff] }
 0x36a   : > { %12126 = vst [vmem:[#allocation24_spill] sm:$0xff] %v7351_v29  ;;  %12129 = vst [vmem:[#allocation77_spill] sm:$0xff] %v7362_v57  ;;  %v1380_v15 = vsel %vm621_vm4, %v12135_v20, %v12134_v9  ;;  %v1384_v39 = vsel %vm621_vm4, %v12134_v9, %v12135_v20  ;;  %v1445_v37 = vmul.f32 %v1435_v61, %v12089_v48  ;;  %2596 = vrot.lane.b32.xlu1 %v7028_v63, %s4920_s20  ;;  %v12137_v32 = vld [vmem:[#allocation41_spill] sm:$0xff]  ;;  %v12139_v9 = vld [vmem:[#allocation30_spill] sm:$0xff] }
 0x36b   : > { %12132 = vst [vmem:[#allocation73_spill] sm:$0xff] %v7368_v5  ;;  %12133 = vst [vmem:[#allocation38_spill] sm:$0xff] %v7370_v26  ;;  %v1387_v56 = vmul.f32 %v1378_v13, %v12065_v59  ;;  %v1388_v17 = vmul.f32 %v1382_v19, %v12067_v45  ;;  %v1470_v40 = vmul.f32 %v12137_v32, %v1446_v23  ;;  %v12141_v5 = vld [vmem:[#allocation42_spill] sm:$0xff]  ;;  %v12146_v19 = vld [vmem:[#allocation36_spill] sm:$0xff] }
 0x36c   : > { %12136 = vst [vmem:[#allocation45_spill] sm:$0xff] %v7385_v34  ;;  %v1526_v26 = vmul.f32 %v12138_v2, %v1502_v24  ;;  %v1413_v20 = vmul.f32 %v12139_v9, %v7148_v46  ;;  %v1414_v61 = vmul.f32 %v12139_v9, %v7151_v7  ;;  %v1433_v57 = vsel %vm686_vm5, %v12141_v5, %v12140_v42  ;;  %v12145_v7 = vld [vmem:[#allocation40_spill] sm:$0xff] }
 0x36d   : > { %v1437_v13 = vsel %vm686_vm5, %v12140_v42, %v12141_v5  ;;  %v7405_v23 = vmul.f32 %v12131_v22, %v7136_v33  ;;  %v7408_v24 = vmul.f32 %v1380_v15, %v12065_v59  ;;  %v7411_v46 = vmul.f32 %v1384_v39, %v12067_v45  ;;  %v7417_v34 = vpop.permute.xlu0 %2024  ;;  %2598 = vrot.lane.b32.xlu0 %v7195_v21, %s4920_s20  ;;  %v7429_v15 = vpop.permute.xlu1 %2061  ;;  %v12149_v5 = vld [vmem:[#allocation34_spill] sm:$0xff] }
 0x36e   : > { %v1490_v9 = vsel %vm751_vm6, %v12146_v19, %v12145_v7  ;;  %12147 = vst [vmem:[#allocation32_spill] sm:$0xff] %v7417_v34  ;;  %v1469_v29 = vmul.f32 %v12137_v32, %v1445_v37  ;;  %v1494_v33 = vsel %vm751_vm6, %v12145_v7, %v12146_v19  ;;  %v1525_v42 = vmul.f32 %v12138_v2, %v1501_v44 }
 0x36f   : > { %12142 = vst [vmem:[#allocation35_spill] sm:$0xff] %v7405_v23  ;;  %12143 = vst [vmem:[#allocation29_spill] sm:$0xff] %v7408_v24  ;;  %2600 = vrot.lane.b32.xlu1 %v7088_v25, %s4920_s20  ;;  %v7432_v22 = vmul.f32 %v12149_v5, %v1387_v56  ;;  %v1441_v39 = vmul.f32 %v1433_v57, %v12089_v48  ;;  %v1442_v37 = vmul.f32 %v1437_v13, %v12091_v31  ;;  %v12150_v23 = vld [vmem:[#allocation51_spill] sm:$0xff]  ;;  %v12153_v24 = vld [vmem:[#allocation9_spill] sm:$0xff] }
 0x370   : > { %12144 = vst [vmem:[#allocation37_spill] sm:$0xff] %v7411_v46  ;;  %12148 = vst [vmem:[#allocation28_spill] sm:$0xff] %v7429_v15  ;;  %v1614_v32 = vadd.f32 %v1526_v26, %v1470_v40  ;;  %v7437_v7 = vmul.f32 %v12149_v5, %v1388_v17  ;;  %v1605_v44 = vadd.f32 %v1413_v20, %v1357_v62  ;;  %v12151_v46 = vld [vmem:[#allocation48_spill] sm:$0xff]  ;;  %v12152_v15 = vld [vmem:[#allocation3_spill] sm:$0xff] }
 0x371   : > { %v1606_v2 = vadd.f32 %v1414_v61, %v1358_v49  ;;  %v1499_v19 = vmul.f32 %v1490_v9, %v12096_v3  ;;  %v1500_v34 = vmul.f32 %v1494_v33, %v12098_v54  ;;  %v1492_v56 = vsel %vm751_vm6, %v12151_v46, %v12150_v23  ;;  %v7453_v62 = vpop.permute.xlu0 %2028  ;;  %v12155_v40 = vld [vmem:[#allocation69_spill] sm:$0xff]  ;;  %2644 = vrot.lane.b32.xlu0 %v6935_v27, %s4921_s22  ;;  %v7466_v13 = vpop.permute.xlu1 %2076 }
 0x372   : > { %v1545_v57 = vsel %vm816_vm7, %v12153_v24, %v12152_v15  ;;  %v1549_v26 = vsel %vm816_vm7, %v12152_v15, %v12153_v24  ;;  %12154 = vst [vmem:[#allocation31_spill] sm:$0xff] %v7453_v62  ;;  %v1496_v49 = vsel %vm751_vm6, %v12150_v23, %v12151_v46  ;;  %v1613_v17 = vadd.f32 %v1525_v42, %v1469_v29  ;;  %v12156_v20 = vld [vmem:[#allocation65_spill] sm:$0xff]  ;;  %v12161_v29 = vld [vmem:[#allocation43_spill] sm:$0xff] }
 0x373   : > { %v1551_v61 = vsel %vm816_vm7, %v12156_v20, %v12155_v40  ;;  %2623 = vperm.xlu1 %4786, %v6836_v8   ;;  %12157 = vst [vmem:[#allocation33_spill] sm:$0xff] %v7466_v13  ;;  %v12158_v24 = vld [vmem:[#allocation25_spill] sm:$0xff]  ;;  %v7476_v23 = vmul.f32 %v12161_v29, %v7231_v47  ;;  %v1630_v46 = vadd.f32 %v1614_v32, %v1606_v2 }
 0x374   : > { %v7469_v9 = vmul.f32 %v12158_v24, %v1441_v39  ;;  %v7472_v33 = vmul.f32 %v12158_v24, %v1442_v37  ;;  %v7480_v42 = vmul.f32 %v12161_v29, %v7239_v41  ;;  %v1553_v15 = vmul.f32 %v1545_v57, %v12118_v10  ;;  %v12166_v41 = vld [vmem:[#allocation20_spill] sm:$0xff]  ;;  %v12167_v57 = vld [vmem:[#allocation61_spill] sm:$0xff] }
 0x375   : > { %12162 = vst [vmem:[#allocation30_spill] sm:$0xff] %v7476_v23  ;;  %v1554_v5 = vmul.f32 %v1549_v26, %v12121_v30  ;;  %v1547_v39 = vsel %vm816_vm7, %v12155_v40, %v12156_v20  ;;  %v7489_v37 = vmul.f32 %v1492_v56, %v12096_v3  ;;  %v7492_v47 = vmul.f32 %v1496_v49, %v12098_v54  ;;  %v7497_v24 = vpop.permute.xlu0 %2032  ;;  %v7510_v56 = vpop.permute.xlu1 %2080  ;;  %v12173_v20 = vld [vmem:[#allocation82_spill] sm:$0xff]  ;;  %v12189_v23 = vld [vmem:[#allocation84_spill] sm:$0xff]  ;;  %v12237_v62 = vld [vmem:[#allocation21_spill] sm:$0xff] }
 0x376   : > { %12159 = vst [vmem:[#allocation41_spill] sm:$0xff] %v7469_v9  ;;  %12160 = vst [vmem:[#allocation70_spill] sm:$0xff] %v7472_v33  ;;  %v1558_v32 = vmul.f32 %v1551_v61, %v12121_v30  ;;  %v1706_v2 = vmul.f32 %v12166_v41, %v6407_v28  ;;  %v7500_v26 = vmul.f32 %v12167_v57, %v1499_v19  ;;  %2648 = vrot.lane.b32.xlu0 %v6981_v36, %s4921_s22  ;;  %v12172_v19 = vld [vmem:[#allocation86_spill] sm:$0xff] }
 0x377   : > { %12163 = vst [vmem:[#allocation63_spill] sm:$0xff] %v7480_v42  ;;  %12164 = vst [vmem:[#allocation42_spill] sm:$0xff] %v7489_v37  ;;  %v7503_v29 = vmul.f32 %v12167_v57, %v1500_v34  ;;  %v7505_v40 = vadd.f32 %v1613_v17, %v1605_v44  ;;  %2627 = vperm.xlu1 %4786, %v6848_v12   ;;  %v7513_v28 = vmul.f32 %v1547_v39, %v12118_v10  ;;  %v12174_v17 = vld [vmem:[#allocation6_spill] sm:$0xff]  ;;  %v12177_v57 = vld [vmem:[#allocation87_spill] sm:$0xff] }
 0x378   : > { %12165 = vst [vmem:[#allocation40_spill] sm:$0xff] %v7492_v47  ;;  %12169 = vst [vmem:[#allocation34_spill] sm:$0xff] %v7510_v56  ;;  %v7516_v49 = vadd.f32 %v1630_v46, %v7325_v58  ;;  %v1757_v34 = vsel %vm361_vm0, %v12173_v20, %v12172_v19  ;;  %v1761_v44 = vsel %vm361_vm0, %v12172_v19, %v12173_v20  ;;  %v12178_v58 = vld [vmem:[#allocation83_spill] sm:$0xff]  ;;  %v12193_v54 = vld [vmem:[#allocation78_spill] sm:$0xff] }
 0x379   : > { %12168 = vst [vmem:[#allocation36_spill] sm:$0xff] %v7505_v40  ;;  %12170 = vst [vmem:[#allocation51_spill] sm:$0xff] %v7513_v28  ;;  %v7527_v61 = vmul.f32 %v12174_v17, %v1553_v15  ;;  %v7530_v39 = vmul.f32 %v12174_v17, %v1554_v5  ;;  %v1758_v46 = vsel %vm361_vm0, %v12178_v58, %v12177_v57  ;;  %v4856_v15 = vld [vmem:[%s5013_s16 + $0x58] sm:$0xff]  ;;  %v7550_v30 = vpop.permute.xlu0 %2053 }
 0x37a   : > { %12171 = vst [vmem:[#allocation48_spill] sm:$0xff] %v7516_v49  ;;  %v1762_v40 = vsel %vm361_vm0, %v12177_v57, %v12178_v58  ;;  %v12179_v49 = vld [vmem:[#allocation5_spill] sm:$0xff]  ;;  %v1707_v20 = vmul.f32 %v4856_v15, %v12166_v41  ;;  %12184 = vst [vmem:[#allocation65_spill] sm:$0xff] %v7550_v30  ;;  %v1767_v58 = vmul.f32 %v1757_v34, %v12033_v35  ;;  %2652 = vrot.lane.b32.xlu0 %v7028_v63, %s4921_s22  ;;  %v7562_v41 = vpop.permute.xlu1 %2084  ;;  %v12186_v15 = vld [vmem:[#allocation74_spill] sm:$0xff] }
 0x37b   : > { %12175 = vst [vmem:[#allocation3_spill] sm:$0xff] %v7527_v61  ;;  %12176 = vst [vmem:[#allocation9_spill] sm:$0xff] %v7530_v39  ;;  %v7541_v19 = vmul.f32 %v12179_v49, %v1558_v32  ;;  %v12181_v61 = vld [vmem:[#allocation79_spill] sm:$0xff]  ;;  %v12182_v17 = vld [vmem:[#allocation85_spill] sm:$0xff]  ;;  %v1766_v32 = vmul.f32 %v1761_v44, %v12032_v0  ;;  %2642 = vrot.lane.b32.xlu1 %v7025_v53, %s4921_s22  ;;  %v1769_v44 = vmul.f32 %v1758_v46, %v12033_v35 }
 0x37c   : > { %v1734_v5 = vadd.f32 %v12181_v61, %v1706_v2  ;;  %v12183_v28 = vld [vmem:[#allocation81_spill] sm:$0xff]  ;;  %12185 = vst [vmem:[#allocation25_spill] sm:$0xff] %v7562_v41  ;;  %v4857_v2 = vld [vmem:[%s5013_s16 + $0x60] sm:$0xff]  ;;  %v4858_v49 = vld [vmem:[%s5013_s16 + $0x68] sm:$0xff]  ;;  %v1735_v30 = vadd.f32 %v12181_v61, %v1707_v20 }
 0x37d   : > { %12180 = vst [vmem:[#allocation69_spill] sm:$0xff] %v7541_v19  ;;  %v1756_v39 = vsel %vm361_vm0, %v12183_v28, %v12182_v17  ;;  %v1760_v57 = vsel %vm361_vm0, %v12182_v17, %v12183_v28  ;;  %v1708_v19 = vmul.f32 %v4857_v2, %v12186_v15  ;;  %v1709_v10 = vmul.f32 %v4858_v49, %v12186_v15  ;;  %v12188_v34 = vld [vmem:[#allocation88_spill] sm:$0xff]  ;;  %v12190_v2 = vld [vmem:[#allocation90_spill] sm:$0xff]  ;;  %v12191_v15 = vld [vmem:[#allocation91_spill] sm:$0xff]  ;;  %v7585_v33 = vpop.permute.xlu0 %2065 }
 0x37e   : > { %v1768_v28 = vmul.f32 %v1762_v40, %v12032_v0  ;;  %v12187_v17 = vmov 2   ;;  %v1759_v42 = vsel %vm361_vm0, %v12189_v23, %v12188_v34  ;;  %v1763_v9 = vsel %vm361_vm0, %v12188_v34, %v12189_v23  ;;  %12192 = vst [vmem:[#allocation43_spill] sm:$0xff] %v7585_v33  ;;  %2656 = vrot.lane.b32.xlu0 %v7088_v25, %s4921_s22 }
 0x37f   : > { %4787 = vset.pattern.permute.xlu1 %v12187_v17  ;;  %v1790_v37 = vmul.f32 %v12190_v2, %v1766_v32  ;;  %v1791_v49 = vmul.f32 %v12190_v2, %v1767_v58  ;;  %v1764_v40 = vmul.f32 %v1760_v57, %v12032_v0  ;;  %v1765_v46 = vmul.f32 %v1756_v39, %v12033_v35  ;;  %v7594_v57 = vpop.permute.xlu1 %2088  ;;  %v12195_v58 = vld [vmem:[#allocation89_spill] sm:$0xff]  ;;  %v12200_v2 = vld [vmem:[#allocation94_spill] sm:$0xff] }
 0x380   : > { %v1792_v17 = vmul.f32 %v12191_v15, %v1768_v28  ;;  %v1793_v47 = vmul.f32 %v12191_v15, %v1769_v44  ;;  %v1736_v3 = vadd.f32 %v12193_v54, %v1708_v19  ;;  %v1737_v23 = vadd.f32 %v12193_v54, %v1709_v10  ;;  %2646 = vrot.lane.b32.xlu1 %v7085_v16, %s4921_s22  ;;  %v12198_v54 = vld [vmem:[#allocation93_spill] sm:$0xff] }
 0x381   : > { %12194 = vst [vmem:[#allocation20_spill] sm:$0xff] %v7594_v57  ;;  %v1770_v39 = vmul.f32 %v1763_v9, %v12032_v0  ;;  %v1771_v32 = vmul.f32 %v1759_v42, %v12033_v35  ;;  %v7599_v28 = vmul.f32 %v12195_v58, %v1764_v40  ;;  %v7602_v61 = vmul.f32 %v12195_v58, %v1765_v46  ;;  %v12199_v42 = vld [vmem:[#allocation98_spill] sm:$0xff]  ;;  %v12206_v46 = vld [vmem:[#allocation92_spill] sm:$0xff]  ;;  %v12208_v58 = vld [vmem:[#allocation97_spill] sm:$0xff] }
 0x382   : > { %v7604_v19 = vadd.f32 %v1790_v37, %v1734_v5  ;;  %v7606_v10 = vadd.f32 %v1791_v49, %v1735_v30  ;;  %v1243_v20 = vmul.f32 %v12198_v54, %v6955_v55  ;;  %v1244_v44 = vmul.f32 %v12198_v54, %v6965_v4  ;;  %v12201_v37 = vld [vmem:[#allocation99_spill] sm:$0xff]  ;;  %2698 = vrot.lane.b32.xlu0 %v7025_v53, %s4923_s23 }
 0x383   : > { %12196 = vst [vmem:[#allocation61_spill] sm:$0xff] %v7599_v28  ;;  %12197 = vst [vmem:[#allocation86_spill] sm:$0xff] %v7602_v61  ;;  %v7612_v34 = vadd.f32 %v1792_v17, %v1736_v3  ;;  %v7614_v9 = vadd.f32 %v1793_v47, %v1737_v23  ;;  %v1813_v40 = vsel %vm426_vm1, %v12200_v2, %v12199_v42  ;;  %v12202_v5 = vld [vmem:[#allocation95_spill] sm:$0xff]  ;;  %v12203_v3 = vld [vmem:[#allocation96_spill] sm:$0xff]  ;;  %v7640_v49 = vpop.permute.xlu1 %2109 }
 0x384   : > { %v1817_v30 = vsel %vm426_vm1, %v12199_v42, %v12200_v2  ;;  %v1812_v55 = vsel %vm426_vm1, %v12202_v5, %v12201_v37  ;;  %v1816_v4 = vsel %vm426_vm1, %v12201_v37, %v12202_v5  ;;  %v12204_v47 = vld [vmem:[#allocation100_spill] sm:$0xff]  ;;  %2650 = vrot.lane.b32.xlu1 %v7139_v6, %s4921_s22  ;;  %12205 = vst [vmem:[#allocation82_spill] sm:$0xff] %v7640_v49  ;;  %v7657_v2 = vpop.permute.xlu0 %1506  ;;  %v12226_v61 = vld [vmem:[#allocation53_spill] sm:$0xff] }
 0x385   : > { %v1819_v17 = vsel %vm426_vm1, %v12204_v47, %v12203_v3  ;;  %v7643_v15 = vmul.f32 %v12206_v46, %v1770_v39  ;;  %v1815_v23 = vsel %vm426_vm1, %v12203_v3, %v12204_v47  ;;  %v1814_v54 = vsel %vm426_vm1, %v12208_v58, %v6737_v60  ;;  %12209 = vst [vmem:[#allocation87_spill] sm:$0xff] %v7657_v2  ;;  %v12236_v2 = vld [vmem:[#allocation112_spill] sm:$0xff] }
 0x386   : > { %v1818_v42 = vsel %vm426_vm1, %v6737_v60, %v12208_v58  ;;  %v7660_v39 = vmul.f32 %v12206_v46, %v1771_v32  ;;  %v7663_v37 = vadd.f32 %v7265_v18, %v1243_v20  ;;  %v7666_v5 = vadd.f32 %v7290_v11, %v1244_v44  ;;  %2702 = vrot.lane.b32.xlu0 %v7085_v16, %s4923_s23 }
 0x387   : > { %12207 = vst [vmem:[#allocation6_spill] sm:$0xff] %v7643_v15  ;;  %v1822_v3 = vmul.f32 %v1817_v30, %v12040_v51  ;;  %v1823_v47 = vmul.f32 %v1813_v40, %v12043_v50  ;;  %v1820_v35 = vmul.f32 %v1816_v4, %v12040_v51  ;;  %v1821_v0 = vmul.f32 %v1812_v55, %v12043_v50  ;;  %v7680_v11 = vpop.permute.xlu1 %2117  ;;  %v12214_v40 = vld [vmem:[#allocation105_spill] sm:$0xff]  ;;  %v12222_v15 = vld [vmem:[#allocation104_spill] sm:$0xff] }
 0x388   : > { %12210 = vst [vmem:[#allocation83_spill] sm:$0xff] %v7660_v39  ;;  %12211 = vst [vmem:[#allocation79_spill] sm:$0xff] %v7663_v37  ;;  %v1826_v60 = vmul.f32 %v1819_v17, %v12040_v51  ;;  %v1827_v58 = vmul.f32 %v1815_v23, %v12043_v50  ;;  %v1824_v32 = vmul.f32 %v1818_v42, %v12040_v51  ;;  %2654 = vrot.lane.b32.xlu1 %v7195_v21, %s4921_s22  ;;  %v7694_v4 = vpop.permute.xlu0 %1518  ;;  %v12216_v17 = vld [vmem:[#allocation101_spill] sm:$0xff]  ;;  %v12217_v23 = vld [vmem:[#allocation102_spill] sm:$0xff] }
 0x389   : > { %12212 = vst [vmem:[#allocation85_spill] sm:$0xff] %v7666_v5  ;;  %v1825_v18 = vmul.f32 %v1814_v54, %v12043_v50  ;;  %12213 = vst [vmem:[#allocation81_spill] sm:$0xff] %v7680_v11  ;;  %v1846_v20 = vmul.f32 %v6739_v52, %v1822_v3  ;;  %v7684_v44 = vmul.f32 %v6739_v52, %v1823_v47  ;;  %v12218_v42 = vld [vmem:[#allocation143_spill] sm:$0xff]  ;;  %v12219_v3 = vld [vmem:[#allocation106_spill] sm:$0xff] }
 0x38a   : > { %v1870_v30 = vsel %vm491_vm2, %v12214_v40, %v6774_v1  ;;  %v1874_v55 = vsel %vm491_vm2, %v6774_v1, %v12214_v40  ;;  %12215 = vst [vmem:[#allocation74_spill] sm:$0xff] %v7694_v4  ;;  %v1844_v46 = vmul.f32 %v12216_v17, %v1820_v35  ;;  %v1848_v54 = vmul.f32 %v12217_v23, %v1824_v32  ;;  %v12220_v47 = vld [vmem:[#allocation144_spill] sm:$0xff]  ;;  %v12221_v39 = vld [vmem:[#allocation107_spill] sm:$0xff] }
 0x38b   : > { %v1297_v52 = vmul.f32 %v12219_v3, %v12218_v42  ;;  %v1298_v50 = vmul.f32 %v12219_v3, %v12220_v47  ;;  %v1849_v51 = vmul.f32 %v12217_v23, %v1825_v18  ;;  %v1868_v37 = vsel %vm491_vm2, %v12222_v15, %v12221_v39  ;;  %v12223_v35 = vld [vmem:[#allocation60_spill] sm:$0xff]  ;;  %v12227_v3 = vld [vmem:[#allocation109_spill] sm:$0xff]  ;;  %2706 = vrot.lane.b32.xlu0 %v7139_v6, %s4923_s23  ;;  %v12229_v23 = vld [vmem:[#allocation135_spill] sm:$0xff]  ;;  %v7722_v33 = vpop.permute.xlu1 %2121 }
 0x38c   : > { %v1872_v1 = vsel %vm491_vm2, %v12221_v39, %v12222_v15  ;;  %v12224_v32 = vld [vmem:[#allocation108_spill] sm:$0xff]  ;;  %v1881_v28 = vmul.f32 %v1870_v30, %v12226_v61  ;;  %v12228_v47 = vld [vmem:[#allocation113_spill] sm:$0xff]  ;;  %2675 = vperm.xlu1 %4787, %v12229_v23   ;;  %12230 = vst [vmem:[#allocation88_spill] sm:$0xff] %v7722_v33  ;;  %v12231_v15 = vld [vmem:[#allocation14_spill] sm:$0xff]  ;;  %v7738_v49 = vpop.permute.xlu0 %2078  ;;  %v1877_v41 = vmul.f32 %v1868_v37, %v12226_v61 }
 0x38d   : > { %v1303_v40 = vmul.f32 %v12224_v32, %v12223_v35  ;;  %v12225_v5 = vld [vmem:[#allocation52_spill] sm:$0xff]  ;;  %v1873_v18 = vsel %vm491_vm2, %v12228_v47, %v12227_v3  ;;  %v1304_v39 = vmul.f32 %v12224_v32, %v12231_v15  ;;  %v1869_v30 = vsel %vm491_vm2, %v12227_v3, %v12228_v47  ;;  %v12233_v35 = vld [vmem:[#allocation111_spill] sm:$0xff]  ;;  %v12235_v32 = vld [vmem:[#allocation153_spill] sm:$0xff] }
 0x38e   : > { %v1880_v42 = vmul.f32 %v1874_v55, %v12225_v5  ;;  %v12232_v55 = vld [vmem:[#allocation115_spill] sm:$0xff]  ;;  %v12234_v33 = vld [vmem:[#allocation12_spill] sm:$0xff]  ;;  %v1594_v15 = vadd.f32 %v1298_v50, %v12235_v32  ;;  %v1905_v3 = vmul.f32 %v12236_v2, %v1881_v28  ;;  %v1876_v47 = vmul.f32 %v1872_v1, %v12225_v5  ;;  %v12240_v37 = vld [vmem:[#allocation110_spill] sm:$0xff] }
 0x38f   : > { %v1871_v4 = vsel %vm491_vm2, %v12233_v35, %v12232_v55  ;;  %v1875_v23 = vsel %vm491_vm2, %v12232_v55, %v12233_v35  ;;  %v1593_v11 = vadd.f32 %v1297_v52, %v12234_v33  ;;  %v1599_v56 = vadd.f32 %v1303_v40, %v12237_v62  ;;  %2710 = vrot.lane.b32.xlu0 %v7195_v21, %s4923_s23  ;;  %v7754_v50 = vpop.permute.xlu1 %2134  ;;  %v12239_v28 = vld [vmem:[#allocation11_spill] sm:$0xff]  ;;  %v12241_v1 = vld [vmem:[#allocation117_spill] sm:$0xff] }
 0x390   : > { %v1904_v13 = vmul.f32 %v12236_v2, %v1880_v42  ;;  %v1878_v57 = vmul.f32 %v1873_v18, %v12225_v5  ;;  %v1879_v55 = vmul.f32 %v1869_v30, %v12226_v61  ;;  %v1882_v35 = vmul.f32 %v1875_v23, %v12225_v5  ;;  %2683 = vperm.xlu1 %4787, %v6848_v12   ;;  %v7760_v42 = vpop.permute.xlu0 %2082  ;;  %v12242_v32 = vld [vmem:[#allocation103_spill] sm:$0xff]  ;;  %v12243_v5 = vld [vmem:[#allocation146_spill] sm:$0xff] }
 0x391   : > { %v1883_v33 = vmul.f32 %v1871_v4, %v12226_v61  ;;  %12238 = vst [vmem:[#allocation84_spill] sm:$0xff] %v7754_v50  ;;  %v1600_v2 = vadd.f32 %v1304_v39, %v12239_v28  ;;  %v1900_v52 = vmul.f32 %v12240_v37, %v1876_v47  ;;  %v1901_v62 = vmul.f32 %v12240_v37, %v1877_v41  ;;  %v12245_v47 = vld [vmem:[#allocation147_spill] sm:$0xff]  ;;  %v12246_v41 = vld [vmem:[#allocation138_spill] sm:$0xff] }
 0x392   : > { %v1902_v40 = vmul.f32 %v12241_v1, %v1878_v57  ;;  %v1845_v18 = vmul.f32 %v12216_v17, %v1821_v0  ;;  %v2200_v4 = vadd.f32 %v1904_v13, %v1848_v54  ;;  %v2201_v30 = vadd.f32 %v1905_v3, %v1849_v51  ;;  %v12248_v37 = vld [vmem:[#allocation114_spill] sm:$0xff]  ;;  %v12249_v51 = vld [vmem:[#allocation139_spill] sm:$0xff] }
 0x393   : > { %v1903_v23 = vmul.f32 %v12241_v1, %v1879_v55  ;;  %v1850_v12 = vmul.f32 %v12242_v32, %v1826_v60  ;;  %v1851_v61 = vmul.f32 %v12242_v32, %v1827_v58  ;;  %v7767_v39 = vadd.f32 %v1593_v11, %v12243_v5  ;;  %2756 = vrot.lane.b32.xlu0 %v6935_v27, %s4925_s24  ;;  %v7780_v13 = vpop.permute.xlu1 %2138  ;;  %v12250_v60 = vld [vmem:[#allocation141_spill] sm:$0xff]  ;;  %v12253_v55 = vld [vmem:[#allocation123_spill] sm:$0xff]  ;;  %v12258_v1 = vld [vmem:[#allocation116_spill] sm:$0xff] }
 0x394   : > { %v7770_v28 = vadd.f32 %v1594_v15, %v12245_v47  ;;  %v7773_v57 = vadd.f32 %v1599_v56, %v12246_v41  ;;  %v1906_v50 = vmul.f32 %v12248_v37, %v1882_v35  ;;  %v1907_v0 = vmul.f32 %v12248_v37, %v1883_v33  ;;  %2687 = vperm.xlu1 %4787, %v12249_v51   ;;  %v7789_v17 = vpop.permute.xlu0 %2086  ;;  %v12254_v35 = vld [vmem:[#allocation127_spill] sm:$0xff]  ;;  %v12263_v32 = vld [vmem:[#allocation118_spill] sm:$0xff] }
 0x395   : > { %12244 = vst [vmem:[#allocation90_spill] sm:$0xff] %v7767_v39  ;;  %v7783_v5 = vadd.f32 %v1600_v2, %v12250_v60  ;;  %v7785_v58 = vadd.f32 %v1900_v52, %v1844_v46  ;;  %v7787_v11 = vadd.f32 %v1901_v62, %v1845_v18  ;;  %v2198_v56 = vadd.f32 %v1902_v40, %v1846_v20  ;;  %v12255_v46 = vld [vmem:[#allocation17_spill] sm:$0xff]  ;;  %v12256_v2 = vld [vmem:[#allocation119_spill] sm:$0xff]  ;;  %v12257_v62 = vld [vmem:[#allocation44_spill] sm:$0xff] }
 0x396   : > { %12247 = vst [vmem:[#allocation91_spill] sm:$0xff] %v7773_v57  ;;  %v7792_v54 = vadd.f32 %v2200_v4, %v7612_v34  ;;  %v7795_v15 = vadd.f32 %v2201_v30, %v7614_v9  ;;  %v2199_v3 = vadd.f32 %v1903_v23, %v7684_v44  ;;  %v1930_v33 = vsel %vm556_vm3, %v12254_v35, %v12253_v55  ;;  %v12259_v40 = vld [vmem:[#allocation120_spill] sm:$0xff] }
 0x397   : > { %12251 = vst [vmem:[#allocation78_spill] sm:$0xff] %v7785_v58  ;;  %12252 = vst [vmem:[#allocation89_spill] sm:$0xff] %v7787_v11  ;;  %v1355_v52 = vmul.f32 %v12256_v2, %v12255_v46  ;;  %v1356_v20 = vmul.f32 %v12256_v2, %v12257_v62  ;;  %v1929_v34 = vsel %vm556_vm3, %v12259_v40, %v12258_v1  ;;  %2760 = vrot.lane.b32.xlu0 %v6981_v36, %s4925_s24  ;;  %v7826_v30 = vpop.permute.xlu1 %2142  ;;  %v12284_v39 = vld [vmem:[#allocation140_spill] sm:$0xff]  ;;  %v12292_v58 = vld [vmem:[#allocation18_spill] sm:$0xff] }
 0x398   : > { %v1926_v9 = vsel %vm556_vm3, %v12253_v55, %v12254_v35  ;;  %v7814_v44 = vadd.f32 %v1906_v50, %v1850_v12  ;;  %v7816_v18 = vadd.f32 %v1907_v0, %v1851_v61  ;;  %v1925_v4 = vsel %vm556_vm3, %v12258_v1, %v12259_v40  ;;  %2700 = vrot.lane.b32.xlu1 %v6935_v27, %s4923_s23  ;;  %v12262_v50 = vld [vmem:[#allocation122_spill] sm:$0xff]  ;;  %v7840_v41 = vpop.permute.xlu0 %2090  ;;  %v12266_v0 = vld [vmem:[#allocation121_spill] sm:$0xff]  ;;  %v12267_v1 = vld [vmem:[#allocation124_spill] sm:$0xff] }
 0x399   : > { %v7829_v23 = vadd.f32 %v2198_v56, %v7604_v19  ;;  %v1927_v61 = vsel %vm556_vm3, %v12263_v32, %v12262_v50  ;;  %v1931_v12 = vsel %vm556_vm3, %v12262_v50, %v12263_v32  ;;  %v1936_v47 = vmul.f32 %v1930_v33, %v12060_v43  ;;  %v12265_v19 = vld [vmem:[#allocation125_spill] sm:$0xff]  ;;  %v12270_v50 = vld [vmem:[#allocation128_spill] sm:$0xff] }
 0x39a   : > { %12260 = vst [vmem:[#allocation93_spill] sm:$0xff] %v7814_v44  ;;  %12261 = vst [vmem:[#allocation98_spill] sm:$0xff] %v7816_v18  ;;  %v12264_v27 = vmov 3   ;;  %v1934_v37 = vmul.f32 %v1929_v34, %v12060_v43  ;;  %v1924_v51 = vsel %vm556_vm3, %v12266_v0, %v12265_v19  ;;  %v1928_v60 = vsel %vm556_vm3, %v12265_v19, %v12266_v0 }
 0x39b   : > { %4788 = vset.pattern.permute.xlu1 %v12264_v27  ;;  %v1937_v56 = vmul.f32 %v1926_v9, %v12062_v14  ;;  %v7854_v55 = vadd.f32 %v2199_v3, %v7606_v10  ;;  %v7857_v35 = vadd.f32 %v7432_v22, %v1355_v52  ;;  %v7860_v33 = vadd.f32 %v7437_v7, %v1356_v20  ;;  %v7872_v22 = vpop.permute.xlu1 %2146  ;;  %v12268_v52 = vld [vmem:[#allocation126_spill] sm:$0xff] }
 0x39c   : > { %v1935_v46 = vmul.f32 %v1925_v4, %v12062_v14  ;;  %v1938_v2 = vmul.f32 %v1931_v12, %v12060_v43  ;;  %v1939_v62 = vmul.f32 %v1927_v61, %v12062_v14  ;;  %v7866_v40 = vmul.f32 %v12267_v1, %v1934_v37  ;;  %2764 = vrot.lane.b32.xlu0 %v7028_v63, %s4925_s24  ;;  %v7880_v34 = vpop.permute.xlu0 %2113  ;;  %v12269_v4 = vld [vmem:[#allocation132_spill] sm:$0xff]  ;;  %v12271_v61 = vld [vmem:[#allocation15_spill] sm:$0xff] }
 0x39d   : > { %2704 = vrot.lane.b32.xlu1 %v6981_v36, %s4923_s23  ;;  %v1932_v10 = vmul.f32 %v1928_v60, %v12060_v43  ;;  %v1933_v3 = vmul.f32 %v1924_v51, %v12062_v14  ;;  %v1960_v20 = vmul.f32 %v12268_v52, %v1936_v47  ;;  %v1961_v9 = vmul.f32 %v12268_v52, %v1937_v56  ;;  %v12272_v12 = vld [vmem:[#allocation16_spill] sm:$0xff]  ;;  %v12273_v47 = vld [vmem:[#allocation129_spill] sm:$0xff]  ;;  %v12274_v51 = vld [vmem:[#allocation131_spill] sm:$0xff] }
 0x39e   : > { %v7875_v7 = vmul.f32 %v12267_v1, %v1935_v46  ;;  %v1980_v36 = vsel %vm621_vm4, %v12270_v50, %v12269_v4  ;;  %v1984_v32 = vsel %vm621_vm4, %v12269_v4, %v12270_v50  ;;  %v1983_v37 = vsel %vm621_vm4, %v12272_v12, %v12271_v61  ;;  %v12275_v1 = vld [vmem:[#allocation137_spill] sm:$0xff]  ;;  %v12276_v52 = vld [vmem:[#allocation130_spill] sm:$0xff]  ;;  %v12277_v50 = vld [vmem:[#allocation152_spill] sm:$0xff] }
 0x39f   : > { %v1956_v19 = vmul.f32 %v12273_v47, %v1932_v10  ;;  %v1957_v0 = vmul.f32 %v12273_v47, %v1933_v3  ;;  %v1962_v60 = vmul.f32 %v12274_v51, %v1938_v2  ;;  %v1987_v56 = vsel %vm621_vm4, %v12271_v61, %v12272_v12  ;;  %v7915_v2 = vpop.permute.xlu1 %2169  ;;  %v12278_v61 = vld [vmem:[#allocation145_spill] sm:$0xff]  ;;  %v12281_v14 = vld [vmem:[#allocation151_spill] sm:$0xff] }
 0x3a0   : > { %v1963_v46 = vmul.f32 %v12274_v51, %v1939_v62  ;;  %v1982_v4 = vsel %vm621_vm4, %v12276_v52, %v12275_v1  ;;  %v1986_v10 = vsel %vm621_vm4, %v12275_v1, %v12276_v52  ;;  %2768 = vrot.lane.b32.xlu0 %v7088_v25, %s4925_s24  ;;  %v1988_v62 = vmul.f32 %v1980_v36, %v12065_v59  ;;  %v12279_v51 = vld [vmem:[#allocation150_spill] sm:$0xff]  ;;  %v12280_v1 = vld [vmem:[#allocation136_spill] sm:$0xff] }
 0x3a1   : > { %2708 = vrot.lane.b32.xlu1 %v7028_v63, %s4923_s23  ;;  %v1989_v3 = vmul.f32 %v1984_v32, %v12067_v45  ;;  %v1981_v12 = vsel %vm621_vm4, %v12278_v61, %v12277_v50  ;;  %v1994_v47 = vmul.f32 %v1983_v37, %v12065_v59  ;;  %v1409_v52 = vmul.f32 %v12280_v1, %v12279_v51  ;;  %v7933_v32 = vpop.permute.xlu0 %1566  ;;  %v12283_v37 = vld [vmem:[#allocation29_spill] sm:$0xff] }
 0x3a2   : > { %v1410_v43 = vmul.f32 %v12280_v1, %v12281_v14  ;;  %v1985_v63 = vsel %vm621_vm4, %v12277_v50, %v12278_v61  ;;  %v1995_v36 = vmul.f32 %v1987_v56, %v12067_v45  ;;  %12282 = vst [vmem:[#allocation94_spill] sm:$0xff] %v7933_v32  ;;  %v1992_v27 = vmul.f32 %v1982_v4, %v12065_v59  ;;  %v12285_v51 = vld [vmem:[#allocation37_spill] sm:$0xff]  ;;  %v12286_v14 = vld [vmem:[#allocation142_spill] sm:$0xff]  ;;  %v12288_v4 = vld [vmem:[#allocation148_spill] sm:$0xff] }
 0x3a3   : > { %v1993_v57 = vmul.f32 %v1986_v10, %v12067_v45  ;;  %v1415_v18 = vmul.f32 %v12284_v39, %v12283_v37  ;;  %v1416_v44 = vmul.f32 %v12284_v39, %v12285_v51  ;;  %v2012_v1 = vmul.f32 %v12286_v14, %v1988_v62  ;;  %v7948_v56 = vpop.permute.xlu1 %2173  ;;  %v12289_v37 = vld [vmem:[#allocation149_spill] sm:$0xff]  ;;  %v12290_v51 = vld [vmem:[#allocation24_spill] sm:$0xff] }
 0x3a4   : > { %v2013_v11 = vmul.f32 %v12286_v14, %v1989_v3  ;;  %v1990_v50 = vmul.f32 %v1981_v12, %v12065_v59  ;;  %2810 = vrot.lane.b32.xlu0 %v7025_v53, %s4927_s25  ;;  %12287 = vst [vmem:[#allocation99_spill] sm:$0xff] %v7948_v56  ;;  %v2016_v10 = vmul.f32 %v12288_v4, %v1992_v27  ;;  %v12291_v12 = vld [vmem:[#allocation77_spill] sm:$0xff] }
 0x3a5   : > { %2712 = vrot.lane.b32.xlu1 %v7088_v25, %s4923_s23  ;;  %v2017_v61 = vmul.f32 %v12288_v4, %v1993_v57  ;;  %v1991_v39 = vmul.f32 %v1985_v63, %v12067_v45  ;;  %v2018_v62 = vmul.f32 %v12289_v37, %v1994_v47  ;;  %v7955_v3 = vadd.f32 %v1409_v52, %v12290_v51  ;;  %v7962_v32 = vpop.permute.xlu0 %2132  ;;  %v12294_v56 = vld [vmem:[#allocation73_spill] sm:$0xff]  ;;  %v12295_v57 = vld [vmem:[#allocation35_spill] sm:$0xff]  ;;  %v12296_v63 = vld [vmem:[#allocation68_spill] sm:$0xff] }
 0x3a6   : > { %v7958_v14 = vadd.f32 %v1410_v43, %v12291_v12  ;;  %v2019_v59 = vmul.f32 %v12289_v37, %v1995_v36  ;;  %v2014_v25 = vmul.f32 %v12292_v58, %v1990_v50  ;;  %12293 = vst [vmem:[#allocation95_spill] sm:$0xff] %v7962_v32  ;;  %v7965_v27 = vadd.f32 %v1415_v18, %v12294_v56  ;;  %v12297_v52 = vld [vmem:[#allocation8_spill] sm:$0xff]  ;;  %v12298_v43 = vld [vmem:[#allocation13_spill] sm:$0xff]  ;;  %v12299_v12 = vld [vmem:[#allocation19_spill] sm:$0xff] }
 0x3a7   : > { %v7968_v4 = vadd.f32 %v1416_v44, %v12295_v57  ;;  %v2015_v47 = vmul.f32 %v12292_v58, %v1991_v39  ;;  %v1467_v51 = vmul.f32 %v12297_v52, %v12296_v63  ;;  %v7973_v45 = vadd.f32 %v2012_v1, %v1956_v19  ;;  %v12300_v50 = vld [vmem:[#allocation62_spill] sm:$0xff]  ;;  %v7992_v1 = vpop.permute.xlu1 %2414  ;;  %v12307_v57 = vld [vmem:[#allocation20_spill] sm:$0xff] }
 0x3a8   : > { %v2037_v36 = vsel %vm686_vm5, %v12299_v12, %v12298_v43  ;;  %v1468_v37 = vmul.f32 %v12297_v52, %v12300_v50  ;;  %2814 = vrot.lane.b32.xlu0 %v7085_v16, %s4927_s25  ;;  %v7984_v44 = vadd.f32 %v2013_v11, %v1957_v0  ;;  %v7986_v58 = vadd.f32 %v2016_v10, %v1960_v20  ;;  %v12303_v11 = vld [vmem:[#allocation22_spill] sm:$0xff]  ;;  %v12304_v0 = vld [vmem:[#allocation7_spill] sm:$0xff]  ;;  %v12312_v50 = vld [vmem:[#allocation25_spill] sm:$0xff] }
 0x3a9   : > { %2735 = vperm.xlu1 %4788, %v6836_v8   ;;  %v7988_v18 = vadd.f32 %v2017_v61, %v1961_v9  ;;  %v7990_v19 = vadd.f32 %v2018_v62, %v1962_v60  ;;  %12301 = vst [vmem:[#allocation96_spill] sm:$0xff] %v7992_v1  ;;  %v7994_v56 = vadd.f32 %v2019_v59, %v1963_v46  ;;  %v8007_v9 = vpop.permute.xlu0 %2136  ;;  %v12305_v46 = vld [vmem:[#allocation32_spill] sm:$0xff] }
 0x3aa   : > { %v7997_v39 = vadd.f32 %v2014_v25, %v7866_v40  ;;  %v2041_v8 = vsel %vm686_vm5, %v12298_v43, %v12299_v12  ;;  %v2039_v20 = vsel %vm686_vm5, %v12304_v0, %v12303_v11  ;;  %v8010_v60 = vadd.f32 %v2015_v47, %v7875_v7  ;;  %v12308_v47 = vld [vmem:[#allocation34_spill] sm:$0xff] }
 0x3ab   : > { %12302 = vst [vmem:[#allocation100_spill] sm:$0xff] %v7994_v56  ;;  %v2046_v59 = vmul.f32 %v2037_v36, %v12089_v48  ;;  %v1611_v40 = vadd.f32 %v7500_v26, %v1467_v51  ;;  %v2038_v10 = vsel %vm686_vm5, %v12305_v46, %v7497_v24  ;;  %v1612_v61 = vadd.f32 %v7503_v29, %v1468_v37  ;;  %v8032_v26 = vld [vmem:[%s11225_s2 + $0x70] sm:$0xff]  ;;  %v8049_v52 = vpop.permute.xlu1 %2424  ;;  %v12310_v51 = vld [vmem:[#allocation31_spill] sm:$0xff]  ;;  %v12311_v43 = vld [vmem:[#allocation38_spill] sm:$0xff] }
 0x3ac   : > { %v2043_v62 = vsel %vm686_vm5, %v12303_v11, %v12304_v0  ;;  %v2042_v7 = vsel %vm686_vm5, %v7497_v24, %v12305_v46  ;;  %2818 = vrot.lane.b32.xlu0 %v7139_v6, %s4927_s25  ;;  %12306 = vst [vmem:[#allocation92_spill] sm:$0xff] %v8032_v26  ;;  %v8036_v29 = vmul.f32 %v2041_v8, %v12091_v31  ;;  %12309 = vst [vmem:[#allocation97_spill] sm:$0xff] %v8049_v52  ;;  %v12313_v37 = vld [vmem:[#allocation33_spill] sm:$0xff]  ;;  %v12317_v52 = vld [vmem:[#allocation66_spill] sm:$0xff] }
 0x3ad   : > { %2739 = vperm.xlu1 %4788, %v8032_v26   ;;  %v8039_v25 = vmul.f32 %v2039_v20, %v12089_v48  ;;  %v2094_v24 = vsel %vm751_vm6, %v12308_v47, %v12307_v57  ;;  %v2098_v63 = vsel %vm751_vm6, %v12307_v57, %v12308_v47  ;;  %v2036_v12 = vsel %vm686_vm5, %v12311_v43, %v12310_v51  ;;  %v8064_v0 = vpop.permute.xlu0 %2140  ;;  %v12333_v56 = vld [vmem:[#allocation42_spill] sm:$0xff] }
 0x3ae   : > { %v2048_v36 = vmul.f32 %v2038_v10, %v12089_v48  ;;  %v2092_v8 = vsel %vm751_vm6, %v12313_v37, %v12312_v50  ;;  %v2096_v11 = vsel %vm751_vm6, %v12312_v50, %v12313_v37  ;;  %12314 = vst [vmem:[#allocation105_spill] sm:$0xff] %v8064_v0  ;;  %v8067_v20 = vadd.f32 %v1611_v40, %v7857_v35  ;;  %v12318_v50 = vld [vmem:[#allocation67_spill] sm:$0xff]  ;;  %v12326_v0 = vld [vmem:[#allocation10_spill] sm:$0xff] }
 0x3af   : > { %v2051_v46 = vmul.f32 %v2043_v62, %v12091_v31  ;;  %v2040_v10 = vsel %vm686_vm5, %v12310_v51, %v12311_v43  ;;  %v2049_v57 = vmul.f32 %v2042_v7, %v12091_v31  ;;  %v8076_v47 = vadd.f32 %v1612_v61, %v7860_v33  ;;  %v12319_v7 = vld [vmem:[#allocation64_spill] sm:$0xff]  ;;  %v12320_v51 = vld [vmem:[#allocation87_spill] sm:$0xff]  ;;  %v8089_v61 = vpop.permute.xlu1 %2429 }
 0x3b0   : > { %12315 = vst [vmem:[#allocation101_spill] sm:$0xff] %v8067_v20  ;;  %v2104_v1 = vmul.f32 %v2094_v24, %v12317_v52  ;;  %v2105_v37 = vmul.f32 %v2098_v63, %v12318_v50  ;;  %2822 = vrot.lane.b32.xlu0 %v7195_v21, %s4927_s25  ;;  %v2044_v35 = vmul.f32 %v2036_v12, %v12089_v48  ;;  %12321 = vst [vmem:[#allocation143_spill] sm:$0xff] %v8089_v61  ;;  %v12322_v24 = vmov 5   ;;  %v12323_v43 = vld [vmem:[#allocation28_spill] sm:$0xff] }
 0x3b1   : > { %12316 = vst [vmem:[#allocation102_spill] sm:$0xff] %v8076_v47  ;;  %2754 = vrot.lane.b32.xlu1 %v7025_v53, %s4925_s24  ;;  %v2100_v40 = vmul.f32 %v2092_v8, %v12317_v52  ;;  %v2101_v62 = vmul.f32 %v2096_v11, %v12318_v50  ;;  %v1522_v33 = vmul.f32 %v12320_v51, %v12319_v7  ;;  %v12324_v47 = vld [vmem:[#allocation81_spill] sm:$0xff]  ;;  %v8096_v48 = vpop.permute.xlu0 %2144  ;;  %v12325_v11 = vld [vmem:[#allocation82_spill] sm:$0xff] }
 0x3b2   : > { %4789 = vset.pattern.permute.xlu1 %v12322_v24  ;;  %v2045_v63 = vmul.f32 %v2040_v10, %v12091_v31  ;;  %v2072_v20 = vmul.f32 %v12323_v43, %v2048_v36  ;;  %v2128_v53 = vmul.f32 %v12324_v47, %v2104_v1  ;;  %v2129_v12 = vmul.f32 %v12324_v47, %v2105_v37  ;;  %v12329_v37 = vld [vmem:[#allocation65_spill] sm:$0xff] }
 0x3b3   : > { %v2073_v8 = vmul.f32 %v12323_v43, %v2049_v57  ;;  %v2124_v32 = vmul.f32 %v12325_v11, %v2100_v40  ;;  %v2125_v7 = vmul.f32 %v12325_v11, %v2101_v62  ;;  %v1521_v61 = vmul.f32 %v12320_v51, %v12326_v0  ;;  %v8116_v57 = vld [vmem:[%s5013_s16 + $0x10] sm:$0xff]  ;;  %v12328_v0 = vld [vmem:[#allocation45_spill] sm:$0xff]  ;;  %v12330_v62 = vld [vmem:[#allocation70_spill] sm:$0xff] }
 0x3b4   : > { %v2093_v36 = vsel %vm751_vm6, %v7738_v49, %v7789_v17  ;;  %v2097_v1 = vsel %vm751_vm6, %v7789_v17, %v7738_v49  ;;  %v2095_v10 = vsel %vm751_vm6, %v7760_v42, %v7840_v41  ;;  %12327 = vst [vmem:[#allocation106_spill] sm:$0xff] %v8116_v57  ;;  %2868 = vrot.lane.b32.xlu0 %v8116_v57, %s4929_s26  ;;  %v12331_v17 = vld [vmem:[#allocation40_spill] sm:$0xff]  ;;  %v12332_v51 = vld [vmem:[#allocation74_spill] sm:$0xff] }
 0x3b5   : > { %2758 = vrot.lane.b32.xlu1 %v7085_v16, %s4925_s24  ;;  %v2070_v47 = vmul.f32 %v12328_v0, %v2046_v59  ;;  %v2068_v40 = vmul.f32 %v12329_v37, %v2044_v35  ;;  %v1610_v49 = vadd.f32 %v1522_v33, %v12330_v62  ;;  %v1528_v43 = vmul.f32 %v12332_v51, %v12331_v17  ;;  %v8130_v26 = vpop.permute.xlu0 %2165  ;;  %v8132_v16 = vpop.permute.xlu1 %2481 }
 0x3b6   : > { %v2069_v11 = vmul.f32 %v12329_v37, %v2045_v63  ;;  %v2216_v31 = vadd.f32 %v2128_v53, %v2072_v20  ;;  %v2217_v24 = vadd.f32 %v2129_v12, %v2073_v8  ;;  %v1527_v57 = vmul.f32 %v12332_v51, %v12333_v56  ;;  %v12334_v12 = vld [vmem:[#allocation41_spill] sm:$0xff]  ;;  %v8143_v56 = vld [vmem:[%s5013_s16 + $0x30] sm:$0xff] }
 0x3b7   : > { %v2102_v59 = vmul.f32 %v2093_v36, %v12317_v52  ;;  %v2103_v35 = vmul.f32 %v2097_v1, %v12318_v50  ;;  %v2099_v33 = vsel %vm751_vm6, %v7840_v41, %v7760_v42  ;;  %v2106_v63 = vmul.f32 %v2095_v10, %v12317_v52  ;;  %v12335_v1 = vld [vmem:[#allocation63_spill] sm:$0xff]  ;;  %v12338_v51 = vld [vmem:[#allocation88_spill] sm:$0xff] }
 0x3b8   : > { %v2212_v20 = vadd.f32 %v2124_v32, %v2068_v40  ;;  %v2213_v53 = vadd.f32 %v2125_v7, %v2069_v11  ;;  %v1609_v8 = vadd.f32 %v1521_v61, %v12334_v12  ;;  %2872 = vrot.lane.b32.xlu0 %v8143_v56, %s4929_s26  ;;  %v1626_v36 = vadd.f32 %v1610_v49, %v7958_v14  ;;  %v12336_v7 = vld [vmem:[#allocation30_spill] sm:$0xff]  ;;  %v12337_v14 = vld [vmem:[#allocation43_spill] sm:$0xff] }
 0x3b9   : > { %2762 = vrot.lane.b32.xlu1 %v7139_v6, %s4925_s24  ;;  %v1616_v37 = vadd.f32 %v1528_v43, %v12335_v1  ;;  %v2126_v42 = vmul.f32 %v7880_v34, %v2102_v59  ;;  %v2127_v41 = vmul.f32 %v7880_v34, %v2103_v35  ;;  %v2071_v32 = vmul.f32 %v12328_v0, %v8036_v29  ;;  %v8158_v62 = vpop.permute.xlu0 %2177  ;;  %v8160_v6 = vpop.permute.xlu1 %2486  ;;  %v4863_v35 = vld [vmem:[%s5013_s16 + $0x10] sm:$0xff] }
 0x3ba   : > { %v2232_v61 = vadd.f32 %v2216_v31, %v7986_v58  ;;  %v1615_v10 = vadd.f32 %v1527_v57, %v12336_v7  ;;  %v2107_v40 = vmul.f32 %v2099_v33, %v12318_v50  ;;  %v2074_v49 = vmul.f32 %v12337_v14, %v8039_v25  ;;  %v8177_v57 = vld [vmem:[%s5013_s16 + $0x18] sm:$0xff] }
 0x3bb   : > { %v2075_v17 = vmul.f32 %v12337_v14, %v2051_v46  ;;  %v2233_v34 = vadd.f32 %v2217_v24, %v7988_v18  ;;  %v2130_v43 = vmul.f32 %v12338_v51, %v2106_v63  ;;  %v8168_v29 = vadd.f32 %v2212_v20, %v7973_v45  ;;  %v12339_v24 = vld [vmem:[#allocation84_spill] sm:$0xff]  ;;  %v8218_v20 = vld [vmem:[%s5013_s16 + $0x38] sm:$0xff]  ;;  %v4867_v14 = vld [vmem:[%s5013_s16 + $0x40] sm:$0xff] }
 0x3bc   : > { %v8171_v31 = vadd.f32 %v2213_v53, %v7984_v44  ;;  %v8174_v58 = vadd.f32 %v1609_v8, %v7955_v3  ;;  %2876 = vrot.lane.b32.xlu0 %v8177_v57, %s4929_s26  ;;  %v1632_v18 = vadd.f32 %v1616_v37, %v7968_v4  ;;  %v2214_v25 = vadd.f32 %v2126_v42, %v2070_v47  ;;  %v8225_v53 = vld [vmem:[%s11225_s2 + $0x60] sm:$0xff] }
 0x3bd   : > { %2766 = vrot.lane.b32.xlu1 %v7195_v21, %s4925_s24  ;;  %v2215_v45 = vadd.f32 %v2127_v41, %v2071_v32  ;;  %v8185_v44 = vadd.f32 %v1626_v36, %v7770_v28  ;;  %v8188_v3 = vadd.f32 %v2232_v61, %v7792_v54  ;;  %v8191_v46 = vadd.f32 %v1615_v10, %v7965_v27  ;;  %v1089_v27 = vpop.permute.xlu0 %1088  ;;  %v8206_v47 = vpop.permute.xlu1 %2504  ;;  %v12341_v36 = vld [vmem:[#allocation72_spill] sm:$0xff] }
 0x3be   : > { %v2149_v21 = vsel %vm816_vm7, %v12339_v24, %v7826_v30  ;;  %v2131_v4 = vmul.f32 %v12338_v51, %v2107_v40  ;;  %v2153_v28 = vsel %vm816_vm7, %v7826_v30, %v12339_v24  ;;  %v2218_v0 = vadd.f32 %v2130_v43, %v2074_v49  ;;  %v4864_v30 = vld [vmem:[%s5013_s16 + $0x18] sm:$0xff]  ;;  %v12342_v41 = vld [vmem:[#allocation4_spill] sm:$0xff]  ;;  %v8260_v51 = vld [vmem:[%s5013_s16] sm:$0xff] }
 0x3bf   : > { %v2151_v54 = vsel %vm816_vm7, %v7780_v13, %v7872_v22  ;;  %v8209_v11 = vadd.f32 %v2233_v34, %v7795_v15  ;;  %v2155_v59 = vsel %vm816_vm7, %v7872_v22, %v7780_v13  ;;  %v1103_v33 = vmul.f32 %v4863_v35, %v1089_v27  ;;  %v12340_v15 = vld [vmem:[#allocation71_spill] sm:$0xff] }
 0x3c0   : > { %v1104_v63 = vmul.f32 %v4864_v30, %v1089_v27  ;;  %2880 = vrot.lane.b32.xlu0 %v8218_v20, %s4929_s26  ;;  %v2158_v12 = vmul.f32 %v2149_v21, %v12340_v15  ;;  %v2230_v13 = vadd.f32 %v2214_v25, %v7997_v39  ;;  %v2231_v22 = vadd.f32 %v2215_v45, %v8010_v60  ;;  %v12343_v45 = vld [vmem:[#allocation134_spill] sm:$0xff]  ;;  %v12345_v24 = vld [vmem:[#allocation39_spill] sm:$0xff]  ;;  %v12348_v27 = vld [vmem:[#allocation100_spill] sm:$0xff] }
 0x3c1   : > { %2787 = vperm.xlu1 %4789, %v8225_v53   ;;  %v8232_v8 = vadd.f32 %v1632_v18, %v7783_v5  ;;  %v2159_v1 = vmul.f32 %v2153_v28, %v12341_v36  ;;  %v2219_v37 = vadd.f32 %v2131_v4, %v2075_v17  ;;  %v8236_v42 = vmul.f32 %v2151_v54, %v12340_v15  ;;  %v1687_v7 = vpop.permute.xlu0 %1686  ;;  %v8250_v10 = vpop.permute.xlu1 %2514  ;;  %v4868_v17 = vld [vmem:[%s5013_s16 + $0x48] sm:$0xff]  ;;  %v12346_v21 = vld [vmem:[#allocation94_spill] sm:$0xff]  ;;  %v12347_v28 = vld [vmem:[#allocation76_spill] sm:$0xff] }
 0x3c2   : > { %v1132_v32 = vadd.f32 %v12342_v41, %v1104_v63  ;;  %v8240_v61 = vadd.f32 %v2218_v0, %v7990_v19  ;;  %v8243_v39 = vmul.f32 %v2155_v59, %v12341_v36  ;;  %v2182_v60 = vmul.f32 %v7915_v2, %v2158_v12  ;;  %v12350_v59 = vld [vmem:[#allocation95_spill] sm:$0xff] }
 0x3c3   : > { %v2150_v5 = vsel %vm816_vm7, %v8007_v9, %v8096_v48  ;;  %v2154_v40 = vsel %vm816_vm7, %v8096_v48, %v8007_v9  ;;  %v1131_v19 = vadd.f32 %v12342_v41, %v1103_v33  ;;  %v1704_v49 = vmul.f32 %v4867_v14, %v1687_v7  ;;  %v12344_v9 = vld [vmem:[#allocation92_spill] sm:$0xff]  ;;  %v12353_v41 = vld [vmem:[#allocation86_spill] sm:$0xff] }
 0x3c4   : > { %v1705_v34 = vmul.f32 %v4868_v17, %v1687_v7  ;;  %2922 = vrot.lane.b32.xlu0 %v8260_v51, %s4931_s27  ;;  %v2183_v43 = vmul.f32 %v7915_v2, %v2159_v1  ;;  %v2238_v18 = vadd.f32 %v2230_v13, %v7829_v23  ;;  %v2239_v25 = vadd.f32 %v2231_v22, %v7854_v55  ;;  %v12349_v23 = vld [vmem:[#allocation105_spill] sm:$0xff]  ;;  %v4870_v7 = vld [vmem:[%s5013_s16 + $0x70] sm:$0xff] }
 0x3c5   : > { %v1588_v48 = vadd.f32 %v12343_v45, %v1132_v32  ;;  %2795 = vperm.xlu1 %4789, %v12344_v9   ;;  %v8271_v4 = vmul.f32 %v12346_v21, %v12345_v24  ;;  %v1732_v0 = vadd.f32 %v12347_v28, %v1704_v49  ;;  %v8276_v2 = vadd.f32 %v2219_v37, %v12348_v27  ;;  %v1702_v63 = vpop.permute.xlu0 %1701  ;;  %v8288_v12 = vpop.permute.xlu1 %2519  ;;  %v12351_v13 = vld [vmem:[#allocation133_spill] sm:$0xff]  ;;  %v8295_v49 = vld [vmem:[%s5013_s16 + $0x20] sm:$0xff] }
 0x3c6   : > { %v1733_v54 = vadd.f32 %v12347_v28, %v1705_v34  ;;  %v2148_v55 = vsel %vm816_vm7, %v12350_v59, %v12349_v23  ;;  %v2152_v35 = vsel %vm816_vm7, %v12349_v23, %v12350_v59  ;;  %v2160_v33 = vmul.f32 %v2150_v5, %v12340_v15  ;;  %v12352_v1 = vld [vmem:[#allocation61_spill] sm:$0xff] }
 0x3c7   : > { %v2161_v30 = vmul.f32 %v2154_v40, %v12341_v36  ;;  %v1587_v22 = vadd.f32 %v12351_v13, %v1131_v19  ;;  %v2188_v37 = vadd.f32 %v12352_v1, %v1732_v0  ;;  %v1710_v14 = vmul.f32 %v4870_v7, %v1702_v63  ;;  %v12354_v34 = vld [vmem:[#allocation85_spill] sm:$0xff]  ;;  %v12355_v0 = vld [vmem:[#allocation78_spill] sm:$0xff] }
 0x3c8   : > { %v2189_v32 = vadd.f32 %v12353_v41, %v1733_v54  ;;  %2926 = vrot.lane.b32.xlu0 %v8295_v49, %s4931_s27  ;;  %v2246_v17 = vadd.f32 %v2238_v18, %v2182_v60  ;;  %v2247_v5 = vadd.f32 %v2239_v25, %v2183_v43  ;;  %v1620_v40 = vadd.f32 %v12354_v34, %v1588_v48  ;;  %v4872_v45 = vld [vmem:[%s5013_s16 + $0x78] sm:$0xff]  ;;  %v12357_v60 = vld [vmem:[#allocation80_spill] sm:$0xff]  ;;  %v12358_v25 = vld [vmem:[#allocation99_spill] sm:$0xff] }
 0x3c9   : > { %v1711_v24 = vmul.f32 %v4872_v45, %v1702_v63  ;;  %v8304_v19 = vld [vmem:[%s11225_s2 + $0x78] sm:$0xff]  ;;  %v2156_v28 = vmul.f32 %v2148_v55, %v12340_v15  ;;  %v2220_v54 = vadd.f32 %v12355_v0, %v2188_v37  ;;  %v1738_v43 = vadd.f32 %v12357_v60, %v1710_v14  ;;  %v8315_v13 = vpop.permute.xlu0 %2476  ;;  %v8317_v1 = vpop.permute.xlu1 %2532  ;;  %v12359_v41 = vld [vmem:[#allocation79_spill] sm:$0xff]  ;;  %v12360_v7 = vld [vmem:[#allocation6_spill] sm:$0xff] }
 0x3ca   : > { %2799 = vperm.xlu1 %4789, %v8304_v19   ;;  %v12356_v27 = vld [vmem:[#allocation89_spill] sm:$0xff]  ;;  %v2157_v18 = vmul.f32 %v2152_v35, %v12341_v36  ;;  %v2184_v48 = vmul.f32 %v12358_v25, %v2160_v33  ;;  %v2185_v59 = vmul.f32 %v12358_v25, %v2161_v30  ;;  %v1619_v37 = vadd.f32 %v12359_v41, %v1587_v22  ;;  %v8324_v34 = vld [vmem:[%s5013_s16 + $0x8] sm:$0xff]  ;;  %v12362_v45 = vld [vmem:[#allocation106_spill] sm:$0xff] }
 0x3cb   : > { %v2221_v23 = vadd.f32 %v12356_v27, %v2189_v32  ;;  %v1739_v63 = vadd.f32 %v12357_v60, %v1711_v24  ;;  %v2180_v55 = vmul.f32 %v8130_v26, %v2156_v28  ;;  %v2236_v32 = vadd.f32 %v8168_v29, %v2220_v54  ;;  %v12361_v33 = vld [vmem:[#allocation83_spill] sm:$0xff]  ;;  %v12363_v28 = vld [vmem:[#allocation102_spill] sm:$0xff]  ;;  %v12364_v0 = vld [vmem:[#allocation93_spill] sm:$0xff] }
 0x3cc   : > { %v2194_v14 = vadd.f32 %v12360_v7, %v1738_v43  ;;  %2930 = vrot.lane.b32.xlu0 %v8324_v34, %s4931_s27  ;;  %v2181_v35 = vmul.f32 %v8130_v26, %v2157_v18  ;;  %v1636_v22 = vadd.f32 %v12363_v28, %v1620_v40  ;;  %v2254_v29 = vmax.f32 %v2246_v17, 0.0  ;;  %v12366_v26 = vld [vmem:[#allocation98_spill] sm:$0xff]  ;;  %v12367_v40 = vld [vmem:[#allocation101_spill] sm:$0xff] }
 0x3cd   : > { %v2195_v30 = vadd.f32 %v12361_v33, %v1739_v63  ;;  %v2237_v24 = vadd.f32 %v8171_v31, %v2221_v23  ;;  %v2255_v27 = vmax.f32 %v2247_v5, 0.0  ;;  %v2244_v60 = vadd.f32 %v2236_v32, %v2180_v55  ;;  %v8338_v63 = vpop.permute.xlu0 %2491  ;;  %v8340_v41 = vpop.permute.xlu1 %2536  ;;  %v8348_v55 = vld [vmem:[%s5013_s16 + $0x28] sm:$0xff] }
 0x3ce   : > { %2812 = vrot.lane.b32.xlu1 %v12362_v45, %s4927_s25  ;;  %v2226_v54 = vadd.f32 %v12364_v0, %v2194_v14  ;;  %v12365_v43 = vmov 6   ;;  %v2248_v25 = vadd.f32 %v8188_v3, %v2184_v48  ;;  %v2249_v31 = vadd.f32 %v8209_v11, %v2185_v59  ;;  %v8359_v11 = vld [vmem:[%s11225_s2 + $0x88] sm:$0xff] }
 0x3cf   : > { %4790 = vset.pattern.permute.xlu1 %v12365_v43  ;;  %v2227_v18 = vadd.f32 %v12366_v26, %v2195_v30  ;;  %v2245_v7 = vadd.f32 %v2237_v24, %v2181_v35  ;;  %v2186_v17 = vmul.f32 %v8158_v62, %v8236_v42  ;;  %v1635_v23 = vadd.f32 %v12367_v40, %v1619_v37  ;;  %v12368_v37 = vld [vmem:[#allocation90_spill] sm:$0xff]  ;;  %v12369_v14 = vld [vmem:[#allocation23_spill] sm:$0xff] }
 0x3d0   : > { %v2242_v5 = vadd.f32 %v8240_v61, %v2226_v54  ;;  %2934 = vrot.lane.b32.xlu0 %v8348_v55, %s4931_s27  ;;  %v2252_v3 = vmax.f32 %v2244_v60, 0.0  ;;  %v2187_v48 = vmul.f32 %v8158_v62, %v8243_v39  ;;  %v1644_v59 = vadd.f32 %v1636_v22, %v8271_v4  ;;  %v12370_v33 = vld [vmem:[#allocation75_spill] sm:$0xff] }
 0x3d1   : > { %v2253_v42 = vmax.f32 %v2245_v7, 0.0  ;;  %v2243_v61 = vadd.f32 %v8276_v2, %v2227_v18  ;;  %v1633_v32 = vadd.f32 %v8174_v58, %v12368_v37  ;;  %v1579_v35 = vmul.f32 %v12346_v21, %v12369_v14  ;;  %v12371_v30 = vld [vmem:[#allocation27_spill] sm:$0xff]  ;;  %v8369_v28 = vpop.permute.xlu0 %2530  ;;  %v8371_v0 = vpop.permute.xlu1 %2540  ;;  %v12372_v2 = vld [vmem:[#allocation9_spill] sm:$0xff] }
 0x3d2   : > { %2816 = vrot.lane.b32.xlu1 %v8143_v56, %s4927_s25  ;;  %v2265_v62 = vpack.c.bf16 %v2254_v29, %v2252_v3  ;;  %v2250_v39 = vadd.f32 %v2242_v5, %v2186_v17  ;;  %v1584_v24 = vmul.f32 %v12371_v30, %v12370_v33  ;;  %v1642_v4 = vadd.f32 %v8185_v44, %v12372_v2  ;;  %v12373_v22 = vld [vmem:[#allocation91_spill] sm:$0xff]  ;;  %v12375_v44 = vld [vmem:[#allocation5_spill] sm:$0xff]  ;;  %v12376_v3 = vld [vmem:[#allocation26_spill] sm:$0xff] }
 0x3d3   : > { %v2266_v54 = vpack.c.bf16 %v2255_v27, %v2253_v42  ;;  %v2251_v60 = vadd.f32 %v2243_v61, %v2187_v48  ;;  %v1639_v58 = vadd.f32 %v8191_v46, %v12373_v22  ;;  %v2256_v26 = vmax.f32 %v2248_v25, 0.0  ;;  %v12374_v40 = vld [vmem:[#allocation51_spill] sm:$0xff]  ;;  %v12379_v61 = vld [vmem:[#allocation48_spill] sm:$0xff] }
 0x3d4   : > { %3084 = vperm.xlu0 %4782, %v8359_v11   ;;  %v2258_v21 = vmax.f32 %v2250_v39, 0.0  ;;  %v1643_v29 = vadd.f32 %v1635_v23, %v1579_v35  ;;  %v2257_v18 = vmax.f32 %v2249_v31, 0.0  ;;  %v1652_v27 = vmax.f32 %v1644_v59, 0.0  ;;  %v12377_v48 = vld [vmem:[#allocation3_spill] sm:$0xff]  ;;  %v12378_v23 = vld [vmem:[#allocation69_spill] sm:$0xff]  ;;  %v8393_v59 = vld [vmem:[%s5013_s16 + $0x50] sm:$0xff] }
 0x3d5   : > { %2285 = vmatprep.subr.bf16.mxu1 %v2266_v54  ;;  %v2259_v7 = vmax.f32 %v2251_v60, 0.0  ;;  %v1648_v17 = vadd.f32 %v8232_v8, %v1584_v24  ;;  %v1581_v5 = vmul.f32 %v12375_v44, %v12374_v40  ;;  %v1583_v46 = vmul.f32 %v12371_v30, %v12376_v3  ;;  %v8388_v14 = vpop.permute.xlu0 %2534  ;;  %v8390_v31 = vpop.permute.xlu1 %2544  ;;  %v12380_v39 = vld [vmem:[#allocation2_spill] sm:$0xff]  ;;  %v12381_v33 = vld [vmem:[#allocation36_spill] sm:$0xff]  ;;  %v8426_v3 = vld [vmem:[%s5013_s16 + $0x58] sm:$0xff] }
 0x3d6   : > { %2820 = vrot.lane.b32.xlu1 %v8177_v57, %s4927_s25  ;;  %2286 = vmatpush1.bf16.msra.mxu1 %v2265_v62  ;;  %v2267_v25 = vpack.c.bf16 %v2258_v21, %v2256_v26  ;;  %v1641_v42 = vadd.f32 %v1633_v32, %v12377_v48  ;;  %v1646_v37 = vadd.f32 %v12379_v61, %v12378_v23  ;;  %v1650_v35 = vmax.f32 %v1642_v4, 0.0  ;;  %v4831_v54 = vld [vmem:[%s11227_s4 + $0x20] sm:$0xff]   ;;  %v8439_v23 = vld [vmem:[%s5013_s16 + $0x78] sm:$0xff] }
 0x3d7   : > { %v2268_v8 = vpack.c.bf16 %v2259_v7, %v2257_v18  ;;  %v1637_v24 = vadd.f32 %v12381_v33, %v12380_v39  ;;  %v1651_v62 = vmax.f32 %v1643_v29, 0.0  ;;  %v1647_v32 = vadd.f32 %v1639_v58, %v1583_v46  ;;  %v8409_v58 = vld [vmem:[%s5013_s16 + $0x70] sm:$0xff]  ;;  %v8417_v7 = vld [vmem:[%s11225_s2 + $0x68] sm:$0xff] }
 0x3d8   : > { %3135 = vrot.lane.b32.xlu0 %v8393_v59, %s4918_s19  ;;  %v1663_v30 = vpack.c.bf16 %v1652_v27, %v1650_v35  ;;  %v1656_v60 = vmax.f32 %v1648_v17, 0.0  ;;  %v1649_v4 = vmax.f32 %v1641_v42, 0.0  ;;  %v1654_v21 = vmax.f32 %v1646_v37, 0.0  ;;  %v4833_v35 = vld [vmem:[%s11227_s4 + $0x10] sm:$0xff]  }
 0x3d9   : > { %2287 = vmatprep.subr.bf16.mxu1 %v2268_v8  ;;  %v1645_v2 = vadd.f32 %v1637_v24, %v1581_v5  ;;  %v8404_v22 = vpop.permute.xlu0 %2538  ;;  %v8406_v26 = vpop.permute.xlu1 %2567  ;;  %v1655_v18 = vmax.f32 %v1647_v32, 0.0  ;;  %v12382_v40 = vmov 0   ;;  %v12383_v61 = vmov 7   ;;  %v4834_v24 = vld [vmem:[%s11227_s4 + $0x18] sm:$0xff]  }
 0x3da   : > { %2824 = vrot.lane.b32.xlu1 %v8218_v20, %s4927_s25  ;;  %2288 = vmatpush1.bf16.msra.mxu1 %v2267_v25  ;;  %v1662_v29 = vpack.c.bf16 %v1651_v62, %v1649_v4  ;;  %v1665_v27 = vpack.c.bf16 %v1656_v60, %v1654_v21  ;;  %v4832_v25 = vld [vmem:[%s11227_s4 + $0x28] sm:$0xff]   ;;  %v8503_v4 = vld [vmem:[%s5013_s16 + $0x60] sm:$0xff] }
 0x3db   : > { %2354 = vmatprep.subr.bf16.mxu1 %v1663_v30  ;;  %v1653_v17 = vmax.f32 %v1645_v2, 0.0 }
 0x3dc   : > { %3139 = vrot.lane.b32.xlu0 %v8409_v58, %s4918_s19 }
 0x3dd   : > { %4623 = vmatmul.mubr.msk.bf16.vlgmr.msra.gmra.mrb[8].mxu1 %vm979_vm8, %v4831_v54  ;;  %v8421_v44 = vpop.permute.xlu0 %2542  ;;  %v8423_v5 = vpop.permute.xlu1 %2575  ;;  %v1664_v46 = vpack.c.bf16 %v1655_v18, %v1653_v17  ;;  %v8493_v54 = vld [vmem:[%s5013_s16 + $0x40] sm:$0xff]  ;;  %v8513_v18 = vld [vmem:[%s5013_s16 + $0x48] sm:$0xff] }
 0x3de   : > { %2847 = vperm.xlu1 %4790, %v8417_v7   ;;  %2355 = vmatpush1.bf16.msra.mxu1 %v1662_v29 }
 0x3df   : > { %2327 = vmatprep.mubr.bf16.mxu1 %v12382_v40  ;;  %2356 = vmatprep.subr.bf16.mxu1 %v1665_v27 }
 0x3e0   : > { %3143 = vrot.lane.b32.xlu0 %v8426_v3, %s4918_s19 }
 0x3e1   : > { %v8434_v48 = vpop.permute.xlu0 %2586  ;;  %v8436_v42 = vpop.permute.xlu1 %2588 }
 0x3e2   : > { %2851 = vperm.xlu1 %4790, %v12344_v9   ;;  %2357 = vmatpush1.bf16.msra.mxu1 %v1664_v46  ;;  %v8524_v46 = vld [vmem:[%s5013_s16 + $0x68] sm:$0xff] }
 0x3e4   : > { %3147 = vrot.lane.b32.xlu0 %v8439_v23, %s4918_s19 }
 0x3e5   : > { %4624 = vmatmul.mubr.msk.bf16.gmra.mrb[12].mxu1 %vm979_vm8, %v4832_v25  ;;  %v8448_v37 = vpop.permute.xlu0 %2590  ;;  %v8450_v8 = vpop.permute.xlu1 %2592  ;;  %v12396_v25 = vmov 8  }
 0x3e6   : > { %2866 = vrot.lane.b32.xlu1 %v8260_v51, %s4929_s26  ;;  %2386 = vmatprep.mubr.bf16.mxu1 %v12382_v40  ;;  %12384 = vst [vmem:[#allocation144_spill] sm:$0xff] %v8450_v8 }
 0x3e7   : > { %4791 = vset.pattern.permute.xlu1 %v12383_v61 }
 0x3e8   : > { %3191 = vrot.lane.b32.xlu0 %v8393_v59, %s4920_s20 }
 0x3e9   : > { %v8459_v39 = vpop.permute.xlu0 %2594  ;;  %v8461_v51 = vpop.permute.xlu1 %2596 }
 0x3ea   : > { %2870 = vrot.lane.b32.xlu1 %v8295_v49, %s4929_s26 }
 0x3ec   : > { %3195 = vrot.lane.b32.xlu0 %v8409_v58, %s4920_s20 }
 0x3ed   : > { %4627 = vmatmul.mubr.msk.bf16.vlgmr.msra.gmra.mrb[8].mxu1 %vm979_vm8, %v4833_v35  ;;  %v8469_v49 = vpop.permute.xlu0 %2598  ;;  %v8471_v33 = vpop.permute.xlu1 %2600 }
 0x3ee   : > { %2874 = vrot.lane.b32.xlu1 %v8324_v34, %s4929_s26  ;;  %2396 = vmatprep.mubr.bf16.mxu1 %v12382_v40  ;;  %12385 = vst [vmem:[#allocation107_spill] sm:$0xff] %v8471_v33 }
 0x3f0   : > { %3199 = vrot.lane.b32.xlu0 %v8426_v3, %s4920_s20 }
 0x3f1   : > { %v8480_v62 = vpop.permute.xlu0 %2644 }
 0x3f2   : > { %2878 = vrot.lane.b32.xlu1 %v8348_v55, %s4929_s26  ;;  %12386 = vst [vmem:[#allocation104_spill] sm:$0xff] %v8480_v62  ;;  %v8482_v34 = vpop.permute.xlu1 %2623 }
 0x3f3   : > { %12387 = vst [vmem:[#allocation60_spill] sm:$0xff] %v8482_v34 }
 0x3f4   : > { %3203 = vrot.lane.b32.xlu0 %v8439_v23, %s4920_s20 }
 0x3f5   : > { %4628 = vmatmul.mubr.msk.bf16.gmra.mrb[12].mxu1 %vm979_vm8, %v4834_v24  ;;  %v8488_v32 = vpop.permute.xlu0 %2648 }
 0x3f6   : > { %2899 = vperm.xlu1 %4791, %v8225_v53   ;;  %12388 = vst [vmem:[#allocation108_spill] sm:$0xff] %v8488_v32  ;;  %v8490_v30 = vpop.permute.xlu1 %2627 }
 0x3f7   : > { %12389 = vst [vmem:[#allocation109_spill] sm:$0xff] %v8490_v30 }
 0x3f8   : > { %3245 = vrot.lane.b32.xlu0 %v8493_v54, %s4921_s22 }
 0x3f9   : > { %v8498_v60 = vpop.permute.xlu0 %2652 }
 0x3fa   : > { %2907 = vperm.xlu1 %4791, %v12344_v9   ;;  %12390 = vst [vmem:[#allocation113_spill] sm:$0xff] %v8498_v60  ;;  %v8500_v2 = vpop.permute.xlu1 %2642  ;;  %v12447_v60 = vmov 2  }
 0x3fb   : > { %12391 = vst [vmem:[#allocation135_spill] sm:$0xff] %v8500_v2  ;;  %v12501_v2 = vld [vmem:[#allocation143_spill] sm:$0xff] }
 0x3fc   : > { %3249 = vrot.lane.b32.xlu0 %v8503_v4, %s4921_s22 }
 0x3fd   : > { %v8508_v21 = vpop.permute.xlu0 %2656 }
 0x3fe   : > { %2911 = vperm.xlu1 %4791, %v8304_v19   ;;  %12392 = vst [vmem:[#allocation14_spill] sm:$0xff] %v8508_v21  ;;  %v8510_v29 = vpop.permute.xlu1 %2646 }
 0x3ff   : > { %12393 = vst [vmem:[#allocation115_spill] sm:$0xff] %v8510_v29 }
 0x400   : > { %3253 = vrot.lane.b32.xlu0 %v8513_v18, %s4921_s22 }
 0x401   : > { %v8519_v27 = vpop.permute.xlu0 %2698 }
 0x402   : > { %2924 = vrot.lane.b32.xlu1 %v12362_v45, %s4931_s27  ;;  %12394 = vst [vmem:[#allocation111_spill] sm:$0xff] %v8519_v27  ;;  %v8521_v17 = vpop.permute.xlu1 %2650 }
 0x403   : > { %12395 = vst [vmem:[#allocation12_spill] sm:$0xff] %v8521_v17  ;;  %4792 = vset.pattern.permute.xlu1 %v12396_v25 }
 0x404   : > { %3257 = vrot.lane.b32.xlu0 %v8524_v46, %s4921_s22 }
 0x405   : > { %v8531_v35 = vpop.permute.xlu0 %2702 }
 0x406   : > { %2928 = vrot.lane.b32.xlu1 %v8143_v56, %s4931_s27  ;;  %12397 = vst [vmem:[#allocation153_spill] sm:$0xff] %v8531_v35  ;;  %v8533_v24 = vpop.permute.xlu1 %2654 }
 0x407   : > { %12398 = vst [vmem:[#allocation112_spill] sm:$0xff] %v8533_v24 }
 0x408   : > { %3303 = vrot.lane.b32.xlu0 %v8393_v59, %s4923_s23 }
 0x409   : > { %v8539_v45 = vpop.permute.xlu0 %2706 }
 0x40a   : > { %2932 = vrot.lane.b32.xlu1 %v8177_v57, %s4931_s27  ;;  %12399 = vst [vmem:[#allocation21_spill] sm:$0xff] %v8539_v45 }
 0x40b   : > { %v8541_v36 = vpop.permute.xlu1 %2675 }
 0x40c   : > { %12400 = vst [vmem:[#allocation11_spill] sm:$0xff] %v8541_v36  ;;  %3307 = vrot.lane.b32.xlu0 %v8409_v58, %s4923_s23  ;;  %v8570_v36 = vld [vmem:[%s11225_s2 + $0x80] sm:$0xff] }
 0x40d   : > { %v8547_v56 = vpop.permute.xlu0 %2710 }
 0x40e   : > { %2936 = vrot.lane.b32.xlu1 %v8218_v20, %s4931_s27  ;;  %12401 = vst [vmem:[#allocation110_spill] sm:$0xff] %v8547_v56 }
 0x40f   : > { %v8549_v15 = vpop.permute.xlu1 %2683 }
 0x410   : > { %12402 = vst [vmem:[#allocation117_spill] sm:$0xff] %v8549_v15  ;;  %3311 = vrot.lane.b32.xlu0 %v8426_v3, %s4923_s23 }
 0x411   : > { %v8554_v57 = vpop.permute.xlu0 %2756 }
 0x412   : > { %2959 = vperm.xlu1 %4792, %v8417_v7   ;;  %12403 = vst [vmem:[#allocation103_spill] sm:$0xff] %v8554_v57  ;;  %v12407_v57 = vmov 4  }
 0x413   : > { %v8556_v50 = vpop.permute.xlu1 %2687 }
 0x414   : > { %12404 = vst [vmem:[#allocation146_spill] sm:$0xff] %v8556_v50  ;;  %3315 = vrot.lane.b32.xlu0 %v8439_v23, %s4923_s23 }
 0x415   : > { %v8561_v52 = vpop.permute.xlu0 %2760 }
 0x416   : > { %2963 = vperm.xlu1 %4792, %v12344_v9   ;;  %12405 = vst [vmem:[#allocation147_spill] sm:$0xff] %v8561_v52 }
 0x417   : > { %v8563_v20 = vpop.permute.xlu1 %2700 }
 0x418   : > { %12406 = vst [vmem:[#allocation138_spill] sm:$0xff] %v8563_v20  ;;  %3357 = vrot.lane.b32.xlu0 %v8493_v54, %s4925_s24  ;;  %v8583_v20 = vld [vmem:[%s11225_s2 + $0x90] sm:$0xff] }
 0x419   : > { %v8574_v50 = vpop.permute.xlu0 %2764 }
 0x41a   : > { %4793 = vset.pattern.permute.xlu1 %v12407_v57  ;;  %12408 = vst [vmem:[#allocation114_spill] sm:$0xff] %v8574_v50 }
 0x41b   : > { %3079 = vperm.xlu1 %4793, %v8570_v36   ;;  %v8576_v15 = vpop.permute.xlu1 %2704 }
 0x41c   : > { %12409 = vst [vmem:[#allocation139_spill] sm:$0xff] %v8576_v15  ;;  %3361 = vrot.lane.b32.xlu0 %v8503_v4, %s4925_s24  ;;  %v8595_v15 = vld [vmem:[%s11225_s2 + $0x98] sm:$0xff] }
 0x41d   : > { %v8586_v52 = vpop.permute.xlu0 %2768 }
 0x41e   : > { %12410 = vst [vmem:[#allocation141_spill] sm:$0xff] %v8586_v52 }
 0x41f   : > { %3089 = vperm.xlu1 %4793, %v8583_v20   ;;  %v8588_v35 = vpop.permute.xlu1 %2708 }
 0x420   : > { %12411 = vst [vmem:[#allocation123_spill] sm:$0xff] %v8588_v35  ;;  %3365 = vrot.lane.b32.xlu0 %v8513_v18, %s4925_s24  ;;  %v4650_v35 = vld [vmem:[%s11226_s3 + $0x88] sm:$0xff] }
 0x421   : > { %v8598_v50 = vpop.permute.xlu0 %2810 }
 0x422   : > { %12412 = vst [vmem:[#allocation127_spill] sm:$0xff] %v8598_v50  ;;  %v4651_v50 = vld [vmem:[%s11226_s3 + $0x90] sm:$0xff] }
 0x423   : > { %3094 = vperm.xlu1 %4793, %v8595_v15   ;;  %v8600_v56 = vpop.permute.xlu1 %2712 }
 0x424   : > { %12413 = vst [vmem:[#allocation17_spill] sm:$0xff] %v8600_v56  ;;  %3369 = vrot.lane.b32.xlu0 %v8524_v46, %s4925_s24 }
 0x425   : > { %v8608_v52 = vpop.permute.xlu0 %2814 }
 0x426   : > { %12414 = vst [vmem:[#allocation119_spill] sm:$0xff] %v8608_v52 }
 0x427   : > { %4794 = vset.pattern.permute.xlu1 %v12382_v40 }
 0x428   : > { %v8610_v27 = vpop.permute.xlu1 %2735  ;;  %3112 = vperm.xlu1 %4794, %v4650_v35   ;;  %3415 = vrot.lane.b32.xlu0 %v8393_v59, %s4927_s25 }
 0x429   : > { %12415 = vst [vmem:[#allocation44_spill] sm:$0xff] %v8610_v27  ;;  %v8617_v56 = vpop.permute.xlu0 %2818 }
 0x42a   : > { %12416 = vst [vmem:[#allocation116_spill] sm:$0xff] %v8617_v56 }
 0x42c   : > { %v8619_v45 = vpop.permute.xlu1 %2739  ;;  %3117 = vperm.xlu1 %4794, %v4651_v50   ;;  %3419 = vrot.lane.b32.xlu0 %v8409_v58, %s4927_s25 }
 0x42d   : > { %12417 = vst [vmem:[#allocation120_spill] sm:$0xff] %v8619_v45  ;;  %v8623_v32 = vpop.permute.xlu0 %2822 }
 0x42e   : > { %12418 = vst [vmem:[#allocation122_spill] sm:$0xff] %v8623_v32 }
 0x430   : > { %v8625_v52 = vpop.permute.xlu1 %2754  ;;  %3133 = vrot.lane.b32.xlu1 %v8493_v54, %s4918_s19  ;;  %3423 = vrot.lane.b32.xlu0 %v8426_v3, %s4927_s25 }
 0x431   : > { %12419 = vst [vmem:[#allocation118_spill] sm:$0xff] %v8625_v52  ;;  %v8631_v35 = vpop.permute.xlu0 %2868 }
 0x432   : > { %12420 = vst [vmem:[#allocation125_spill] sm:$0xff] %v8631_v35 }
 0x434   : > { %v8633_v27 = vpop.permute.xlu1 %2758  ;;  %3137 = vrot.lane.b32.xlu1 %v8503_v4, %s4918_s19  ;;  %3427 = vrot.lane.b32.xlu0 %v8439_v23, %s4927_s25 }
 0x435   : > { %12421 = vst [vmem:[#allocation121_spill] sm:$0xff] %v8633_v27  ;;  %v8639_v50 = vpop.permute.xlu0 %2872 }
 0x436   : > { %12422 = vst [vmem:[#allocation124_spill] sm:$0xff] %v8639_v50 }
 0x438   : > { %v8641_v32 = vpop.permute.xlu1 %2762  ;;  %3141 = vrot.lane.b32.xlu1 %v8513_v18, %s4918_s19  ;;  %3469 = vrot.lane.b32.xlu0 %v8493_v54, %s4929_s26 }
 0x439   : > { %12423 = vst [vmem:[#allocation126_spill] sm:$0xff] %v8641_v32  ;;  %v8647_v52 = vpop.permute.xlu0 %2876 }
 0x43a   : > { %12424 = vst [vmem:[#allocation132_spill] sm:$0xff] %v8647_v52 }
 0x43c   : > { %v8649_v35 = vpop.permute.xlu1 %2766  ;;  %3145 = vrot.lane.b32.xlu1 %v8524_v46, %s4918_s19  ;;  %3473 = vrot.lane.b32.xlu0 %v8503_v4, %s4929_s26 }
 0x43d   : > { %12425 = vst [vmem:[#allocation128_spill] sm:$0xff] %v8649_v35  ;;  %v8655_v45 = vpop.permute.xlu0 %2880 }
 0x43e   : > { %12426 = vst [vmem:[#allocation15_spill] sm:$0xff] %v8655_v45  ;;  %v12432_v45 = vmov 1  }
 0x440   : > { %v8657_v50 = vpop.permute.xlu1 %2787  ;;  %3166 = vperm.xlu1 %4794, %v8570_v36   ;;  %3477 = vrot.lane.b32.xlu0 %v8513_v18, %s4929_s26 }
 0x441   : > { %12427 = vst [vmem:[#allocation16_spill] sm:$0xff] %v8657_v50  ;;  %v8662_v32 = vpop.permute.xlu0 %2922 }
 0x442   : > { %12428 = vst [vmem:[#allocation129_spill] sm:$0xff] %v8662_v32 }
 0x444   : > { %3174 = vperm.xlu1 %4794, %v8583_v20   ;;  %v8665_v52 = vpop.permute.xlu1 %2795  ;;  %3481 = vrot.lane.b32.xlu0 %v8524_v46, %s4929_s26 }
 0x445   : > { %12429 = vst [vmem:[#allocation131_spill] sm:$0xff] %v8665_v52  ;;  %v8669_v56 = vpop.permute.xlu0 %2926 }
 0x446   : > { %12430 = vst [vmem:[#allocation137_spill] sm:$0xff] %v8669_v56 }
 0x448   : > { %3189 = vrot.lane.b32.xlu1 %v8493_v54, %s4920_s20  ;;  %3533 = vrot.lane.b32.xlu0 %v8513_v18, %s4931_s27 }
 0x449   : > { %v8673_v50 = vpop.permute.xlu1 %2799  ;;  %4795 = vset.pattern.permute.xlu1 %v12432_v45  ;;  %v8678_v32 = vpop.permute.xlu0 %2930 }
 0x44a   : > { %12431 = vst [vmem:[#allocation130_spill] sm:$0xff] %v8673_v50  ;;  %12433 = vst [vmem:[#allocation152_spill] sm:$0xff] %v8678_v32  ;;  %v8697_v32 = vld [vmem:[%s11225_s2 + $0xa0] sm:$0xff] }
 0x44c   : > { %3193 = vrot.lane.b32.xlu1 %v8503_v4, %s4920_s20  ;;  %3529 = vrot.lane.b32.xlu0 %v8503_v4, %s4931_s27 }
 0x44d   : > { %v8682_v52 = vpop.permute.xlu1 %2812  ;;  %v8686_v56 = vpop.permute.xlu0 %2934 }
 0x44e   : > { %12434 = vst [vmem:[#allocation145_spill] sm:$0xff] %v8682_v52  ;;  %12435 = vst [vmem:[#allocation150_spill] sm:$0xff] %v8686_v56 }
 0x450   : > { %3197 = vrot.lane.b32.xlu1 %v8513_v18, %s4920_s20  ;;  %3537 = vrot.lane.b32.xlu0 %v8524_v46, %s4931_s27 }
 0x451   : > { %v8690_v50 = vpop.permute.xlu1 %2816 }
 0x452   : > { %12436 = vst [vmem:[#allocation136_spill] sm:$0xff] %v8690_v50  ;;  %v8709_v50 = vld [vmem:[%s11225_s2 + $0xb0] sm:$0xff] }
 0x453   : > { %v8699_v27 = vpop.permute.xlu0 %3084 }
 0x454   : > { %12437 = vst [vmem:[#allocation151_spill] sm:$0xff] %v8699_v27  ;;  %3201 = vrot.lane.b32.xlu1 %v8524_v46, %s4920_s20  ;;  %3820 = vperm.xlu0 %4782, %v8697_v32  }
 0x455   : > { %v8703_v52 = vpop.permute.xlu1 %2820 }
 0x456   : > { %12438 = vst [vmem:[#allocation29_spill] sm:$0xff] %v8703_v52  ;;  %v4630_v52 = vld [vmem:[%s11228_s5 + $0x28] sm:$0xff] }
 0x457   : > { %v8711_v56 = vpop.permute.xlu0 %3135 }
 0x458   : > { %12439 = vst [vmem:[#allocation140_spill] sm:$0xff] %v8711_v56  ;;  %3222 = vperm.xlu1 %4795, %v8570_v36   ;;  %3830 = vperm.xlu0 %4782, %v8709_v50  }
 0x459   : > { %v8714_v35 = vpop.permute.xlu1 %2824 }
 0x45a   : > { %12440 = vst [vmem:[#allocation37_spill] sm:$0xff] %v8714_v35  ;;  %v4638_v35 = vld [vmem:[%s11226_s3 + $0x68] sm:$0xff] }
 0x45b   : > { %v8717_v27 = vpop.permute.xlu0 %3139 }
 0x45c   : > { %12441 = vst [vmem:[#allocation142_spill] sm:$0xff] %v8717_v27  ;;  %3230 = vperm.xlu1 %4795, %v8583_v20   ;;  %4810 = vset.pattern.permute.xlu0 %v12382_v40 }
 0x45d   : > { %v8723_v21 = vpop.permute.xlu1 %2847  ;;  %2419 = vperm.xlu0 %4810, %v4630_v52  }
 0x45e   : > { %12442 = vst [vmem:[#allocation148_spill] sm:$0xff] %v8723_v21 }
 0x45f   : > { %v8726_v56 = vpop.permute.xlu0 %3143 }
 0x460   : > { %12443 = vst [vmem:[#allocation149_spill] sm:$0xff] %v8726_v56  ;;  %3234 = vperm.xlu1 %4795, %v8595_v15  }
 0x461   : > { %v8732_v27 = vpop.permute.xlu1 %2851  ;;  %2509 = vperm.xlu0 %4810, %v4638_v35  }
 0x462   : > { %12444 = vst [vmem:[#allocation24_spill] sm:$0xff] %v8732_v27  ;;  %v4652_v27 = vld [vmem:[%s11226_s3 + $0x98] sm:$0xff] }
 0x463   : > { %v8734_v62 = vpop.permute.xlu0 %3147 }
 0x464   : > { %12445 = vst [vmem:[#allocation77_spill] sm:$0xff] %v8734_v62  ;;  %3247 = vrot.lane.b32.xlu1 %v8393_v59, %s4921_s22  ;;  %v4649_v62 = vld [vmem:[%s11226_s3 + $0x80] sm:$0xff] }
 0x465   : > { %v8738_v21 = vpop.permute.xlu1 %2866  ;;  %4796 = vset.pattern.permute.xlu1 %v12447_v60  ;;  %2563 = vperm.xlu0 %4810, %v8225_v53  }
 0x466   : > { %12446 = vst [vmem:[#allocation18_spill] sm:$0xff] %v8738_v21 }
 0x467   : > { %v8742_v52 = vpop.permute.xlu0 %3191 }
 0x468   : > { %12448 = vst [vmem:[#allocation73_spill] sm:$0xff] %v8742_v52  ;;  %3251 = vrot.lane.b32.xlu1 %v8409_v58, %s4921_s22 }
 0x469   : > { %v8746_v56 = vpop.permute.xlu1 %2870  ;;  %2571 = vperm.xlu0 %4810, %v12344_v9  }
 0x46a   : > { %12449 = vst [vmem:[#allocation35_spill] sm:$0xff] %v8746_v56 }
 0x46b   : > { %v8749_v35 = vpop.permute.xlu0 %3195 }
 0x46c   : > { %12450 = vst [vmem:[#allocation68_spill] sm:$0xff] %v8749_v35  ;;  %3255 = vrot.lane.b32.xlu1 %v8426_v3, %s4921_s22 }
 0x46d   : > { %v8756_v21 = vpop.permute.xlu1 %2874  ;;  %3107 = vperm.xlu0 %4810, %v4649_v62  }
 0x46e   : > { %12451 = vst [vmem:[#allocation8_spill] sm:$0xff] %v8756_v21 }
 0x46f   : > { %v8758_v52 = vpop.permute.xlu0 %3199 }
 0x470   : > { %12452 = vst [vmem:[#allocation13_spill] sm:$0xff] %v8758_v52  ;;  %3259 = vrot.lane.b32.xlu1 %v8439_v23, %s4921_s22 }
 0x471   : > { %v8765_v9 = vpop.permute.xlu1 %2878  ;;  %3122 = vperm.xlu0 %4810, %v4652_v27   ;;  %v4670_v27 = vld [vmem:[%s11226_s3 + $0xa8] sm:$0xff] }
 0x472   : > { %12453 = vst [vmem:[#allocation19_spill] sm:$0xff] %v8765_v9 }
 0x473   : > { %v8767_v35 = vpop.permute.xlu0 %3203 }
 0x474   : > { %12454 = vst [vmem:[#allocation62_spill] sm:$0xff] %v8767_v35  ;;  %3282 = vperm.xlu1 %4796, %v8359_v11   ;;  %v12460_v35 = vmov 3  }
 0x475   : > { %v8770_v56 = vpop.permute.xlu1 %2899  ;;  %3170 = vperm.xlu0 %4810, %v8359_v11  }
 0x476   : > { %12455 = vst [vmem:[#allocation22_spill] sm:$0xff] %v8770_v56 }
 0x477   : > { %v8773_v62 = vpop.permute.xlu0 %3245 }
 0x478   : > { %12456 = vst [vmem:[#allocation7_spill] sm:$0xff] %v8773_v62  ;;  %3286 = vperm.xlu1 %4796, %v8583_v20  }
 0x479   : > { %v8776_v52 = vpop.permute.xlu1 %2907  ;;  %3178 = vperm.xlu0 %4810, %v8595_v15  }
 0x47a   : > { %12457 = vst [vmem:[#allocation32_spill] sm:$0xff] %v8776_v52  ;;  %v4672_v52 = vld [vmem:[%s11226_s3 + $0xb8] sm:$0xff] }
 0x47b   : > { %v8779_v21 = vpop.permute.xlu0 %3249 }
 0x47c   : > { %12458 = vst [vmem:[#allocation20_spill] sm:$0xff] %v8779_v21  ;;  %3301 = vrot.lane.b32.xlu1 %v8493_v54, %s4923_s23 }
 0x47d   : > { %v8786_v56 = vpop.permute.xlu1 %2911  ;;  %4797 = vset.pattern.permute.xlu1 %v12460_v35  ;;  %3853 = vperm.xlu0 %4810, %v4670_v27  }
 0x47e   : > { %12459 = vst [vmem:[#allocation34_spill] sm:$0xff] %v8786_v56 }
 0x47f   : > { %v8789_v62 = vpop.permute.xlu0 %3253 }
 0x480   : > { %12461 = vst [vmem:[#allocation31_spill] sm:$0xff] %v8789_v62  ;;  %3305 = vrot.lane.b32.xlu1 %v8503_v4, %s4923_s23 }
 0x481   : > { %v8796_v21 = vpop.permute.xlu1 %2924  ;;  %3863 = vperm.xlu0 %4810, %v4672_v52  }
 0x482   : > { %12462 = vst [vmem:[#allocation38_spill] sm:$0xff] %v8796_v21 }
 0x483   : > { %v8798_v9 = vpop.permute.xlu0 %3257 }
 0x484   : > { %12463 = vst [vmem:[#allocation25_spill] sm:$0xff] %v8798_v9  ;;  %3309 = vrot.lane.b32.xlu1 %v8513_v18, %s4923_s23 }
 0x485   : > { %v8802_v56 = vpop.permute.xlu1 %2928 }
 0x486   : > { %12464 = vst [vmem:[#allocation33_spill] sm:$0xff] %v8802_v56 }
 0x487   : > { %v8804_v27 = vpop.permute.xlu0 %3303 }
 0x488   : > { %12465 = vst [vmem:[#allocation64_spill] sm:$0xff] %v8804_v27  ;;  %3313 = vrot.lane.b32.xlu1 %v8524_v46, %s4923_s23 }
 0x489   : > { %v8808_v62 = vpop.permute.xlu1 %2932 }
 0x48a   : > { %12466 = vst [vmem:[#allocation87_spill] sm:$0xff] %v8808_v62 }
 0x48b   : > { %v8810_v30 = vpop.permute.xlu0 %3307 }
 0x48c   : > { %12467 = vst [vmem:[#allocation28_spill] sm:$0xff] %v8810_v30  ;;  %3334 = vperm.xlu1 %4797, %v8570_v36   ;;  %v12474_v30 = vmov 5  }
 0x48d   : > { %v8813_v21 = vpop.permute.xlu1 %2936 }
 0x48e   : > { %12468 = vst [vmem:[#allocation81_spill] sm:$0xff] %v8813_v21 }
 0x48f   : > { %v8815_v52 = vpop.permute.xlu0 %3311 }
 0x490   : > { %12469 = vst [vmem:[#allocation82_spill] sm:$0xff] %v8815_v52  ;;  %3342 = vperm.xlu1 %4797, %v8583_v20  }
 0x491   : > { %v8818_v9 = vpop.permute.xlu1 %2959 }
 0x492   : > { %12470 = vst [vmem:[#allocation10_spill] sm:$0xff] %v8818_v9 }
 0x493   : > { %v8820_v56 = vpop.permute.xlu0 %3315 }
 0x494   : > { %12471 = vst [vmem:[#allocation45_spill] sm:$0xff] %v8820_v56  ;;  %3346 = vperm.xlu1 %4797, %v8595_v15  }
 0x495   : > { %v8823_v27 = vpop.permute.xlu1 %2963 }
 0x496   : > { %12472 = vst [vmem:[#allocation65_spill] sm:$0xff] %v8823_v27 }
 0x497   : > { %v8825_v29 = vpop.permute.xlu0 %3357 }
 0x498   : > { %12473 = vst [vmem:[#allocation70_spill] sm:$0xff] %v8825_v29  ;;  %3359 = vrot.lane.b32.xlu1 %v8393_v59, %s4925_s24 }
 0x499   : > { %4798 = vset.pattern.permute.xlu1 %v12474_v30 }
 0x49a   : > { %v8830_v21 = vpop.permute.xlu1 %3079 }
 0x49b   : > { %12475 = vst [vmem:[#allocation40_spill] sm:$0xff] %v8830_v21  ;;  %v8832_v52 = vpop.permute.xlu0 %3361 }
 0x49c   : > { %12476 = vst [vmem:[#allocation74_spill] sm:$0xff] %v8832_v52  ;;  %3363 = vrot.lane.b32.xlu1 %v8409_v58, %s4925_s24 }
 0x49e   : > { %v8836_v9 = vpop.permute.xlu1 %3089 }
 0x49f   : > { %12477 = vst [vmem:[#allocation42_spill] sm:$0xff] %v8836_v9  ;;  %v8838_v56 = vpop.permute.xlu0 %3365 }
 0x4a0   : > { %12478 = vst [vmem:[#allocation41_spill] sm:$0xff] %v8838_v56  ;;  %3367 = vrot.lane.b32.xlu1 %v8426_v3, %s4925_s24 }
 0x4a2   : > { %v8842_v27 = vpop.permute.xlu1 %3094 }
 0x4a3   : > { %12479 = vst [vmem:[#allocation63_spill] sm:$0xff] %v8842_v27  ;;  %v8844_v29 = vpop.permute.xlu0 %3369 }
 0x4a4   : > { %12480 = vst [vmem:[#allocation30_spill] sm:$0xff] %v8844_v29  ;;  %3371 = vrot.lane.b32.xlu1 %v8439_v23, %s4925_s24 }
 0x4a7   : > { %v8848_v21 = vpop.permute.xlu1 %3112  ;;  %v8850_v52 = vpop.permute.xlu0 %3415 }
 0x4a8   : > { %12481 = vst [vmem:[#allocation43_spill] sm:$0xff] %v8848_v21  ;;  %12482 = vst [vmem:[#allocation88_spill] sm:$0xff] %v8850_v52  ;;  %3394 = vperm.xlu1 %4798, %v8359_v11  }
 0x4ab   : > { %v8853_v62 = vpop.permute.xlu1 %3117  ;;  %v8855_v9 = vpop.permute.xlu0 %3419 }
 0x4ac   : > { %12483 = vst [vmem:[#allocation84_spill] sm:$0xff] %v8853_v62  ;;  %12484 = vst [vmem:[#allocation4_spill] sm:$0xff] %v8855_v9  ;;  %3398 = vperm.xlu1 %4798, %v8583_v20  }
 0x4af   : > { %v8858_v56 = vpop.permute.xlu1 %3133  ;;  %v8860_v27 = vpop.permute.xlu0 %3423 }
 0x4b0   : > { %12485 = vst [vmem:[#allocation134_spill] sm:$0xff] %v8858_v56  ;;  %12486 = vst [vmem:[#allocation92_spill] sm:$0xff] %v8860_v27  ;;  %3413 = vrot.lane.b32.xlu1 %v8493_v54, %s4927_s25 }
 0x4b1   : > { %4799 = vset.pattern.permute.xlu1 %v12365_v43 }
 0x4b3   : > { %v8865_v21 = vpop.permute.xlu1 %3137  ;;  %v8867_v52 = vpop.permute.xlu0 %3427 }
 0x4b4   : > { %12487 = vst [vmem:[#allocation39_spill] sm:$0xff] %v8865_v21  ;;  %12488 = vst [vmem:[#allocation94_spill] sm:$0xff] %v8867_v52  ;;  %3417 = vrot.lane.b32.xlu1 %v8503_v4, %s4927_s25 }
 0x4b7   : > { %v8871_v62 = vpop.permute.xlu1 %3141  ;;  %v8873_v9 = vpop.permute.xlu0 %3469 }
 0x4b8   : > { %12489 = vst [vmem:[#allocation76_spill] sm:$0xff] %v8871_v62  ;;  %12490 = vst [vmem:[#allocation100_spill] sm:$0xff] %v8873_v9  ;;  %3421 = vrot.lane.b32.xlu1 %v8513_v18, %s4927_s25  ;;  %v12495_v9 = vld [vmem:[#allocation96_spill] sm:$0xff] }
 0x4bb   : > { %v8877_v56 = vpop.permute.xlu1 %3145  ;;  %v8879_v27 = vpop.permute.xlu0 %3473 }
 0x4bc   : > { %12491 = vst [vmem:[#allocation105_spill] sm:$0xff] %v8877_v56  ;;  %12492 = vst [vmem:[#allocation95_spill] sm:$0xff] %v8879_v27  ;;  %3425 = vrot.lane.b32.xlu1 %v8524_v46, %s4927_s25 }
 0x4bf   : > { %v8883_v52 = vpop.permute.xlu1 %3166  ;;  %v8885_v21 = vpop.permute.xlu0 %3477 }
 0x4c0   : > { %12493 = vst [vmem:[#allocation133_spill] sm:$0xff] %v8883_v52  ;;  %12494 = vst [vmem:[#allocation61_spill] sm:$0xff] %v8885_v21  ;;  %3446 = vperm.xlu1 %4799, %v8570_v36   ;;  %v2388_v4 = vpop.f32.mrb[8].mxu1 }
 0x4c1   : > { %v2432_v62 = vadd.f32 %v12495_v9, %v2388_v4  ;;  %v2390_v29 = vpop.f32.mrb[9].mxu1  ;;  %v12500_v4 = vld [vmem:[#allocation97_spill] sm:$0xff] }
 0x4c2   : > { %v2433_v18 = vadd.f32 %v12495_v9, %v2390_v29  ;;  %v2392_v56 = vpop.f32.mrb[10].mxu1 }
 0x4c3   : > { %v8890_v24 = vmax.f32 %v2432_v62, 0.0  ;;  %v8892_v27 = vpop.permute.xlu1 %3174  ;;  %v8894_v34 = vpop.permute.xlu0 %3481 }
 0x4c4   : > { %12496 = vst [vmem:[#allocation86_spill] sm:$0xff] %v8892_v27  ;;  %12497 = vst [vmem:[#allocation85_spill] sm:$0xff] %v8894_v34  ;;  %v8896_v46 = vmax.f32 %v2433_v18, 0.0  ;;  %3454 = vperm.xlu1 %4799, %v8583_v20   ;;  %v2394_v52 = vpop.f32.mrb[11].mxu1 }
 0x4c5   : > { %2448 = vst [vmem:[%s5013_s16 + $0x80] sm:$0xff] %v8890_v24 }
 0x4c6   : > { %2449 = vst [vmem:[%s5013_s16 + $0x88] sm:$0xff] %v8896_v46  ;;  %3882 = vrot.lane.b32.xlu0 %v8896_v46, %s4918_s19 }
 0x4c7   : > { %v8905_v29 = vpop.permute.xlu1 %3189  ;;  %v8907_v9 = vpop.permute.xlu0 %3533 }
 0x4c8   : > { %12498 = vst [vmem:[#allocation78_spill] sm:$0xff] %v8905_v29  ;;  %12499 = vst [vmem:[#allocation89_spill] sm:$0xff] %v8907_v9  ;;  %3458 = vperm.xlu1 %4799, %v8595_v15   ;;  %v2398_v62 = vpop.f32.mrb[12].mxu1 }
 0x4c9   : > { %v2436_v18 = vadd.f32 %v12500_v4, %v2398_v62  ;;  %v2400_v34 = vpop.f32.mrb[13].mxu1 }
 0x4ca   : > { %v2437_v27 = vadd.f32 %v12500_v4, %v2400_v34  ;;  %v2402_v21 = vpop.f32.mrb[14].mxu1  ;;  %3915 = vperm.xlu0 %4810, %v8709_v50  }
 0x4cb   : > { %v8913_v17 = vmax.f32 %v2436_v18, 0.0  ;;  %v2438_v29 = vadd.f32 %v12501_v2, %v2402_v21  ;;  %v8916_v9 = vpop.permute.xlu1 %3193  ;;  %v2404_v8 = vpop.f32.mrb[15].mxu1 }
 0x4cc   : > { %12502 = vst [vmem:[#allocation80_spill] sm:$0xff] %v8916_v9  ;;  %v8918_v33 = vmax.f32 %v2437_v27, 0.0  ;;  %v2439_v62 = vadd.f32 %v12501_v2, %v2404_v8  ;;  %3471 = vrot.lane.b32.xlu1 %v8393_v59, %s4929_s26  ;;  %v8923_v34 = vpop.permute.xlu0 %3529 }
 0x4cd   : > { %12503 = vst [vmem:[#allocation99_spill] sm:$0xff] %v8923_v34  ;;  %2452 = vst [vmem:[%s5013_s16 + $0xa0] sm:$0xff] %v8913_v17  ;;  %v2446_v4 = vmax.f32 %v2438_v29, 0.0  ;;  %4800 = vset.pattern.permute.xlu1 %v12383_v61 }
 0x4ce   : > { %2453 = vst [vmem:[%s5013_s16 + $0xa8] sm:$0xff] %v8918_v33  ;;  %v2447_v21 = vmax.f32 %v2439_v62, 0.0  ;;  %4813 = vset.pattern.permute.xlu0 %v12432_v45 }
 0x4cf   : > { %2454 = vst [vmem:[%s5013_s16 + $0xb0] sm:$0xff] %v2446_v4  ;;  %v8932_v27 = vpop.permute.xlu1 %3197  ;;  %2619 = vperm.xlu0 %4813, %v8225_v53  }
 0x4d0   : > { %2455 = vst [vmem:[%s5013_s16 + $0xb8] sm:$0xff] %v2447_v21  ;;  %3475 = vrot.lane.b32.xlu1 %v8409_v58, %s4929_s26  ;;  %v8938_v8 = vpop.permute.xlu0 %3537 }
 0x4d3   : > { %v8940_v2 = vpop.permute.xlu1 %3201  ;;  %2631 = vperm.xlu0 %4813, %v8304_v19  }
 0x4d4   : > { %12504 = vst [vmem:[#allocation79_spill] sm:$0xff] %v8940_v2  ;;  %3479 = vrot.lane.b32.xlu1 %v8426_v3, %s4929_s26  ;;  %v8945_v29 = vpop.permute.xlu0 %3820 }
 0x4d5   : > { %12505 = vst [vmem:[#allocation6_spill] sm:$0xff] %v8945_v29 }
 0x4d7   : > { %v8947_v18 = vpop.permute.xlu1 %3222  ;;  %3226 = vperm.xlu0 %4813, %v8359_v11  }
 0x4d8   : > { %12506 = vst [vmem:[#allocation83_spill] sm:$0xff] %v8947_v18  ;;  %3483 = vrot.lane.b32.xlu1 %v8439_v23, %s4929_s26  ;;  %v8952_v62 = vpop.permute.xlu0 %3830 }
 0x4d9   : > { %12507 = vst [vmem:[#allocation106_spill] sm:$0xff] %v8952_v62 }
 0x4db   : > { %v8954_v4 = vpop.permute.xlu1 %3230  ;;  %3963 = vperm.xlu0 %4813, %v8697_v32  }
 0x4dc   : > { %12508 = vst [vmem:[#allocation102_spill] sm:$0xff] %v8954_v4  ;;  %3506 = vperm.xlu1 %4800, %v8359_v11   ;;  %v2420_v21 = vpop.permute.xlu0 %2419 }
 0x4dd   : > { %v2434_v9 = vadd.f32 %v2420_v21, %v2392_v56  ;;  %v2435_v29 = vadd.f32 %v2420_v21, %v2394_v52 }
 0x4df   : > { %v8958_v2 = vpop.permute.xlu1 %3234  ;;  %3930 = vrot.lane.b32.xlu0 %v8890_v24, %s4920_s20  ;;  %v8962_v18 = vmax.f32 %v2434_v9, 0.0  ;;  %v8964_v34 = vmax.f32 %v2435_v29, 0.0 }
 0x4e0   : > { %12509 = vst [vmem:[#allocation93_spill] sm:$0xff] %v8958_v2  ;;  %3510 = vperm.xlu1 %4800, %v8583_v20  }
 0x4e1   : > { %2450 = vst [vmem:[%s5013_s16 + $0x90] sm:$0xff] %v8962_v18  ;;  %2451 = vst [vmem:[%s5013_s16 + $0x98] sm:$0xff] %v8964_v34 }
 0x4e3   : > { %v8971_v4 = vpop.permute.xlu1 %3247  ;;  %3938 = vrot.lane.b32.xlu0 %v8896_v46, %s4920_s20 }
 0x4e4   : > { %12510 = vst [vmem:[#allocation98_spill] sm:$0xff] %v8971_v4  ;;  %4801 = vset.pattern.permute.xlu1 %v12396_v25 }
 0x4e5   : > { %3558 = vperm.xlu1 %4801, %v8570_v36  }
 0x4e7   : > { %v8977_v56 = vpop.permute.xlu1 %3251  ;;  %3971 = vperm.xlu0 %4813, %v8709_v50  }
 0x4e8   : > { %12511 = vst [vmem:[#allocation101_spill] sm:$0xff] %v8977_v56 }
 0x4e9   : > { %3525 = vrot.lane.b32.xlu1 %v8493_v54, %s4931_s27  ;;  %v9000_v54 = vld [vmem:[%s11225_s2 + $0xa8] sm:$0xff] }
 0x4eb   : > { %v8982_v52 = vpop.permute.xlu1 %3255  ;;  %4814 = vset.pattern.permute.xlu0 %v12447_v60 }
 0x4ec   : > { %12512 = vst [vmem:[#allocation90_spill] sm:$0xff] %v8982_v52  ;;  %2679 = vperm.xlu0 %4814, %v8417_v7  }
 0x4ed   : > { %3527 = vrot.lane.b32.xlu1 %v8393_v59, %s4931_s27 }
 0x4ef   : > { %v8988_v9 = vpop.permute.xlu1 %3259 }
 0x4f0   : > { %12513 = vst [vmem:[#allocation23_spill] sm:$0xff] %v8988_v9  ;;  %3278 = vperm.xlu0 %4814, %v8570_v36  }
 0x4f1   : > { %3535 = vrot.lane.b32.xlu1 %v8426_v3, %s4931_s27 }
 0x4f3   : > { %v8993_v29 = vpop.permute.xlu1 %3282 }
 0x4f4   : > { %12514 = vst [vmem:[#allocation75_spill] sm:$0xff] %v8993_v29  ;;  %3290 = vperm.xlu0 %4814, %v8595_v15  }
 0x4f5   : > { %3570 = vperm.xlu1 %4801, %v8595_v15  }
 0x4f7   : > { %v9002_v21 = vpop.permute.xlu1 %3286 }
 0x4f8   : > { %12515 = vst [vmem:[#allocation27_spill] sm:$0xff] %v9002_v21  ;;  %4023 = vperm.xlu0 %4814, %v9000_v54  }
 0x4f9   : > { %3531 = vrot.lane.b32.xlu1 %v8409_v58, %s4931_s27  ;;  %v9022_v58 = vld [vmem:[%s11225_s2 + $0xb8] sm:$0xff] }
 0x4fa   : > { %4802 = vset.pattern.permute.xlu1 %v12407_v57 }
 0x4fb   : > { %v9008_v59 = vpop.permute.xlu1 %3301 }
 0x4fc   : > { %12516 = vst [vmem:[#allocation9_spill] sm:$0xff] %v9008_v59  ;;  %3988 = vrot.lane.b32.xlu0 %v8962_v18, %s4921_s22  ;;  %v4669_v59 = vld [vmem:[%s11226_s3 + $0xa0] sm:$0xff] }
 0x4fd   : > { %3539 = vrot.lane.b32.xlu1 %v8439_v23, %s4931_s27 }
 0x4ff   : > { %v9014_v3 = vpop.permute.xlu1 %3305 }
 0x500   : > { %12517 = vst [vmem:[#allocation91_spill] sm:$0xff] %v9014_v3  ;;  %3996 = vrot.lane.b32.xlu0 %v8964_v34, %s4921_s22 }
 0x501   : > { %3825 = vperm.xlu1 %4802, %v9000_v54  }
 0x503   : > { %v9024_v29 = vpop.permute.xlu1 %3309 }
 0x504   : > { %12518 = vst [vmem:[#allocation51_spill] sm:$0xff] %v9024_v29  ;;  %4031 = vperm.xlu0 %4814, %v9022_v58  }
 0x505   : > { %4803 = vset.pattern.permute.xlu1 %v12382_v40 }
 0x506   : > { %3848 = vperm.xlu1 %4803, %v4669_v59   ;;  %v9044_v59 = vpop.permute.xlu0 %2509 }
 0x507   : > { %v9031_v23 = vpop.permute.xlu1 %3313  ;;  %12522 = vst [vmem:[#allocation69_spill] sm:$0xff] %v9044_v59 }
 0x508   : > { %12519 = vst [vmem:[#allocation5_spill] sm:$0xff] %v9031_v23  ;;  %4817 = vset.pattern.permute.xlu0 %v12460_v35 }
 0x509   : > { %2731 = vperm.xlu0 %4817, %v8225_v53  }
 0x50a   : > { %3907 = vperm.xlu1 %4803, %v8697_v32  }
 0x50b   : > { %v9036_v3 = vpop.permute.xlu1 %3334 }
 0x50c   : > { %12520 = vst [vmem:[#allocation26_spill] sm:$0xff] %v9036_v3 }
 0x50d   : > { %2743 = vperm.xlu0 %4817, %v8304_v19  }
 0x50e   : > { %3911 = vperm.xlu1 %4803, %v9000_v54  }
 0x50f   : > { %v9040_v29 = vpop.permute.xlu1 %3342 }
 0x510   : > { %12521 = vst [vmem:[#allocation3_spill] sm:$0xff] %v9040_v29  ;;  %v9055_v29 = vpop.permute.xlu0 %2563 }
 0x511   : > { %3338 = vperm.xlu0 %4817, %v8359_v11   ;;  %12525 = vst [vmem:[#allocation36_spill] sm:$0xff] %v9055_v29  ;;  %v12686_v29 = vld [vmem:[#allocation151_spill] sm:$0xff] }
 0x512   : > { %4804 = vset.pattern.permute.xlu1 %v12432_v45 }
 0x513   : > { %3967 = vperm.xlu1 %4804, %v9000_v54   ;;  %v9047_v23 = vpop.permute.xlu1 %3346 }
 0x514   : > { %12523 = vst [vmem:[#allocation48_spill] sm:$0xff] %v9047_v23  ;;  %v9064_v23 = vpop.permute.xlu0 %2571 }
 0x515   : > { %4050 = vrot.lane.b32.xlu0 %v8896_v46, %s4923_s23 }
 0x517   : > { %4805 = vset.pattern.permute.xlu1 %v12447_v60  ;;  %v9052_v53 = vpop.permute.xlu1 %3359 }
 0x518   : > { %12524 = vst [vmem:[#allocation2_spill] sm:$0xff] %v9052_v53  ;;  %4019 = vperm.xlu1 %4805, %v8697_v32   ;;  %v9072_v56 = vpop.permute.xlu0 %3107 }
 0x519   : > { %4083 = vperm.xlu0 %4817, %v8709_v50   ;;  %12529 = vst [vmem:[#allocation154_spill] sm:$0xff] %v9072_v56  ;;  %v12656_v56 = vld [vmem:[#allocation131_spill] sm:$0xff] }
 0x51b   : > { %v9058_v3 = vpop.permute.xlu1 %3363 }
 0x51c   : > { %12526 = vst [vmem:[#allocation96_spill] sm:$0xff] %v9058_v3  ;;  %4806 = vset.pattern.permute.xlu1 %v12460_v35 }
 0x51d   : > { %4075 = vperm.xlu1 %4806, %v8697_v32   ;;  %4818 = vset.pattern.permute.xlu0 %v12474_v30 }
 0x51e   : > { %2791 = vperm.xlu0 %4818, %v8417_v7  }
 0x51f   : > { %v9066_v21 = vpop.permute.xlu1 %3367 }
 0x520   : > { %12527 = vst [vmem:[#allocation97_spill] sm:$0xff] %v9066_v21  ;;  %v9081_v21 = vpop.permute.xlu0 %3122 }
 0x521   : > { %4079 = vperm.xlu1 %4806, %v9000_v54   ;;  %12531 = vst [vmem:[#allocation156_spill] sm:$0xff] %v9081_v21 }
 0x522   : > { %3390 = vperm.xlu0 %4818, %v8570_v36  }
 0x523   : > { %v9070_v53 = vpop.permute.xlu1 %3371 }
 0x524   : > { %12528 = vst [vmem:[#allocation143_spill] sm:$0xff] %v9070_v53 }
 0x525   : > { %4807 = vset.pattern.permute.xlu1 %v12474_v30 }
 0x526   : > { %4135 = vperm.xlu1 %4807, %v9000_v54   ;;  %3402 = vperm.xlu0 %4818, %v8595_v15  }
 0x527   : > { %v9077_v3 = vpop.permute.xlu1 %3394 }
 0x528   : > { %12530 = vst [vmem:[#allocation155_spill] sm:$0xff] %v9077_v3  ;;  %v9092_v3 = vpop.permute.xlu0 %3170 }
 0x529   : > { %12534 = vst [vmem:[#allocation159_spill] sm:$0xff] %v9092_v3 }
 0x52a   : > { %4808 = vset.pattern.permute.xlu1 %v12365_v43  ;;  %4131 = vperm.xlu0 %4818, %v8697_v32  }
 0x52b   : > { %4187 = vperm.xlu1 %4808, %v8697_v32   ;;  %v9084_v9 = vpop.permute.xlu1 %3398 }
 0x52c   : > { %12532 = vst [vmem:[#allocation157_spill] sm:$0xff] %v9084_v9  ;;  %v9100_v9 = vpop.permute.xlu0 %3178 }
 0x52d   : > { %12536 = vst [vmem:[#allocation161_spill] sm:$0xff] %v9100_v9  ;;  %v9117_v9 = vld [vmem:[%s11225_s2 + $0x60] sm:$0xff] }
 0x52e   : > { %4100 = vrot.lane.b32.xlu0 %v8962_v18, %s4925_s24 }
 0x52f   : > { %4809 = vset.pattern.permute.xlu1 %v12383_v61  ;;  %v9089_v53 = vpop.permute.xlu1 %3413 }
 0x530   : > { %12533 = vst [vmem:[#allocation158_spill] sm:$0xff] %v9089_v53  ;;  %4243 = vperm.xlu1 %4809, %v8697_v32   ;;  %v9107_v32 = vpop.permute.xlu0 %3853 }
 0x531   : > { %12538 = vst [vmem:[#allocation163_spill] sm:$0xff] %v9107_v32 }
 0x532   : > { %4108 = vrot.lane.b32.xlu0 %v8964_v34, %s4925_s24 }
 0x533   : > { %v9096_v4 = vpop.permute.xlu1 %3417 }
 0x534   : > { %12535 = vst [vmem:[#allocation160_spill] sm:$0xff] %v9096_v4  ;;  %4247 = vperm.xlu1 %4809, %v9000_v54   ;;  %v4671_v4 = vld [vmem:[%s11226_s3 + $0xb0] sm:$0xff]  ;;  %v9124_v32 = vpop.permute.xlu0 %3863 }
 0x535   : > { %12541 = vst [vmem:[#allocation166_spill] sm:$0xff] %v9124_v32 }
 0x536   : > { %4143 = vperm.xlu0 %4818, %v9022_v58  }
 0x537   : > { %v9102_v21 = vpop.permute.xlu1 %3421 }
 0x538   : > { %12537 = vst [vmem:[#allocation162_spill] sm:$0xff] %v9102_v21  ;;  %4811 = vset.pattern.permute.xlu1 %v12407_v57  ;;  %v9131_v21 = vpop.permute.xlu0 %3882 }
 0x539   : > { %3835 = vperm.xlu1 %4811, %v9022_v58   ;;  %12543 = vst [vmem:[#allocation168_spill] sm:$0xff] %v9131_v21 }
 0x53a   : > { %4821 = vset.pattern.permute.xlu0 %v12365_v43 }
 0x53b   : > { %v9109_v53 = vpop.permute.xlu1 %3425  ;;  %2843 = vperm.xlu0 %4821, %v9117_v9  }
 0x53c   : > { %12539 = vst [vmem:[#allocation164_spill] sm:$0xff] %v9109_v53 }
 0x53d   : > { %4812 = vset.pattern.permute.xlu1 %v12382_v40 }
 0x53e   : > { %3858 = vperm.xlu1 %4812, %v4671_v4  }
 0x53f   : > { %v9121_v57 = vpop.permute.xlu1 %3446  ;;  %2855 = vperm.xlu0 %4821, %v8304_v19  }
 0x540   : > { %12540 = vst [vmem:[#allocation165_spill] sm:$0xff] %v9121_v57 }
 0x542   : > { %3874 = vrot.lane.b32.xlu1 %v8890_v24, %s4918_s19 }
 0x543   : > { %v9128_v53 = vpop.permute.xlu1 %3454  ;;  %3450 = vperm.xlu0 %4821, %v8359_v11  }
 0x544   : > { %12542 = vst [vmem:[#allocation167_spill] sm:$0xff] %v9128_v53 }
 0x546   : > { %3876 = vrot.lane.b32.xlu1 %v8962_v18, %s4918_s19 }
 0x547   : > { %v9135_v40 = vpop.permute.xlu1 %3458  ;;  %4191 = vperm.xlu0 %4821, %v9000_v54  }
 0x548   : > { %12544 = vst [vmem:[#allocation169_spill] sm:$0xff] %v9135_v40  ;;  %v4878_v40 = vld [vmem:[%s5013_s16] sm:$0xff] }
 0x549   : > { %v9138_v4 = vpop.permute.xlu0 %3915  ;;  %v2494_v53 = vmul.f32 %v4878_v40, %v8315_v13  ;;  %v2499_v40 = vmul.f32 %v8348_v55, %v8160_v6 }
 0x54a   : > { %12545 = vst [vmem:[#allocation170_spill] sm:$0xff] %v9138_v4  ;;  %3884 = vrot.lane.b32.xlu1 %v8964_v34, %s4918_s19 }
 0x54b   : > { %v9142_v19 = vpop.permute.xlu1 %3471  ;;  %4162 = vrot.lane.b32.xlu0 %v8896_v46, %s4927_s25 }
 0x54c   : > { %12546 = vst [vmem:[#allocation171_spill] sm:$0xff] %v9142_v19 }
 0x54e   : > { %3919 = vperm.xlu1 %4812, %v9022_v58   ;;  %v9147_v11 = vpop.permute.xlu0 %2619 }
 0x54f   : > { %12547 = vst [vmem:[#allocation172_spill] sm:$0xff] %v9147_v11  ;;  %v9149_v32 = vpop.permute.xlu1 %3475  ;;  %4195 = vperm.xlu0 %4821, %v8709_v50  }
 0x550   : > { %12548 = vst [vmem:[#allocation173_spill] sm:$0xff] %v9149_v32 }
 0x552   : > { %3932 = vrot.lane.b32.xlu1 %v8962_v18, %s4920_s20  ;;  %v9154_v4 = vpop.permute.xlu0 %2631 }
 0x553   : > { %12549 = vst [vmem:[#allocation174_spill] sm:$0xff] %v9154_v4  ;;  %v9156_v21 = vpop.permute.xlu1 %3479  ;;  %4815 = vset.pattern.permute.xlu1 %v12432_v45  ;;  %4822 = vset.pattern.permute.xlu0 %v12383_v61  ;;  %v4881_v4 = vld [vmem:[%s5013_s16 + $0x30] sm:$0xff] }
 0x554   : > { %12550 = vst [vmem:[#allocation175_spill] sm:$0xff] %v9156_v21  ;;  %2903 = vperm.xlu0 %4822, %v8417_v7   ;;  %v4879_v7 = vld [vmem:[%s5013_s16 + $0x20] sm:$0xff] }
 0x555   : > { %v2498_v57 = vmul.f32 %v4879_v7, %v8160_v6 }
 0x556   : > { %3940 = vrot.lane.b32.xlu1 %v8964_v34, %s4920_s20  ;;  %v9163_v32 = vpop.permute.xlu0 %3226 }
 0x557   : > { %12551 = vst [vmem:[#allocation176_spill] sm:$0xff] %v9163_v32  ;;  %v9165_v19 = vpop.permute.xlu1 %3483  ;;  %v4880_v32 = vld [vmem:[%s5013_s16 + $0x8] sm:$0xff] }
 0x558   : > { %12552 = vst [vmem:[#allocation177_spill] sm:$0xff] %v9165_v19  ;;  %3502 = vperm.xlu0 %4822, %v8570_v36   ;;  %v2495_v19 = vmul.f32 %v4880_v32, %v8315_v13  ;;  %v2500_v36 = vmul.f32 %v4881_v4, %v8338_v63  ;;  %v2547_v13 = vsel %vm361_vm0, %v8317_v1, %v8371_v0  ;;  %v4883_v4 = vld [vmem:[%s5013_s16 + $0x10] sm:$0xff] }
 0x559   : > { %v2553_v32 = vsel %vm361_vm0, %v8390_v31, %v8340_v41  ;;  %v9204_v6 = vmul.f32 %v4883_v4, %v8132_v16  ;;  %v9224_v4 = vadd.f32 %v8206_v47, %v2494_v53 }
 0x55a   : > { %3975 = vperm.xlu1 %4815, %v9022_v58   ;;  %v9169_v21 = vpop.permute.xlu0 %3963  ;;  %v9232_v11 = vadd.f32 %v8206_v47, %v2495_v19 }
 0x55b   : > { %12553 = vst [vmem:[#allocation178_spill] sm:$0xff] %v9169_v21  ;;  %v9171_v45 = vpop.permute.xlu1 %3506  ;;  %v2551_v21 = vsel %vm361_vm0, %v8371_v0, %v8317_v1  ;;  %12556 = vst [vmem:[#allocation181_spill] sm:$0xff] %v9204_v6  ;;  %v9211_v1 = vadd.f32 %v8250_v10, %v2498_v57  ;;  %v2549_v0 = vsel %vm361_vm0, %v8340_v41, %v8390_v31  ;;  %v12563_v31 = vld [vmem:[#allocation47_spill] sm:$0xff] }
 0x55c   : > { %12554 = vst [vmem:[#allocation179_spill] sm:$0xff] %v9171_v45  ;;  %3514 = vperm.xlu0 %4822, %v8595_v15   ;;  %v4882_v45 = vld [vmem:[%s5013_s16 + $0x38] sm:$0xff]  ;;  %12560 = vst [vmem:[#allocation185_spill] sm:$0xff] %v9224_v4  ;;  %v2550_v57 = vsel %vm361_vm0, %v8404_v22, %v8369_v28  ;;  %v2528_v41 = vadd.f32 %v8288_v12, %v2500_v36 }
 0x55d   : > { %v2501_v7 = vmul.f32 %v4882_v45, %v8338_v63  ;;  %v4884_v63 = vld [vmem:[%s5013_s16 + $0x18] sm:$0xff]  ;;  %12562 = vst [vmem:[#allocation186_spill] sm:$0xff] %v9232_v11 }
 0x55e   : > { %3986 = vrot.lane.b32.xlu1 %v8890_v24, %s4921_s22  ;;  %v9200_v15 = vpop.permute.xlu0 %3930  ;;  %v9208_v55 = vmul.f32 %v4884_v63, %v8132_v16  ;;  %v12561_v16 = vld [vmem:[#allocation46_spill] sm:$0xff] }
 0x55f   : > { %12555 = vst [vmem:[#allocation180_spill] sm:$0xff] %v9200_v15  ;;  %v9217_v45 = vpop.permute.xlu1 %3510  ;;  %4816 = vset.pattern.permute.xlu1 %v12447_v60  ;;  %v9221_v15 = vadd.f32 %v8250_v10, %v2499_v40  ;;  %v2556_v63 = vmul.f32 %v2551_v21, %v12561_v16  ;;  %v2557_v60 = vmul.f32 %v2547_v13, %v12563_v31 }
 0x560   : > { %12557 = vst [vmem:[#allocation182_spill] sm:$0xff] %v9208_v55  ;;  %12558 = vst [vmem:[#allocation183_spill] sm:$0xff] %v9217_v45  ;;  %v2560_v10 = vmul.f32 %v2553_v32, %v12561_v16  ;;  %4212 = vrot.lane.b32.xlu0 %v8962_v18, %s4929_s26  ;;  %v2529_v53 = vadd.f32 %v8288_v12, %v2501_v7  ;;  %v2561_v21 = vmul.f32 %v2549_v0, %v12563_v31 }
 0x561   : > { %12559 = vst [vmem:[#allocation184_spill] sm:$0xff] %v9221_v15  ;;  %v2546_v40 = vsel %vm361_vm0, %v8369_v28, %v8404_v22  ;;  %v9246_v47 = vmul.f32 %v8406_v26, %v2556_v63  ;;  %v9253_v36 = vmul.f32 %v2550_v57, %v12561_v16  ;;  %v9256_v12 = vmul.f32 %v8406_v26, %v2557_v60  ;;  %v12570_v57 = vld [vmem:[#allocation107_spill] sm:$0xff]  ;;  %v12571_v60 = vld [vmem:[#allocation144_spill] sm:$0xff] }
 0x562   : > { %3994 = vrot.lane.b32.xlu1 %v8896_v46, %s4921_s22  ;;  %v9250_v19 = vpop.permute.xlu0 %3938  ;;  %v2552_v7 = vsel %vm361_vm0, %v8421_v44, %v8388_v14  ;;  %v2584_v28 = vmul.f32 %v8423_v5, %v2560_v10  ;;  %v2548_v22 = vsel %vm361_vm0, %v8388_v14, %v8421_v44  ;;  %v2585_v13 = vmul.f32 %v8423_v5, %v2561_v21 }
 0x563   : > { %12564 = vst [vmem:[#allocation187_spill] sm:$0xff] %v9246_v47  ;;  %12565 = vst [vmem:[#allocation188_spill] sm:$0xff] %v9250_v19  ;;  %v2604_v26 = vsel %vm426_vm1, %v8448_v37, %v8469_v49  ;;  %v2608_v32 = vsel %vm426_vm1, %v8469_v49, %v8448_v37  ;;  %v9279_v63 = vmul.f32 %v2546_v40, %v12563_v31 }
 0x564   : > { %12566 = vst [vmem:[#allocation189_spill] sm:$0xff] %v9253_v36  ;;  %12567 = vst [vmem:[#allocation190_spill] sm:$0xff] %v9256_v12  ;;  %v9276_v0 = vpop.permute.xlu1 %3558  ;;  %v2602_v14 = vsel %vm426_vm1, %v8434_v48, %v8459_v39  ;;  %v2606_v44 = vsel %vm426_vm1, %v8459_v39, %v8434_v48  ;;  %v2607_v5 = vsel %vm426_vm1, %v8461_v51, %v8436_v42  ;;  %4220 = vrot.lane.b32.xlu0 %v8964_v34, %s4929_s26 }
 0x565   : > { %12568 = vst [vmem:[#allocation191_spill] sm:$0xff] %v9276_v0  ;;  %12569 = vst [vmem:[#allocation192_spill] sm:$0xff] %v9279_v63  ;;  %v9296_v37 = vmul.f32 %v2552_v7, %v12561_v16  ;;  %v2603_v49 = vsel %vm426_vm1, %v8436_v42, %v8461_v51  ;;  %v2605_v48 = vsel %vm426_vm1, %v12571_v60, %v12570_v57  ;;  %v12574_v42 = vld [vmem:[#allocation49_spill] sm:$0xff]  ;;  %v12575_v7 = vld [vmem:[#allocation50_spill] sm:$0xff] }
 0x566   : > { %v2609_v39 = vsel %vm426_vm1, %v12570_v57, %v12571_v60  ;;  %4027 = vperm.xlu1 %4816, %v8709_v50   ;;  %v9311_v10 = vpop.permute.xlu0 %3971  ;;  %v9314_v21 = vmul.f32 %v2548_v22, %v12563_v31  ;;  %v9316_v40 = vadd.f32 %v2584_v28, %v2528_v41  ;;  %v2614_v51 = vmul.f32 %v2608_v32, %v12574_v42  ;;  %v12584_v32 = vld [vmem:[#allocation60_spill] sm:$0xff] }
 0x567   : > { %12572 = vst [vmem:[#allocation107_spill] sm:$0xff] %v9311_v10  ;;  %v2615_v0 = vmul.f32 %v2604_v26, %v12575_v7  ;;  %v9320_v19 = vadd.f32 %v2585_v13, %v2529_v53  ;;  %v9323_v45 = vmul.f32 %v2606_v44, %v12574_v42  ;;  %v9326_v57 = vmul.f32 %v2602_v14, %v12575_v7  ;;  %v12582_v53 = vld [vmem:[#allocation135_spill] sm:$0xff]  ;;  %v12583_v13 = vld [vmem:[#allocation12_spill] sm:$0xff] }
 0x568   : > { %12573 = vst [vmem:[#allocation144_spill] sm:$0xff] %v9316_v40  ;;  %v2612_v60 = vmul.f32 %v2607_v5, %v12574_v42  ;;  %v9329_v10 = vpop.permute.xlu1 %3525  ;;  %v2613_v22 = vmul.f32 %v2603_v49, %v12575_v7  ;;  %v9333_v41 = vmul.f32 %v2609_v39, %v12574_v42  ;;  %v9336_v28 = vmul.f32 %v2605_v48, %v12575_v7  ;;  %v12586_v5 = vld [vmem:[#allocation112_spill] sm:$0xff]  ;;  %v12587_v49 = vld [vmem:[#allocation115_spill] sm:$0xff] }
 0x569   : > { %12576 = vst [vmem:[#allocation193_spill] sm:$0xff] %v9320_v19  ;;  %12577 = vst [vmem:[#allocation194_spill] sm:$0xff] %v9323_v45  ;;  %v2662_v26 = vsel %vm491_vm2, %v12583_v13, %v12582_v53  ;;  %4255 = vperm.xlu0 %4822, %v9022_v58   ;;  %v2658_v44 = vsel %vm491_vm2, %v12582_v53, %v12583_v13  ;;  %v2660_v48 = vsel %vm491_vm2, %v12587_v49, %v12586_v5  ;;  %v12590_v13 = vld [vmem:[#allocation113_spill] sm:$0xff]  ;;  %v12591_v40 = vld [vmem:[#allocation104_spill] sm:$0xff] }
 0x56a   : > { %12578 = vst [vmem:[#allocation195_spill] sm:$0xff] %v9326_v57  ;;  %12579 = vst [vmem:[#allocation196_spill] sm:$0xff] %v9329_v10  ;;  %v9344_v14 = vmul.f32 %v12584_v32, %v2612_v60  ;;  %v2664_v39 = vsel %vm491_vm2, %v12586_v5, %v12587_v49  ;;  %4042 = vrot.lane.b32.xlu1 %v8890_v24, %s4923_s23  ;;  %v9361_v60 = vmul.f32 %v12584_v32, %v2613_v22  ;;  %v12593_v22 = vld [vmem:[#allocation14_spill] sm:$0xff]  ;;  %v12594_v32 = vld [vmem:[#allocation108_spill] sm:$0xff] }
 0x56b   : > { %12580 = vst [vmem:[#allocation197_spill] sm:$0xff] %v9333_v41  ;;  %12581 = vst [vmem:[#allocation198_spill] sm:$0xff] %v9336_v28  ;;  %v2659_v10 = vsel %vm491_vm2, %v12591_v40, %v12590_v13  ;;  %v9369_v28 = vpop.permute.xlu0 %2679  ;;  %4819 = vset.pattern.permute.xlu1 %v12460_v35  ;;  %v2663_v5 = vsel %vm491_vm2, %v12590_v13, %v12591_v40  ;;  %v12597_v35 = vld [vmem:[#allocation53_spill] sm:$0xff]  ;;  %v12599_v57 = vld [vmem:[#allocation111_spill] sm:$0xff] }
 0x56c   : > { %12585 = vst [vmem:[#allocation135_spill] sm:$0xff] %v9344_v14  ;;  %12588 = vst [vmem:[#allocation12_spill] sm:$0xff] %v9361_v60  ;;  %v12589_v14 = vld [vmem:[#allocation109_spill] sm:$0xff]  ;;  %v9385_v60 = vpop.permute.xlu1 %3527  ;;  %v2671_v40 = vmul.f32 %v2660_v48, %v12597_v35 }
 0x56d   : > { %v2638_v19 = vmul.f32 %v12589_v14, %v2614_v51  ;;  %v2639_v53 = vmul.f32 %v12589_v14, %v2615_v0  ;;  %12592 = vst [vmem:[#allocation60_spill] sm:$0xff] %v9369_v28  ;;  %v2661_v51 = vsel %vm491_vm2, %v12594_v32, %v12593_v22  ;;  %v2665_v0 = vsel %vm491_vm2, %v12593_v22, %v12594_v32  ;;  %v12595_v14 = vld [vmem:[#allocation52_spill] sm:$0xff]  ;;  %v12598_v13 = vld [vmem:[#allocation21_spill] sm:$0xff]  ;;  %v12600_v22 = vld [vmem:[#allocation110_spill] sm:$0xff] }
 0x56e   : > { %v2666_v49 = vmul.f32 %v2662_v26, %v12595_v14  ;;  %12596 = vst [vmem:[#allocation112_spill] sm:$0xff] %v9385_v60  ;;  %v2667_v28 = vmul.f32 %v2658_v44, %v12597_v35  ;;  %v2670_v41 = vmul.f32 %v2664_v39, %v12595_v14  ;;  %v2714_v45 = vsel %vm556_vm3, %v12599_v57, %v12598_v13  ;;  %v12601_v32 = vld [vmem:[#allocation153_spill] sm:$0xff] }
 0x56f   : > { %4825 = vset.pattern.permute.xlu0 %v12396_v25  ;;  %v2718_v26 = vsel %vm556_vm3, %v12598_v13, %v12599_v57  ;;  %v2716_v44 = vsel %vm556_vm3, %v12601_v32, %v12600_v22  ;;  %v2720_v48 = vsel %vm556_vm3, %v12600_v22, %v12601_v32  ;;  %4044 = vrot.lane.b32.xlu1 %v8962_v18, %s4923_s23  ;;  %v12604_v60 = vld [vmem:[#allocation117_spill] sm:$0xff]  ;;  %v9418_v11 = vpop.permute.xlu0 %3278  ;;  %v12606_v22 = vld [vmem:[#allocation11_spill] sm:$0xff] }
 0x570   : > { %2955 = vperm.xlu0 %4825, %v9117_v9   ;;  %v9411_v39 = vmul.f32 %v2663_v5, %v12595_v14  ;;  %v9414_v57 = vmul.f32 %v2659_v10, %v12597_v35  ;;  %v2672_v13 = vmul.f32 %v2665_v0, %v12595_v14  ;;  %v2694_v3 = vmul.f32 %v12604_v60, %v2670_v41  ;;  %v9428_v5 = vpop.permute.xlu1 %3535  ;;  %v12610_v10 = vld [vmem:[#allocation54_spill] sm:$0xff] }
 0x571   : > { %12605 = vst [vmem:[#allocation113_spill] sm:$0xff] %v9418_v11  ;;  %v2673_v4 = vmul.f32 %v2661_v51, %v12597_v35  ;;  %v9422_v32 = vmul.f32 %v12606_v22, %v2666_v49  ;;  %v9425_v12 = vmul.f32 %v12606_v22, %v2667_v28  ;;  %v2695_v9 = vmul.f32 %v12604_v60, %v2671_v40  ;;  %v12614_v51 = vld [vmem:[#allocation114_spill] sm:$0xff]  ;;  %v12615_v49 = vld [vmem:[#allocation103_spill] sm:$0xff]  ;;  %v12616_v40 = vld [vmem:[#allocation141_spill] sm:$0xff] }
 0x572   : > { %12602 = vst [vmem:[#allocation115_spill] sm:$0xff] %v9411_v39  ;;  %12603 = vst [vmem:[#allocation109_spill] sm:$0xff] %v9414_v57  ;;  %v2726_v57 = vmul.f32 %v2720_v48, %v12610_v10  ;;  %v12611_v39 = vld [vmem:[#allocation55_spill] sm:$0xff]  ;;  %v9433_v41 = vmul.f32 %v2718_v26, %v12610_v10  ;;  %v2771_v28 = vsel %vm621_vm4, %v12615_v49, %v12614_v51 }
 0x573   : > { %12607 = vst [vmem:[#allocation104_spill] sm:$0xff] %v9422_v32  ;;  %12608 = vst [vmem:[#allocation14_spill] sm:$0xff] %v9425_v12  ;;  %v2727_v0 = vmul.f32 %v2716_v44, %v12611_v39  ;;  %v9436_v11 = vmul.f32 %v2714_v45, %v12611_v39  ;;  %v2775_v60 = vsel %vm621_vm4, %v12614_v51, %v12615_v49  ;;  %v12617_v48 = vld [vmem:[#allocation147_spill] sm:$0xff]  ;;  %4052 = vrot.lane.b32.xlu1 %v8964_v34, %s4923_s23  ;;  %v4885_v45 = vld [vmem:[%s11225_s2 + $0x78] sm:$0xff] }
 0x574   : > { %12609 = vst [vmem:[#allocation108_spill] sm:$0xff] %v9428_v5  ;;  %12612 = vst [vmem:[#allocation52_spill] sm:$0xff] %v9433_v41  ;;  %v2773_v44 = vsel %vm621_vm4, %v12617_v48, %v12616_v40  ;;  %2967 = vperm.xlu0 %4825, %v4885_v45   ;;  %v9455_v26 = vadd.f32 %v2694_v3, %v2638_v19  ;;  %v2777_v22 = vsel %vm621_vm4, %v12616_v40, %v12617_v48  ;;  %v12619_v51 = vld [vmem:[#allocation123_spill] sm:$0xff]  ;;  %v12620_v49 = vld [vmem:[#allocation138_spill] sm:$0xff]  ;;  %v9469_v5 = vpop.permute.xlu0 %3290  ;;  %v9484_v47 = vpop.permute.xlu1 %3570 }
 0x575   : > { %12613 = vst [vmem:[#allocation53_spill] sm:$0xff] %v9436_v11  ;;  %v2715_v11 = vsel %vm556_vm3, %v12620_v49, %v12619_v51  ;;  %v2719_v41 = vsel %vm556_vm3, %v12619_v51, %v12620_v49  ;;  %12621 = vst [vmem:[#allocation111_spill] sm:$0xff] %v9469_v5  ;;  %v9471_v45 = vadd.f32 %v2695_v9, %v2639_v53  ;;  %v12623_v3 = vld [vmem:[#allocation146_spill] sm:$0xff]  ;;  %v12625_v12 = vld [vmem:[#allocation17_spill] sm:$0xff] }
 0x576   : > { %12618 = vst [vmem:[#allocation21_spill] sm:$0xff] %v9455_v26  ;;  %v9474_v19 = vmul.f32 %v12623_v3, %v2672_v13  ;;  %v12626_v32 = vld [vmem:[#allocation139_spill] sm:$0xff]  ;;  %12627 = vst [vmem:[#allocation117_spill] sm:$0xff] %v9484_v47  ;;  %v9487_v51 = vmul.f32 %v12623_v3, %v2673_v4  ;;  %v12629_v53 = vld [vmem:[#allocation56_spill] sm:$0xff]  ;;  %v2724_v52 = vmul.f32 %v2719_v41, %v12610_v10 }
 0x577   : > { %12622 = vst [vmem:[#allocation110_spill] sm:$0xff] %v9471_v45  ;;  %v2717_v40 = vsel %vm556_vm3, %v12626_v32, %v12625_v12  ;;  %v2721_v48 = vsel %vm556_vm3, %v12625_v12, %v12626_v32  ;;  %v2784_v9 = vmul.f32 %v2773_v44, %v12629_v53  ;;  %v9491_v13 = vmul.f32 %v2771_v28, %v12629_v53  ;;  %v12631_v49 = vld [vmem:[#allocation57_spill] sm:$0xff]  ;;  %v4886_v4 = vld [vmem:[%s11225_s2 + $0x88] sm:$0xff]  ;;  %v12633_v32 = vld [vmem:[#allocation128_spill] sm:$0xff] }
 0x578   : > { %12624 = vst [vmem:[#allocation153_spill] sm:$0xff] %v9474_v19  ;;  %12628 = vst [vmem:[#allocation11_spill] sm:$0xff] %v9487_v51  ;;  %v9494_v5 = vmul.f32 %v2775_v60, %v12631_v49  ;;  %v9497_v19 = vmul.f32 %v2777_v22, %v12631_v49  ;;  %v2725_v12 = vmul.f32 %v2715_v11, %v12611_v39  ;;  %4087 = vperm.xlu1 %4819, %v9022_v58   ;;  %v12634_v28 = vld [vmem:[#allocation121_spill] sm:$0xff]  ;;  %v9513_v41 = vpop.permute.xlu0 %4023  ;;  %v12638_v3 = vld [vmem:[#allocation44_spill] sm:$0xff] }
 0x579   : > { %12630 = vst [vmem:[#allocation114_spill] sm:$0xff] %v9491_v13  ;;  %3562 = vperm.xlu0 %4825, %v4886_v4   ;;  %v2772_v60 = vsel %vm621_vm4, %v12634_v28, %v12633_v32  ;;  %v2776_v44 = vsel %vm621_vm4, %v12633_v32, %v12634_v28  ;;  %12635 = vst [vmem:[#allocation141_spill] sm:$0xff] %v9513_v41  ;;  %v9516_v11 = vmul.f32 %v2721_v48, %v12610_v10  ;;  %v12641_v13 = vld [vmem:[#allocation116_spill] sm:$0xff]  ;;  %v12642_v47 = vld [vmem:[#allocation127_spill] sm:$0xff]  ;;  %v9535_v32 = vpop.permute.xlu1 %3531 }
 0x57a   : > { %12632 = vst [vmem:[#allocation103_spill] sm:$0xff] %v9494_v5  ;;  %v9519_v22 = vmul.f32 %v2717_v40, %v12611_v39  ;;  %v9522_v4 = vmul.f32 %v12638_v3, %v2724_v52  ;;  %v9525_v5 = vmul.f32 %v12638_v3, %v2725_v12  ;;  %v2826_v51 = vsel %vm686_vm5, %v12642_v47, %v12641_v13  ;;  %v12644_v40 = vld [vmem:[#allocation120_spill] sm:$0xff]  ;;  %v12647_v3 = vld [vmem:[#allocation126_spill] sm:$0xff]  ;;  %v12650_v41 = vld [vmem:[#allocation125_spill] sm:$0xff] }
 0x57b   : > { %12636 = vst [vmem:[#allocation147_spill] sm:$0xff] %v9516_v11  ;;  %v2830_v48 = vsel %vm686_vm5, %v12641_v13, %v12642_v47  ;;  %12643 = vst [vmem:[#allocation17_spill] sm:$0xff] %v9535_v32  ;;  %v2750_v28 = vmul.f32 %v12644_v40, %v2726_v57  ;;  %v2751_v52 = vmul.f32 %v12644_v40, %v2727_v0  ;;  %v12649_v40 = vld [vmem:[#allocation132_spill] sm:$0xff] }
 0x57c   : > { %12637 = vst [vmem:[#allocation123_spill] sm:$0xff] %v9519_v22  ;;  %12639 = vst [vmem:[#allocation138_spill] sm:$0xff] %v9522_v4  ;;  %v12645_v4 = vld [vmem:[#allocation122_spill] sm:$0xff]  ;;  %v12646_v22 = vld [vmem:[#allocation119_spill] sm:$0xff]  ;;  %v2782_v13 = vmul.f32 %v2772_v60, %v12629_v53  ;;  %v2783_v57 = vmul.f32 %v2776_v44, %v12631_v49  ;;  %4098 = vrot.lane.b32.xlu1 %v8890_v24, %s4925_s24  ;;  %v2883_v32 = vsel %vm751_vm6, %v12650_v41, %v12649_v40  ;;  %v9569_v60 = vpop.permute.xlu0 %3988 }
 0x57d   : > { %12640 = vst [vmem:[#allocation146_spill] sm:$0xff] %v9525_v5  ;;  %v2828_v12 = vsel %vm686_vm5, %v12646_v22, %v12645_v4  ;;  %v12648_v5 = vld [vmem:[#allocation118_spill] sm:$0xff]  ;;  %3566 = vperm.xlu0 %4825, %v8583_v20   ;;  %v2832_v0 = vsel %vm686_vm5, %v12645_v4, %v12646_v22  ;;  %4820 = vset.pattern.permute.xlu1 %v12474_v30  ;;  %12651 = vst [vmem:[#allocation139_spill] sm:$0xff] %v9569_v60  ;;  %v12655_v45 = vld [vmem:[#allocation124_spill] sm:$0xff]  ;;  %v9584_v30 = vpop.permute.xlu1 %3539 }
 0x57e   : > { %v2770_v11 = vsel %vm621_vm4, %v12648_v5, %v12647_v3  ;;  %v2774_v47 = vsel %vm621_vm4, %v12647_v3, %v12648_v5  ;;  %v2887_v5 = vsel %vm751_vm6, %v12649_v40, %v12650_v41  ;;  %v12652_v20 = vld [vmem:[#allocation58_spill] sm:$0xff]  ;;  %v12654_v3 = vld [vmem:[#allocation15_spill] sm:$0xff]  ;;  %v2806_v26 = vmul.f32 %v12656_v56, %v2782_v13  ;;  %12657 = vst [vmem:[#allocation128_spill] sm:$0xff] %v9584_v30 }
 0x57f   : > { %v9572_v44 = vmul.f32 %v2826_v51, %v12652_v20  ;;  %v2885_v22 = vsel %vm751_vm6, %v12655_v45, %v12654_v3  ;;  %v2889_v4 = vsel %vm751_vm6, %v12654_v3, %v12655_v45  ;;  %v2807_v41 = vmul.f32 %v12656_v56, %v2783_v57  ;;  %v12658_v60 = vld [vmem:[#allocation59_spill] sm:$0xff]  ;;  %v12660_v56 = vld [vmem:[#allocation66_spill] sm:$0xff] }
 0x580   : > { %v2838_v40 = vmul.f32 %v2828_v12, %v12652_v20  ;;  %v2778_v51 = vmul.f32 %v2770_v11, %v12629_v53  ;;  %v9590_v2 = vmul.f32 %v2830_v48, %v12658_v60  ;;  %v2839_v63 = vmul.f32 %v2832_v0, %v12658_v60  ;;  %4106 = vrot.lane.b32.xlu1 %v8896_v46, %s4925_s24  ;;  %v12662_v13 = vld [vmem:[#allocation67_spill] sm:$0xff]  ;;  %v9615_v3 = vpop.permute.xlu0 %3996 }
 0x581   : > { %12653 = vst [vmem:[#allocation56_spill] sm:$0xff] %v9572_v44  ;;  %v2779_v44 = vmul.f32 %v2774_v47, %v12631_v49  ;;  %3878 = vrot.lane.b32.xlu0 %v8913_v17, %s4918_s19  ;;  %v9598_v45 = vmul.f32 %v2883_v32, %v12660_v56  ;;  %v9601_v12 = vmul.f32 %v2887_v5, %v12662_v13  ;;  %v12664_v47 = vld [vmem:[#allocation16_spill] sm:$0xff]  ;;  %12667 = vst [vmem:[#allocation122_spill] sm:$0xff] %v9615_v3  ;;  %v12668_v5 = vld [vmem:[#allocation130_spill] sm:$0xff]  ;;  %v9628_v30 = vpop.permute.xlu1 %3825 }
 0x582   : > { %12659 = vst [vmem:[#allocation121_spill] sm:$0xff] %v9590_v2  ;;  %v9604_v11 = vmul.f32 %v2885_v22, %v12660_v56  ;;  %v9607_v48 = vmul.f32 %v2889_v4, %v12662_v13  ;;  %v9610_v57 = vmul.f32 %v12664_v47, %v2778_v51  ;;  %v9617_v2 = vadd.f32 %v2806_v26, %v2750_v28  ;;  %v12670_v22 = vld [vmem:[#allocation152_spill] sm:$0xff]  ;;  %v12673_v51 = vld [vmem:[#allocation150_spill] sm:$0xff]  ;;  %v12674_v26 = vld [vmem:[#allocation137_spill] sm:$0xff] }
 0x583   : > { %12661 = vst [vmem:[#allocation44_spill] sm:$0xff] %v9598_v45  ;;  %12663 = vst [vmem:[#allocation116_spill] sm:$0xff] %v9601_v12  ;;  %v9613_v0 = vmul.f32 %v12664_v47, %v2779_v44  ;;  %v9619_v32 = vadd.f32 %v2807_v41, %v2751_v52  ;;  %v9622_v12 = vmul.f32 %v12668_v5, %v2784_v9  ;;  %v12671_v45 = vld [vmem:[#allocation129_spill] sm:$0xff] }
 0x584   : > { %12665 = vst [vmem:[#allocation127_spill] sm:$0xff] %v9610_v57  ;;  %v2938_v4 = vsel %vm816_vm7, %v12671_v45, %v12670_v22  ;;  %12672 = vst [vmem:[#allocation126_spill] sm:$0xff] %v9628_v30  ;;  %v2942_v44 = vsel %vm816_vm7, %v12670_v22, %v12671_v45  ;;  %v2940_v28 = vsel %vm816_vm7, %v12674_v26, %v12673_v51  ;;  %v12675_v52 = vld [vmem:[#allocation29_spill] sm:$0xff]  ;;  %v12677_v22 = vld [vmem:[#allocation19_spill] sm:$0xff]  ;;  %4139 = vperm.xlu1 %4820, %v8709_v50  }
 0x585   : > { %12666 = vst [vmem:[#allocation120_spill] sm:$0xff] %v9613_v0  ;;  %12669 = vst [vmem:[#allocation119_spill] sm:$0xff] %v9622_v12  ;;  %v2944_v9 = vsel %vm816_vm7, %v12673_v51, %v12674_v26  ;;  %v12676_v41 = vld [vmem:[#allocation145_spill] sm:$0xff]  ;;  %v12678_v12 = vld [vmem:[#allocation35_spill] sm:$0xff]  ;;  %3886 = vrot.lane.b32.xlu0 %v8918_v33, %s4918_s19  ;;  %v9663_v26 = vmul.f32 %v12668_v5, %v9497_v19 }
 0x586   : > { %v2827_v47 = vsel %vm686_vm5, %v12676_v41, %v12675_v52  ;;  %v2831_v45 = vsel %vm686_vm5, %v12675_v52, %v12676_v41  ;;  %v2884_v0 = vsel %vm751_vm6, %v12678_v12, %v12677_v22  ;;  %v2888_v51 = vsel %vm751_vm6, %v12677_v22, %v12678_v12  ;;  %v12680_v52 = vld [vmem:[#allocation37_spill] sm:$0xff]  ;;  %v12681_v41 = vld [vmem:[#allocation136_spill] sm:$0xff]  ;;  %v9673_v22 = vpop.permute.xlu0 %4031  ;;  %v12683_v50 = vld [vmem:[#allocation71_spill] sm:$0xff] }
 0x587   : > { %12679 = vst [vmem:[#allocation118_spill] sm:$0xff] %v9663_v26  ;;  %v2829_v57 = vsel %vm686_vm5, %v12681_v41, %v12680_v52  ;;  %v2833_v12 = vsel %vm686_vm5, %v12680_v52, %v12681_v41  ;;  %12682 = vst [vmem:[#allocation132_spill] sm:$0xff] %v9673_v22  ;;  %v9676_v30 = vmul.f32 %v2938_v4, %v12683_v50  ;;  %v12685_v19 = vld [vmem:[#allocation72_spill] sm:$0xff] }
 0x588   : > { %v9679_v3 = vmul.f32 %v2940_v28, %v12683_v50  ;;  %v9682_v5 = vmul.f32 %v2944_v9, %v12685_v19  ;;  %v4887_v26 = vld [vmem:[%s5013_s16 + $0x50] sm:$0xff]  ;;  %v9689_v55 = vmul.f32 %v2942_v44, %v12685_v19  ;;  %v2836_v52 = vmul.f32 %v2827_v47, %v12652_v20  ;;  %v9695_v28 = vpop.permute.xlu1 %3848  ;;  %4154 = vrot.lane.b32.xlu1 %v8890_v24, %s4927_s25 }
 0x589   : > { %12684 = vst [vmem:[#allocation125_spill] sm:$0xff] %v9676_v30  ;;  %v9686_v36 = vmul.f32 %v4887_v26, %v12686_v29  ;;  %v2837_v41 = vmul.f32 %v2831_v45, %v12658_v60  ;;  %v2894_v4 = vmul.f32 %v2884_v0, %v12660_v56  ;;  %v2895_v22 = vmul.f32 %v2888_v51, %v12662_v13  ;;  %v4888_v30 = vld [vmem:[%s5013_s16 + $0x58] sm:$0xff]  ;;  %v12691_v0 = vld [vmem:[#allocation148_spill] sm:$0xff] }
 0x58a   : > { %12687 = vst [vmem:[#allocation15_spill] sm:$0xff] %v9689_v55  ;;  %12688 = vst [vmem:[#allocation124_spill] sm:$0xff] %v9695_v28  ;;  %v9699_v9 = vmul.f32 %v4888_v30, %v12686_v29  ;;  %3934 = vrot.lane.b32.xlu0 %v8913_v17, %s4920_s20  ;;  %v9706_v44 = vmul.f32 %v2829_v57, %v12652_v20  ;;  %v9709_v47 = vmul.f32 %v2833_v12, %v12658_v60  ;;  %v12694_v29 = vld [vmem:[#allocation32_spill] sm:$0xff]  ;;  %v12695_v55 = vld [vmem:[#allocation149_spill] sm:$0xff] }
 0x58b   : > { %v9712_v45 = vmul.f32 %v12691_v0, %v2836_v52  ;;  %v9715_v51 = vmul.f32 %v12691_v0, %v2837_v41  ;;  %v2918_v30 = vmul.f32 %v12694_v29, %v2894_v4  ;;  %v2919_v26 = vmul.f32 %v12694_v29, %v2895_v22  ;;  %4823 = vset.pattern.permute.xlu1 %v12365_v43  ;;  %v12696_v28 = vld [vmem:[#allocation140_spill] sm:$0xff]  ;;  %v9730_v0 = vpop.permute.xlu0 %2731  ;;  %v12699_v4 = vld [vmem:[#allocation77_spill] sm:$0xff]  ;;  %v12700_v22 = vld [vmem:[#allocation142_spill] sm:$0xff] }
 0x58c   : > { %12689 = vst [vmem:[#allocation131_spill] sm:$0xff] %v9706_v44  ;;  %12690 = vst [vmem:[#allocation16_spill] sm:$0xff] %v9709_v47  ;;  %v3150_v57 = vsel %vm361_vm0, %v12696_v28, %v12695_v55  ;;  %v3154_v12 = vsel %vm361_vm0, %v12695_v55, %v12696_v28  ;;  %v12697_v52 = vld [vmem:[#allocation24_spill] sm:$0xff]  ;;  %v3152_v43 = vsel %vm361_vm0, %v12700_v22, %v12699_v4  ;;  %v12704_v28 = vld [vmem:[#allocation13_spill] sm:$0xff]  ;;  %4156 = vrot.lane.b32.xlu1 %v8962_v18, %s4927_s25 }
 0x58d   : > { %12692 = vst [vmem:[#allocation130_spill] sm:$0xff] %v9712_v45  ;;  %12693 = vst [vmem:[#allocation152_spill] sm:$0xff] %v9715_v51  ;;  %v2862_v47 = vmul.f32 %v12697_v52, %v2838_v40  ;;  %v2863_v41 = vmul.f32 %v12697_v52, %v2839_v63  ;;  %v3156_v29 = vsel %vm361_vm0, %v12699_v4, %v12700_v22  ;;  %v12701_v44 = vld [vmem:[#allocation8_spill] sm:$0xff]  ;;  %v12702_v51 = vld [vmem:[#allocation18_spill] sm:$0xff]  ;;  %v9748_v40 = vpop.permute.xlu1 %3907 }
 0x58e   : > { %12698 = vst [vmem:[#allocation129_spill] sm:$0xff] %v9730_v0  ;;  %v2882_v55 = vsel %vm751_vm6, %v12702_v51, %v12701_v44  ;;  %v2886_v63 = vsel %vm751_vm6, %v12701_v44, %v12702_v51  ;;  %12703 = vst [vmem:[#allocation150_spill] sm:$0xff] %v9748_v40  ;;  %v12705_v52 = vld [vmem:[#allocation73_spill] sm:$0xff]  ;;  %v12706_v22 = vld [vmem:[#allocation68_spill] sm:$0xff]  ;;  %3942 = vrot.lane.b32.xlu0 %v8918_v33, %s4920_s20  ;;  %v9767_v44 = vmul.f32 %v3154_v12, %v12561_v16 }
 0x58f   : > { %v3206_v45 = vsel %vm426_vm1, %v12705_v52, %v12704_v28  ;;  %v3210_v4 = vsel %vm426_vm1, %v12704_v28, %v12705_v52  ;;  %v12707_v0 = vld [vmem:[#allocation62_spill] sm:$0xff]  ;;  %v3006_v28 = vadd.f32 %v2918_v30, %v2862_v47  ;;  %v3007_v52 = vadd.f32 %v2919_v26, %v2863_v41  ;;  %v9783_v12 = vpop.permute.xlu0 %2743 }
 0x590   : > { %v3212_v59 = vsel %vm426_vm1, %v12707_v0, %v12706_v22  ;;  %12708 = vst [vmem:[#allocation137_spill] sm:$0xff] %v9767_v44  ;;  %v3208_v51 = vsel %vm426_vm1, %v12706_v22, %v12707_v0  ;;  %v9774_v40 = vmul.f32 %v3150_v57, %v12563_v31  ;;  %v9777_v6 = vmul.f32 %v3156_v29, %v12561_v16  ;;  %v12713_v41 = vld [vmem:[#allocation22_spill] sm:$0xff]  ;;  %v12716_v29 = vld [vmem:[#allocation31_spill] sm:$0xff]  ;;  %v12720_v22 = vld [vmem:[#allocation25_spill] sm:$0xff] }
 0x591   : > { %v9780_v18 = vmul.f32 %v3152_v43, %v12563_v31  ;;  %v2890_v62 = vmul.f32 %v2882_v55, %v12660_v56  ;;  %12709 = vst [vmem:[#allocation29_spill] sm:$0xff] %v9783_v12  ;;  %v2891_v44 = vmul.f32 %v2886_v63, %v12662_v13  ;;  %v9787_v15 = vmul.f32 %v3210_v4, %v12574_v42  ;;  %v9795_v26 = vpop.permute.xlu1 %3911  ;;  %v12715_v43 = vld [vmem:[#allocation7_spill] sm:$0xff]  ;;  %v12718_v63 = vld [vmem:[#allocation34_spill] sm:$0xff] }
 0x592   : > { %v9790_v47 = vmul.f32 %v3206_v45, %v12575_v7  ;;  %v9793_v30 = vmul.f32 %v3212_v59, %v12574_v42  ;;  %12712 = vst [vmem:[#allocation35_spill] sm:$0xff] %v9795_v26  ;;  %v9798_v57 = vmul.f32 %v3208_v51, %v12575_v7  ;;  %v3265_v55 = vsel %vm491_vm2, %v12716_v29, %v12715_v43  ;;  %v12721_v51 = vld [vmem:[#allocation20_spill] sm:$0xff] }
 0x593   : > { %12710 = vst [vmem:[#allocation145_spill] sm:$0xff] %v9787_v15  ;;  %v9801_v0 = vmul.f32 %v12713_v41, %v2890_v62  ;;  %4164 = vrot.lane.b32.xlu1 %v8964_v34, %s4927_s25  ;;  %3990 = vrot.lane.b32.xlu0 %v8913_v17, %s4921_s22  ;;  %v9812_v59 = vmul.f32 %v12713_v41, %v2891_v44 }
 0x594   : > { %12711 = vst [vmem:[#allocation19_spill] sm:$0xff] %v9790_v47  ;;  %v9815_v45 = vadd.f32 %v3006_v28, %v9617_v2  ;;  %v9818_v62 = vadd.f32 %v3007_v52, %v9619_v32  ;;  %v9822_v4 = vmul.f32 %v12718_v63, %v9604_v11  ;;  %v3261_v34 = vsel %vm491_vm2, %v12715_v43, %v12716_v29  ;;  %v12722_v32 = vld [vmem:[#allocation87_spill] sm:$0xff]  ;;  %v12723_v28 = vld [vmem:[#allocation38_spill] sm:$0xff]  ;;  %v9840_v52 = vpop.permute.xlu0 %3338  ;;  %v12765_v47 = vld [vmem:[#allocation84_spill] sm:$0xff] }
 0x595   : > { %12714 = vst [vmem:[#allocation37_spill] sm:$0xff] %v9801_v0  ;;  %12717 = vst [vmem:[#allocation136_spill] sm:$0xff] %v9812_v59  ;;  %v3263_v44 = vsel %vm491_vm2, %v12721_v51, %v12720_v22  ;;  %v3267_v2 = vsel %vm491_vm2, %v12720_v22, %v12721_v51  ;;  %v2939_v11 = vsel %vm816_vm7, %v12723_v28, %v12722_v32  ;;  %v12727_v22 = vld [vmem:[#allocation81_spill] sm:$0xff] }
 0x596   : > { %12719 = vst [vmem:[#allocation151_spill] sm:$0xff] %v9822_v4  ;;  %12724 = vst [vmem:[#allocation148_spill] sm:$0xff] %v9840_v52  ;;  %v9844_v41 = vmul.f32 %v12718_v63, %v9607_v48  ;;  %v9847_v43 = vmul.f32 %v3265_v55, %v12595_v14  ;;  %v2943_v29 = vsel %vm816_vm7, %v12722_v32, %v12723_v28  ;;  %v12728_v51 = vld [vmem:[#allocation33_spill] sm:$0xff]  ;;  %v12729_v48 = vld [vmem:[#allocation82_spill] sm:$0xff]  ;;  %v9869_v28 = vpop.permute.xlu1 %3967 }
 0x597   : > { %v2941_v4 = vsel %vm816_vm7, %v12728_v51, %v12727_v22  ;;  %v2945_v59 = vsel %vm816_vm7, %v12727_v22, %v12728_v51  ;;  %v12730_v63 = vld [vmem:[#allocation64_spill] sm:$0xff]  ;;  %12731 = vst [vmem:[#allocation140_spill] sm:$0xff] %v9869_v28  ;;  %4199 = vperm.xlu1 %4823, %v9022_v58   ;;  %3998 = vrot.lane.b32.xlu0 %v8918_v33, %s4921_s22 }
 0x598   : > { %12725 = vst [vmem:[#allocation32_spill] sm:$0xff] %v9844_v41  ;;  %12726 = vst [vmem:[#allocation149_spill] sm:$0xff] %v9847_v43  ;;  %v3318_v55 = vsel %vm556_vm3, %v12730_v63, %v12729_v48  ;;  %v3322_v32 = vsel %vm556_vm3, %v12729_v48, %v12730_v63  ;;  %v9875_v41 = vmul.f32 %v3261_v34, %v12597_v35  ;;  %v12733_v63 = vld [vmem:[#allocation45_spill] sm:$0xff]  ;;  %v12734_v28 = vld [vmem:[#allocation28_spill] sm:$0xff]  ;;  %v9893_v52 = vpop.permute.xlu0 %4050 }
 0x599   : > { %v9878_v22 = vmul.f32 %v3267_v2, %v12595_v14  ;;  %v9881_v51 = vmul.f32 %v3263_v44, %v12597_v35  ;;  %v2948_v0 = vmul.f32 %v2939_v11, %v12683_v50  ;;  %v2949_v48 = vmul.f32 %v2943_v29, %v12685_v19  ;;  %12735 = vst [vmem:[#allocation77_spill] sm:$0xff] %v9893_v52  ;;  %v12737_v44 = vld [vmem:[#allocation10_spill] sm:$0xff] }
 0x59a   : > { %12732 = vst [vmem:[#allocation24_spill] sm:$0xff] %v9875_v41  ;;  %v3320_v58 = vsel %vm556_vm3, %v12734_v28, %v12733_v63  ;;  %v3324_v34 = vsel %vm556_vm3, %v12733_v63, %v12734_v28  ;;  %v9896_v2 = vmul.f32 %v2941_v4, %v12683_v50  ;;  %v9902_v11 = vmul.f32 %v3322_v32, %v12610_v10  ;;  %v12743_v63 = vld [vmem:[#allocation41_spill] sm:$0xff]  ;;  %v12744_v4 = vld [vmem:[#allocation70_spill] sm:$0xff] }
 0x59b   : > { %v9899_v12 = vmul.f32 %v12737_v44, %v2948_v0  ;;  %v9905_v29 = vmul.f32 %v3318_v55, %v12611_v39  ;;  %v9908_v26 = vmul.f32 %v2945_v59, %v12685_v19  ;;  %v9911_v28 = vmul.f32 %v12737_v44, %v2949_v48  ;;  %4210 = vrot.lane.b32.xlu1 %v8890_v24, %s4929_s26  ;;  %v12745_v48 = vld [vmem:[#allocation65_spill] sm:$0xff]  ;;  %v9939_v24 = vpop.permute.xlu1 %4019 }
 0x59c   : > { %12736 = vst [vmem:[#allocation142_spill] sm:$0xff] %v9896_v2  ;;  %12739 = vst [vmem:[#allocation18_spill] sm:$0xff] %v9902_v11  ;;  %v3373_v0 = vsel %vm621_vm4, %v12744_v4, %v12743_v63  ;;  %v3377_v32 = vsel %vm621_vm4, %v12743_v63, %v12744_v4  ;;  %4046 = vrot.lane.b32.xlu0 %v8913_v17, %s4923_s23  ;;  %v9926_v59 = vmul.f32 %v3324_v34, %v12610_v10  ;;  %v12747_v2 = vld [vmem:[#allocation30_spill] sm:$0xff]  ;;  %v4894_v41 = vld [vmem:[%s5013_s16 + $0x78] sm:$0xff] }
 0x59d   : > { %12738 = vst [vmem:[#allocation8_spill] sm:$0xff] %v9899_v12  ;;  %12740 = vst [vmem:[#allocation13_spill] sm:$0xff] %v9905_v29  ;;  %v9929_v55 = vmul.f32 %v3320_v58, %v12611_v39  ;;  %v9933_v44 = vmul.f32 %v12745_v48, %v9679_v3  ;;  %v12748_v63 = vld [vmem:[#allocation74_spill] sm:$0xff]  ;;  %4824 = vset.pattern.permute.xlu1 %v12383_v61  ;;  %v9944_v34 = vmul.f32 %v12745_v48, %v9682_v5  ;;  %v4890_v3 = vld [vmem:[%s5013_s16 + $0x48] sm:$0xff]  ;;  %v9958_v12 = vpop.permute.xlu0 %4083 }
 0x59e   : > { %12741 = vst [vmem:[#allocation73_spill] sm:$0xff] %v9908_v26  ;;  %12742 = vst [vmem:[#allocation68_spill] sm:$0xff] %v9911_v28  ;;  %v3375_v4 = vsel %vm621_vm4, %v12748_v63, %v12747_v2  ;;  %v4889_v58 = vld [vmem:[%s5013_s16 + $0x40] sm:$0xff]  ;;  %v12751_v26 = vld [vmem:[#allocation40_spill] sm:$0xff]  ;;  %v3379_v28 = vsel %vm621_vm4, %v12747_v2, %v12748_v63 }
 0x59f   : > { %12746 = vst [vmem:[#allocation62_spill] sm:$0xff] %v9933_v44  ;;  %12749 = vst [vmem:[#allocation22_spill] sm:$0xff] %v9939_v24  ;;  %v9948_v52 = vmul.f32 %v4889_v58, %v12751_v26  ;;  %v9952_v44 = vmul.f32 %v4890_v3, %v12751_v26  ;;  %v4891_v61 = vld [vmem:[%s5013_s16 + $0x60] sm:$0xff]  ;;  %v4892_v5 = vld [vmem:[%s5013_s16 + $0x68] sm:$0xff]  ;;  %v9965_v58 = vmul.f32 %v3373_v0, %v12629_v53  ;;  %4218 = vrot.lane.b32.xlu1 %v8896_v46, %s4929_s26  ;;  %v10016_v43 = vpop.permute.xlu1 %4075 }
 0x5a0   : > { %12750 = vst [vmem:[#allocation7_spill] sm:$0xff] %v9944_v34  ;;  %12752 = vst [vmem:[#allocation31_spill] sm:$0xff] %v9958_v12  ;;  %v12753_v24 = vld [vmem:[#allocation42_spill] sm:$0xff]  ;;  %v9968_v34 = vmul.f32 %v3377_v32, %v12631_v49  ;;  %v4893_v26 = vld [vmem:[%s5013_s16 + $0x70] sm:$0xff]  ;;  %v9979_v63 = vmul.f32 %v3375_v4, %v12629_v53  ;;  %4054 = vrot.lane.b32.xlu0 %v8918_v33, %s4923_s23  ;;  %v9986_v0 = vmul.f32 %v3379_v28, %v12631_v49 }
 0x5a1   : > { %v3101_v29 = vmul.f32 %v4891_v61, %v12753_v24  ;;  %v3102_v48 = vmul.f32 %v4892_v5, %v12753_v24  ;;  %12754 = vst [vmem:[#allocation34_spill] sm:$0xff] %v9965_v58  ;;  %v12756_v3 = vld [vmem:[#allocation63_spill] sm:$0xff]  ;;  %v12758_v61 = vld [vmem:[#allocation92_spill] sm:$0xff]  ;;  %v12760_v4 = vld [vmem:[#allocation134_spill] sm:$0xff] }
 0x5a2   : > { %12755 = vst [vmem:[#allocation25_spill] sm:$0xff] %v9968_v34  ;;  %v9972_v11 = vmul.f32 %v4893_v26, %v12756_v3  ;;  %v9976_v2 = vmul.f32 %v4894_v41, %v12756_v3  ;;  %v12757_v32 = vld [vmem:[#allocation43_spill] sm:$0xff]  ;;  %v12759_v5 = vld [vmem:[#allocation88_spill] sm:$0xff]  ;;  %v12762_v28 = vld [vmem:[#allocation105_spill] sm:$0xff] }
 0x5a3   : > { %v9990_v24 = vadd.f32 %v12757_v32, %v9686_v36  ;;  %v3430_v41 = vsel %vm686_vm5, %v12759_v5, %v12758_v61  ;;  %v12761_v26 = vld [vmem:[#allocation76_spill] sm:$0xff]  ;;  %v10002_v3 = vadd.f32 %v12757_v32, %v9699_v9  ;;  %v12763_v12 = vld [vmem:[#allocation39_spill] sm:$0xff]  ;;  %12764 = vst [vmem:[#allocation20_spill] sm:$0xff] %v10016_v43  ;;  %v3129_v9 = vadd.f32 %v12765_v47, %v3101_v29 }
 0x5a4   : > { %v3153_v46 = vsel %vm361_vm0, %v12761_v26, %v12760_v4  ;;  %v3149_v36 = vsel %vm361_vm0, %v12760_v4, %v12761_v26  ;;  %v3151_v34 = vsel %vm361_vm0, %v12763_v12, %v12762_v28  ;;  %v3155_v58 = vsel %vm361_vm0, %v12762_v28, %v12763_v12  ;;  %v12766_v4 = vld [vmem:[#allocation94_spill] sm:$0xff]  ;;  %v12767_v26 = vld [vmem:[#allocation4_spill] sm:$0xff]  ;;  %v10031_v12 = vpop.permute.xlu0 %2791  ;;  %4102 = vrot.lane.b32.xlu0 %v8913_v17, %s4925_s24  ;;  %v12774_v17 = vld [vmem:[#allocation133_spill] sm:$0xff] }
 0x5a5   : > { %v3434_v32 = vsel %vm686_vm5, %v12758_v61, %v12759_v5  ;;  %v3432_v15 = vsel %vm686_vm5, %v12767_v26, %v12766_v4  ;;  %v3436_v49 = vsel %vm686_vm5, %v12766_v4, %v12767_v26  ;;  %12768 = vst [vmem:[#allocation87_spill] sm:$0xff] %v10031_v12  ;;  %v3130_v28 = vadd.f32 %v12765_v47, %v3102_v48  ;;  %v10038_v61 = vld [vmem:[%s11225_s2 + $0xb0] sm:$0xff]  ;;  %v12771_v48 = vld [vmem:[#allocation61_spill] sm:$0xff] }
 0x5a6   : > { %v3157_v29 = vmul.f32 %v3153_v46, %v12561_v16  ;;  %12769 = vst [vmem:[#allocation38_spill] sm:$0xff] %v10038_v61  ;;  %4251 = vperm.xlu1 %4824, %v10038_v61   ;;  %v10044_v5 = vmul.f32 %v3430_v41, %v12652_v20  ;;  %v3158_v4 = vmul.f32 %v3149_v36, %v12563_v31  ;;  %v12772_v46 = vld [vmem:[#allocation100_spill] sm:$0xff]  ;;  %v12777_v36 = vld [vmem:[#allocation86_spill] sm:$0xff] }
 0x5a7   : > { %v3161_v26 = vmul.f32 %v3155_v58, %v12561_v16  ;;  %v3162_v47 = vmul.f32 %v3151_v34, %v12563_v31  ;;  %v3485_v43 = vsel %vm751_vm6, %v12772_v46, %v12771_v48  ;;  %v10054_v12 = vmul.f32 %v3432_v15, %v12652_v20 }
 0x5a8   : > { %12770 = vst [vmem:[#allocation81_spill] sm:$0xff] %v10044_v5  ;;  %v10057_v61 = vmul.f32 %v3436_v49, %v12658_v60  ;;  %v10060_v41 = vmul.f32 %v12774_v17, %v3157_v29  ;;  %v10062_v5 = vpop.permute.xlu1 %4079  ;;  %v10065_v58 = vmul.f32 %v3434_v32, %v12658_v60  ;;  %v10068_v34 = vmul.f32 %v12774_v17, %v3158_v4  ;;  %v10076_v16 = vpop.permute.xlu0 %3390  ;;  %v12779_v29 = vld [vmem:[#allocation85_spill] sm:$0xff] }
 0x5a9   : > { %12775 = vst [vmem:[#allocation82_spill] sm:$0xff] %v10062_v5  ;;  %v3489_v15 = vsel %vm751_vm6, %v12771_v48, %v12772_v46  ;;  %v3185_v31 = vmul.f32 %v12777_v36, %v3161_v26  ;;  %v3186_v49 = vmul.f32 %v12777_v36, %v3162_v47  ;;  %12778 = vst [vmem:[#allocation45_spill] sm:$0xff] %v10076_v16  ;;  %4110 = vrot.lane.b32.xlu0 %v8918_v33, %s4925_s24  ;;  %v12782_v47 = vld [vmem:[#allocation78_spill] sm:$0xff]  ;;  %v12785_v36 = vld [vmem:[#allocation80_spill] sm:$0xff] }
 0x5aa   : > { %12773 = vst [vmem:[#allocation33_spill] sm:$0xff] %v10057_v61  ;;  %12776 = vst [vmem:[#allocation64_spill] sm:$0xff] %v10065_v58  ;;  %v12780_v61 = vld [vmem:[#allocation95_spill] sm:$0xff]  ;;  %4826 = vset.pattern.permute.xlu1 %v12396_v25  ;;  %v10090_v26 = vmul.f32 %v3485_v43, %v12660_v56  ;;  %v3205_v48 = vsel %vm426_vm1, %v12782_v47, %v8932_v27  ;;  %v3209_v46 = vsel %vm426_vm1, %v8932_v27, %v12782_v47  ;;  %v4896_v43 = vld [vmem:[%s11225_s2 + $0xa0] sm:$0xff] }
 0x5ab   : > { %v3487_v32 = vsel %vm751_vm6, %v12780_v61, %v12779_v29  ;;  %v3491_v4 = vsel %vm751_vm6, %v12779_v29, %v12780_v61  ;;  %v12783_v61 = vld [vmem:[#allocation99_spill] sm:$0xff]  ;;  %v2582_v33 = vmul.f32 %v9064_v23, %v9296_v37  ;;  %4299 = vperm.xlu1 %4826, %v4896_v43   ;;  %v2583_v47 = vmul.f32 %v9064_v23, %v9314_v21  ;;  %v10143_v21 = vld [vmem:[%s5013_s16 + $0xa0] sm:$0xff]  ;;  %v12804_v16 = vld [vmem:[#allocation69_spill] sm:$0xff] }
 0x5ac   : > { %12781 = vst [vmem:[#allocation28_spill] sm:$0xff] %v10090_v26  ;;  %v3543_v25 = vsel %vm816_vm7, %v12783_v61, %v8938_v8  ;;  %v3547_v17 = vsel %vm816_vm7, %v8938_v8, %v12783_v61  ;;  %v12784_v27 = vld [vmem:[#allocation79_spill] sm:$0xff]  ;;  %v10123_v5 = vadd.f32 %v3185_v31, %v3129_v9  ;;  %v10125_v43 = vadd.f32 %v3186_v49, %v3130_v28  ;;  %v10130_v61 = vpop.permute.xlu1 %4135  ;;  %v10132_v58 = vpop.permute.xlu0 %3402 }
 0x5ad   : > { %v3207_v29 = vsel %vm426_vm1, %v12785_v36, %v12784_v27  ;;  %v3211_v37 = vsel %vm426_vm1, %v12784_v27, %v12785_v36  ;;  %v10128_v8 = vmul.f32 %v3487_v32, %v12660_v56  ;;  %12786 = vst [vmem:[#allocation10_spill] sm:$0xff] %v10130_v61  ;;  %12787 = vst [vmem:[#allocation41_spill] sm:$0xff] %v10132_v58  ;;  %4158 = vrot.lane.b32.xlu0 %v10143_v21, %s4927_s25 }
 0x5ae   : > { %v10135_v26 = vmul.f32 %v3489_v15, %v12662_v13  ;;  %v10138_v27 = vmul.f32 %v3491_v4, %v12662_v13  ;;  %v3213_v23 = vmul.f32 %v3209_v46, %v12574_v42  ;;  %v3214_v31 = vmul.f32 %v3205_v48, %v12575_v7  ;;  %12789 = vst [vmem:[#allocation65_spill] sm:$0xff] %v10143_v21  ;;  %v10158_v4 = vld [vmem:[%s5013_s16 + $0x80] sm:$0xff] }
 0x5af   : > { %v10148_v9 = vmul.f32 %v3543_v25, %v12683_v50  ;;  %v3217_v28 = vmul.f32 %v3211_v37, %v12574_v42  ;;  %v3218_v15 = vmul.f32 %v3207_v29, %v12575_v7  ;;  %v2982_v49 = vadd.f32 %v2582_v33, %v9211_v1  ;;  %4303 = vperm.xlu1 %4826, %v9000_v54   ;;  %v12792_v48 = vld [vmem:[#allocation6_spill] sm:$0xff]  ;;  %v10165_v25 = vld [vmem:[%s5013_s16 + $0x88] sm:$0xff]  ;;  %v12797_v54 = vld [vmem:[#allocation184_spill] sm:$0xff] }
 0x5b0   : > { %12788 = vst [vmem:[#allocation70_spill] sm:$0xff] %v10135_v26  ;;  %v10155_v32 = vmul.f32 %v3547_v17, %v12685_v19  ;;  %v10162_v46 = vmul.f32 %v10158_v4, %v12792_v48  ;;  %v10169_v36 = vmul.f32 %v10165_v25, %v12792_v48  ;;  %v12795_v29 = vld [vmem:[#allocation83_spill] sm:$0xff]  ;;  %v2983_v33 = vadd.f32 %v2583_v47, %v12797_v54  ;;  %v12799_v37 = vld [vmem:[#allocation106_spill] sm:$0xff]  ;;  %v10184_v58 = vpop.permute.xlu0 %4131  ;;  %v12803_v48 = vld [vmem:[#allocation181_spill] sm:$0xff] }
 0x5b1   : > { %12790 = vst [vmem:[#allocation30_spill] sm:$0xff] %v10148_v9  ;;  %v10172_v1 = vmul.f32 %v12795_v29, %v3213_v23  ;;  %v10176_v17 = vmul.f32 %v12795_v29, %v3214_v31  ;;  %v12801_v9 = vld [vmem:[#allocation102_spill] sm:$0xff]  ;;  %12802 = vst [vmem:[#allocation88_spill] sm:$0xff] %v10184_v58  ;;  %v2524_v23 = vadd.f32 %v12804_v16, %v12803_v48  ;;  %v12806_v54 = vld [vmem:[#allocation189_spill] sm:$0xff] }
 0x5b2   : > { %12791 = vst [vmem:[#allocation74_spill] sm:$0xff] %v10155_v32  ;;  %12793 = vst [vmem:[#allocation40_spill] sm:$0xff] %v10162_v46  ;;  %v10180_v32 = vmul.f32 %v10143_v21, %v12799_v37  ;;  %v3241_v61 = vmul.f32 %v12801_v9, %v3217_v28  ;;  %v3242_v26 = vmul.f32 %v12801_v9, %v3218_v15  ;;  %v12807_v31 = vld [vmem:[#allocation36_spill] sm:$0xff]  ;;  %v10194_v37 = vpop.permute.xlu1 %4187  ;;  %v12811_v9 = vld [vmem:[#allocation93_spill] sm:$0xff] }
 0x5b3   : > { %12794 = vst [vmem:[#allocation42_spill] sm:$0xff] %v10169_v36  ;;  %12796 = vst [vmem:[#allocation63_spill] sm:$0xff] %v10172_v1  ;;  %v12805_v36 = vld [vmem:[#allocation182_spill] sm:$0xff]  ;;  %v2578_v29 = vmul.f32 %v12807_v31, %v12806_v54  ;;  %v12808_v46 = vld [vmem:[#allocation192_spill] sm:$0xff]  ;;  %v10203_v28 = vmul.f32 %v12811_v9, %v9793_v30 }
 0x5b4   : > { %12798 = vst [vmem:[#allocation43_spill] sm:$0xff] %v10176_v17  ;;  %12800 = vst [vmem:[#allocation92_spill] sm:$0xff] %v10180_v32  ;;  %v2525_v47 = vadd.f32 %v12804_v16, %v12805_v36  ;;  %v2579_v17 = vmul.f32 %v12807_v31, %v12808_v46  ;;  %v10197_v32 = vld [vmem:[%s5013_s16 + $0xa8] sm:$0xff]  ;;  %v10207_v16 = vmul.f32 %v12811_v9, %v9798_v57  ;;  %v12814_v15 = vld [vmem:[#allocation21_spill] sm:$0xff] }
 0x5b5   : > { %12809 = vst [vmem:[#allocation134_spill] sm:$0xff] %v10194_v37  ;;  %12810 = vst [vmem:[#allocation76_spill] sm:$0xff] %v10197_v32  ;;  %4166 = vrot.lane.b32.xlu0 %v10197_v32, %s4927_s25  ;;  %v3014_v36 = vadd.f32 %v12814_v15, %v2982_v49  ;;  %v12815_v48 = vld [vmem:[#allocation154_spill] sm:$0xff]  ;;  %v10213_v54 = vld [vmem:[%s5013_s16 + $0xb0] sm:$0xff] }
 0x5b6   : > { %12812 = vst [vmem:[#allocation105_spill] sm:$0xff] %v10203_v28  ;;  %12813 = vst [vmem:[#allocation39_spill] sm:$0xff] %v10207_v16  ;;  %v3125_v46 = vadd.f32 %v12815_v48, %v9948_v52  ;;  %3880 = vrot.lane.b32.xlu1 %v10213_v54, %s4918_s19  ;;  %v12816_v31 = vld [vmem:[#allocation110_spill] sm:$0xff]  ;;  %v3126_v52 = vadd.f32 %v12815_v48, %v9952_v44  ;;  %v12819_v49 = vld [vmem:[#allocation23_spill] sm:$0xff] }
 0x5b7   : > { %v3015_v37 = vadd.f32 %v12816_v31, %v2983_v33  ;;  %v12817_v58 = vld [vmem:[#allocation90_spill] sm:$0xff]  ;;  %v12820_v9 = vld [vmem:[#allocation101_spill] sm:$0xff]  ;;  %v12821_v31 = vld [vmem:[#allocation27_spill] sm:$0xff] }
 0x5b8   : > { %v12818_v1 = vld [vmem:[#allocation98_spill] sm:$0xff]  ;;  %v3264_v15 = vsel %vm491_vm2, %v12820_v9, %v12819_v49  ;;  %v3268_v33 = vsel %vm491_vm2, %v12819_v49, %v12820_v9  ;;  %v3297_v16 = vmul.f32 %v12821_v31, %v9878_v22  ;;  %v12822_v28 = vld [vmem:[#allocation187_spill] sm:$0xff]  ;;  %v12824_v50 = vld [vmem:[#allocation185_spill] sm:$0xff]  ;;  %v10255_v22 = vadd.f32 %v9815_v45, %v3014_v36 }
 0x5b9   : > { %v3262_v30 = vsel %vm491_vm2, %v12818_v1, %v12817_v58  ;;  %v3266_v57 = vsel %vm491_vm2, %v12817_v58, %v12818_v1  ;;  %v3298_v58 = vmul.f32 %v12821_v31, %v9881_v51  ;;  %v4101_v1 = vpop.permute.xlu0 %4100  ;;  %v10241_v44 = vadd.f32 %v12822_v28, %v2524_v23  ;;  %v12823_v48 = vld [vmem:[#allocation190_spill] sm:$0xff]  ;;  %4214 = vrot.lane.b32.xlu0 %v10143_v21, %s4929_s26  ;;  %v12830_v36 = vld [vmem:[#allocation159_spill] sm:$0xff] }
 0x5ba   : > { %v10244_v19 = vadd.f32 %v12823_v48, %v2525_v47  ;;  %v10247_v7 = vadd.f32 %v2578_v29, %v12824_v50  ;;  %v12825_v42 = vld [vmem:[#allocation186_spill] sm:$0xff]  ;;  %12826 = vst [vmem:[#allocation84_spill] sm:$0xff] %v10255_v22  ;;  %v3271_v51 = vmul.f32 %v3266_v57, %v12595_v14  ;;  %v3272_v23 = vmul.f32 %v3262_v30, %v12597_v35  ;;  %v10262_v47 = vpop.permute.xlu1 %4243  ;;  %v10265_v50 = vld [vmem:[%s5013_s16 + $0xb8] sm:$0xff]  ;;  %v12835_v31 = vld [vmem:[#allocation91_spill] sm:$0xff] }
 0x5bb   : > { %v10250_v13 = vadd.f32 %v2579_v17, %v12825_v42  ;;  %v10260_v28 = vadd.f32 %v10060_v41, %v3125_v46  ;;  %12827 = vst [vmem:[#allocation94_spill] sm:$0xff] %v10262_v47  ;;  %3888 = vrot.lane.b32.xlu1 %v10265_v50, %s4918_s19  ;;  %v10270_v42 = vadd.f32 %v10068_v34, %v3126_v52  ;;  %v12829_v41 = vld [vmem:[#allocation137_spill] sm:$0xff]  ;;  %v12831_v34 = vld [vmem:[#allocation51_spill] sm:$0xff] }
 0x5bc   : > { %v10273_v45 = vmul.f32 %v3268_v33, %v12595_v14  ;;  %v10276_v17 = vmul.f32 %v3264_v15, %v12597_v35  ;;  %v10279_v29 = vadd.f32 %v9818_v62, %v3015_v37  ;;  %v3183_v46 = vmul.f32 %v12830_v36, %v12829_v41  ;;  %v12832_v52 = vld [vmem:[#allocation9_spill] sm:$0xff] }
 0x5bd   : > { %v3184_v30 = vmul.f32 %v12830_v36, %v9774_v40  ;;  %v3593_v57 = vadd.f32 %v3297_v16, %v3241_v61  ;;  %v3594_v49 = vadd.f32 %v3298_v58, %v3242_v26  ;;  %v4109_v9 = vpop.permute.xlu0 %4108  ;;  %v3317_v33 = vsel %vm556_vm3, %v12832_v52, %v12831_v34  ;;  %4222 = vrot.lane.b32.xlu0 %v10197_v32, %s4929_s26  ;;  %v12833_v26 = vld [vmem:[#allocation161_spill] sm:$0xff]  ;;  %v12838_v36 = vld [vmem:[#allocation75_spill] sm:$0xff] }
 0x5be   : > { %12828 = vst [vmem:[#allocation4_spill] sm:$0xff] %v10279_v29  ;;  %v3321_v62 = vsel %vm556_vm3, %v12831_v34, %v12832_v52  ;;  %v10297_v37 = vsel %vm621_vm4, %v4101_v1, %v4109_v9  ;;  %v10301_v40 = vsel %vm621_vm4, %v4109_v9, %v4101_v1  ;;  %v3187_v61 = vmul.f32 %v12833_v26, %v9777_v6  ;;  %v12834_v15 = vld [vmem:[#allocation5_spill] sm:$0xff]  ;;  %v10315_v41 = vpop.permute.xlu1 %4247  ;;  %v12837_v6 = vld [vmem:[#allocation156_spill] sm:$0xff] }
 0x5bf   : > { %v3188_v16 = vmul.f32 %v12833_v26, %v9780_v18  ;;  %v3319_v58 = vsel %vm556_vm3, %v12835_v31, %v12834_v15  ;;  %v3323_v48 = vsel %vm556_vm3, %v12834_v15, %v12835_v31  ;;  %12836 = vst [vmem:[#allocation61_spill] sm:$0xff] %v10315_v41  ;;  %3936 = vrot.lane.b32.xlu1 %v10213_v54, %s4920_s20 }
 0x5c0   : > { %v3131_v1 = vadd.f32 %v12837_v6, %v9972_v11  ;;  %v3132_v18 = vadd.f32 %v12837_v6, %v9976_v2  ;;  %v10324_v9 = vmul.f32 %v12838_v36, %v3271_v51  ;;  %v10327_v34 = vmul.f32 %v12838_v36, %v3272_v23  ;;  %v12846_v6 = vld [vmem:[#allocation96_spill] sm:$0xff]  ;;  %v12847_v36 = vld [vmem:[#allocation157_spill] sm:$0xff] }
 0x5c1   : > { %v10330_v52 = vadd.f32 %v3183_v46, %v9990_v24  ;;  %v10333_v26 = vadd.f32 %v3184_v30, %v10002_v3  ;;  %v3325_v15 = vmul.f32 %v3321_v62, %v12610_v10  ;;  %v3326_v31 = vmul.f32 %v3317_v33, %v12611_v39  ;;  %v10337_v11 = vpop.permute.xlu0 %4143  ;;  %4266 = vrot.lane.b32.xlu0 %v10158_v4, %s4931_s27  ;;  %v12840_v30 = vld [vmem:[#allocation26_spill] sm:$0xff]  ;;  %v12842_v62 = vld [vmem:[#allocation97_spill] sm:$0xff] }
 0x5c2   : > { %12839 = vst [vmem:[#allocation100_spill] sm:$0xff] %v10337_v11  ;;  %v10340_v2 = vadd.f32 %v3593_v57, %v10123_v5  ;;  %v10343_v51 = vadd.f32 %v3594_v49, %v10125_v43  ;;  %v3329_v23 = vmul.f32 %v3323_v48, %v12610_v10  ;;  %v3330_v24 = vmul.f32 %v3319_v58, %v12611_v39  ;;  %v12841_v43 = vld [vmem:[#allocation3_spill] sm:$0xff]  ;;  %v12843_v58 = vld [vmem:[#allocation2_spill] sm:$0xff] }
 0x5c3   : > { %v10349_v3 = vadd.f32 %v3187_v61, %v3131_v1  ;;  %v10351_v46 = vadd.f32 %v3188_v16, %v3132_v18  ;;  %v10354_v33 = vmul.f32 %v12840_v30, %v3325_v15  ;;  %v10357_v5 = vmul.f32 %v12840_v30, %v3326_v31  ;;  %3944 = vrot.lane.b32.xlu1 %v10265_v50, %s4920_s20  ;;  %v10371_v16 = vpop.permute.xlu1 %3835  ;;  %v12845_v48 = vld [vmem:[#allocation143_spill] sm:$0xff]  ;;  %v12862_v39 = vld [vmem:[#allocation14_spill] sm:$0xff] }
 0x5c4   : > { %v3353_v57 = vmul.f32 %v12841_v43, %v3329_v23  ;;  %v3354_v49 = vmul.f32 %v12841_v43, %v3330_v24  ;;  %v3374_v4 = vsel %vm621_vm4, %v12843_v58, %v12842_v62  ;;  %v3378_v61 = vsel %vm621_vm4, %v12842_v62, %v12843_v58  ;;  %12844 = vst [vmem:[#allocation133_spill] sm:$0xff] %v10371_v16  ;;  %v12848_v23 = vld [vmem:[#allocation48_spill] sm:$0xff]  ;;  %v12851_v43 = vld [vmem:[#allocation194_spill] sm:$0xff]  ;;  %v12853_v11 = vld [vmem:[#allocation195_spill] sm:$0xff] }
 0x5c5   : > { %v3376_v1 = vsel %vm621_vm4, %v12846_v6, %v12845_v48  ;;  %v3380_v18 = vsel %vm621_vm4, %v12845_v48, %v12846_v6  ;;  %v3409_v15 = vmul.f32 %v12847_v36, %v9979_v63  ;;  %v3410_v31 = vmul.f32 %v12847_v36, %v9986_v0  ;;  %v12852_v62 = vld [vmem:[#allocation172_spill] sm:$0xff]  ;;  %4274 = vrot.lane.b32.xlu0 %v10165_v25, %s4931_s27  ;;  %v10399_v63 = vpop.permute.xlu0 %2843  ;;  %v12854_v6 = vld [vmem:[#allocation57_spill] sm:$0xff]  ;;  %v12855_v36 = vld [vmem:[#allocation162_spill] sm:$0xff] }
 0x5c6   : > { %v10387_v24 = vmul.f32 %v12848_v23, %v9926_v59  ;;  %v10391_v30 = vmul.f32 %v12848_v23, %v9929_v55  ;;  %v2634_v58 = vmul.f32 %v12852_v62, %v12851_v43  ;;  %v2635_v48 = vmul.f32 %v12852_v62, %v12853_v11  ;;  %v12856_v16 = vld [vmem:[#allocation158_spill] sm:$0xff]  ;;  %v12857_v25 = vld [vmem:[#allocation164_spill] sm:$0xff] }
 0x5c7   : > { %v3383_v0 = vmul.f32 %v3374_v4, %v12629_v53  ;;  %v3384_v59 = vmul.f32 %v3378_v61, %v12854_v6  ;;  %v3429_v55 = vsel %vm686_vm5, %v12856_v16, %v12855_v36  ;;  %v3433_v23 = vsel %vm686_vm5, %v12855_v36, %v12856_v16  ;;  %3992 = vrot.lane.b32.xlu1 %v10213_v54, %s4921_s22  ;;  %v12858_v11 = vld [vmem:[#allocation160_spill] sm:$0xff]  ;;  %v12859_v16 = vld [vmem:[#allocation155_spill] sm:$0xff]  ;;  %v10433_v29 = vpop.permute.xlu1 %3858 }
 0x5c8   : > { %12849 = vst [vmem:[#allocation86_spill] sm:$0xff] %v10387_v24  ;;  %12850 = vst [vmem:[#allocation85_spill] sm:$0xff] %v10391_v30  ;;  %v3431_v4 = vsel %vm686_vm5, %v12858_v11, %v12857_v25  ;;  %v3435_v61 = vsel %vm686_vm5, %v12857_v25, %v12858_v11  ;;  %v10422_v43 = vmul.f32 %v3376_v1, %v12629_v53  ;;  %v12861_v11 = vld [vmem:[#allocation104_spill] sm:$0xff]  ;;  %v12903_v30 = vld [vmem:[#allocation115_spill] sm:$0xff] }
 0x5c9   : > { %v10425_v62 = vmul.f32 %v3380_v18, %v12854_v6  ;;  %v10428_v36 = vmul.f32 %v12859_v16, %v3383_v0  ;;  %v10431_v47 = vmul.f32 %v12859_v16, %v3384_v59  ;;  %v3601_v41 = vadd.f32 %v3409_v15, %v3353_v57  ;;  %12860 = vst [vmem:[#allocation95_spill] sm:$0xff] %v10433_v29  ;;  %v12863_v18 = vld [vmem:[#allocation38_spill] sm:$0xff]  ;;  %v10440_v21 = vpop.permute.xlu0 %2855  ;;  %v12865_v57 = vld [vmem:[#allocation197_spill] sm:$0xff]  ;;  %v12870_v16 = vld [vmem:[#allocation176_spill] sm:$0xff] }
 0x5ca   : > { %v3602_v22 = vadd.f32 %v3410_v31, %v3354_v49  ;;  %v3437_v32 = vmul.f32 %v3429_v55, %v12652_v20  ;;  %v3438_v25 = vmul.f32 %v3433_v23, %v12658_v60  ;;  %v2986_v1 = vadd.f32 %v12861_v11, %v2634_v58  ;;  %4307 = vperm.xlu0 %4825, %v12863_v18   ;;  %v12866_v49 = vld [vmem:[#allocation174_spill] sm:$0xff]  ;;  %v12868_v58 = vld [vmem:[#allocation165_spill] sm:$0xff]  ;;  %v12871_v11 = vld [vmem:[#allocation19_spill] sm:$0xff] }
 0x5cb   : > { %v2987_v10 = vadd.f32 %v12862_v39, %v2635_v48  ;;  %12864 = vst [vmem:[#allocation78_spill] sm:$0xff] %v10440_v21  ;;  %v3441_v0 = vmul.f32 %v3431_v4, %v12652_v20  ;;  %v3442_v59 = vmul.f32 %v3435_v61, %v12658_v60  ;;  %v2640_v15 = vmul.f32 %v12866_v49, %v12865_v57  ;;  %v12867_v31 = vld [vmem:[#allocation198_spill] sm:$0xff]  ;;  %v12869_v48 = vld [vmem:[#allocation145_spill] sm:$0xff]  ;;  %v12872_v18 = vld [vmem:[#allocation167_spill] sm:$0xff]  ;;  %v10466_v20 = vpop.permute.xlu1 %3874 }
 0x5cc   : > { %v2641_v55 = vmul.f32 %v12866_v49, %v12867_v31  ;;  %4000 = vrot.lane.b32.xlu1 %v10265_v50, %s4921_s22  ;;  %v10451_v23 = vmul.f32 %v12868_v58, %v3437_v32  ;;  %v10454_v39 = vmul.f32 %v12868_v58, %v3438_v25  ;;  %v3239_v4 = vmul.f32 %v12870_v16, %v12869_v48  ;;  %v12873_v49 = vld [vmem:[#allocation183_spill] sm:$0xff]  ;;  %v12874_v25 = vld [vmem:[#allocation169_spill] sm:$0xff]  ;;  %v12904_v24 = vld [vmem:[#allocation60_spill] sm:$0xff] }
 0x5cd   : > { %v3240_v61 = vmul.f32 %v12870_v16, %v12871_v11  ;;  %v3465_v57 = vmul.f32 %v12872_v18, %v3441_v0  ;;  %v3466_v60 = vmul.f32 %v12872_v18, %v3442_v59  ;;  %v3521_v31 = vmul.f32 %v12873_v49, %v10128_v8  ;;  %v12876_v48 = vld [vmem:[#allocation33_spill] sm:$0xff]  ;;  %v10484_v8 = vpop.permute.xlu0 %3450  ;;  %v12881_v16 = vld [vmem:[#allocation171_spill] sm:$0xff] }
 0x5ce   : > { %v3522_v32 = vmul.f32 %v12873_v49, %v10138_v27  ;;  %v10470_v58 = vmul.f32 %v12874_v25, %v10054_v12  ;;  %v10474_v29 = vmul.f32 %v12874_v25, %v12876_v48  ;;  %v10477_v0 = vadd.f32 %v2986_v1, %v10247_v7  ;;  %4272 = vrot.lane.b32.xlu0 %v10213_v54, %s4931_s27  ;;  %v12880_v27 = vld [vmem:[#allocation175_spill] sm:$0xff]  ;;  %v12882_v7 = vld [vmem:[#allocation153_spill] sm:$0xff]  ;;  %v12884_v25 = vld [vmem:[#allocation188_spill] sm:$0xff] }
 0x5cf   : > { %v10480_v59 = vadd.f32 %v2987_v10, %v10250_v13  ;;  %v3486_v12 = vsel %vm751_vm6, %v12881_v16, %v12880_v27  ;;  %v3490_v11 = vsel %vm751_vm6, %v12880_v27, %v12881_v16  ;;  %v2992_v1 = vadd.f32 %v12882_v7, %v2640_v15  ;;  %v12883_v18 = vld [vmem:[#allocation11_spill] sm:$0xff]  ;;  %v12885_v48 = vld [vmem:[#allocation180_spill] sm:$0xff]  ;;  %v12888_v16 = vld [vmem:[#allocation173_spill] sm:$0xff] }
 0x5d0   : > { %12875 = vst [vmem:[#allocation99_spill] sm:$0xff] %v10470_v58  ;;  %12877 = vst [vmem:[#allocation79_spill] sm:$0xff] %v10474_v29  ;;  %v2993_v10 = vadd.f32 %v12883_v18, %v2641_v55  ;;  %4048 = vrot.lane.b32.xlu1 %v10213_v54, %s4923_s23  ;;  %v3591_v13 = vadd.f32 %v10324_v9, %v3239_v4  ;;  %v3592_v49 = vadd.f32 %v10327_v34, %v3240_v61  ;;  %v12886_v15 = vmov 0   ;;  %v12887_v55 = vld [vmem:[#allocation177_spill] sm:$0xff]  ;;  %v3877_v61 = vpop.permute.xlu1 %3876 }
 0x5d1   : > { %12878 = vst [vmem:[#allocation80_spill] sm:$0xff] %v10477_v0  ;;  %12879 = vst [vmem:[#allocation6_spill] sm:$0xff] %v10480_v59  ;;  %v3946_v21 = vsel %vm426_vm1, %v12885_v48, %v12884_v25  ;;  %v3950_v27 = vsel %vm426_vm1, %v12884_v25, %v12885_v48  ;;  %4828 = vset.pattern.permute.xlu0 %v12886_v15  ;;  %v3488_v7 = vsel %vm751_vm6, %v12888_v16, %v12887_v55  ;;  %v12889_v59 = vld [vmem:[#allocation67_spill] sm:$0xff]  ;;  %v12890_v25 = vld [vmem:[#allocation89_spill] sm:$0xff] }
 0x5d2   : > { %v3492_v9 = vsel %vm751_vm6, %v12887_v55, %v12888_v16  ;;  %v3609_v34 = vadd.f32 %v3521_v31, %v3465_v57  ;;  %v3610_v4 = vadd.f32 %v3522_v32, %v3466_v60  ;;  %v3495_v18 = vmul.f32 %v3486_v12, %v12660_v56  ;;  %v12891_v48 = vld [vmem:[#allocation196_spill] sm:$0xff]  ;;  %4280 = vrot.lane.b32.xlu0 %v10265_v50, %s4931_s27  ;;  %v10529_v57 = vpop.permute.xlu0 %4191  ;;  %v12895_v32 = vld [vmem:[#allocation193_spill] sm:$0xff]  ;;  %v12898_v16 = vld [vmem:[#allocation50_spill] sm:$0xff] }
 0x5d3   : > { %v3496_v0 = vmul.f32 %v3490_v11, %v12889_v59  ;;  %v3541_v15 = vsel %vm816_vm7, %v12891_v48, %v12890_v25  ;;  %v3545_v58 = vsel %vm816_vm7, %v12890_v25, %v12891_v48  ;;  %12892 = vst [vmem:[#allocation83_spill] sm:$0xff] %v10529_v57  ;;  %v12893_v60 = vld [vmem:[#allocation144_spill] sm:$0xff]  ;;  %v10535_v12 = vadd.f32 %v2993_v10, %v12895_v32  ;;  %v12897_v11 = vld [vmem:[#allocation49_spill] sm:$0xff] }
 0x5d4   : > { %v10532_v31 = vadd.f32 %v2992_v1, %v12893_v60  ;;  %v3954_v55 = vmul.f32 %v3950_v27, %v12897_v11  ;;  %v3955_v29 = vmul.f32 %v3946_v21, %v12898_v16  ;;  %4056 = vrot.lane.b32.xlu1 %v10265_v50, %s4923_s23  ;;  %v10542_v25 = vadd.f32 %v3591_v13, %v10330_v52  ;;  %v12901_v27 = vld [vmem:[#allocation71_spill] sm:$0xff]  ;;  %v12902_v21 = vld [vmem:[#allocation72_spill] sm:$0xff]  ;;  %v12905_v13 = vld [vmem:[#allocation109_spill] sm:$0xff] }
 0x5d5   : > { %12896 = vst [vmem:[#allocation102_spill] sm:$0xff] %v10535_v12  ;;  %v10545_v48 = vmul.f32 %v3488_v7, %v12660_v56  ;;  %v10548_v57 = vmul.f32 %v3492_v9, %v12889_v59  ;;  %v10551_v1 = vadd.f32 %v3592_v49, %v10333_v26  ;;  %v3625_v10 = vadd.f32 %v3609_v34, %v3601_v41  ;;  %v3885_v12 = vpop.permute.xlu1 %3884 }
 0x5d6   : > { %12894 = vst [vmem:[#allocation184_spill] sm:$0xff] %v10532_v31  ;;  %12899 = vst [vmem:[#allocation181_spill] sm:$0xff] %v10542_v25  ;;  %v3626_v60 = vadd.f32 %v3610_v4, %v3602_v22  ;;  %v3549_v32 = vmul.f32 %v3541_v15, %v12901_v27  ;;  %v3550_v31 = vmul.f32 %v3545_v58, %v12902_v21  ;;  %v10563_v49 = vpop.permute.xlu0 %4162  ;;  %v12907_v22 = vld [vmem:[#allocation179_spill] sm:$0xff]  ;;  %v12910_v15 = vld [vmem:[#allocation178_spill] sm:$0xff] }
 0x5d7   : > { %12900 = vst [vmem:[#allocation69_spill] sm:$0xff] %v10551_v1  ;;  %v2692_v52 = vmul.f32 %v12904_v24, %v12903_v30  ;;  %v2693_v7 = vmul.f32 %v12904_v24, %v12905_v13  ;;  %v3891_v9 = vsel %vm361_vm0, %v3877_v61, %v3885_v12  ;;  %v3895_v26 = vsel %vm361_vm0, %v3885_v12, %v3877_v61  ;;  %v12911_v24 = vld [vmem:[#allocation149_spill] sm:$0xff]  ;;  %v12913_v12 = vld [vmem:[#allocation24_spill] sm:$0xff] }
 0x5d8   : > { %12906 = vst [vmem:[#allocation182_spill] sm:$0xff] %v10563_v49  ;;  %v10566_v41 = vmul.f32 %v12907_v22, %v3495_v18  ;;  %v10569_v58 = vmul.f32 %v12907_v22, %v3496_v0  ;;  %v10572_v34 = vmul.f32 %v12910_v15, %v3954_v55  ;;  %v10575_v30 = vmul.f32 %v12910_v15, %v3955_v29  ;;  %v12912_v4 = vld [vmem:[#allocation113_spill] sm:$0xff]  ;;  %v12914_v18 = vld [vmem:[#allocation111_spill] sm:$0xff] }
 0x5d9   : > { %4104 = vrot.lane.b32.xlu1 %v10213_v54, %s4925_s24  ;;  %v3293_v61 = vmul.f32 %v12912_v4, %v12911_v24  ;;  %v3294_v13 = vmul.f32 %v12912_v4, %v12913_v12  ;;  %v3299_v59 = vmul.f32 %v12914_v18, %v10273_v45  ;;  %v3300_v0 = vmul.f32 %v12914_v18, %v10276_v17  ;;  %v10587_v55 = vpop.permute.xlu1 %3919  ;;  %v12918_v15 = vld [vmem:[#allocation191_spill] sm:$0xff]  ;;  %v12922_v45 = vld [vmem:[#allocation12_spill] sm:$0xff]  ;;  %v12924_v18 = vld [vmem:[#allocation17_spill] sm:$0xff] }
 0x5da   : > { %12908 = vst [vmem:[#allocation189_spill] sm:$0xff] %v10566_v41  ;;  %12909 = vst [vmem:[#allocation36_spill] sm:$0xff] %v10569_v58  ;;  %v10590_v29 = vadd.f32 %v3625_v10, %v10340_v2  ;;  %v10593_v22 = vadd.f32 %v3626_v60, %v10343_v51  ;;  %v10596_v56 = vmul.f32 %v12918_v15, %v3550_v31  ;;  %v12921_v4 = vld [vmem:[#allocation135_spill] sm:$0xff]  ;;  %v12923_v17 = vld [vmem:[#allocation128_spill] sm:$0xff]  ;;  %v10611_v31 = vpop.permute.xlu0 %4195 }
 0x5db   : > { %12915 = vst [vmem:[#allocation192_spill] sm:$0xff] %v10587_v55  ;;  %v10599_v24 = vmul.f32 %v12918_v15, %v3549_v32  ;;  %v2988_v12 = vadd.f32 %v2692_v52, %v12921_v4  ;;  %v2989_v49 = vadd.f32 %v2693_v7, %v12922_v45  ;;  %v3544_v2 = vsel %vm816_vm7, %v12924_v18, %v12923_v17  ;;  %v12926_v10 = vld [vmem:[#allocation108_spill] sm:$0xff]  ;;  %v12928_v7 = vld [vmem:[#allocation122_spill] sm:$0xff]  ;;  %v12929_v15 = vld [vmem:[#allocation139_spill] sm:$0xff] }
 0x5dc   : > { %12916 = vst [vmem:[#allocation93_spill] sm:$0xff] %v10590_v29  ;;  %12917 = vst [vmem:[#allocation21_spill] sm:$0xff] %v10593_v22  ;;  %v3548_v51 = vsel %vm816_vm7, %v12923_v17, %v12924_v18  ;;  %v12927_v60 = vld [vmem:[#allocation112_spill] sm:$0xff]  ;;  %v4003_v4 = vsel %vm491_vm2, %v12929_v15, %v12928_v7  ;;  %v4007_v45 = vsel %vm491_vm2, %v12928_v7, %v12929_v15  ;;  %v12930_v17 = vld [vmem:[#allocation63_spill] sm:$0xff] }
 0x5dd   : > { %12919 = vst [vmem:[#allocation154_spill] sm:$0xff] %v10596_v56  ;;  %12920 = vst [vmem:[#allocation110_spill] sm:$0xff] %v10599_v24  ;;  %v3542_v32 = vsel %vm816_vm7, %v12927_v60, %v12926_v10  ;;  %v3546_v52 = vsel %vm816_vm7, %v12926_v10, %v12927_v60  ;;  %4112 = vrot.lane.b32.xlu1 %v10265_v50, %s4925_s24  ;;  %v3589_v18 = vadd.f32 %v3293_v61, %v12930_v17  ;;  %v12931_v55 = vld [vmem:[#allocation43_spill] sm:$0xff]  ;;  %v12932_v22 = vld [vmem:[#allocation105_spill] sm:$0xff]  ;;  %v3933_v17 = vpop.permute.xlu1 %3932 }
 0x5de   : > { %12925 = vst [vmem:[#allocation90_spill] sm:$0xff] %v10611_v31  ;;  %v3590_v31 = vadd.f32 %v3294_v13, %v12931_v55  ;;  %v3595_v29 = vadd.f32 %v3299_v59, %v12932_v22  ;;  %v12933_v10 = vld [vmem:[#allocation39_spill] sm:$0xff]  ;;  %v3555_v1 = vmul.f32 %v3544_v2, %v12901_v27  ;;  %v3556_v25 = vmul.f32 %v3548_v51, %v12902_v21  ;;  %v10638_v24 = vld [vmem:[%s5013_s16 + $0x90] sm:$0xff]  ;;  %v12934_v56 = vld [vmem:[#allocation126_spill] sm:$0xff] }
 0x5df   : > { %v3596_v60 = vadd.f32 %v3300_v0, %v12933_v10  ;;  %v3840_v7 = vmul.f32 %v10638_v24, %v12934_v56  ;;  %v10643_v15 = vld [vmem:[%s5013_s16 + $0x98] sm:$0xff]  ;;  %v10648_v13 = vadd.f32 %v2988_v12, %v10241_v44  ;;  %v10651_v59 = vadd.f32 %v2989_v49, %v10244_v19  ;;  %v12935_v22 = vld [vmem:[#allocation46_spill] sm:$0xff]  ;;  %v12936_v51 = vld [vmem:[#allocation47_spill] sm:$0xff] }
 0x5e0   : > { %v3841_v61 = vmul.f32 %v10643_v15, %v12934_v56  ;;  %v4012_v0 = vmul.f32 %v4007_v45, %v12595_v14  ;;  %v4013_v55 = vmul.f32 %v4003_v4, %v12597_v35  ;;  %v3900_v2 = vmul.f32 %v3895_v26, %v12935_v22  ;;  %v2904_v26 = vpop.permute.xlu0 %2903  ;;  %v12943_v4 = vld [vmem:[#allocation117_spill] sm:$0xff] }
 0x5e1   : > { %v3901_v10 = vmul.f32 %v3891_v9, %v12936_v51  ;;  %4160 = vrot.lane.b32.xlu1 %v10213_v54, %s4927_s25  ;;  %v10660_v56 = vmul.f32 %v3542_v32, %v12901_v27  ;;  %v10663_v44 = vmul.f32 %v3546_v52, %v12902_v21  ;;  %v10666_v19 = vadd.f32 %v3589_v18, %v10260_v28  ;;  %v12946_v52 = vld [vmem:[#allocation163_spill] sm:$0xff]  ;;  %v3941_v18 = vpop.permute.xlu1 %3940 }
 0x5e2   : > { %v10669_v49 = vadd.f32 %v3595_v29, %v10349_v3  ;;  %v10672_v12 = vadd.f32 %v3596_v60, %v10351_v46  ;;  %v10675_v9 = vadd.f32 %v3590_v31, %v10270_v42  ;;  %v10678_v45 = vmul.f32 %v12943_v4, %v3555_v1  ;;  %v12947_v3 = vld [vmem:[#allocation141_spill] sm:$0xff]  ;;  %v12948_v1 = vld [vmem:[#allocation35_spill] sm:$0xff] }
 0x5e3   : > { %12937 = vst [vmem:[#allocation98_spill] sm:$0xff] %v10660_v56  ;;  %12938 = vst [vmem:[#allocation23_spill] sm:$0xff] %v10663_v44  ;;  %v10681_v32 = vmul.f32 %v12943_v4, %v3556_v25  ;;  %v3868_v21 = vadd.f32 %v12946_v52, %v3840_v7  ;;  %v3869_v28 = vadd.f32 %v12946_v52, %v3841_v61  ;;  %v12949_v61 = vld [vmem:[#allocation40_spill] sm:$0xff] }
 0x5e4   : > { %12939 = vst [vmem:[#allocation101_spill] sm:$0xff] %v10666_v19  ;;  %12940 = vst [vmem:[#allocation27_spill] sm:$0xff] %v10669_v49  ;;  %v4036_v29 = vmul.f32 %v12947_v3, %v4012_v0  ;;  %v4037_v46 = vmul.f32 %v12947_v3, %v4013_v55  ;;  %v3947_v60 = vsel %vm426_vm1, %v3933_v17, %v3941_v18  ;;  %v12950_v0 = vld [vmem:[#allocation124_spill] sm:$0xff]  ;;  %v12952_v3 = vld [vmem:[#allocation129_spill] sm:$0xff] }
 0x5e5   : > { %12941 = vst [vmem:[#allocation187_spill] sm:$0xff] %v10672_v12  ;;  %12942 = vst [vmem:[#allocation190_spill] sm:$0xff] %v10675_v9  ;;  %v3951_v42 = vsel %vm426_vm1, %v3941_v18, %v3933_v17  ;;  %v3924_v31 = vmul.f32 %v12948_v1, %v3900_v2  ;;  %v3925_v25 = vmul.f32 %v12948_v1, %v3901_v10  ;;  %4168 = vrot.lane.b32.xlu1 %v10265_v50, %s4927_s25  ;;  %v12951_v52 = vld [vmem:[#allocation52_spill] sm:$0xff]  ;;  %v12954_v2 = vld [vmem:[#allocation147_spill] sm:$0xff]  ;;  %v3503_v1 = vpop.permute.xlu0 %3502  ;;  %v10713_v49 = vpop.permute.xlu1 %3975 }
 0x5e6   : > { %12944 = vst [vmem:[#allocation185_spill] sm:$0xff] %v10678_v45  ;;  %12945 = vst [vmem:[#allocation186_spill] sm:$0xff] %v10681_v32  ;;  %v3956_v4 = vmul.f32 %v3951_v42, %v12897_v11  ;;  %v3957_v7 = vmul.f32 %v3947_v60, %v12898_v16  ;;  %v10699_v55 = vadd.f32 %v12950_v0, %v12949_v61  ;;  %v12953_v45 = vld [vmem:[#allocation53_spill] sm:$0xff]  ;;  %v12956_v42 = vld [vmem:[#allocation123_spill] sm:$0xff] }
 0x5e7   : > { %v2746_v27 = vmul.f32 %v12952_v3, %v12951_v52  ;;  %v2747_v17 = vmul.f32 %v12952_v3, %v12953_v45  ;;  %v12955_v18 = vld [vmem:[#allocation29_spill] sm:$0xff]  ;;  %v12957_v16 = vld [vmem:[#allocation18_spill] sm:$0xff]  ;;  %v12958_v11 = vld [vmem:[#allocation148_spill] sm:$0xff]  ;;  %12960 = vst [vmem:[#allocation137_spill] sm:$0xff] %v10713_v49 }
 0x5e8   : > { %v2752_v10 = vmul.f32 %v12955_v18, %v12954_v2  ;;  %v2753_v60 = vmul.f32 %v12955_v18, %v12956_v42  ;;  %v3351_v32 = vmul.f32 %v12958_v11, %v12957_v16  ;;  %v12959_v44 = vld [vmem:[#allocation140_spill] sm:$0xff]  ;;  %v12961_v52 = vld [vmem:[#allocation13_spill] sm:$0xff]  ;;  %v12962_v45 = vld [vmem:[#allocation114_spill] sm:$0xff]  ;;  %v4324_v42 = vadd.f32 %v3924_v31, %v3868_v21 }
 0x5e9   : > { %v3980_v56 = vmul.f32 %v12959_v44, %v3956_v4  ;;  %v3981_v61 = vmul.f32 %v12959_v44, %v3957_v7  ;;  %v3352_v12 = vmul.f32 %v12958_v11, %v12961_v52  ;;  %v12963_v3 = vld [vmem:[#allocation87_spill] sm:$0xff]  ;;  %v12965_v18 = vld [vmem:[#allocation168_spill] sm:$0xff]  ;;  %v4325_v4 = vadd.f32 %v3925_v25, %v3869_v28  ;;  %4216 = vrot.lane.b32.xlu1 %v10213_v54, %s4929_s26  ;;  %v12966_v7 = vld [vmem:[#allocation42_spill] sm:$0xff]  ;;  %v3515_v41 = vpop.permute.xlu0 %3514  ;;  %v3987_v31 = vpop.permute.xlu1 %3986 }
 0x5ea   : > { %v2804_v19 = vmul.f32 %v12963_v3, %v12962_v45  ;;  %v12964_v2 = vld [vmem:[#allocation103_spill] sm:$0xff]  ;;  %v3894_v16 = vsel %vm361_vm0, %v12965_v18, %v10466_v20  ;;  %v3867_v11 = vadd.f32 %v12950_v0, %v12966_v7  ;;  %v3890_v52 = vsel %vm361_vm0, %v10466_v20, %v12965_v18  ;;  %v12967_v45 = vld [vmem:[#allocation44_spill] sm:$0xff]  ;;  %v12972_v20 = vld [vmem:[#allocation118_spill] sm:$0xff] }
 0x5eb   : > { %v2805_v9 = vmul.f32 %v12963_v3, %v12964_v2  ;;  %v4332_v58 = vadd.f32 %v4036_v29, %v3980_v56  ;;  %v4333_v44 = vadd.f32 %v4037_v46, %v3981_v61  ;;  %v2916_v3 = vmul.f32 %v2904_v26, %v12967_v45  ;;  %v12968_v2 = vld [vmem:[#allocation116_spill] sm:$0xff]  ;;  %v12969_v21 = vld [vmem:[#allocation127_spill] sm:$0xff]  ;;  %v12977_v45 = vld [vmem:[#allocation25_spill] sm:$0xff] }
 0x5ec   : > { %v2917_v49 = vmul.f32 %v2904_v26, %v12968_v2  ;;  %v10736_v28 = vadd.f32 %v12969_v21, %v2746_v27  ;;  %v12970_v56 = vld [vmem:[#allocation120_spill] sm:$0xff]  ;;  %v12971_v25 = vld [vmem:[#allocation119_spill] sm:$0xff]  ;;  %v10749_v61 = vadd.f32 %v12972_v20, %v2753_v60  ;;  %v10752_v26 = vadd.f32 %v10428_v36, %v3351_v32  ;;  %v12976_v60 = vld [vmem:[#allocation45_spill] sm:$0xff] }
 0x5ed   : > { %v10739_v29 = vadd.f32 %v12970_v56, %v2747_v17  ;;  %v10741_v54 = vadd.f32 %v4332_v58, %v4324_v42  ;;  %v10743_v46 = vadd.f32 %v4333_v44, %v4325_v4  ;;  %v10746_v0 = vadd.f32 %v12971_v25, %v2752_v10  ;;  %v12973_v17 = vld [vmem:[#allocation138_spill] sm:$0xff]  ;;  %4224 = vrot.lane.b32.xlu1 %v10265_v50, %s4929_s26  ;;  %v12979_v2 = vld [vmem:[#allocation152_spill] sm:$0xff]  ;;  %v3995_v25 = vpop.permute.xlu1 %3994 }
 0x5ee   : > { %v3898_v27 = vmul.f32 %v3894_v16, %v12935_v22  ;;  %v10756_v18 = vadd.f32 %v10431_v47, %v3352_v12  ;;  %v2996_v58 = vadd.f32 %v2804_v19, %v12973_v17  ;;  %v12974_v42 = vld [vmem:[#allocation146_spill] sm:$0xff]  ;;  %v3899_v44 = vmul.f32 %v3890_v52, %v12936_v51  ;;  %v4213_v12 = vpop.permute.xlu0 %4212  ;;  %v12980_v19 = vld [vmem:[#allocation41_spill] sm:$0xff]  ;;  %v12981_v52 = vld [vmem:[#allocation56_spill] sm:$0xff] }
 0x5ef   : > { %v2997_v4 = vadd.f32 %v2805_v9, %v12974_v42  ;;  %v12975_v10 = vld [vmem:[#allocation34_spill] sm:$0xff]  ;;  %v3406_v36 = vmul.f32 %v12976_v60, %v12977_v45  ;;  %v3005_v47 = vadd.f32 %v2917_v49, %v12979_v2  ;;  %v3411_v21 = vmul.f32 %v12980_v19, %v10422_v43  ;;  %v12983_v42 = vld [vmem:[#allocation121_spill] sm:$0xff]  ;;  %v12984_v45 = vld [vmem:[#allocation28_spill] sm:$0xff] }
 0x5f0   : > { %v3405_v7 = vmul.f32 %v12976_v60, %v12975_v10  ;;  %v12978_v32 = vld [vmem:[#allocation130_spill] sm:$0xff]  ;;  %v3412_v9 = vmul.f32 %v12980_v19, %v10425_v62  ;;  %v4124_v50 = vmul.f32 %v10297_v37, %v12629_v53  ;;  %v2858_v56 = vmul.f32 %v10399_v63, %v12981_v52 }
 0x5f1   : > { %v3004_v16 = vadd.f32 %v2916_v3, %v12978_v32  ;;  %v12982_v20 = vld [vmem:[#allocation150_spill] sm:$0xff]  ;;  %v2859_v3 = vmul.f32 %v10399_v63, %v12983_v42  ;;  %v4002_v49 = vsel %vm491_vm2, %v3987_v31, %v3995_v25  ;;  %v4006_v43 = vsel %vm491_vm2, %v3995_v25, %v3987_v31  ;;  %4268 = vrot.lane.b32.xlu1 %v10638_v24, %s4931_s27  ;;  %v10795_v42 = vpop.permute.xlu1 %4027 }
 0x5f2   : > { %v3922_v17 = vmul.f32 %v12982_v20, %v3898_v27  ;;  %v4125_v62 = vmul.f32 %v10301_v40, %v12854_v6  ;;  %v3923_v37 = vmul.f32 %v12982_v20, %v3899_v44  ;;  %v4010_v10 = vmul.f32 %v4006_v43, %v12595_v14  ;;  %v12985_v2 = vld [vmem:[#allocation70_spill] sm:$0xff]  ;;  %v4221_v52 = vpop.permute.xlu0 %4220  ;;  %v12989_v20 = vld [vmem:[#allocation81_spill] sm:$0xff] }
 0x5f3   : > { %v4011_v60 = vmul.f32 %v4002_v49, %v12597_v35  ;;  %v3020_v27 = vadd.f32 %v3004_v16, %v2996_v58  ;;  %v3021_v63 = vadd.f32 %v3005_v47, %v2997_v4  ;;  %v3517_v32 = vmul.f32 %v3503_v1, %v12984_v45  ;;  %v12986_v31 = vld [vmem:[#allocation22_spill] sm:$0xff]  ;;  %v12987_v4 = vld [vmem:[#allocation37_spill] sm:$0xff] }
 0x5f4   : > { %v3518_v19 = vmul.f32 %v3503_v1, %v12985_v2  ;;  %v4034_v25 = vmul.f32 %v12986_v31, %v4010_v10  ;;  %v10799_v44 = vsel %vm751_vm6, %v4213_v12, %v4221_v52  ;;  %v10803_v24 = vsel %vm751_vm6, %v4221_v52, %v4213_v12  ;;  %v12988_v1 = vld [vmem:[#allocation136_spill] sm:$0xff]  ;;  %v12994_v52 = vld [vmem:[#allocation79_spill] sm:$0xff] }
 0x5f5   : > { %v4035_v40 = vmul.f32 %v12986_v31, %v4011_v60  ;;  %v4322_v58 = vadd.f32 %v3922_v17, %v10699_v55  ;;  %v3002_v16 = vadd.f32 %v12987_v4, %v2858_v56  ;;  %v3003_v47 = vadd.f32 %v12988_v1, %v2859_v3  ;;  %4276 = vrot.lane.b32.xlu1 %v10643_v15, %s4931_s27  ;;  %v12990_v12 = vld [vmem:[#allocation64_spill] sm:$0xff]  ;;  %v10828_v15 = vpop.permute.xlu1 %4042 }
 0x5f6   : > { %v3463_v49 = vmul.f32 %v10484_v8, %v12989_v20  ;;  %v4323_v43 = vadd.f32 %v3923_v37, %v3867_v11  ;;  %v4330_v10 = vadd.f32 %v4034_v25, %v10572_v34  ;;  %v3524_v45 = vmul.f32 %v3515_v41, %v10548_v57  ;;  %v10820_v2 = vpop.permute.xlu0 %4255  ;;  %v12991_v37 = vld [vmem:[#allocation86_spill] sm:$0xff] }
 0x5f7   : > { %v4331_v60 = vadd.f32 %v4035_v40, %v10575_v30  ;;  %v3464_v55 = vmul.f32 %v10484_v8, %v12990_v12  ;;  %v3028_v56 = vadd.f32 %v3020_v27, %v10648_v13  ;;  %v3029_v17 = vadd.f32 %v3021_v63, %v10651_v59  ;;  %v12992_v63 = vld [vmem:[#allocation85_spill] sm:$0xff]  ;;  %v12998_v40 = vld [vmem:[#allocation8_spill] sm:$0xff]  ;;  %v13005_v12 = vld [vmem:[#allocation78_spill] sm:$0xff] }
 0x5f8   : > { %v3606_v3 = vadd.f32 %v3518_v19, %v10454_v39  ;;  %v3605_v34 = vadd.f32 %v3517_v32, %v10451_v23  ;;  %v10823_v11 = vadd.f32 %v4330_v10, %v4322_v58  ;;  %v3523_v57 = vmul.f32 %v3515_v41, %v10545_v48  ;;  %v12993_v32 = vld [vmem:[#allocation189_spill] sm:$0xff] }
 0x5f9   : > { %v10825_v30 = vadd.f32 %v4331_v60, %v4323_v43  ;;  %v3597_v8 = vadd.f32 %v3405_v7, %v10354_v33  ;;  %v3598_v13 = vadd.f32 %v3406_v36, %v10357_v5  ;;  %v3018_v59 = vadd.f32 %v3002_v16, %v10736_v28  ;;  %v4905_v48 = vld [vmem:[%s11225_s2 + $0xb8] sm:$0xff]  ;;  %v12995_v33 = vld [vmem:[#allocation10_spill] sm:$0xff]  ;;  %v12996_v28 = vld [vmem:[#allocation36_spill] sm:$0xff] }
 0x5fa   : > { %v3019_v39 = vadd.f32 %v3003_v47, %v10739_v29  ;;  %v3603_v27 = vadd.f32 %v3411_v21, %v12991_v37  ;;  %v3604_v23 = vadd.f32 %v3412_v9, %v12992_v63  ;;  %v3607_v19 = vadd.f32 %v12993_v32, %v3463_v49  ;;  %4311 = vperm.xlu1 %4826, %v4905_v48   ;;  %v12997_v21 = vld [vmem:[#allocation99_spill] sm:$0xff]  ;;  %v4045_v9 = vpop.permute.xlu1 %4044  ;;  %v2956_v4 = vpop.permute.xlu0 %2955  ;;  %v12999_v16 = vld [vmem:[#allocation68_spill] sm:$0xff]  ;;  %v13001_v49 = vld [vmem:[#allocation6_spill] sm:$0xff] }
 0x5fb   : > { %v3612_v31 = vadd.f32 %v3524_v45, %v12994_v52  ;;  %v4148_v41 = vmul.f32 %v12995_v33, %v4124_v50  ;;  %v4149_v5 = vmul.f32 %v12995_v33, %v4125_v62  ;;  %v3608_v7 = vadd.f32 %v12996_v28, %v3464_v55  ;;  %v13000_v47 = vld [vmem:[#allocation80_spill] sm:$0xff]  ;;  %v13002_v10 = vld [vmem:[#allocation125_spill] sm:$0xff]  ;;  %v13003_v60 = vld [vmem:[#allocation15_spill] sm:$0xff] }
 0x5fc   : > { %v3622_v29 = vadd.f32 %v3606_v3, %v3598_v13  ;;  %v3621_v36 = vadd.f32 %v3605_v34, %v3597_v8  ;;  %v3611_v25 = vadd.f32 %v3523_v57, %v12997_v21  ;;  %v3036_v58 = vadd.f32 %v3028_v56, %v12998_v40  ;;  %v13004_v45 = vld [vmem:[#allocation131_spill] sm:$0xff]  ;;  %v13006_v3 = vld [vmem:[#allocation16_spill] sm:$0xff]  ;;  %v13007_v8 = vld [vmem:[#allocation65_spill] sm:$0xff] }
 0x5fd   : > { %v3037_v1 = vadd.f32 %v3029_v17, %v12999_v16  ;;  %v3026_v20 = vadd.f32 %v3018_v59, %v13000_v47  ;;  %v3027_v43 = vadd.f32 %v3019_v39, %v13001_v49  ;;  %v2970_v50 = vmul.f32 %v2956_v4, %v13002_v10  ;;  %v13008_v39 = vld [vmem:[#allocation190_spill] sm:$0xff]  ;;  %v13010_v28 = vld [vmem:[#allocation101_spill] sm:$0xff]  ;;  %v13015_v47 = vld [vmem:[#allocation76_spill] sm:$0xff] }
 0x5fe   : > { %v2971_v62 = vmul.f32 %v2956_v4, %v13003_v60  ;;  %v2864_v55 = vmul.f32 %v13005_v12, %v13004_v45  ;;  %v2865_v34 = vmul.f32 %v13005_v12, %v13006_v3  ;;  %v3623_v57 = vadd.f32 %v3607_v19, %v10752_v26  ;;  %4270 = vrot.lane.b32.xlu1 %v13007_v8, %s4931_s27  ;;  %v4053_v52 = vpop.permute.xlu1 %4052  ;;  %v2968_v33 = vpop.permute.xlu0 %2967  ;;  %v13013_v16 = vld [vmem:[#allocation54_spill] sm:$0xff]  ;;  %v13018_v10 = vld [vmem:[#allocation27_spill] sm:$0xff]  ;;  %v13021_v8 = vld [vmem:[#allocation181_spill] sm:$0xff] }
 0x5ff   : > { %v3628_v56 = vadd.f32 %v3612_v31, %v3604_v23  ;;  %v3624_v17 = vadd.f32 %v3608_v7, %v10756_v18  ;;  %v3034_v13 = vadd.f32 %v3026_v20, %v2970_v50  ;;  %v3630_v37 = vadd.f32 %v3622_v29, %v13008_v39  ;;  %v13011_v31 = vld [vmem:[#allocation32_spill] sm:$0xff]  ;;  %v13012_v29 = vld [vmem:[#allocation187_spill] sm:$0xff]  ;;  %v13017_v49 = vld [vmem:[#allocation154_spill] sm:$0xff] }
 0x600   : > { %v3035_v59 = vadd.f32 %v3027_v43, %v2971_v62  ;;  %v13009_v63 = vmov 0   ;;  %v3627_v32 = vadd.f32 %v3611_v25, %v3603_v27  ;;  %v3044_v48 = vmax.f32 %v3036_v58, 0.0  ;;  %v13014_v25 = vld [vmem:[#allocation55_spill] sm:$0xff]  ;;  %v13019_v60 = vld [vmem:[#allocation82_spill] sm:$0xff] }
 0x601   : > { %4827 = vset.pattern.permute.xlu1 %v13009_v63  ;;  %v3629_v21 = vadd.f32 %v3621_v36, %v13010_v28  ;;  %v3045_v40 = vmax.f32 %v3037_v1, 0.0  ;;  %v4059_v26 = vsel %vm556_vm3, %v4045_v9, %v4053_v52  ;;  %v4063_v23 = vsel %vm556_vm3, %v4053_v52, %v4045_v9  ;;  %v13016_v36 = vld [vmem:[#allocation151_spill] sm:$0xff] }
 0x602   : > { %v3042_v18 = vmax.f32 %v3034_v13, 0.0  ;;  %v3043_v19 = vmax.f32 %v3035_v59, 0.0  ;;  %v3009_v7 = vadd.f32 %v13011_v31, %v2865_v34  ;;  %v3636_v4 = vadd.f32 %v3628_v56, %v13012_v29  ;;  %4278 = vrot.lane.b32.xlu1 %v13015_v47, %s4931_s27  ;;  %v10881_v12 = vpop.permute.xlu1 %4087  ;;  %v3563_v3 = vpop.permute.xlu0 %3562  ;;  %v13020_v34 = vld [vmem:[#allocation110_spill] sm:$0xff]  ;;  %v13023_v39 = vld [vmem:[#allocation23_spill] sm:$0xff] }
 0x603   : > { %v4068_v27 = vmul.f32 %v4063_v23, %v13013_v16  ;;  %v4069_v58 = vmul.f32 %v4059_v26, %v13014_v25  ;;  %v3008_v1 = vadd.f32 %v13016_v36, %v2864_v55  ;;  %v3638_v43 = vadd.f32 %v3630_v37, %v13017_v49  ;;  %v13022_v55 = vld [vmem:[#allocation98_spill] sm:$0xff]  ;;  %v13024_v37 = vld [vmem:[#allocation69_spill] sm:$0xff] }
 0x604   : > { %v10873_v20 = vpack.c.bf16 %v3044_v48, %v3042_v18  ;;  %v10876_v9 = vpack.c.bf16 %v3045_v40, %v3043_v19  ;;  %v3635_v50 = vadd.f32 %v3627_v32, %v13018_v10  ;;  %v3637_v56 = vadd.f32 %v3629_v21, %v13020_v34  ;;  %v13025_v26 = vld [vmem:[#allocation186_spill] sm:$0xff]  ;;  %v13026_v18 = vld [vmem:[#allocation77_spill] sm:$0xff] }
 0x605   : > { %v4092_v62 = vmul.f32 %v13019_v60, %v4068_v27  ;;  %v4093_v45 = vmul.f32 %v13019_v60, %v4069_v58  ;;  %v3631_v13 = vadd.f32 %v3623_v57, %v13021_v8  ;;  %v3575_v59 = vmul.f32 %v3563_v3, %v13022_v55  ;;  %v13028_v27 = vld [vmem:[#allocation185_spill] sm:$0xff]  ;;  %v13029_v58 = vld [vmem:[#allocation30_spill] sm:$0xff] }
 0x606   : > { %v3576_v52 = vmul.f32 %v3563_v3, %v13023_v39  ;;  %v3632_v48 = vadd.f32 %v3624_v17, %v13024_v37  ;;  %v3025_v28 = vadd.f32 %v3009_v7, %v10749_v61  ;;  %v3644_v23 = vadd.f32 %v3636_v4, %v13025_v26  ;;  %v13027_v61 = vld [vmem:[#allocation73_spill] sm:$0xff]  ;;  %v4099_v7 = vpop.permute.xlu1 %4098  ;;  %v13030_v49 = vld [vmem:[#allocation74_spill] sm:$0xff] }
 0x607   : > { %v10889_v32 = vadd.f32 %v4148_v41, %v4092_v62  ;;  %v10891_v40 = vadd.f32 %v4149_v5, %v4093_v45  ;;  %v4062_v21 = vsel %vm556_vm3, %v13026_v18, %v10828_v15  ;;  %v3639_v57 = vadd.f32 %v3631_v13, %v3575_v59  ;;  %v3567_v5 = vpop.permute.xlu0 %3566  ;;  %v13031_v3 = vld [vmem:[#allocation102_spill] sm:$0xff]  ;;  %v13032_v8 = vld [vmem:[#allocation93_spill] sm:$0xff] }
 0x608   : > { %v3640_v19 = vadd.f32 %v3632_v48, %v3576_v52  ;;  %v3646_v31 = vmax.f32 %v3638_v43, 0.0  ;;  %v4058_v17 = vsel %vm556_vm3, %v10828_v15, %v13026_v18  ;;  %v2977_v41 = vmul.f32 %v2968_v33, %v13027_v61  ;;  %v13033_v55 = vld [vmem:[#allocation21_spill] sm:$0xff]  ;;  %v13034_v52 = vld [vmem:[#allocation142_spill] sm:$0xff] }
 0x609   : > { %v3645_v29 = vmax.f32 %v3637_v56, 0.0  ;;  %v3643_v4 = vadd.f32 %v3635_v50, %v13028_v27  ;;  %v3577_v36 = vmul.f32 %v3567_v5, %v13029_v58  ;;  %v3578_v10 = vmul.f32 %v3567_v5, %v13030_v49  ;;  %v13039_v58 = vld [vmem:[#allocation4_spill] sm:$0xff] }
 0x60a   : > { %v3648_v60 = vmax.f32 %v3640_v19, 0.0  ;;  %v3647_v62 = vmax.f32 %v3639_v57, 0.0  ;;  %v3024_v43 = vadd.f32 %v3008_v1, %v10746_v0  ;;  %v4066_v45 = vmul.f32 %v4062_v21, %v13013_v16  ;;  %v4107_v26 = vpop.permute.xlu1 %4106  ;;  %v13035_v21 = vld [vmem:[#allocation106_spill] sm:$0xff] }
 0x60b   : > { %v3033_v34 = vadd.f32 %v3025_v28, %v13031_v3  ;;  %v3652_v15 = vmax.f32 %v3644_v23, 0.0  ;;  %v3641_v13 = vadd.f32 %v13032_v8, %v3577_v36  ;;  %v3642_v59 = vadd.f32 %v13033_v55, %v3578_v10  ;;  %v3879_v18 = vpop.permute.xlu0 %3878  ;;  %v13040_v10 = vld [vmem:[#allocation88_spill] sm:$0xff]  ;;  %v13041_v3 = vld [vmem:[#allocation62_spill] sm:$0xff] }
 0x60c   : > { %v3659_v56 = vpack.c.bf16 %v3648_v60, %v3646_v31  ;;  %v3658_v39 = vpack.c.bf16 %v3647_v62, %v3645_v29  ;;  %v4067_v50 = vmul.f32 %v4058_v17, %v13014_v25  ;;  %v2976_v37 = vmul.f32 %v2968_v33, %v13034_v52  ;;  %v13036_v31 = vld [vmem:[#allocation184_spill] sm:$0xff]  ;;  %v4835_v55 = vld [vmem:[%s11227_s4 + $0x40] sm:$0xff]  }
 0x60d   : > { %v3041_v48 = vadd.f32 %v3033_v34, %v2977_v41  ;;  %v3651_v57 = vmax.f32 %v3643_v4, 0.0  ;;  %v4114_v0 = vsel %vm621_vm4, %v4099_v7, %v4107_v26  ;;  %v4118_v1 = vsel %vm621_vm4, %v4107_v26, %v4099_v7  ;;  %v13037_v41 = vld [vmem:[#allocation20_spill] sm:$0xff]  ;;  %v13038_v4 = vld [vmem:[#allocation7_spill] sm:$0xff] }
 0x60e   : > { %v3649_v28 = vmax.f32 %v3641_v13, 0.0  ;;  %v3650_v23 = vmax.f32 %v3642_v59, 0.0  ;;  %3678 = vmatprep.subr.bf16.mxu0 %v3659_v56  ;;  %v3843_v19 = vmul.f32 %v13015_v47, %v13035_v21  ;;  %v3032_v17 = vadd.f32 %v3024_v43, %v13036_v31  ;;  %v10928_v62 = vpop.permute.xlu1 %4139  ;;  %v13042_v34 = vld [vmem:[#allocation84_spill] sm:$0xff]  ;;  %v13046_v31 = vld [vmem:[#allocation182_spill] sm:$0xff] }
 0x60f   : > { %v4122_v33 = vmul.f32 %v4114_v0, %v12629_v53  ;;  %v4123_v61 = vmul.f32 %v4118_v1, %v12854_v6  ;;  %3679 = vmatpush1.bf16.msra.mxu0 %v3658_v39  ;;  %v4090_v5 = vmul.f32 %v13037_v41, %v4066_v45  ;;  %v3039_v7 = vadd.f32 %v13039_v58, %v13038_v4  ;;  %v3887_v43 = vpop.permute.xlu0 %3886  ;;  %v13043_v52 = vld [vmem:[#allocation92_spill] sm:$0xff]  ;;  %v13045_v1 = vld [vmem:[#allocation170_spill] sm:$0xff]  ;;  %v4836_v4 = vld [vmem:[%s11227_s4 + $0x48] sm:$0xff]  }
 0x610   : > { %v3661_v29 = vpack.c.bf16 %v3652_v15, %v3650_v23  ;;  %v3660_v27 = vpack.c.bf16 %v3651_v57, %v3649_v28  ;;  %v4091_v36 = vmul.f32 %v13037_v41, %v4067_v50  ;;  %v3040_v49 = vadd.f32 %v3032_v17, %v2976_v37  ;;  %v13044_v37 = vld [vmem:[#allocation95_spill] sm:$0xff]  ;;  %v4681_v58 = vld [vmem:[%s11228_s5 + $0x40] sm:$0xff] }
 0x611   : > { %v4146_v60 = vmul.f32 %v13040_v10, %v4122_v33  ;;  %v4147_v47 = vmul.f32 %v13040_v10, %v4123_v61  ;;  %v3038_v8 = vadd.f32 %v13042_v34, %v13041_v3  ;;  %v3049_v13 = vmax.f32 %v3041_v48, 0.0  ;;  %4487 = vperm.xlu1 %4827, %v4681_v58   ;;  %v13048_v10 = vld [vmem:[#allocation67_spill] sm:$0xff] }
 0x612   : > { %v3892_v45 = vsel %vm361_vm0, %v3879_v18, %v3887_v43  ;;  %v3896_v15 = vsel %vm361_vm0, %v3887_v43, %v3879_v18  ;;  %3680 = vmatprep.subr.bf16.mxu0 %v3661_v29  ;;  %v3870_v48 = vadd.f32 %v13044_v37, %v13043_v52  ;;  %v3047_v26 = vmax.f32 %v3039_v7, 0.0  ;;  %v4155_v0 = vpop.permute.xlu1 %4154  ;;  %v4682_v7 = vld [vmem:[%s11228_s5 + $0x48] sm:$0xff] }
 0x613   : > { %v10939_v59 = vadd.f32 %v4146_v60, %v4090_v5  ;;  %v10941_v56 = vadd.f32 %v4147_v47, %v4091_v36  ;;  %v3902_v39 = vmul.f32 %v3896_v15, %v12935_v22  ;;  %v3903_v50 = vmul.f32 %v3892_v45, %v12936_v51  ;;  %3681 = vmatpush1.bf16.msra.mxu0 %v3660_v27  ;;  %v3935_v21 = vpop.permute.xlu0 %3934  ;;  %v13047_v36 = vld [vmem:[#allocation66_spill] sm:$0xff]  ;;  %v13050_v15 = vld [vmem:[#allocation59_spill] sm:$0xff] }
 0x614   : > { %3747 = vmatprep.subr.bf16.mxu0 %v10876_v9  ;;  %v3871_v18 = vadd.f32 %v13044_v37, %v3843_v19  ;;  %v3048_v57 = vmax.f32 %v3040_v49, 0.0  ;;  %v10954_v17 = vsel %vm686_vm5, %v4155_v0, %v13046_v31  ;;  %v10959_v33 = vsel %vm686_vm5, %v13046_v31, %v4155_v0  ;;  %4492 = vperm.xlu0 %4828, %v4682_v7   ;;  %v4684_v37 = vld [vmem:[%s11228_s5 + $0x58] sm:$0xff] }
 0x615   : > { %v3926_v28 = vmul.f32 %v13045_v1, %v3902_v39  ;;  %v3927_v23 = vmul.f32 %v13045_v1, %v3903_v50  ;;  %v3058_v9 = vpack.c.bf16 %v3049_v13, %v3047_v26  ;;  %v3046_v19 = vmax.f32 %v3038_v8, 0.0  ;;  %v13052_v50 = vld [vmem:[#allocation50_spill] sm:$0xff] }
 0x616   : > { %4659 = vmatmul.mubr.msk.bf16.vlgmr.msra.gmra.mrb[0].mxu0 %vm979_vm8, %v4835_v55  ;;  %v4157_v29 = vpop.permute.xlu1 %4156  ;;  %v4236_v49 = vmul.f32 %v10799_v44, %v13047_v36  ;;  %v4237_v60 = vmul.f32 %v10803_v24, %v13048_v10  ;;  %v13049_v44 = vld [vmem:[#allocation58_spill] sm:$0xff]  ;;  %v13051_v55 = vld [vmem:[#allocation49_spill] sm:$0xff] }
 0x617   : > { %v4326_v61 = vadd.f32 %v3926_v28, %v3870_v48  ;;  %v4327_v41 = vadd.f32 %v3927_v23, %v3871_v18  ;;  %3748 = vmatpush1.bf16.msra.mxu0 %v10873_v20  ;;  %3720 = vmatprep.mubr.bf16.mxu0 %v13009_v63  ;;  %v3057_v5 = vpack.c.bf16 %v3048_v57, %v3046_v19  ;;  %v3943_v27 = vpop.permute.xlu0 %3942  ;;  %v4683_v20 = vld [vmem:[%s11228_s5 + $0x50] sm:$0xff]  ;;  %v13053_v48 = vld [vmem:[#allocation61_spill] sm:$0xff]  ;;  %v13054_v57 = vld [vmem:[#allocation83_spill] sm:$0xff] }
 0x618   : > { %3749 = vmatprep.subr.bf16.mxu0 %v3058_v9  ;;  %v3948_v43 = vsel %vm426_vm1, %v3935_v21, %v3943_v27  ;;  %v3952_v3 = vsel %vm426_vm1, %v3943_v27, %v3935_v21  ;;  %4497 = vperm.xlu1 %4827, %v4683_v20   ;;  %v4260_v26 = vmul.f32 %v13053_v48, %v4236_v49  ;;  %v4837_v9 = vld [vmem:[%s11227_s4 + $0x30] sm:$0xff]  }
 0x619   : > { %v3958_v39 = vmul.f32 %v3952_v3, %v13051_v55  ;;  %v3959_v52 = vmul.f32 %v3948_v43, %v13052_v50  ;;  %v4261_v18 = vmul.f32 %v13053_v48, %v4237_v60 }
 0x61a   : > { %v4165_v47 = vpop.permute.xlu1 %4164 }
 0x61b   : > { %3750 = vmatpush1.bf16.msra.mxu0 %v3057_v5  ;;  %v3991_v34 = vpop.permute.xlu0 %3990  ;;  %v4171_v8 = vsel %vm686_vm5, %v4157_v29, %v4165_v47  ;;  %v4175_v13 = vsel %vm686_vm5, %v4165_v47, %v4157_v29 }
 0x61c   : > { %v4180_v45 = vmul.f32 %v4171_v8, %v13049_v44  ;;  %v4181_v24 = vmul.f32 %v4175_v13, %v13050_v15  ;;  %4502 = vperm.xlu1 %4827, %v4684_v37   ;;  %v4838_v37 = vld [vmem:[%s11227_s4 + $0x38] sm:$0xff]  }
 0x61e   : > { %4660 = vmatmul.mubr.msk.bf16.gmra.mrb[4].mxu0 %vm979_vm8, %v4836_v4  ;;  %v4204_v0 = vmul.f32 %v13054_v57, %v4180_v45  ;;  %v4205_v1 = vmul.f32 %v13054_v57, %v4181_v24  ;;  %v11001_v28 = vpop.permute.xlu1 %4199  ;;  %v13055_v4 = vld [vmem:[#allocation107_spill] sm:$0xff] }
 0x61f   : > { %3779 = vmatprep.mubr.bf16.mxu0 %v13009_v63  ;;  %v3999_v23 = vpop.permute.xlu0 %3998  ;;  %v3982_v58 = vmul.f32 %v13055_v4, %v3958_v39  ;;  %v3983_v7 = vmul.f32 %v13055_v4, %v3959_v52 }
 0x620   : > { %v4004_v21 = vsel %vm491_vm2, %v3991_v34, %v3999_v23  ;;  %v4008_v31 = vsel %vm491_vm2, %v3999_v23, %v3991_v34  ;;  %v4348_v19 = vadd.f32 %v4260_v26, %v4204_v0  ;;  %v4349_v5 = vadd.f32 %v4261_v18, %v4205_v1  ;;  %v13057_v26 = vld [vmem:[#allocation94_spill] sm:$0xff] }
 0x621   : > { %v4014_v29 = vmul.f32 %v4008_v31, %v12595_v14  ;;  %v4015_v27 = vmul.f32 %v4004_v21, %v12597_v35 }
 0x622   : > { %v4364_v20 = vadd.f32 %v4348_v19, %v10889_v32  ;;  %v4365_v49 = vadd.f32 %v4349_v5, %v10891_v40  ;;  %v4211_v60 = vpop.permute.xlu1 %4210  ;;  %v4178_v32 = vmul.f32 %v10954_v17, %v13049_v44  ;;  %v4179_v40 = vmul.f32 %v10959_v33, %v13050_v15 }
 0x623   : > { %v4038_v47 = vmul.f32 %v10795_v42, %v4014_v29  ;;  %v4039_v43 = vmul.f32 %v10795_v42, %v4015_v27  ;;  %v4047_v3 = vpop.permute.xlu0 %4046 }
 0x624   : > { %v11020_v13 = vadd.f32 %v4364_v20, %v10741_v54  ;;  %v11023_v45 = vadd.f32 %v4365_v49, %v10743_v46 }
 0x625   : > { %v4334_v34 = vadd.f32 %v4038_v47, %v3982_v58  ;;  %v4335_v8 = vadd.f32 %v4039_v43, %v3983_v7 }
 0x626   : > { %4663 = vmatmul.mubr.msk.bf16.vlgmr.msra.gmra.mrb[0].mxu0 %vm979_vm8, %v4837_v9  ;;  %v4219_v39 = vpop.permute.xlu1 %4218 }
 0x627   : > { %3789 = vmatprep.mubr.bf16.mxu0 %v13009_v63  ;;  %v11030_v42 = vadd.f32 %v4334_v34, %v4326_v61  ;;  %v11032_v24 = vadd.f32 %v4335_v8, %v4327_v41  ;;  %v4055_v52 = vpop.permute.xlu0 %4054  ;;  %v4226_v54 = vsel %vm751_vm6, %v4211_v60, %v4219_v39  ;;  %v4230_v46 = vsel %vm751_vm6, %v4219_v39, %v4211_v60  ;;  %v13056_v61 = vld [vmem:[#allocation134_spill] sm:$0xff] }
 0x628   : > { %v4234_v17 = vmul.f32 %v4226_v54, %v13047_v36  ;;  %v4235_v33 = vmul.f32 %v4230_v46, %v13048_v10  ;;  %v4202_v48 = vmul.f32 %v13056_v61, %v4178_v32  ;;  %v4203_v41 = vmul.f32 %v13056_v61, %v4179_v40 }
 0x62a   : > { %v4258_v18 = vmul.f32 %v13057_v26, %v4234_v17  ;;  %v4259_v57 = vmul.f32 %v13057_v26, %v4235_v33  ;;  %v4252_v0 = vpop.permute.xlu1 %4251 }
 0x62b   : > { %v4103_v1 = vpop.permute.xlu0 %4102 }
 0x62c   : > { %v4346_v23 = vadd.f32 %v4258_v18, %v4202_v48  ;;  %v4347_v21 = vadd.f32 %v4259_v57, %v4203_v41  ;;  %v13058_v41 = vld [vmem:[#allocation31_spill] sm:$0xff]  ;;  %v13059_v57 = vld [vmem:[#allocation90_spill] sm:$0xff] }
 0x62e   : > { %4664 = vmatmul.mubr.msk.bf16.gmra.mrb[4].mxu0 %vm979_vm8, %v4838_v37  ;;  %v4362_v31 = vadd.f32 %v4346_v23, %v10939_v59  ;;  %v4363_v9 = vadd.f32 %v4347_v21, %v10941_v56  ;;  %v4300_v5 = vpop.permute.xlu1 %4299  ;;  %v4060_v56 = vsel %vm556_vm3, %v4047_v3, %v4055_v52 }
 0x62f   : > { %4451 = vmatprep.mubr.bf16.mxu0 %v13009_v63  ;;  %v4111_v19 = vpop.permute.xlu0 %4110  ;;  %v4071_v40 = vmul.f32 %v4060_v56, %v13014_v25 }
 0x630   : > { %v4370_v29 = vadd.f32 %v4362_v31, %v10823_v11  ;;  %v4371_v27 = vadd.f32 %v4363_v9, %v10825_v30  ;;  %v4116_v49 = vsel %vm621_vm4, %v4103_v1, %v4111_v19  ;;  %v4120_v59 = vsel %vm621_vm4, %v4111_v19, %v4103_v1 }
 0x631   : > { %v4064_v11 = vsel %vm556_vm3, %v4055_v52, %v4047_v3  ;;  %v4126_v34 = vmul.f32 %v4116_v49, %v12629_v53  ;;  %v4127_v8 = vmul.f32 %v4120_v59, %v12854_v6  ;;  %v4095_v18 = vmul.f32 %v13058_v41, %v4071_v40 }
 0x632   : > { %v11053_v58 = vpop.permute.xlu1 %4303  ;;  %v4070_v32 = vmul.f32 %v4064_v11, %v13013_v16 }
 0x633   : > { %v4159_v4 = vpop.permute.xlu0 %4158  ;;  %v4150_v17 = vmul.f32 %v10928_v62, %v4126_v34  ;;  %v4151_v33 = vmul.f32 %v10928_v62, %v4127_v8  ;;  %v13060_v34 = vld [vmem:[#allocation71_spill] sm:$0xff] }
 0x634   : > { %v4094_v26 = vmul.f32 %v13058_v41, %v4070_v32  ;;  %v13061_v32 = vld [vmem:[#allocation72_spill] sm:$0xff] }
 0x636   : > { %v11055_v20 = vpop.permute.xlu1 %3880 }
 0x637   : > { %v4167_v7 = vpop.permute.xlu0 %4166 }
 0x638   : > { %v4172_v47 = vsel %vm686_vm5, %v4159_v4, %v4167_v7  ;;  %v4176_v43 = vsel %vm686_vm5, %v4167_v7, %v4159_v4  ;;  %v4342_v4 = vadd.f32 %v4150_v17, %v4094_v26  ;;  %v4343_v7 = vadd.f32 %v4151_v33, %v4095_v18 }
 0x639   : > { %v4182_v39 = vmul.f32 %v4172_v47, %v13049_v44  ;;  %v4183_v3 = vmul.f32 %v4176_v43, %v13050_v15 }
 0x63a   : > { %v3889_v30 = vpop.permute.xlu1 %3888 }
 0x63b   : > { %v4215_v60 = vpop.permute.xlu0 %4214  ;;  %v4206_v1 = vmul.f32 %v13059_v57, %v4182_v39  ;;  %v4207_v23 = vmul.f32 %v13059_v57, %v4183_v3 }
 0x63e   : > { %v3937_v54 = vpop.permute.xlu1 %3936 }
 0x63f   : > { %v4223_v52 = vpop.permute.xlu0 %4222 }
 0x640   : > { %v4228_v46 = vsel %vm751_vm6, %v4215_v60, %v4223_v52  ;;  %v4232_v37 = vsel %vm751_vm6, %v4223_v52, %v4215_v60 }
 0x641   : > { %v4238_v61 = vmul.f32 %v4228_v46, %v13047_v36  ;;  %v4239_v48 = vmul.f32 %v4232_v37, %v13048_v10 }
 0x642   : > { %v3945_v19 = vpop.permute.xlu1 %3944 }
 0x643   : > { %v4262_v21 = vmul.f32 %v4252_v0, %v4238_v61  ;;  %v4263_v31 = vmul.f32 %v4252_v0, %v4239_v48  ;;  %v4267_v9 = vpop.permute.xlu0 %4266 }
 0x645   : > { %v4350_v49 = vadd.f32 %v4262_v21, %v4206_v1  ;;  %v4351_v62 = vadd.f32 %v4263_v31, %v4207_v23  ;;  %v13062_v1 = vld [vmem:[#allocation133_spill] sm:$0xff]  ;;  %v3949_v31 = vsel %vm426_vm1, %v3937_v54, %v3945_v19 }
 0x646   : > { %v3993_v60 = vpop.permute.xlu1 %3992  ;;  %v4907_v21 = vld [vmem:[%s5013_s16 + $0xb8] sm:$0xff] }
 0x647   : > { %v4366_v59 = vadd.f32 %v4350_v49, %v4342_v4  ;;  %v4367_v56 = vadd.f32 %v4351_v62, %v4343_v7  ;;  %v4275_v11 = vpop.permute.xlu0 %4274  ;;  %v13063_v62 = vld [vmem:[#allocation166_spill] sm:$0xff] }
 0x648   : > { %v4282_v47 = vsel %vm816_vm7, %v4267_v9, %v4275_v11  ;;  %v4286_v43 = vsel %vm816_vm7, %v4275_v11, %v4267_v9  ;;  %v3953_v9 = vsel %vm426_vm1, %v3945_v19, %v3937_v54 }
 0x649   : > { %v4290_v8 = vmul.f32 %v4282_v47, %v13060_v34  ;;  %v4291_v0 = vmul.f32 %v4286_v43, %v13061_v32  ;;  %v11094_v40 = vadd.f32 %v4366_v59, %v11030_v42  ;;  %v11097_v39 = vadd.f32 %v4367_v56, %v11032_v24  ;;  %v4906_v42 = vld [vmem:[%s5013_s16 + $0xb0] sm:$0xff] }
 0x64a   : > { %v4001_v46 = vpop.permute.xlu1 %4000  ;;  %v3844_v23 = vmul.f32 %v4906_v42, %v13062_v1  ;;  %v3845_v24 = vmul.f32 %v4907_v21, %v13062_v1  ;;  %v13064_v43 = vld [vmem:[#allocation192_spill] sm:$0xff]  ;;  %v13065_v21 = vld [vmem:[#allocation137_spill] sm:$0xff] }
 0x64b   : > { %v4314_v3 = vmul.f32 %v4300_v5, %v4290_v8  ;;  %v4315_v52 = vmul.f32 %v4300_v5, %v4291_v0  ;;  %v3893_v5 = vsel %vm361_vm0, %v11055_v20, %v3889_v30 }
 0x64c   : > { %v3905_v49 = vmul.f32 %v3893_v5, %v12936_v51  ;;  %v11122_v59 = vadd.f32 %v13063_v62, %v3844_v23  ;;  %v11125_v56 = vadd.f32 %v13063_v62, %v3845_v24  ;;  %v4009_v51 = vsel %vm491_vm2, %v4001_v46, %v3993_v60 }
 0x64d   : > { %v11099_v37 = vadd.f32 %v4370_v29, %v4314_v3  ;;  %v11101_v17 = vadd.f32 %v4371_v27, %v4315_v52  ;;  %v3897_v29 = vsel %vm361_vm0, %v3889_v30, %v11055_v20  ;;  %v11113_v27 = vpop.permute.xlu0 %4307  ;;  %v3960_v20 = vmul.f32 %v3953_v9, %v13051_v55 }
 0x64e   : > { %v4049_v33 = vpop.permute.xlu1 %4048  ;;  %v3904_v7 = vmul.f32 %v3897_v29, %v12935_v22  ;;  %v3961_v30 = vmul.f32 %v3949_v31, %v13052_v50  ;;  %v4005_v22 = vsel %vm491_vm2, %v3993_v60, %v4001_v46  ;;  %v3929_v0 = vmul.f32 %v13064_v43, %v3905_v49  ;;  %v13066_v29 = vld [vmem:[#allocation132_spill] sm:$0xff] }
 0x64f   : > { %v4017_v42 = vmul.f32 %v4005_v22, %v12597_v35 }
 0x650   : > { %v3928_v8 = vmul.f32 %v13064_v43, %v3904_v7 }
 0x651   : > { %v4273_v19 = vpop.permute.xlu0 %4272 }
 0x652   : > { %v4057_v61 = vpop.permute.xlu1 %4056 }
 0x653   : > { %v4061_v60 = vsel %vm556_vm3, %v4049_v33, %v4057_v61  ;;  %v4065_v46 = vsel %vm556_vm3, %v4057_v61, %v4049_v33 }
 0x656   : > { %v4105_v48 = vpop.permute.xlu1 %4104 }
 0x65a   : > { %v4113_v41 = vpop.permute.xlu1 %4112 }
 0x65b   : > { %v4117_v47 = vsel %vm621_vm4, %v4105_v48, %v4113_v41  ;;  %v4121_v55 = vsel %vm621_vm4, %v4113_v41, %v4105_v48  ;;  %v4016_v41 = vmul.f32 %v4009_v51, %v12595_v14 }
 0x65c   : > { %v4128_v1 = vmul.f32 %v4117_v47, %v12629_v53  ;;  %v4129_v23 = vmul.f32 %v4121_v55, %v12854_v6  ;;  %v4281_v53 = vpop.permute.xlu0 %4280 }
 0x65d   : > { %v4040_v31 = vmul.f32 %v13066_v29, %v4016_v41  ;;  %v4289_v22 = vsel %vm816_vm7, %v4281_v53, %v4273_v19 }
 0x65e   : > { %v4161_v26 = vpop.permute.xlu1 %4160 }
 0x662   : > { %v4169_v18 = vpop.permute.xlu1 %4168 }
 0x663   : > { %v4173_v3 = vsel %vm686_vm5, %v4161_v26, %v4169_v18  ;;  %v4177_v52 = vsel %vm686_vm5, %v4169_v18, %v4161_v26  ;;  %v3984_v26 = vmul.f32 %v13065_v21, %v3960_v20  ;;  %v3985_v18 = vmul.f32 %v13065_v21, %v3961_v30 }
 0x664   : > { %v4184_v24 = vmul.f32 %v4173_v3, %v13049_v44  ;;  %v4185_v33 = vmul.f32 %v4177_v52, %v13050_v15  ;;  %v4387_v3 = vmax.f32 %v11101_v17, 0.0 }
 0x666   : > { %v4217_v57 = vpop.permute.xlu1 %4216  ;;  %v4208_v7 = vmul.f32 %v11001_v28, %v4184_v24  ;;  %v4209_v49 = vmul.f32 %v11001_v28, %v4185_v33 }
 0x66a   : > { %v4225_v4 = vpop.permute.xlu1 %4224 }
 0x66b   : > { %v4229_v11 = vsel %vm751_vm6, %v4217_v57, %v4225_v4  ;;  %v4233_v54 = vsel %vm751_vm6, %v4225_v4, %v4217_v57 }
 0x66c   : > { %v4240_v57 = vmul.f32 %v4229_v11, %v13047_v36  ;;  %v4241_v48 = vmul.f32 %v4233_v54, %v13048_v10  ;;  %v4072_v36 = vmul.f32 %v4065_v46, %v13013_v16  ;;  %v4073_v10 = vmul.f32 %v4061_v60, %v13014_v25  ;;  %v13067_v25 = vld [vmem:[#allocation100_spill] sm:$0xff] }
 0x66d   : > { %v4041_v16 = vmul.f32 %v13066_v29, %v4017_v42  ;;  %v4152_v9 = vmul.f32 %v13067_v25, %v4128_v1  ;;  %v4153_v4 = vmul.f32 %v13067_v25, %v4129_v23  ;;  %v4285_v54 = vsel %vm816_vm7, %v4273_v19, %v4281_v53 }
 0x66e   : > { %v4269_v50 = vpop.permute.xlu1 %4268  ;;  %v4264_v6 = vmul.f32 %v10820_v2, %v4240_v57  ;;  %v4265_v5 = vmul.f32 %v10820_v2, %v4241_v48  ;;  %v4096_v30 = vmul.f32 %v10881_v12, %v4072_v36  ;;  %v4097_v11 = vmul.f32 %v10881_v12, %v4073_v10 }
 0x66f   : > { %v4337_v43 = vadd.f32 %v4041_v16, %v3985_v18  ;;  %v4328_v48 = vadd.f32 %v3928_v8, %v11122_v59  ;;  %v4329_v19 = vadd.f32 %v3929_v0, %v11125_v56  ;;  %v4296_v41 = vmul.f32 %v4285_v54, %v13060_v34 }
 0x670   : > { %v4352_v51 = vadd.f32 %v4264_v6, %v4208_v7  ;;  %v4353_v47 = vadd.f32 %v4265_v5, %v4209_v49  ;;  %v4344_v52 = vadd.f32 %v4152_v9, %v4096_v30  ;;  %v4345_v12 = vadd.f32 %v4153_v4, %v4097_v11 }
 0x672   : > { %v4277_v61 = vpop.permute.xlu1 %4276  ;;  %v4369_v42 = vadd.f32 %v4353_v47, %v4345_v12 }
 0x673   : > { %v4283_v14 = vsel %vm816_vm7, %v4269_v50, %v4277_v61  ;;  %v4287_v35 = vsel %vm816_vm7, %v4277_v61, %v4269_v50  ;;  %v4336_v50 = vadd.f32 %v4040_v31, %v3984_v26  ;;  %v4361_v26 = vadd.f32 %v4337_v43, %v4329_v19 }
 0x674   : > { %v4292_v44 = vmul.f32 %v4283_v14, %v13060_v34  ;;  %v4293_v15 = vmul.f32 %v4287_v35, %v13061_v32 }
 0x675   : > { %v4360_v17 = vadd.f32 %v4336_v50, %v4328_v48  ;;  %v4377_v8 = vadd.f32 %v4369_v42, %v4361_v26 }
 0x676   : > { %v4316_v62 = vmul.f32 %v11053_v58, %v4292_v44  ;;  %v4317_v2 = vmul.f32 %v11053_v58, %v4293_v15  ;;  %v4386_v58 = vmax.f32 %v11099_v37, 0.0 }
 0x678   : > { %v4380_v55 = vadd.f32 %v11020_v13, %v4316_v62  ;;  %v4381_v28 = vadd.f32 %v11023_v45, %v4317_v2  ;;  %v4297_v13 = vmul.f32 %v4289_v22, %v13061_v32  ;;  %v4368_v45 = vadd.f32 %v4352_v51, %v4344_v52 }
 0x679   : > { %v4312_v20 = vpop.permute.xlu1 %4311 }
 0x67a   : > { %v4388_v60 = vmax.f32 %v4380_v55, 0.0  ;;  %v4389_v57 = vmax.f32 %v4381_v28, 0.0  ;;  %v4320_v37 = vmul.f32 %v4312_v20, %v4296_v41  ;;  %v4321_v21 = vmul.f32 %v4312_v20, %v4297_v13 }
 0x67b   : > { %v4376_v56 = vadd.f32 %v4368_v45, %v4360_v17 }
 0x67c   : > { %v4400_v1 = vpack.c.bf16 %v4389_v57, %v4387_v3  ;;  %v4399_v23 = vpack.c.bf16 %v4388_v60, %v4386_v58  ;;  %v4385_v36 = vadd.f32 %v4377_v8, %v4321_v21 }
 0x67d   : > { %v4271_v46 = vpop.permute.xlu1 %4270  ;;  %v4384_v61 = vadd.f32 %v4376_v56, %v4320_v37 }
 0x67e   : > { %4419 = vmatprep.subr.bf16.mxu0 %v4400_v1  ;;  %v4393_v38 = vmax.f32 %v4385_v36, 0.0 }
 0x67f   : > { %4420 = vmatpush1.bf16.msra.mxu0 %v4399_v23  ;;  %v4392_v6 = vmax.f32 %v4384_v61, 0.0 }
 0x681   : > { %v4279_v18 = vpop.permute.xlu1 %4278 }
 0x682   : > { %v4284_v24 = vsel %vm816_vm7, %v4271_v46, %v4279_v18  ;;  %v4288_v59 = vsel %vm816_vm7, %v4279_v18, %v4271_v46 }
 0x683   : > { %v4294_v0 = vmul.f32 %v4284_v24, %v13060_v34  ;;  %v4295_v33 = vmul.f32 %v4288_v59, %v13061_v32  ;;  %v4839_v34 = vld [vmem:[%s11227_s4 + $0x50] sm:$0xff]   ;;  %v4840_v32 = vld [vmem:[%s11227_s4 + $0x58] sm:$0xff]  }
 0x685   : > { %v4318_v10 = vmul.f32 %v11113_v27, %v4294_v0  ;;  %v4319_v14 = vmul.f32 %v11113_v27, %v4295_v33 }
 0x687   : > { %v4382_v35 = vadd.f32 %v11094_v40, %v4318_v10  ;;  %v4383_v53 = vadd.f32 %v11097_v39, %v4319_v14 }
 0x689   : > { %v4390_v5 = vmax.f32 %v4382_v35, 0.0  ;;  %v4391_v44 = vmax.f32 %v4383_v53, 0.0 }
 0x68b   : > { %v4402_v15 = vpack.c.bf16 %v4393_v38, %v4391_v44  ;;  %v4401_v29 = vpack.c.bf16 %v4392_v6, %v4390_v5 }
 0x68d   : > { %4421 = vmatprep.subr.bf16.mxu0 %v4402_v15 }
 0x68e   : > { %4422 = vmatpush1.bf16.msra.mxu0 %v4401_v29 }
 0x690   : > { %v4488_v40 = vpop.permute.xlu1 %4487 }
 0x691   : > { %4679 = vmatmul.mubr.msk.bf16.vlgmr.msra.gmra.mrb[0].mxu0 %vm979_vm8, %v4839_v34 }
 0x692   : > { %4461 = vmatprep.mubr.bf16.mxu0 %v13009_v63 }
 0x693   : > { %v4493_v27 = vpop.permute.xlu0 %4492 }
 0x697   : > { %v4498_v2 = vpop.permute.xlu1 %4497 }
 0x699   : > { %4680 = vmatmul.mubr.msk.bf16.gmra.mrb[4].mxu0 %vm979_vm8, %v4840_v32 }
 0x69b   : > { %v4503_v51 = vpop.permute.xlu1 %4502 }
 0x764   : > { %v4453_v39 = vpop.f32.mrb[0].mxu0 }
 0x765   : > { %v4505_v31 = vadd.f32 %v4488_v40, %v4453_v39  ;;  %v4455_v16 = vpop.f32.mrb[1].mxu0 }
 0x766   : > { %v4506_v25 = vadd.f32 %v4488_v40, %v4455_v16  ;;  %v4457_v9 = vpop.f32.mrb[2].mxu0 }
 0x767   : > { %v4513_v4 = vmax.f32 %v4505_v31, 0.0  ;;  %v4507_v7 = vadd.f32 %v4493_v27, %v4457_v9  ;;  %v4459_v63 = vpop.f32.mrb[3].mxu0 }
 0x768   : > { %v4514_v49 = vmax.f32 %v4506_v25, 0.0  ;;  %v4508_v62 = vadd.f32 %v4493_v27, %v4459_v63 }
 0x769   : > { %4521 = vst [vmem:[%s5013_s16 + $0xc0] sm:$0xff] %v4513_v4  ;;  %v4515_v20 = vmax.f32 %v4507_v7, 0.0 }
 0x76a   : > { %4522 = vst [vmem:[%s5013_s16 + $0xc8] sm:$0xff] %v4514_v49  ;;  %v4516_v30 = vmax.f32 %v4508_v62, 0.0 }
 0x76b   : > { %4523 = vst [vmem:[%s5013_s16 + $0xd0] sm:$0xff] %v4515_v20 }
 0x76c   : > { %4524 = vst [vmem:[%s5013_s16 + $0xd8] sm:$0xff] %v4516_v30  ;;  %v4463_v11 = vpop.f32.mrb[4].mxu0 }
 0x76d   : > { %v4509_v54 = vadd.f32 %v4498_v2, %v4463_v11  ;;  %v4465_v22 = vpop.f32.mrb[5].mxu0 }
 0x76e   : > { %v4510_v47 = vadd.f32 %v4498_v2, %v4465_v22  ;;  %v4467_v55 = vpop.f32.mrb[6].mxu0 }
 0x76f   : > { %v4517_v28 = vmax.f32 %v4509_v54, 0.0  ;;  %v4511_v50 = vadd.f32 %v4503_v51, %v4467_v55  ;;  %v4469_v43 = vpop.f32.mrb[7].mxu0 }
 0x770   : > { %v4518_v58 = vmax.f32 %v4510_v47, 0.0  ;;  %v4512_v3 = vadd.f32 %v4503_v51, %v4469_v43 }
 0x771   : > { %4525 = vst [vmem:[%s5013_s16 + $0xe0] sm:$0xff] %v4517_v28  ;;  %v4519_v52 = vmax.f32 %v4511_v50, 0.0 }
 0x772   : > { %4526 = vst [vmem:[%s5013_s16 + $0xe8] sm:$0xff] %v4518_v58  ;;  %v4520_v12 = vmax.f32 %v4512_v3, 0.0 }
 0x773   : > { %4527 = vst [vmem:[%s5013_s16 + $0xf0] sm:$0xff] %v4519_v52 }
 0x774   : > { %4528 = vst [vmem:[%s5013_s16 + $0xf8] sm:$0xff] %v4520_v12 }
 0x775 PF: > { %s16_s21 = sadd.s32 1, %s4914_s21  }
 0x776   : > { %p13_p4 = scmp.ge.s32.totalorder %s16_s21, 4  }
 0x778   :  { %15 = sbr.rel (!%p13_p4) target bundleno = 1 (0x1), region = 91 }

</bundles_post_ra>
